<compile_context>
chip_gen: v5e
topology: v5e:2x2
jax: 0.10.0
libtpu: 0.0.40
codegen_flags: <defaults>
</compile_context>

<pallas_src>
import functools
import math

import jax
import jax.numpy as jnp
from jax.experimental import pallas as pl
from jax.experimental.pallas import tpu as pltpu

_EPS = 1e-5        # torch.nn.LayerNorm default eps
_NEG = -1e30       # finite stand-in for -inf in the masked max (NaN-safe)
_LANES = 128
_ROW_TILE = 512    # target rows per grid step (review: 512-1024)


# ---------------------------------------------------------------------------
# in-kernel helpers
# ---------------------------------------------------------------------------
def _ln(x, g, b):
    mu = jnp.mean(x, axis=-1, keepdims=True)
    var = jnp.mean((x - mu) ** 2, axis=-1, keepdims=True)
    return (x - mu) * jax.lax.rsqrt(var + _EPS) * g + b


def _gelu(x):
    # exact (erf) GELU, matching torch.nn.GELU() default
    return 0.5 * x * (1.0 + jax.lax.erf(x * (1.0 / math.sqrt(2.0))))


def _full_spec(shape):
    return pl.BlockSpec(shape, lambda i, _n=len(shape): (0,) * _n)


def _choose_row_tile(n_rows, group, target=_ROW_TILE):
    """Largest row tile <= target that is a multiple of `group` and of 8
    (sublane rule), or the full extent when the array is small."""
    if n_rows <= target:
        return n_rows
    unit = group * 8 // math.gcd(group, 8)        # lcm(group, 8)
    tile = max(unit, (target // unit) * unit)
    return tile if tile <= n_rows else n_rows


# ---------------------------------------------------------------------------
# Kernel A: one whole TrajectoryEncoderSubLayer on a row tile [TM, H]
#   y = FE2_1(x); y = FE2_2(y); y = relu(y); y = masked_max(y); LN(y) + x
# ---------------------------------------------------------------------------
def _sublayer_kernel(x_ref, m_ref,
                     dproj_ref, w1c_ref, w1s_ref, dx_ref, b1_ref, g1_ref,
                     be1_ref, mgrp_ref, w2_ref, b2_ref, og_ref, ob_ref,
                     wo_ref, bo_ref, lng_ref, lnb_ref, o_ref, *, points):
    f32 = jnp.float32
    x = x_ref[...]                                   # [TM, H]
    mgrp = mgrp_ref[...]                             # [H*H, H*H] group-mean matrix

    def fourier_embedding(v, k):
        # Packed FourierEmbedding2: per-feature MLPs folded into block-diagonal
        # matmuls; all intermediates are lane-dense ([TM, 2H*H] / [TM, H*H]).
        proj = jnp.dot(v, dproj_ref[k], preferred_element_type=f32)      # [TM, H*F]
        h = (jnp.dot(jnp.cos(proj), w1c_ref[k], preferred_element_type=f32)
             + jnp.dot(jnp.sin(proj), w1s_ref[k], preferred_element_type=f32)
             + jnp.dot(v, dx_ref[k], preferred_element_type=f32)
             + b1_ref[k])                                                # [TM, H*H]
        # per-feature LayerNorm: stats over each group of H lanes via matmul
        mu = jnp.dot(h, mgrp, preferred_element_type=f32)
        d = h - mu
        var = jnp.dot(d * d, mgrp, preferred_element_type=f32)
        h = d * jax.lax.rsqrt(var + _EPS) * g1_ref[k] + be1_ref[k]
        h = _gelu(h)
        # sum over features of the per-feature second Linear == ONE matmul
        s = jnp.dot(h, w2_ref[k], preferred_element_type=f32) + b2_ref[k]  # [TM, H]
        s = _gelu(_ln(s, og_ref[k], ob_ref[k]))
        return jnp.dot(s, wo_ref[k], preferred_element_type=f32) + bo_ref[k]

    y = fourier_embedding(fourier_embedding(x, 0), 1)
    y = jnp.maximum(y, 0.0)                          # ReLU (end of self.dense)

    tm, hidden = y.shape
    groups = tm // points                            # whole (b,p) groups per tile
    y3 = y.reshape(groups, points, hidden)
    m3 = m_ref[...].reshape(groups, points, 1) > 0.5
    mx = jnp.max(jnp.where(m3, y3, _NEG), axis=1, keepdims=True)  # max over points
    out = jnp.where(m3, y3 + mx, 0.0).reshape(tm, hidden)
    o_ref[...] = _ln(out, lng_ref[...], lnb_ref[...]) + x


def sublayer_apply(x_flat, mask_flat, sp, mgrp, points, tm):
    n, hidden = x_flat.shape
    kernel = functools.partial(_sublayer_kernel, points=points)
    return pl.pallas_call(
        kernel,
        out_shape=jax.ShapeDtypeStruct((n, hidden), jnp.float32),
        grid=(pl.cdiv(n, tm),),
        in_specs=[
            pl.BlockSpec((tm, hidden), lambda i: (i, 0)),   # x (also residual)
            pl.BlockSpec((tm, 1), lambda i: (i, 0)),        # mask
            _full_spec(sp["dproj"].shape), _full_spec(sp["w1c"].shape),
            _full_spec(sp["w1s"].shape), _full_spec(sp["dx"].shape),
            _full_spec(sp["b1"].shape), _full_spec(sp["g1"].shape),
            _full_spec(sp["be1"].shape), _full_spec(mgrp.shape),
            _full_spec(sp["w2"].shape), _full_spec(sp["b2"].shape),
            _full_spec(sp["og"].shape), _full_spec(sp["ob"].shape),
            _full_spec(sp["wo"].shape), _full_spec(sp["bo"].shape),
            _full_spec(sp["ln_g"].shape), _full_spec(sp["ln_b"].shape),
        ],
        out_specs=pl.BlockSpec((tm, hidden), lambda i: (i, 0)),
        compiler_params=pltpu.CompilerParams(
            dimension_semantics=("parallel",)),
    )(x_flat, mask_flat, sp["dproj"], sp["w1c"], sp["w1s"], sp["dx"],
      sp["b1"], sp["g1"], sp["be1"], mgrp, sp["w2"], sp["b2"],
      sp["og"], sp["ob"], sp["wo"], sp["bo"], sp["ln_g"], sp["ln_b"])


# ---------------------------------------------------------------------------
# Kernel B: final LayerNorm + residual with the encoder's original input
#   lane-dense variant: [N, H] viewed as [N*H/128, 128]; per-row LN stats are
#   computed with a 128x128 group-averaging matmul (full-lane stores/loads).
# ---------------------------------------------------------------------------
def _final_ln_folded_kernel(y_ref, x0_ref, g_ref, b_ref, m_ref, o_ref):
    y = y_ref[...]
    m = m_ref[...]
    mu = jnp.dot(y, m, preferred_element_type=jnp.float32)
    d = y - mu
    var = jnp.dot(d * d, m, preferred_element_type=jnp.float32)
    o_ref[...] = (d * jax.lax.rsqrt(var + _EPS) * g_ref[...] + b_ref[...]
                  + x0_ref[...])


def _final_ln_rows_kernel(y_ref, x0_ref, g_ref, b_ref, o_ref):
    o_ref[...] = _ln(y_ref[...], g_ref[...], b_ref[...]) + x0_ref[...]


def final_ln_apply(y_flat, x0_flat, gamma, beta):
    n, hidden = y_flat.shape
    if (n * hidden) % _LANES == 0 and _LANES % hidden == 0:
        reps = _LANES // hidden
        rows = (n * hidden) // _LANES
        tr = _choose_row_tile(rows, 1)
        grp = jnp.kron(jnp.eye(reps, dtype=jnp.float32),
                       jnp.ones((hidden, hidden), jnp.float32)) / hidden
        out = pl.pallas_call(
            _final_ln_folded_kernel,
            out_shape=jax.ShapeDtypeStruct((rows, _LANES), jnp.float32),
            grid=(pl.cdiv(rows, tr),),
            in_specs=[pl.BlockSpec((tr, _LANES), lambda i: (i, 0)),
                      pl.BlockSpec((tr, _LANES), lambda i: (i, 0)),
                      _full_spec((1, _LANES)),
                      _full_spec((1, _LANES)),
                      _full_spec((_LANES, _LANES))],
            out_specs=pl.BlockSpec((tr, _LANES), lambda i: (i, 0)),
            compiler_params=pltpu.CompilerParams(
                dimension_semantics=("parallel",)),
        )(y_flat.reshape(rows, _LANES), x0_flat.reshape(rows, _LANES),
          jnp.tile(gamma.reshape(1, hidden), (1, reps)),
          jnp.tile(beta.reshape(1, hidden), (1, reps)), grp)
        return out.reshape(n, hidden)
    # fallback: plain row tiling (still pipelined & parallel)
    tr = _choose_row_tile(n, 1)
    return pl.pallas_call(
        _final_ln_rows_kernel,
        out_shape=jax.ShapeDtypeStruct((n, hidden), jnp.float32),
        grid=(pl.cdiv(n, tr),),
        in_specs=[pl.BlockSpec((tr, hidden), lambda i: (i, 0)),
                  pl.BlockSpec((tr, hidden), lambda i: (i, 0)),
                  _full_spec((1, hidden)), _full_spec((1, hidden))],
        out_specs=pl.BlockSpec((tr, hidden), lambda i: (i, 0)),
        compiler_params=pltpu.CompilerParams(
            dimension_semantics=("parallel",)),
    )(y_flat, x0_flat, gamma.reshape(1, hidden), beta.reshape(1, hidden))


# ---------------------------------------------------------------------------
# Parameters (deterministic, synthetic) and packing into the kernel layout
# ---------------------------------------------------------------------------
def init_fe2_params(key, hidden):
    freq = 2 * hidden                  # freq_bands = hidden_size * 2
    ff = 2 * freq + 1
    ks = jax.random.split(key, 7)
    s = 0.1
    return dict(
        dense=jax.random.normal(ks[0], (hidden, freq), jnp.float32),
        w1=s * jax.random.normal(ks[1], (hidden, ff, hidden), jnp.float32),
        b1=s * jax.random.normal(ks[2], (hidden, hidden), jnp.float32),
        g1=jnp.ones((hidden, hidden), jnp.float32),
        be1=jnp.zeros((hidden, hidden), jnp.float32),
        w2=s * jax.random.normal(ks[3], (hidden, hidden, hidden), jnp.float32),
        b2=s * jax.random.normal(ks[4], (hidden, hidden), jnp.float32),
        og=jnp.ones((1, hidden), jnp.float32),
        ob=jnp.zeros((1, hidden), jnp.float32),
        wo=s * jax.random.normal(ks[5], (hidden, hidden), jnp.float32),
        bo=s * jax.random.normal(ks[6], (1, hidden), jnp.float32),
    )


def init_params(key, hidden, sub_layers):
    layers = []
    for _ in range(sub_layers):
        k1, k2, key = jax.random.split(key, 3)
        layers.append(dict(
            fe1=init_fe2_params(k1, hidden),
            fe2=init_fe2_params(k2, hidden),
            ln_g=jnp.ones((hidden,), jnp.float32),
            ln_b=jnp.zeros((hidden,), jnp.float32),
        ))
    return dict(layers=layers,
                ln_g=jnp.ones((hidden,), jnp.float32),
                ln_b=jnp.zeros((hidden,), jnp.float32))


def _pack_fe2(p):
    """Repack per-feature FourierEmbedding2 weights into block-diagonal /
    stacked matrices so the kernel needs no per-feature loop or concat."""
    hidden, freq = p["dense"].shape
    idx = jnp.arange(hidden)

    def row_block(mat):            # [H, C] -> [H, H*C]; row i in cols i*C:(i+1)*C
        c = mat.shape[-1]
        z = jnp.zeros((hidden, hidden, c), jnp.float32)
        z = z.at[idx, idx, :].set(mat)
        return z.reshape(hidden, hidden * c)

    def block_diag(blocks):        # [H, F, C] -> [H*F, H*C] block-diagonal
        f, c = blocks.shape[1], blocks.shape[2]
        z = jnp.zeros((hidden, f, hidden, c), jnp.float32)
        z = z.at[idx, :, idx, :].set(blocks)
        return z.reshape(hidden * f, hidden * c)

    w1 = p["w1"]                                           # [H, 2F+1, H] (in,out)
    return dict(
        dproj=row_block(p["dense"] * (2.0 * math.pi)),     # x -> fourier args
        w1c=block_diag(w1[:, :freq, :]),                   # cos part of Linear1
        w1s=block_diag(w1[:, freq:2 * freq, :]),           # sin part of Linear1
        dx=row_block(w1[:, 2 * freq, :]),                  # raw-x part of Linear1
        b1=p["b1"].reshape(1, hidden * hidden),
        g1=p["g1"].reshape(1, hidden * hidden),
        be1=p["be1"].reshape(1, hidden * hidden),
        w2=p["w2"].reshape(hidden * hidden, hidden),       # vstack of per-feat W2
        b2=jnp.sum(p["b2"], axis=0, keepdims=True),        # summed over features
        og=p["og"], ob=p["ob"], wo=p["wo"], bo=p["bo"],
    )


def pack_params(params, hidden):
    layers = []
    for lp in params["layers"]:
        p1 = _pack_fe2(lp["fe1"])
        p2 = _pack_fe2(lp["fe2"])
        sp = {k: jnp.stack([p1[k], p2[k]]) for k in p1}    # fe1/fe2 stacked
        sp["ln_g"] = lp["ln_g"].reshape(1, hidden)
        sp["ln_b"] = lp["ln_b"].reshape(1, hidden)
        layers.append(sp)
    mgrp = jnp.kron(jnp.eye(hidden, dtype=jnp.float32),
                    jnp.ones((hidden, hidden), jnp.float32)) / hidden
    return dict(layers=layers, mgrp=mgrp,
                ln_g=params["ln_g"].reshape(1, hidden),
                ln_b=params["ln_b"].reshape(1, hidden))


# ---------------------------------------------------------------------------
# Full TrajectoryEncoder forward
# ---------------------------------------------------------------------------
def trajectory_encoder_forward(x, mask4, packed):
    """x: [B, P, T, H] float32; mask4: [B, P, T, 1] float32 (1 = valid)."""
    b, p, t, hidden = x.shape
    n = b * p * t
    x_flat = x.reshape(n, hidden)
    m_flat = mask4.reshape(n, 1)
    tm = _choose_row_tile(n, t)                 # row tile covers whole (b,p) groups
    out = x_flat
    for sp in packed["layers"]:
        out = sublayer_apply(out, m_flat, sp, packed["mgrp"], t, tm)
    out = final_ln_apply(out, x_flat, packed["ln_g"], packed["ln_b"])
    return out.reshape(b, p, t, hidden)


if __name__ == "__main__":
    key = jax.random.PRNGKey(0)
    kx, km, kp = jax.random.split(key, 3)

    B, P, T, H = 2, 4, 8, 8          # batch, polygons, points, hidden_size
    sub_layers = 2

    x = jax.random.normal(kx, (B, P, T, H), jnp.float32)
    mask = (jax.random.uniform(km, (B, P, T)) > 0.3).astype(jnp.float32)
    mask = mask.at[:, :, 0].set(1.0)            # >= 1 valid point per polygon
    mask4 = mask.reshape(B, P, T, 1)

    params = init_params(kp, H, sub_layers)
    packed = pack_params(params, H)             # one-off pure-JAX weight repack

    fwd = jax.jit(trajectory_encoder_forward)
    out = jax.block_until_ready(fwd(x, mask4, packed))

    assert out.shape == (B, P, T, H)
    assert bool(jnp.all(jnp.isfinite(out)))
    print("KERNEL_OK")
</pallas_src>

<mosaic_0001>
module attributes {stable_mosaic.version = 11 : i64} {
  func.func @_sublayer_kernel(%arg0: i32, %arg1: memref<64x8xf32, #tpu.memory_space<vmem>>, %arg2: memref<64x1xf32, #tpu.memory_space<vmem>>, %arg3: memref<2x8x128xf32, #tpu.memory_space<vmem>>, %arg4: memref<2x128x64xf32, #tpu.memory_space<vmem>>, %arg5: memref<2x128x64xf32, #tpu.memory_space<vmem>>, %arg6: memref<2x8x64xf32, #tpu.memory_space<vmem>>, %arg7: memref<2x1x64xf32, #tpu.memory_space<vmem>>, %arg8: memref<2x1x64xf32, #tpu.memory_space<vmem>>, %arg9: memref<2x1x64xf32, #tpu.memory_space<vmem>>, %arg10: memref<64x64xf32, #tpu.memory_space<vmem>>, %arg11: memref<2x64x8xf32, #tpu.memory_space<vmem>>, %arg12: memref<2x1x8xf32, #tpu.memory_space<vmem>>, %arg13: memref<2x1x8xf32, #tpu.memory_space<vmem>>, %arg14: memref<2x1x8xf32, #tpu.memory_space<vmem>>, %arg15: memref<2x8x8xf32, #tpu.memory_space<vmem>>, %arg16: memref<2x1x8xf32, #tpu.memory_space<vmem>>, %arg17: memref<1x8xf32, #tpu.memory_space<vmem>>, %arg18: memref<1x8xf32, #tpu.memory_space<vmem>>, %arg19: memref<64x8xf32, #tpu.memory_space<vmem>>) attributes {dimension_semantics = [#tpu.dimension_semantics<parallel>], iteration_bounds = array<i64: 1>, scalar_prefetch = 0 : i64, scratch_operands = 0 : i64, tpu.core_type = #tpu.core_type<tc>, window_params = [{transform_indices = @transform_0, window_bounds = array<i64: 64, 8>}, {transform_indices = @transform_1, window_bounds = array<i64: 64, 1>}, {pipeline_mode = #tpu.pipeline_mode<synchronous>, transform_indices = @transform_2, window_bounds = array<i64: 2, 8, 128>}, {pipeline_mode = #tpu.pipeline_mode<synchronous>, transform_indices = @transform_3, window_bounds = array<i64: 2, 128, 64>}, {pipeline_mode = #tpu.pipeline_mode<synchronous>, transform_indices = @transform_4, window_bounds = array<i64: 2, 128, 64>}, {pipeline_mode = #tpu.pipeline_mode<synchronous>, transform_indices = @transform_5, window_bounds = array<i64: 2, 8, 64>}, {pipeline_mode = #tpu.pipeline_mode<synchronous>, transform_indices = @transform_6, window_bounds = array<i64: 2, 1, 64>}, {pipeline_mode = #tpu.pipeline_mode<synchronous>, transform_indices = @transform_7, window_bounds = array<i64: 2, 1, 64>}, {pipeline_mode = #tpu.pipeline_mode<synchronous>, transform_indices = @transform_8, window_bounds = array<i64: 2, 1, 64>}, {pipeline_mode = #tpu.pipeline_mode<synchronous>, transform_indices = @transform_9, window_bounds = array<i64: 64, 64>}, {pipeline_mode = #tpu.pipeline_mode<synchronous>, transform_indices = @transform_10, window_bounds = array<i64: 2, 64, 8>}, {pipeline_mode = #tpu.pipeline_mode<synchronous>, transform_indices = @transform_11, window_bounds = array<i64: 2, 1, 8>}, {pipeline_mode = #tpu.pipeline_mode<synchronous>, transform_indices = @transform_12, window_bounds = array<i64: 2, 1, 8>}, {pipeline_mode = #tpu.pipeline_mode<synchronous>, transform_indices = @transform_13, window_bounds = array<i64: 2, 1, 8>}, {pipeline_mode = #tpu.pipeline_mode<synchronous>, transform_indices = @transform_14, window_bounds = array<i64: 2, 8, 8>}, {pipeline_mode = #tpu.pipeline_mode<synchronous>, transform_indices = @transform_15, window_bounds = array<i64: 2, 1, 8>}, {pipeline_mode = #tpu.pipeline_mode<synchronous>, transform_indices = @transform_16, window_bounds = array<i64: 1, 8>}, {pipeline_mode = #tpu.pipeline_mode<synchronous>, transform_indices = @transform_17, window_bounds = array<i64: 1, 8>}, {transform_indices = @transform_18, window_bounds = array<i64: 64, 8>}]} {
    %c0 = arith.constant 0 : index
    %c0_0 = arith.constant 0 : index
    %0 = vector.load %arg1[%c0, %c0_0] : memref<64x8xf32, #tpu.memory_space<vmem>>, vector<64x8xf32>
    %c0_1 = arith.constant 0 : index
    %c0_2 = arith.constant 0 : index
    %1 = vector.load %arg10[%c0_1, %c0_2] : memref<64x64xf32, #tpu.memory_space<vmem>>, vector<64x64xf32>
    %c0_3 = arith.constant 0 : index
    %c0_4 = arith.constant 0 : index
    %c0_5 = arith.constant 0 : index
    %2 = vector.load %arg3[%c0_3, %c0_4, %c0_5] : memref<2x8x128xf32, #tpu.memory_space<vmem>>, vector<1x8x128xf32>
    %3 = vector.shape_cast %2 : vector<1x8x128xf32> to vector<8x128xf32>
    %cst = arith.constant dense<0.000000e+00> : vector<64x128xf32>
    %4 = tpu.matmul %0, %3, %cst {dimension_numbers = #tpu.dot_dimension_numbers<[1], [0], [0], [1], [0, 0, 1, 1], [], []>} : vector<64x8xf32>, vector<8x128xf32>, vector<64x128xf32> -> vector<64x128xf32>
    %5 = math.cos %4 : vector<64x128xf32>
    %c0_6 = arith.constant 0 : index
    %c0_7 = arith.constant 0 : index
    %c0_8 = arith.constant 0 : index
    %6 = vector.load %arg4[%c0_6, %c0_7, %c0_8] : memref<2x128x64xf32, #tpu.memory_space<vmem>>, vector<1x128x64xf32>
    %7 = vector.shape_cast %6 : vector<1x128x64xf32> to vector<128x64xf32>
    %cst_9 = arith.constant dense<0.000000e+00> : vector<64x64xf32>
    %8 = tpu.matmul %5, %7, %cst_9 {dimension_numbers = #tpu.dot_dimension_numbers<[1], [0], [0], [1], [0, 0, 1, 1], [], []>} : vector<64x128xf32>, vector<128x64xf32>, vector<64x64xf32> -> vector<64x64xf32>
    %9 = math.sin %4 : vector<64x128xf32>
    %c0_10 = arith.constant 0 : index
    %c0_11 = arith.constant 0 : index
    %c0_12 = arith.constant 0 : index
    %10 = vector.load %arg5[%c0_10, %c0_11, %c0_12] : memref<2x128x64xf32, #tpu.memory_space<vmem>>, vector<1x128x64xf32>
    %11 = vector.shape_cast %10 : vector<1x128x64xf32> to vector<128x64xf32>
    %cst_13 = arith.constant dense<0.000000e+00> : vector<64x64xf32>
    %12 = tpu.matmul %9, %11, %cst_13 {dimension_numbers = #tpu.dot_dimension_numbers<[1], [0], [0], [1], [0, 0, 1, 1], [], []>} : vector<64x128xf32>, vector<128x64xf32>, vector<64x64xf32> -> vector<64x64xf32>
    %13 = arith.addf %8, %12 : vector<64x64xf32>
    %c0_14 = arith.constant 0 : index
    %c0_15 = arith.constant 0 : index
    %c0_16 = arith.constant 0 : index
    %14 = vector.load %arg6[%c0_14, %c0_15, %c0_16] : memref<2x8x64xf32, #tpu.memory_space<vmem>>, vector<1x8x64xf32>
    %15 = vector.shape_cast %14 : vector<1x8x64xf32> to vector<8x64xf32>
    %cst_17 = arith.constant dense<0.000000e+00> : vector<64x64xf32>
    %16 = tpu.matmul %0, %15, %cst_17 {dimension_numbers = #tpu.dot_dimension_numbers<[1], [0], [0], [1], [0, 0, 1, 1], [], []>} : vector<64x8xf32>, vector<8x64xf32>, vector<64x64xf32> -> vector<64x64xf32>
    %17 = arith.addf %13, %16 : vector<64x64xf32>
    %c0_18 = arith.constant 0 : index
    %c0_19 = arith.constant 0 : index
    %c0_20 = arith.constant 0 : index
    %18 = vector.load %arg7[%c0_18, %c0_19, %c0_20] : memref<2x1x64xf32, #tpu.memory_space<vmem>>, vector<1x1x64xf32>
    %19 = vector.shape_cast %18 : vector<1x1x64xf32> to vector<1x64xf32>
    %20 = vector.broadcast %19 : vector<1x64xf32> to vector<64x64xf32>
    %21 = arith.addf %17, %20 : vector<64x64xf32>
    %cst_21 = arith.constant dense<0.000000e+00> : vector<64x64xf32>
    %22 = tpu.matmul %21, %1, %cst_21 {dimension_numbers = #tpu.dot_dimension_numbers<[1], [0], [0], [1], [0, 0, 1, 1], [], []>} : vector<64x64xf32>, vector<64x64xf32>, vector<64x64xf32> -> vector<64x64xf32>
    %23 = arith.subf %21, %22 : vector<64x64xf32>
    %24 = arith.mulf %23, %23 : vector<64x64xf32>
    %cst_22 = arith.constant dense<0.000000e+00> : vector<64x64xf32>
    %25 = tpu.matmul %24, %1, %cst_22 {dimension_numbers = #tpu.dot_dimension_numbers<[1], [0], [0], [1], [0, 0, 1, 1], [], []>} : vector<64x64xf32>, vector<64x64xf32>, vector<64x64xf32> -> vector<64x64xf32>
    %cst_23 = arith.constant 9.99999974E-6 : f32
    %26 = vector.broadcast %cst_23 : f32 to vector<64x64xf32>
    %27 = arith.addf %25, %26 : vector<64x64xf32>
    %28 = math.rsqrt %27 : vector<64x64xf32>
    %29 = arith.mulf %23, %28 : vector<64x64xf32>
    %c0_24 = arith.constant 0 : index
    %c0_25 = arith.constant 0 : index
    %c0_26 = arith.constant 0 : index
    %30 = vector.load %arg8[%c0_24, %c0_25, %c0_26] : memref<2x1x64xf32, #tpu.memory_space<vmem>>, vector<1x1x64xf32>
    %31 = vector.shape_cast %30 : vector<1x1x64xf32> to vector<1x64xf32>
    %32 = vector.broadcast %31 : vector<1x64xf32> to vector<64x64xf32>
    %33 = arith.mulf %29, %32 : vector<64x64xf32>
    %c0_27 = arith.constant 0 : index
    %c0_28 = arith.constant 0 : index
    %c0_29 = arith.constant 0 : index
    %34 = vector.load %arg9[%c0_27, %c0_28, %c0_29] : memref<2x1x64xf32, #tpu.memory_space<vmem>>, vector<1x1x64xf32>
    %35 = vector.shape_cast %34 : vector<1x1x64xf32> to vector<1x64xf32>
    %36 = vector.broadcast %35 : vector<1x64xf32> to vector<64x64xf32>
    %37 = arith.addf %33, %36 : vector<64x64xf32>
    %cst_30 = arith.constant 5.000000e-01 : f32
    %38 = vector.broadcast %cst_30 : f32 to vector<64x64xf32>
    %39 = arith.mulf %38, %37 : vector<64x64xf32>
    %cst_31 = arith.constant 0.707106769 : f32
    %40 = vector.broadcast %cst_31 : f32 to vector<64x64xf32>
    %41 = arith.mulf %37, %40 : vector<64x64xf32>
    %42 = math.erf %41 : vector<64x64xf32>
    %cst_32 = arith.constant 1.000000e+00 : f32
    %43 = vector.broadcast %cst_32 : f32 to vector<64x64xf32>
    %44 = arith.addf %43, %42 : vector<64x64xf32>
    %45 = arith.mulf %39, %44 : vector<64x64xf32>
    %c0_33 = arith.constant 0 : index
    %c0_34 = arith.constant 0 : index
    %c0_35 = arith.constant 0 : index
    %46 = vector.load %arg11[%c0_33, %c0_34, %c0_35] : memref<2x64x8xf32, #tpu.memory_space<vmem>>, vector<1x64x8xf32>
    %47 = vector.shape_cast %46 : vector<1x64x8xf32> to vector<64x8xf32>
    %cst_36 = arith.constant dense<0.000000e+00> : vector<64x8xf32>
    %48 = tpu.matmul %45, %47, %cst_36 {dimension_numbers = #tpu.dot_dimension_numbers<[1], [0], [0], [1], [0, 0, 1, 1], [], []>} : vector<64x64xf32>, vector<64x8xf32>, vector<64x8xf32> -> vector<64x8xf32>
    %c0_37 = arith.constant 0 : index
    %c0_38 = arith.constant 0 : index
    %c0_39 = arith.constant 0 : index
    %49 = vector.load %arg12[%c0_37, %c0_38, %c0_39] : memref<2x1x8xf32, #tpu.memory_space<vmem>>, vector<1x1x8xf32>
    %50 = vector.shape_cast %49 : vector<1x1x8xf32> to vector<1x8xf32>
    %51 = vector.broadcast %50 : vector<1x8xf32> to vector<64x8xf32>
    %52 = arith.addf %48, %51 : vector<64x8xf32>
    %c0_40 = arith.constant 0 : index
    %c0_41 = arith.constant 0 : index
    %c0_42 = arith.constant 0 : index
    %53 = vector.load %arg13[%c0_40, %c0_41, %c0_42] : memref<2x1x8xf32, #tpu.memory_space<vmem>>, vector<1x1x8xf32>
    %54 = vector.shape_cast %53 : vector<1x1x8xf32> to vector<1x8xf32>
    %c0_43 = arith.constant 0 : index
    %c0_44 = arith.constant 0 : index
    %c0_45 = arith.constant 0 : index
    %55 = vector.load %arg14[%c0_43, %c0_44, %c0_45] : memref<2x1x8xf32, #tpu.memory_space<vmem>>, vector<1x1x8xf32>
    %56 = vector.shape_cast %55 : vector<1x1x8xf32> to vector<1x8xf32>
    %cst_46 = arith.constant dense<0.000000e+00> : vector<64xf32>
    %57 = vector.multi_reduction <add>, %52, %cst_46 [1] : vector<64x8xf32> to vector<64xf32>
    %58 = vector.shape_cast %57 : vector<64xf32> to vector<64x1xf32>
    %cst_47 = arith.constant 8.000000e+00 : f32
    %59 = vector.broadcast %cst_47 : f32 to vector<64x1xf32>
    %60 = arith.divf %58, %59 : vector<64x1xf32>
    %61 = vector.broadcast %60 : vector<64x1xf32> to vector<64x8xf32>
    %62 = arith.subf %52, %61 : vector<64x8xf32>
    %63 = arith.mulf %62, %62 : vector<64x8xf32>
    %cst_48 = arith.constant dense<0.000000e+00> : vector<64xf32>
    %64 = vector.multi_reduction <add>, %63, %cst_48 [1] : vector<64x8xf32> to vector<64xf32>
    %65 = vector.shape_cast %64 : vector<64xf32> to vector<64x1xf32>
    %cst_49 = arith.constant 8.000000e+00 : f32
    %66 = vector.broadcast %cst_49 : f32 to vector<64x1xf32>
    %67 = arith.divf %65, %66 : vector<64x1xf32>
    %68 = vector.broadcast %60 : vector<64x1xf32> to vector<64x8xf32>
    %69 = arith.subf %52, %68 : vector<64x8xf32>
    %cst_50 = arith.constant 9.99999974E-6 : f32
    %70 = vector.broadcast %cst_50 : f32 to vector<64x1xf32>
    %71 = arith.addf %67, %70 : vector<64x1xf32>
    %72 = math.rsqrt %71 : vector<64x1xf32>
    %73 = vector.broadcast %72 : vector<64x1xf32> to vector<64x8xf32>
    %74 = arith.mulf %69, %73 : vector<64x8xf32>
    %75 = vector.broadcast %54 : vector<1x8xf32> to vector<64x8xf32>
    %76 = arith.mulf %74, %75 : vector<64x8xf32>
    %77 = vector.broadcast %56 : vector<1x8xf32> to vector<64x8xf32>
    %78 = arith.addf %76, %77 : vector<64x8xf32>
    %cst_51 = arith.constant 5.000000e-01 : f32
    %79 = vector.broadcast %cst_51 : f32 to vector<64x8xf32>
    %80 = arith.mulf %79, %78 : vector<64x8xf32>
    %cst_52 = arith.constant 0.707106769 : f32
    %81 = vector.broadcast %cst_52 : f32 to vector<64x8xf32>
    %82 = arith.mulf %78, %81 : vector<64x8xf32>
    %83 = math.erf %82 : vector<64x8xf32>
    %cst_53 = arith.constant 1.000000e+00 : f32
    %84 = vector.broadcast %cst_53 : f32 to vector<64x8xf32>
    %85 = arith.addf %84, %83 : vector<64x8xf32>
    %86 = arith.mulf %80, %85 : vector<64x8xf32>
    %c0_54 = arith.constant 0 : index
    %c0_55 = arith.constant 0 : index
    %c0_56 = arith.constant 0 : index
    %87 = vector.load %arg15[%c0_54, %c0_55, %c0_56] : memref<2x8x8xf32, #tpu.memory_space<vmem>>, vector<1x8x8xf32>
    %88 = vector.shape_cast %87 : vector<1x8x8xf32> to vector<8x8xf32>
    %cst_57 = arith.constant dense<0.000000e+00> : vector<64x8xf32>
    %89 = tpu.matmul %86, %88, %cst_57 {dimension_numbers = #tpu.dot_dimension_numbers<[1], [0], [0], [1], [0, 0, 1, 1], [], []>} : vector<64x8xf32>, vector<8x8xf32>, vector<64x8xf32> -> vector<64x8xf32>
    %c0_58 = arith.constant 0 : index
    %c0_59 = arith.constant 0 : index
    %c0_60 = arith.constant 0 : index
    %90 = vector.load %arg16[%c0_58, %c0_59, %c0_60] : memref<2x1x8xf32, #tpu.memory_space<vmem>>, vector<1x1x8xf32>
    %91 = vector.shape_cast %90 : vector<1x1x8xf32> to vector<1x8xf32>
    %92 = vector.broadcast %91 : vector<1x8xf32> to vector<64x8xf32>
    %93 = arith.addf %89, %92 : vector<64x8xf32>
    %c1 = arith.constant 1 : index
    %c0_61 = arith.constant 0 : index
    %c0_62 = arith.constant 0 : index
    %94 = vector.load %arg3[%c1, %c0_61, %c0_62] : memref<2x8x128xf32, #tpu.memory_space<vmem>>, vector<1x8x128xf32>
    %95 = vector.shape_cast %94 : vector<1x8x128xf32> to vector<8x128xf32>
    %cst_63 = arith.constant dense<0.000000e+00> : vector<64x128xf32>
    %96 = tpu.matmul %93, %95, %cst_63 {dimension_numbers = #tpu.dot_dimension_numbers<[1], [0], [0], [1], [0, 0, 1, 1], [], []>} : vector<64x8xf32>, vector<8x128xf32>, vector<64x128xf32> -> vector<64x128xf32>
    %97 = math.cos %96 : vector<64x128xf32>
    %c1_64 = arith.constant 1 : index
    %c0_65 = arith.constant 0 : index
    %c0_66 = arith.constant 0 : index
    %98 = vector.load %arg4[%c1_64, %c0_65, %c0_66] : memref<2x128x64xf32, #tpu.memory_space<vmem>>, vector<1x128x64xf32>
    %99 = vector.shape_cast %98 : vector<1x128x64xf32> to vector<128x64xf32>
    %cst_67 = arith.constant dense<0.000000e+00> : vector<64x64xf32>
    %100 = tpu.matmul %97, %99, %cst_67 {dimension_numbers = #tpu.dot_dimension_numbers<[1], [0], [0], [1], [0, 0, 1, 1], [], []>} : vector<64x128xf32>, vector<128x64xf32>, vector<64x64xf32> -> vector<64x64xf32>
    %101 = math.sin %96 : vector<64x128xf32>
    %c1_68 = arith.constant 1 : index
    %c0_69 = arith.constant 0 : index
    %c0_70 = arith.constant 0 : index
    %102 = vector.load %arg5[%c1_68, %c0_69, %c0_70] : memref<2x128x64xf32, #tpu.memory_space<vmem>>, vector<1x128x64xf32>
    %103 = vector.shape_cast %102 : vector<1x128x64xf32> to vector<128x64xf32>
    %cst_71 = arith.constant dense<0.000000e+00> : vector<64x64xf32>
    %104 = tpu.matmul %101, %103, %cst_71 {dimension_numbers = #tpu.dot_dimension_numbers<[1], [0], [0], [1], [0, 0, 1, 1], [], []>} : vector<64x128xf32>, vector<128x64xf32>, vector<64x64xf32> -> vector<64x64xf32>
    %105 = arith.addf %100, %104 : vector<64x64xf32>
    %c1_72 = arith.constant 1 : index
    %c0_73 = arith.constant 0 : index
    %c0_74 = arith.constant 0 : index
    %106 = vector.load %arg6[%c1_72, %c0_73, %c0_74] : memref<2x8x64xf32, #tpu.memory_space<vmem>>, vector<1x8x64xf32>
    %107 = vector.shape_cast %106 : vector<1x8x64xf32> to vector<8x64xf32>
    %cst_75 = arith.constant dense<0.000000e+00> : vector<64x64xf32>
    %108 = tpu.matmul %93, %107, %cst_75 {dimension_numbers = #tpu.dot_dimension_numbers<[1], [0], [0], [1], [0, 0, 1, 1], [], []>} : vector<64x8xf32>, vector<8x64xf32>, vector<64x64xf32> -> vector<64x64xf32>
    %109 = arith.addf %105, %108 : vector<64x64xf32>
    %c1_76 = arith.constant 1 : index
    %c0_77 = arith.constant 0 : index
    %c0_78 = arith.constant 0 : index
    %110 = vector.load %arg7[%c1_76, %c0_77, %c0_78] : memref<2x1x64xf32, #tpu.memory_space<vmem>>, vector<1x1x64xf32>
    %111 = vector.shape_cast %110 : vector<1x1x64xf32> to vector<1x64xf32>
    %112 = vector.broadcast %111 : vector<1x64xf32> to vector<64x64xf32>
    %113 = arith.addf %109, %112 : vector<64x64xf32>
    %cst_79 = arith.constant dense<0.000000e+00> : vector<64x64xf32>
    %114 = tpu.matmul %113, %1, %cst_79 {dimension_numbers = #tpu.dot_dimension_numbers<[1], [0], [0], [1], [0, 0, 1, 1], [], []>} : vector<64x64xf32>, vector<64x64xf32>, vector<64x64xf32> -> vector<64x64xf32>
    %115 = arith.subf %113, %114 : vector<64x64xf32>
    %116 = arith.mulf %115, %115 : vector<64x64xf32>
    %cst_80 = arith.constant dense<0.000000e+00> : vector<64x64xf32>
    %117 = tpu.matmul %116, %1, %cst_80 {dimension_numbers = #tpu.dot_dimension_numbers<[1], [0], [0], [1], [0, 0, 1, 1], [], []>} : vector<64x64xf32>, vector<64x64xf32>, vector<64x64xf32> -> vector<64x64xf32>
    %cst_81 = arith.constant 9.99999974E-6 : f32
    %118 = vector.broadcast %cst_81 : f32 to vector<64x64xf32>
    %119 = arith.addf %117, %118 : vector<64x64xf32>
    %120 = math.rsqrt %119 : vector<64x64xf32>
    %121 = arith.mulf %115, %120 : vector<64x64xf32>
    %c1_82 = arith.constant 1 : index
    %c0_83 = arith.constant 0 : index
    %c0_84 = arith.constant 0 : index
    %122 = vector.load %arg8[%c1_82, %c0_83, %c0_84] : memref<2x1x64xf32, #tpu.memory_space<vmem>>, vector<1x1x64xf32>
    %123 = vector.shape_cast %122 : vector<1x1x64xf32> to vector<1x64xf32>
    %124 = vector.broadcast %123 : vector<1x64xf32> to vector<64x64xf32>
    %125 = arith.mulf %121, %124 : vector<64x64xf32>
    %c1_85 = arith.constant 1 : index
    %c0_86 = arith.constant 0 : index
    %c0_87 = arith.constant 0 : index
    %126 = vector.load %arg9[%c1_85, %c0_86, %c0_87] : memref<2x1x64xf32, #tpu.memory_space<vmem>>, vector<1x1x64xf32>
    %127 = vector.shape_cast %126 : vector<1x1x64xf32> to vector<1x64xf32>
    %128 = vector.broadcast %127 : vector<1x64xf32> to vector<64x64xf32>
    %129 = arith.addf %125, %128 : vector<64x64xf32>
    %cst_88 = arith.constant 5.000000e-01 : f32
    %130 = vector.broadcast %cst_88 : f32 to vector<64x64xf32>
    %131 = arith.mulf %130, %129 : vector<64x64xf32>
    %cst_89 = arith.constant 0.707106769 : f32
    %132 = vector.broadcast %cst_89 : f32 to vector<64x64xf32>
    %133 = arith.mulf %129, %132 : vector<64x64xf32>
    %134 = math.erf %133 : vector<64x64xf32>
    %cst_90 = arith.constant 1.000000e+00 : f32
    %135 = vector.broadcast %cst_90 : f32 to vector<64x64xf32>
    %136 = arith.addf %135, %134 : vector<64x64xf32>
    %137 = arith.mulf %131, %136 : vector<64x64xf32>
    %c1_91 = arith.constant 1 : index
    %c0_92 = arith.constant 0 : index
    %c0_93 = arith.constant 0 : index
    %138 = vector.load %arg11[%c1_91, %c0_92, %c0_93] : memref<2x64x8xf32, #tpu.memory_space<vmem>>, vector<1x64x8xf32>
    %139 = vector.shape_cast %138 : vector<1x64x8xf32> to vector<64x8xf32>
    %cst_94 = arith.constant dense<0.000000e+00> : vector<64x8xf32>
    %140 = tpu.matmul %137, %139, %cst_94 {dimension_numbers = #tpu.dot_dimension_numbers<[1], [0], [0], [1], [0, 0, 1, 1], [], []>} : vector<64x64xf32>, vector<64x8xf32>, vector<64x8xf32> -> vector<64x8xf32>
    %c1_95 = arith.constant 1 : index
    %c0_96 = arith.constant 0 : index
    %c0_97 = arith.constant 0 : index
    %141 = vector.load %arg12[%c1_95, %c0_96, %c0_97] : memref<2x1x8xf32, #tpu.memory_space<vmem>>, vector<1x1x8xf32>
    %142 = vector.shape_cast %141 : vector<1x1x8xf32> to vector<1x8xf32>
    %143 = vector.broadcast %142 : vector<1x8xf32> to vector<64x8xf32>
    %144 = arith.addf %140, %143 : vector<64x8xf32>
    %c1_98 = arith.constant 1 : index
    %c0_99 = arith.constant 0 : index
    %c0_100 = arith.constant 0 : index
    %145 = vector.load %arg13[%c1_98, %c0_99, %c0_100] : memref<2x1x8xf32, #tpu.memory_space<vmem>>, vector<1x1x8xf32>
    %146 = vector.shape_cast %145 : vector<1x1x8xf32> to vector<1x8xf32>
    %c1_101 = arith.constant 1 : index
    %c0_102 = arith.constant 0 : index
    %c0_103 = arith.constant 0 : index
    %147 = vector.load %arg14[%c1_101, %c0_102, %c0_103] : memref<2x1x8xf32, #tpu.memory_space<vmem>>, vector<1x1x8xf32>
    %148 = vector.shape_cast %147 : vector<1x1x8xf32> to vector<1x8xf32>
    %cst_104 = arith.constant dense<0.000000e+00> : vector<64xf32>
    %149 = vector.multi_reduction <add>, %144, %cst_104 [1] : vector<64x8xf32> to vector<64xf32>
    %150 = vector.shape_cast %149 : vector<64xf32> to vector<64x1xf32>
    %cst_105 = arith.constant 8.000000e+00 : f32
    %151 = vector.broadcast %cst_105 : f32 to vector<64x1xf32>
    %152 = arith.divf %150, %151 : vector<64x1xf32>
    %153 = vector.broadcast %152 : vector<64x1xf32> to vector<64x8xf32>
    %154 = arith.subf %144, %153 : vector<64x8xf32>
    %155 = arith.mulf %154, %154 : vector<64x8xf32>
    %cst_106 = arith.constant dense<0.000000e+00> : vector<64xf32>
    %156 = vector.multi_reduction <add>, %155, %cst_106 [1] : vector<64x8xf32> to vector<64xf32>
    %157 = vector.shape_cast %156 : vector<64xf32> to vector<64x1xf32>
    %cst_107 = arith.constant 8.000000e+00 : f32
    %158 = vector.broadcast %cst_107 : f32 to vector<64x1xf32>
    %159 = arith.divf %157, %158 : vector<64x1xf32>
    %160 = vector.broadcast %152 : vector<64x1xf32> to vector<64x8xf32>
    %161 = arith.subf %144, %160 : vector<64x8xf32>
    %cst_108 = arith.constant 9.99999974E-6 : f32
    %162 = vector.broadcast %cst_108 : f32 to vector<64x1xf32>
    %163 = arith.addf %159, %162 : vector<64x1xf32>
    %164 = math.rsqrt %163 : vector<64x1xf32>
    %165 = vector.broadcast %164 : vector<64x1xf32> to vector<64x8xf32>
    %166 = arith.mulf %161, %165 : vector<64x8xf32>
    %167 = vector.broadcast %146 : vector<1x8xf32> to vector<64x8xf32>
    %168 = arith.mulf %166, %167 : vector<64x8xf32>
    %169 = vector.broadcast %148 : vector<1x8xf32> to vector<64x8xf32>
    %170 = arith.addf %168, %169 : vector<64x8xf32>
    %cst_109 = arith.constant 5.000000e-01 : f32
    %171 = vector.broadcast %cst_109 : f32 to vector<64x8xf32>
    %172 = arith.mulf %171, %170 : vector<64x8xf32>
    %cst_110 = arith.constant 0.707106769 : f32
    %173 = vector.broadcast %cst_110 : f32 to vector<64x8xf32>
    %174 = arith.mulf %170, %173 : vector<64x8xf32>
    %175 = math.erf %174 : vector<64x8xf32>
    %cst_111 = arith.constant 1.000000e+00 : f32
    %176 = vector.broadcast %cst_111 : f32 to vector<64x8xf32>
    %177 = arith.addf %176, %175 : vector<64x8xf32>
    %178 = arith.mulf %172, %177 : vector<64x8xf32>
    %c1_112 = arith.constant 1 : index
    %c0_113 = arith.constant 0 : index
    %c0_114 = arith.constant 0 : index
    %179 = vector.load %arg15[%c1_112, %c0_113, %c0_114] : memref<2x8x8xf32, #tpu.memory_space<vmem>>, vector<1x8x8xf32>
    %180 = vector.shape_cast %179 : vector<1x8x8xf32> to vector<8x8xf32>
    %cst_115 = arith.constant dense<0.000000e+00> : vector<64x8xf32>
    %181 = tpu.matmul %178, %180, %cst_115 {dimension_numbers = #tpu.dot_dimension_numbers<[1], [0], [0], [1], [0, 0, 1, 1], [], []>} : vector<64x8xf32>, vector<8x8xf32>, vector<64x8xf32> -> vector<64x8xf32>
    %c1_116 = arith.constant 1 : index
    %c0_117 = arith.constant 0 : index
    %c0_118 = arith.constant 0 : index
    %182 = vector.load %arg16[%c1_116, %c0_117, %c0_118] : memref<2x1x8xf32, #tpu.memory_space<vmem>>, vector<1x1x8xf32>
    %183 = vector.shape_cast %182 : vector<1x1x8xf32> to vector<1x8xf32>
    %184 = vector.broadcast %183 : vector<1x8xf32> to vector<64x8xf32>
    %185 = arith.addf %181, %184 : vector<64x8xf32>
    %cst_119 = arith.constant 0.000000e+00 : f32
    %186 = vector.broadcast %cst_119 : f32 to vector<64x8xf32>
    %187 = arith.maximumf %185, %186 : vector<64x8xf32>
    %188 = vector.shape_cast %187 : vector<64x8xf32> to vector<8x8x8xf32>
    %c0_120 = arith.constant 0 : index
    %c0_121 = arith.constant 0 : index
    %189 = vector.load %arg2[%c0_120, %c0_121] : memref<64x1xf32, #tpu.memory_space<vmem>>, vector<64x1xf32>
    %190 = vector.shape_cast %189 : vector<64x1xf32> to vector<8x8x1xf32>
    %cst_122 = arith.constant 5.000000e-01 : f32
    %191 = vector.broadcast %cst_122 : f32 to vector<8x8x1xf32>
    %192 = arith.cmpf ogt, %190, %191 : vector<8x8x1xf32>
    %cst_123 = arith.constant -1.000000e+30 : f32
    %193 = vector.shape_cast %192 : vector<8x8x1xi1> to vector<8x8x1xi1>
    %194 = vector.broadcast %193 : vector<8x8x1xi1> to vector<8x8x8xi1>
    %195 = vector.broadcast %cst_123 : f32 to vector<8x8x8xf32>
    %196 = arith.select %194, %188, %195 : vector<8x8x8xi1>, vector<8x8x8xf32>
    %cst_124 = arith.constant dense<0xFF800000> : vector<8x8xf32>
    %197 = vector.multi_reduction <maximumf>, %196, %cst_124 [1] : vector<8x8x8xf32> to vector<8x8xf32>
    %198 = vector.shape_cast %197 : vector<8x8xf32> to vector<8x1x8xf32>
    %199 = vector.broadcast %198 : vector<8x1x8xf32> to vector<8x8x8xf32>
    %200 = arith.addf %188, %199 : vector<8x8x8xf32>
    %cst_125 = arith.constant 0.000000e+00 : f32
    %201 = vector.shape_cast %192 : vector<8x8x1xi1> to vector<8x8x1xi1>
    %202 = vector.broadcast %201 : vector<8x8x1xi1> to vector<8x8x8xi1>
    %203 = vector.broadcast %cst_125 : f32 to vector<8x8x8xf32>
    %204 = arith.select %202, %200, %203 : vector<8x8x8xi1>, vector<8x8x8xf32>
    %205 = vector.shape_cast %204 : vector<8x8x8xf32> to vector<64x8xf32>
    %c0_126 = arith.constant 0 : index
    %c0_127 = arith.constant 0 : index
    %206 = vector.load %arg17[%c0_126, %c0_127] : memref<1x8xf32, #tpu.memory_space<vmem>>, vector<1x8xf32>
    %c0_128 = arith.constant 0 : index
    %c0_129 = arith.constant 0 : index
    %207 = vector.load %arg18[%c0_128, %c0_129] : memref<1x8xf32, #tpu.memory_space<vmem>>, vector<1x8xf32>
    %cst_130 = arith.constant dense<0.000000e+00> : vector<64xf32>
    %208 = vector.multi_reduction <add>, %205, %cst_130 [1] : vector<64x8xf32> to vector<64xf32>
    %209 = vector.shape_cast %208 : vector<64xf32> to vector<64x1xf32>
    %cst_131 = arith.constant 8.000000e+00 : f32
    %210 = vector.broadcast %cst_131 : f32 to vector<64x1xf32>
    %211 = arith.divf %209, %210 : vector<64x1xf32>
    %212 = vector.broadcast %211 : vector<64x1xf32> to vector<64x8xf32>
    %213 = arith.subf %205, %212 : vector<64x8xf32>
    %214 = arith.mulf %213, %213 : vector<64x8xf32>
    %cst_132 = arith.constant dense<0.000000e+00> : vector<64xf32>
    %215 = vector.multi_reduction <add>, %214, %cst_132 [1] : vector<64x8xf32> to vector<64xf32>
    %216 = vector.shape_cast %215 : vector<64xf32> to vector<64x1xf32>
    %cst_133 = arith.constant 8.000000e+00 : f32
    %217 = vector.broadcast %cst_133 : f32 to vector<64x1xf32>
    %218 = arith.divf %216, %217 : vector<64x1xf32>
    %219 = vector.broadcast %211 : vector<64x1xf32> to vector<64x8xf32>
    %220 = arith.subf %205, %219 : vector<64x8xf32>
    %cst_134 = arith.constant 9.99999974E-6 : f32
    %221 = vector.broadcast %cst_134 : f32 to vector<64x1xf32>
    %222 = arith.addf %218, %221 : vector<64x1xf32>
    %223 = math.rsqrt %222 : vector<64x1xf32>
    %224 = vector.broadcast %223 : vector<64x1xf32> to vector<64x8xf32>
    %225 = arith.mulf %220, %224 : vector<64x8xf32>
    %226 = vector.broadcast %206 : vector<1x8xf32> to vector<64x8xf32>
    %227 = arith.mulf %225, %226 : vector<64x8xf32>
    %228 = vector.broadcast %207 : vector<1x8xf32> to vector<64x8xf32>
    %229 = arith.addf %227, %228 : vector<64x8xf32>
    %230 = arith.addf %229, %0 : vector<64x8xf32>
    %c0_135 = arith.constant 0 : index
    %c0_136 = arith.constant 0 : index
    %231 = vector.load %arg19[%c0_135, %c0_136] : memref<64x8xf32, #tpu.memory_space<vmem>>, vector<64x8xf32>
    tpu.vector_store %arg19[%c0_135, %c0_136], %230 {strides = array<i32>} : memref<64x8xf32, #tpu.memory_space<vmem>>, vector<64x8xf32>,
    return
  }
  func.func @transform_0(%arg0: i32) -> (i32, i32) {
    %c0_i32 = arith.constant 0 : i32
    %c0_i32_0 = arith.constant 0 : i32
    return %arg0, %c0_i32 : i32, i32
  }
  func.func @transform_1(%arg0: i32) -> (i32, i32) {
    %c0_i32 = arith.constant 0 : i32
    %c0_i32_0 = arith.constant 0 : i32
    return %arg0, %c0_i32 : i32, i32
  }
  func.func @transform_2(%arg0: i32) -> (i32, i32, i32) {
    %c0_i32 = arith.constant 0 : i32
    %c0_i32_0 = arith.constant 0 : i32
    %c0_i32_1 = arith.constant 0 : i32
    %c0_i32_2 = arith.constant 0 : i32
    return %c0_i32, %c0_i32_0, %c0_i32_1 : i32, i32, i32
  }
  func.func @transform_3(%arg0: i32) -> (i32, i32, i32) {
    %c0_i32 = arith.constant 0 : i32
    %c0_i32_0 = arith.constant 0 : i32
    %c0_i32_1 = arith.constant 0 : i32
    %c0_i32_2 = arith.constant 0 : i32
    return %c0_i32, %c0_i32_0, %c0_i32_1 : i32, i32, i32
  }
  func.func @transform_4(%arg0: i32) -> (i32, i32, i32) {
    %c0_i32 = arith.constant 0 : i32
    %c0_i32_0 = arith.constant 0 : i32
    %c0_i32_1 = arith.constant 0 : i32
    %c0_i32_2 = arith.constant 0 : i32
    return %c0_i32, %c0_i32_0, %c0_i32_1 : i32, i32, i32
  }
  func.func @transform_5(%arg0: i32) -> (i32, i32, i32) {
    %c0_i32 = arith.constant 0 : i32
    %c0_i32_0 = arith.constant 0 : i32
    %c0_i32_1 = arith.constant 0 : i32
    %c0_i32_2 = arith.constant 0 : i32
    return %c0_i32, %c0_i32_0, %c0_i32_1 : i32, i32, i32
  }
  func.func @transform_6(%arg0: i32) -> (i32, i32, i32) {
    %c0_i32 = arith.constant 0 : i32
    %c0_i32_0 = arith.constant 0 : i32
    %c0_i32_1 = arith.constant 0 : i32
    %c0_i32_2 = arith.constant 0 : i32
    return %c0_i32, %c0_i32_0, %c0_i32_1 : i32, i32, i32
  }
  func.func @transform_7(%arg0: i32) -> (i32, i32, i32) {
    %c0_i32 = arith.constant 0 : i32
    %c0_i32_0 = arith.constant 0 : i32
    %c0_i32_1 = arith.constant 0 : i32
    %c0_i32_2 = arith.constant 0 : i32
    return %c0_i32, %c0_i32_0, %c0_i32_1 : i32, i32, i32
  }
  func.func @transform_8(%arg0: i32) -> (i32, i32, i32) {
    %c0_i32 = arith.constant 0 : i32
    %c0_i32_0 = arith.constant 0 : i32
    %c0_i32_1 = arith.constant 0 : i32
    %c0_i32_2 = arith.constant 0 : i32
    return %c0_i32, %c0_i32_0, %c0_i32_1 : i32, i32, i32
  }
  func.func @transform_9(%arg0: i32) -> (i32, i32) {
    %c0_i32 = arith.constant 0 : i32
    %c0_i32_0 = arith.constant 0 : i32
    %c0_i32_1 = arith.constant 0 : i32
    return %c0_i32, %c0_i32_0 : i32, i32
  }
  func.func @transform_10(%arg0: i32) -> (i32, i32, i32) {
    %c0_i32 = arith.constant 0 : i32
    %c0_i32_0 = arith.constant 0 : i32
    %c0_i32_1 = arith.constant 0 : i32
    %c0_i32_2 = arith.constant 0 : i32
    return %c0_i32, %c0_i32_0, %c0_i32_1 : i32, i32, i32
  }
  func.func @transform_11(%arg0: i32) -> (i32, i32, i32) {
    %c0_i32 = arith.constant 0 : i32
    %c0_i32_0 = arith.constant 0 : i32
    %c0_i32_1 = arith.constant 0 : i32
    %c0_i32_2 = arith.constant 0 : i32
    return %c0_i32, %c0_i32_0, %c0_i32_1 : i32, i32, i32
  }
  func.func @transform_12(%arg0: i32) -> (i32, i32, i32) {
    %c0_i32 = arith.constant 0 : i32
    %c0_i32_0 = arith.constant 0 : i32
    %c0_i32_1 = arith.constant 0 : i32
    %c0_i32_2 = arith.constant 0 : i32
    return %c0_i32, %c0_i32_0, %c0_i32_1 : i32, i32, i32
  }
  func.func @transform_13(%arg0: i32) -> (i32, i32, i32) {
    %c0_i32 = arith.constant 0 : i32
    %c0_i32_0 = arith.constant 0 : i32
    %c0_i32_1 = arith.constant 0 : i32
    %c0_i32_2 = arith.constant 0 : i32
    return %c0_i32, %c0_i32_0, %c0_i32_1 : i32, i32, i32
  }
  func.func @transform_14(%arg0: i32) -> (i32, i32, i32) {
    %c0_i32 = arith.constant 0 : i32
    %c0_i32_0 = arith.constant 0 : i32
    %c0_i32_1 = arith.constant 0 : i32
    %c0_i32_2 = arith.constant 0 : i32
    return %c0_i32, %c0_i32_0, %c0_i32_1 : i32, i32, i32
  }
  func.func @transform_15(%arg0: i32) -> (i32, i32, i32) {
    %c0_i32 = arith.constant 0 : i32
    %c0_i32_0 = arith.constant 0 : i32
    %c0_i32_1 = arith.constant 0 : i32
    %c0_i32_2 = arith.constant 0 : i32
    return %c0_i32, %c0_i32_0, %c0_i32_1 : i32, i32, i32
  }
  func.func @transform_16(%arg0: i32) -> (i32, i32) {
    %c0_i32 = arith.constant 0 : i32
    %c0_i32_0 = arith.constant 0 : i32
    %c0_i32_1 = arith.constant 0 : i32
    return %c0_i32, %c0_i32_0 : i32, i32
  }
  func.func @transform_17(%arg0: i32) -> (i32, i32) {
    %c0_i32 = arith.constant 0 : i32
    %c0_i32_0 = arith.constant 0 : i32
    %c0_i32_1 = arith.constant 0 : i32
    return %c0_i32, %c0_i32_0 : i32, i32
  }
  func.func @transform_18(%arg0: i32) -> (i32, i32) {
    %c0_i32 = arith.constant 0 : i32
    %c0_i32_0 = arith.constant 0 : i32
    return %arg0, %c0_i32 : i32, i32
  }
}

module attributes {stable_mosaic.version = 11 : i64} {
  func.func @_final_ln_folded_kernel(%arg0: i32, %arg1: memref<4x128xf32, #tpu.memory_space<vmem>>, %arg2: memref<4x128xf32, #tpu.memory_space<vmem>>, %arg3: memref<1x128xf32, #tpu.memory_space<vmem>>, %arg4: memref<1x128xf32, #tpu.memory_space<vmem>>, %arg5: memref<128x128xf32, #tpu.memory_space<vmem>>, %arg6: memref<4x128xf32, #tpu.memory_space<vmem>>) attributes {dimension_semantics = [#tpu.dimension_semantics<parallel>], iteration_bounds = array<i64: 1>, scalar_prefetch = 0 : i64, scratch_operands = 0 : i64, tpu.core_type = #tpu.core_type<tc>, window_params = [{transform_indices = @transform_0, window_bounds = array<i64: 4, 128>}, {transform_indices = @transform_1, window_bounds = array<i64: 4, 128>}, {pipeline_mode = #tpu.pipeline_mode<synchronous>, transform_indices = @transform_2, window_bounds = array<i64: 1, 128>}, {pipeline_mode = #tpu.pipeline_mode<synchronous>, transform_indices = @transform_3, window_bounds = array<i64: 1, 128>}, {pipeline_mode = #tpu.pipeline_mode<synchronous>, transform_indices = @transform_4, window_bounds = array<i64: 128, 128>}, {transform_indices = @transform_5, window_bounds = array<i64: 4, 128>}]} {
    %c0 = arith.constant 0 : index
    %c0_0 = arith.constant 0 : index
    %0 = vector.load %arg1[%c0, %c0_0] : memref<4x128xf32, #tpu.memory_space<vmem>>, vector<4x128xf32>
    %c0_1 = arith.constant 0 : index
    %c0_2 = arith.constant 0 : index
    %1 = vector.load %arg5[%c0_1, %c0_2] : memref<128x128xf32, #tpu.memory_space<vmem>>, vector<128x128xf32>
    %cst = arith.constant dense<0.000000e+00> : vector<4x128xf32>
    %2 = tpu.matmul %0, %1, %cst {dimension_numbers = #tpu.dot_dimension_numbers<[1], [0], [0], [1], [0, 0, 1, 1], [], []>} : vector<4x128xf32>, vector<128x128xf32>, vector<4x128xf32> -> vector<4x128xf32>
    %3 = arith.subf %0, %2 : vector<4x128xf32>
    %4 = arith.mulf %3, %3 : vector<4x128xf32>
    %cst_3 = arith.constant dense<0.000000e+00> : vector<4x128xf32>
    %5 = tpu.matmul %4, %1, %cst_3 {dimension_numbers = #tpu.dot_dimension_numbers<[1], [0], [0], [1], [0, 0, 1, 1], [], []>} : vector<4x128xf32>, vector<128x128xf32>, vector<4x128xf32> -> vector<4x128xf32>
    %cst_4 = arith.constant 9.99999974E-6 : f32
    %6 = vector.broadcast %cst_4 : f32 to vector<4x128xf32>
    %7 = arith.addf %5, %6 : vector<4x128xf32>
    %8 = math.rsqrt %7 : vector<4x128xf32>
    %9 = arith.mulf %3, %8 : vector<4x128xf32>
    %c0_5 = arith.constant 0 : index
    %c0_6 = arith.constant 0 : index
    %10 = vector.load %arg3[%c0_5, %c0_6] : memref<1x128xf32, #tpu.memory_space<vmem>>, vector<1x128xf32>
    %11 = vector.broadcast %10 : vector<1x128xf32> to vector<4x128xf32>
    %12 = arith.mulf %9, %11 : vector<4x128xf32>
    %c0_7 = arith.constant 0 : index
    %c0_8 = arith.constant 0 : index
    %13 = vector.load %arg4[%c0_7, %c0_8] : memref<1x128xf32, #tpu.memory_space<vmem>>, vector<1x128xf32>
    %14 = vector.broadcast %13 : vector<1x128xf32> to vector<4x128xf32>
    %15 = arith.addf %12, %14 : vector<4x128xf32>
    %c0_9 = arith.constant 0 : index
    %c0_10 = arith.constant 0 : index
    %16 = vector.load %arg2[%c0_9, %c0_10] : memref<4x128xf32, #tpu.memory_space<vmem>>, vector<4x128xf32>
    %17 = arith.addf %15, %16 : vector<4x128xf32>
    %c0_11 = arith.constant 0 : index
    %c0_12 = arith.constant 0 : index
    %18 = vector.load %arg6[%c0_11, %c0_12] : memref<4x128xf32, #tpu.memory_space<vmem>>, vector<4x128xf32>
    tpu.vector_store %arg6[%c0_11, %c0_12], %17 {strides = array<i32>} : memref<4x128xf32, #tpu.memory_space<vmem>>, vector<4x128xf32>,
    return
  }
  func.func @transform_0(%arg0: i32) -> (i32, i32) {
    %c0_i32 = arith.constant 0 : i32
    %c0_i32_0 = arith.constant 0 : i32
    return %arg0, %c0_i32 : i32, i32
  }
  func.func @transform_1(%arg0: i32) -> (i32, i32) {
    %c0_i32 = arith.constant 0 : i32
    %c0_i32_0 = arith.constant 0 : i32
    return %arg0, %c0_i32 : i32, i32
  }
  func.func @transform_2(%arg0: i32) -> (i32, i32) {
    %c0_i32 = arith.constant 0 : i32
    %c0_i32_0 = arith.constant 0 : i32
    %c0_i32_1 = arith.constant 0 : i32
    return %c0_i32, %c0_i32_0 : i32, i32
  }
  func.func @transform_3(%arg0: i32) -> (i32, i32) {
    %c0_i32 = arith.constant 0 : i32
    %c0_i32_0 = arith.constant 0 : i32
    %c0_i32_1 = arith.constant 0 : i32
    return %c0_i32, %c0_i32_0 : i32, i32
  }
  func.func @transform_4(%arg0: i32) -> (i32, i32) {
    %c0_i32 = arith.constant 0 : i32
    %c0_i32_0 = arith.constant 0 : i32
    %c0_i32_1 = arith.constant 0 : i32
    return %c0_i32, %c0_i32_0 : i32, i32
  }
  func.func @transform_5(%arg0: i32) -> (i32, i32) {
    %c0_i32 = arith.constant 0 : i32
    %c0_i32_0 = arith.constant 0 : i32
    return %arg0, %c0_i32 : i32, i32
  }
}

</mosaic_0001>

<bundles_post_ra>
// kernel: trajectory_encoder_forward.5
= control target key start
LH: loop header
LB: loop body
LE: loop exit
PB: predicated region body
PF: predicated region fallthrough
CT: control target
= control target key end

     0   :  { %s204_s4 = inlined_call_operand.vmem [shape: f32[128,128], index: 4, kind: input, shape index: {}]   ;;  %s205_s0 = inlined_call_operand.vmem [shape: f32[4,128], index: 0, kind: input, shape index: {}]   ;;  %s206_s2 = inlined_call_operand.vmem [shape: f32[1,128], index: 2, kind: input, shape index: {}]   ;;  %s207_s3 = inlined_call_operand.vmem [shape: f32[1,128], index: 3, kind: input, shape index: {}]   ;;  %s208_s1 = inlined_call_operand.vmem [shape: f32[4,128], index: 1, kind: input, shape index: {}]   ;;  %s209_s5 = inlined_call_operand.vmem [shape: f32[4,128], index: 5, kind: output, shape index: {}]  }
   0x1   :  { %v36_v0 = vld [vmem:[%s204_s4 + $0x78] sm:$0xff]  ;;  %v35_v1 = vld [vmem:[%s204_s4 + $0x70] sm:$0xff]  ;;  %v34_v2 = vld [vmem:[%s204_s4 + $0x68] sm:$0xff] }
   0x2   :  { %37 = vmatpush.msra.mxu0 %v36_v0  ;;  %59 = vmatpush.msra.mxu1 %v36_v0  ;;  %v33_v3 = vld [vmem:[%s204_s4 + $0x60] sm:$0xff]  ;;  %v32_v4 = vld [vmem:[%s204_s4 + $0x58] sm:$0xff]  ;;  %v31_v5 = vld [vmem:[%s204_s4 + $0x50] sm:$0xff] }
   0x3   :  { %v30_v6 = vld [vmem:[%s204_s4 + $0x48] sm:$0xff]  ;;  %v29_v7 = vld [vmem:[%s204_s4 + $0x40] sm:$0xff]  ;;  %v28_v8 = vld [vmem:[%s204_s4 + $0x38] sm:$0xff] }
   0x4   :  { %38 = vmatpush.msra.mxu0 %v35_v1  ;;  %60 = vmatpush.msra.mxu1 %v35_v1  ;;  %v27_v9 = vld [vmem:[%s204_s4 + $0x30] sm:$0xff]  ;;  %v26_v10 = vld [vmem:[%s204_s4 + $0x28] sm:$0xff]  ;;  %v25_v11 = vld [vmem:[%s204_s4 + $0x20] sm:$0xff] }
   0x5   :  { %v24_v12 = vld [vmem:[%s204_s4 + $0x18] sm:$0xff]  ;;  %v23_v13 = vld [vmem:[%s204_s4 + $0x10] sm:$0xff]  ;;  %v22_v14 = vld [vmem:[%s204_s4 + $0x8] sm:$0xff] }
   0x6   :  { %39 = vmatpush.msra.mxu0 %v34_v2  ;;  %61 = vmatpush.msra.mxu1 %v34_v2  ;;  %v21_v15 = vld [vmem:[%s204_s4] sm:$0xff] }
   0x7   :  { %v20_v16 = vld [vmem:[%s205_s0] sm:$0xf] }
   0x8   :  { %40 = vmatpush.msra.mxu0 %v33_v3  ;;  %62 = vmatpush.msra.mxu1 %v33_v3  ;;  %v107_v28 = vld [vmem:[%s206_s2] ss:$0 sm:$0xff] }
   0x9   :  { %v108_v31 = vld [vmem:[%s207_s3] ss:$0 sm:$0xff] }
   0xa   :  { %41 = vmatpush.msra.mxu0 %v32_v4  ;;  %63 = vmatpush.msra.mxu1 %v32_v4  ;;  %v100_v33 = vld [vmem:[%s208_s1] sm:$0xf] }
   0xc   :  { %42 = vmatpush.msra.mxu0 %v31_v5  ;;  %64 = vmatpush.msra.mxu1 %v31_v5 }
   0xe   :  { %43 = vmatpush.msra.mxu0 %v30_v6  ;;  %65 = vmatpush.msra.mxu1 %v30_v6 }
  0x10   :  { %44 = vmatpush.msra.mxu0 %v29_v7  ;;  %66 = vmatpush.msra.mxu1 %v29_v7 }
  0x12   :  { %45 = vmatpush.msra.mxu0 %v28_v8  ;;  %67 = vmatpush.msra.mxu1 %v28_v8 }
  0x14   :  { %46 = vmatpush.msra.mxu0 %v27_v9  ;;  %68 = vmatpush.msra.mxu1 %v27_v9 }
  0x16   :  { %47 = vmatpush.msra.mxu0 %v26_v10  ;;  %69 = vmatpush.msra.mxu1 %v26_v10 }
  0x18   :  { %48 = vmatpush.msra.mxu0 %v25_v11  ;;  %70 = vmatpush.msra.mxu1 %v25_v11 }
  0x1a   :  { %49 = vmatpush.msra.mxu0 %v24_v12  ;;  %71 = vmatpush.msra.mxu1 %v24_v12 }
  0x1c   :  { %50 = vmatpush.msra.mxu0 %v23_v13  ;;  %72 = vmatpush.msra.mxu1 %v23_v13 }
  0x1e   :  { %51 = vmatpush.msra.mxu0 %v22_v14  ;;  %73 = vmatpush.msra.mxu1 %v22_v14 }
  0x20   :  { %52 = vmatpush.msra.mxu0 %v21_v15  ;;  %74 = vmatpush.msra.mxu1 %v21_v15 }
  0x21   :  { %53 = vmatmul.f32.vlgmr.msra.gmra.mxu0 %v20_v16 }
  0x9e   :  { %v54_v17 = vpop.f32.mrf.mxu0 }
  0x9f   :  { %v57_v18 = vsub.f32 %v20_v16, %v54_v17 }
  0xa1   :  { %v58_v19 = vmul.f32 %v57_v18, %v57_v18 }
  0xa3   :  { %75 = vmatmul.f32.vlgmr.msra.gmra.mxu1 %v58_v19 }
 0x120   :  { %v76_v20 = vpop.f32.mrf.mxu1 }
 0x121   :  { %v77_v21 = vadd.f32 1e-05, %v76_v20 }
 0x123   :  { %109 = vrsqrt.f32 %v77_v21  ;;  %vm85_vm1 = vweird.f32 %v77_v21 }
 0x129   :  { %v110_v22 = vpop.eup %109 }
 0x12a   :  { %v80_v23 = vmul.f32 %v110_v22, %v77_v21  ;;  %vm86_vm0 = vweird.f32 %v110_v22 }
 0x12b   :  { %vm87_vm2 = vmor %vm85_vm1, %vm86_vm0 }
 0x12c   :  { %v81_v24 = vmul.f32 %v110_v22, %v80_v23 }
 0x12e   :  { %v82_v25 = vmul.f32 0.5, %v81_v24 }
 0x130   :  { %v83_v26 = vsub.f32 1.5, %v82_v25 }
 0x132   :  { %v84_v27 = vmul.f32 %v110_v22, %v83_v26 }
 0x134   :  { %v88_v29 = vsel %vm87_vm2, %v110_v22, %v84_v27 }
 0x135   :  { %v89_v30 = vmul.f32 %v88_v29, %v57_v18 }
 0x137   :  { %v94_v32 = vmul.f32 %v107_v28, %v89_v30 }
 0x139   :  { %v99_v34 = vadd.f32 %v108_v31, %v94_v32 }
 0x13b   :  { %v101_v35 = vadd.f32 %v100_v33, %v99_v34 }
 0x13d   :  { %102 = vst [vmem:[%s209_s5] sm:$0xf] %v101_v35 }

// kernel: trajectory_encoder_forward.3
= control target key start
LH: loop header
LB: loop body
LE: loop exit
PB: predicated region body
PF: predicated region fallthrough
CT: control target
= control target key end

     0   :  { %vm13814_vm0 = vcmask 64512   ;;  %v13727_v23 = vmov 1326507024   ;;  %v13731_v26 = vmov 2102212464   ;;  %s13695_s2 = inlined_call_operand.vmem [shape: f32[2,8,128], index: 2, kind: input, shape index: {}]   ;;  %s13696_s0 = inlined_call_operand.vmem [shape: f32[64,8], index: 0, kind: input, shape index: {}]   ;;  %s13697_s4 = inlined_call_operand.vmem [shape: f32[2,128,64], index: 4, kind: input, shape index: {}]   ;;  %s13698_s3 = inlined_call_operand.vmem [shape: f32[2,128,64], index: 3, kind: input, shape index: {}]   ;;  %s13699_s5 = inlined_call_operand.vmem [shape: f32[2,8,64], index: 5, kind: input, shape index: {}]   ;;  %s13700_s6 = inlined_call_operand.vmem [shape: f32[2,1,64], index: 6, kind: input, shape index: {}]   ;;  %s13701_s9 = inlined_call_operand.vmem [shape: f32[64,64], index: 9, kind: input, shape index: {}]   ;;  %s13702_s7 = inlined_call_operand.vmem [shape: f32[2,1,64], index: 7, kind: input, shape index: {}]   ;;  %s13703_s8 = inlined_call_operand.vmem [shape: f32[2,1,64], index: 8, kind: input, shape index: {}]   ;;  %s13704_s10 = inlined_call_operand.vmem [shape: f32[2,64,8], index: 10, kind: input, shape index: {}]   ;;  %s13705_s11 = inlined_call_operand.vmem [shape: f32[2,1,8], index: 11, kind: input, shape index: {}]   ;;  %s13706_s12 = inlined_call_operand.vmem [shape: f32[2,1,8], index: 12, kind: input, shape index: {}]   ;;  %s13707_s13 = inlined_call_operand.vmem [shape: f32[2,1,8], index: 13, kind: input, shape index: {}]   ;;  %s13708_s15 = inlined_call_operand.vmem [shape: f32[2,1,8], index: 15, kind: input, shape index: {}]   ;;  %s13709_s14 = inlined_call_operand.vmem [shape: f32[2,8,8], index: 14, kind: input, shape index: {}]   ;;  %s13710_s1 = inlined_call_operand.vmem [shape: f32[64,1], index: 1, kind: input, shape index: {}]   ;;  %s13711_s16 = inlined_call_operand.vmem [shape: f32[1,8], index: 16, kind: input, shape index: {}]   ;;  %s13712_s17 = inlined_call_operand.vmem [shape: f32[1,8], index: 17, kind: input, shape index: {}]   ;;  %s13713_s18 = inlined_call_operand.vmem [shape: f32[64,8], index: 18, kind: output, shape index: {}]  }
   0x1   :  { %13819 = sst [smem:[#allocation58_spill]] %s13695_s2  ;;  %v13734_v28 = vmov 920167782   ;;  %v13725_v33 = vmov 2131351028  }
   0x2   :  { %13820 = sst [smem:[#allocation59_spill]] %s13696_s0  ;;  %v13729_v37 = vmov 2475754826   ;;  %v13740_v45 = vmov 683565275  }
   0x3   :  { %13821 = sst [smem:[#allocation60_spill]] %s13697_s4 }
   0x4   :  { %s13822_s29 = sld [smem:[#allocation58_spill]] }
   0x5   :  { %s13823_s19 = sld [smem:[#allocation59_spill]] }
   0x6   :  { %s13857_s22 = sld [smem:[#allocation60_spill]] }
   0xa   :  { %v75_v0 = vld [vmem:[%s13822_s29] sm:$0xff] }
   0xb   :  { %v59_v1 = vld [vmem:[%s13823_s19] sm:$0xff]  ;;  %116 = vmatpush.msra.mxu0 %v75_v0  ;;  %v60_v2 = vld [vmem:[%s13823_s19 + $0x8] sm:$0xff]  ;;  %v61_v3 = vld [vmem:[%s13823_s19 + $0x10] sm:$0xff] }
   0xc   :  { %8507 = vmatmul.msk.f32.vlgmr.msra.gmra.mxu0 %vm13814_vm0, %v59_v1  ;;  %v62_v4 = vld [vmem:[%s13823_s19 + $0x18] sm:$0xff]  ;;  %v63_v5 = vld [vmem:[%s13823_s19 + $0x20] sm:$0xff]  ;;  %v64_v6 = vld [vmem:[%s13823_s19 + $0x28] sm:$0xff] }
   0xd   :  { %v65_v7 = vld [vmem:[%s13823_s19 + $0x30] sm:$0xff]  ;;  %v66_v8 = vld [vmem:[%s13823_s19 + $0x38] sm:$0xff] }
  0x14   :  { %8508 = vmatmul.msk.f32.gmra.mxu0 %vm13814_vm0, %v60_v2 }
  0x1c   :  { %8509 = vmatmul.msk.f32.gmra.mxu0 %vm13814_vm0, %v61_v3 }
  0x24   :  { %8510 = vmatmul.msk.f32.gmra.mxu0 %vm13814_vm0, %v62_v4 }
  0x2c   :  { %8511 = vmatmul.msk.f32.gmra.mxu0 %vm13814_vm0, %v63_v5 }
  0x34   :  { %8512 = vmatmul.msk.f32.gmra.mxu0 %vm13814_vm0, %v64_v6 }
  0x3c   :  { %8513 = vmatmul.msk.f32.gmra.mxu0 %vm13814_vm0, %v65_v7 }
  0x44   :  { %8514 = vmatmul.msk.f32.gmra.mxu0 %vm13814_vm0, %v66_v8 }
  0x89   :  { %v9126_v9 = vpop.f32.mrf.mxu0 }
  0x8a   :  { %13824 = vst [vmem:[#allocation2_spill] sm:$0xff] %v9126_v9  ;;  %v145_v10 = vand.u32 2139095040, %v9126_v9  ;;  %v13720_v21 = vand.u32 2147483647, %v9126_v9 }
  0x8c   :  { %v146_v11 = vshrl.u32 %v145_v10, 23  ;;  %v149_v25 = vand.u32 8388607, %v13720_v21 }
  0x8e   :  { %v8515_v12 = vadd.s32 4294967169, %v146_v11  ;;  %v150_v42 = vor.u32 8388608, %v149_v25 }
  0x90   :  { %v152_v13 = vadd.s32 1, %v8515_v12  ;;  %v9152_v54 = vshll.u32 %v150_v42, 8 }
  0x91   :  { %v9129_v14 = vpop.f32.mrf.mxu0 }
  0x92   :  { %13825 = vst [vmem:[#allocation3_spill] sm:$0xff] %v9129_v14  ;;  %vm153_vm1 = vcmp.gt.s32.totalorder %v152_v13, 0  ;;  %v299_v15 = vand.u32 2139095040, %v9129_v14  ;;  %v13719_v36 = vand.u32 2147483647, %v9129_v14  ;;  %v9164_v7 = vand.u32 65535, %v9152_v54 }
  0x93   :  { %v154_v16 = vsel %vm153_vm1, %v152_v13, 0  ;;  %13827 = vst [vmem:[#allocation5_spill] sm:$0xff] %v9152_v54  ;;  %v9167_v8 = vshrl.u32 %v9152_v54, 16 }
  0x94   :  { %v300_v17 = vshrl.u32 %v299_v15, 23  ;;  %v156_v18 = vand.u32 31, %v154_v16  ;;  %v155_v32 = vshrl.u32 %v154_v16, 5  ;;  %v303_v53 = vand.u32 8388607, %v13719_v36 }
  0x96   :  { %v8518_v19 = vadd.s32 4294967169, %v300_v17  ;;  %v157_v20 = vsub.s32 32, %v156_v18  ;;  %v171_v30 = vshll.u32 %v13734_v28, %v156_v18  ;;  %v165_v35 = vshll.u32 %v13725_v33, %v156_v18 }
  0x97   :  { %v168_v39 = vshll.u32 %v13731_v26, %v156_v18  ;;  %v162_v43 = vshll.u32 %v13729_v37, %v156_v18  ;;  %v159_v46 = vshll.u32 %v13740_v45, %v156_v18  ;;  %vm177_vm3 = vcmp.lt.s32.totalorder %v155_v32, 4 }
  0x98   :  { %v306_v22 = vadd.s32 1, %v8518_v19  ;;  %v172_v24 = vshrl.u32 %v13727_v23, %v157_v20  ;;  %v166_v27 = vshrl.u32 %v13731_v26, %v157_v20  ;;  %v169_v29 = vshrl.u32 %v13734_v28, %v157_v20 }
  0x99   :  { %v9139_v31 = vpop.f32.mrf.mxu0  ;;  %v163_v34 = vshrl.u32 %v13725_v33, %v157_v20  ;;  %v160_v38 = vshrl.u32 %v13729_v37, %v157_v20  ;;  %vm174_vm4 = vcmp.lt.s32.totalorder %v155_v32, 1  ;;  %v158_v56 = vshrl.u32 %v13740_v45, %v157_v20 }
  0x9a   :  { %vm307_vm2 = vcmp.gt.s32.totalorder %v306_v22, 0  ;;  %13826 = vst [vmem:[#allocation4_spill] sm:$0xff] %v9139_v31  ;;  %v173_v40 = vor.u32 %v172_v24, %v171_v30  ;;  %v453_v44 = vand.u32 2139095040, %v9139_v31  ;;  %v167_v47 = vor.u32 %v166_v27, %v165_v35 }
  0x9b   :  { %v308_v41 = vsel %vm307_vm2, %v306_v22, 0  ;;  %v170_v48 = vor.u32 %v169_v29, %v168_v39  ;;  %v164_v49 = vor.u32 %v163_v34, %v162_v43  ;;  %v161_v51 = vor.u32 %v160_v38, %v159_v46 }
  0x9c   :  { %v310_v50 = vand.u32 31, %v308_v41  ;;  %v187_v52 = vsel %vm177_vm3, %v173_v40, 1326507024  ;;  %v454_v55 = vshrl.u32 %v453_v44, 23  ;;  %vm176_vm5 = vcmp.lt.s32.totalorder %v155_v32, 3 }
  0x9d   :  { %v179_v57 = vsel %vm177_vm3, %v167_v47, 2102212464  ;;  %v183_v58 = vsel %vm177_vm3, %v170_v48, 920167782  ;;  %v186_v59 = vsel %vm174_vm4, %v164_v49, %v167_v47  ;;  %v188_v60 = vsel %vm176_vm5, %v170_v48, %v187_v52 }
  0x9e   :  { %v311_v61 = vsub.s32 32, %v310_v50  ;;  %v8521_v62 = vadd.s32 4294967169, %v454_v55  ;;  %vm175_vm6 = vcmp.lt.s32.totalorder %v155_v32, 2  ;;  %v178_v63 = vsel %vm174_vm4, %v158_v56, %v161_v51 }
  0x9f   :  { %v304_v0 = vor.u32 8388608, %v303_v53  ;;  %v180_v2 = vsel %vm176_vm5, %v164_v49, %v179_v57  ;;  %v182_v3 = vsel %vm174_vm4, %v161_v51, %v164_v49  ;;  %v184_v4 = vsel %vm176_vm5, %v167_v47, %v183_v58 }
  0xa0   :  { %v460_v5 = vadd.s32 1, %v8521_v62  ;;  %v9161_v6 = vsel %vm175_vm6, %v186_v59, %v188_v60  ;;  %v13718_v10 = vand.u32 2147483647, %v9139_v31  ;;  %v325_v11 = vshll.u32 %v13734_v28, %v310_v50 }
  0xa1   :  { %v9157_v1 = vpop.f32.mrf.mxu0  ;;  %v326_v12 = vshrl.u32 %v13727_v23, %v311_v61  ;;  %v9174_v15 = vsel %vm175_vm6, %v178_v63, %v180_v2  ;;  %v9177_v16 = vsel %vm175_vm6, %v182_v3, %v184_v4  ;;  %v9179_v17 = vshrl.u32 %v308_v41, 5 }
  0xa2   :  { %13828 = vst [vmem:[#allocation6_spill] sm:$0xff] %v9157_v1  ;;  %vm461_vm7 = vcmp.gt.s32.totalorder %v460_v5, 0  ;;  %v607_v13 = vand.u32 2139095040, %v9157_v1  ;;  %v9181_v18 = vshll.u32 %v304_v0, 8  ;;  %v194_v19 = vshrl.u32 %v9161_v6, 16 }
  0xa3   :  { %13829 = vst [vmem:[#allocation7_spill] sm:$0xff] %v9174_v15  ;;  %v316_v20 = vshll.u32 %v13729_v37, %v310_v50  ;;  %v319_v22 = vshll.u32 %v13725_v33, %v310_v50  ;;  %v462_v24 = vsel %vm461_vm7, %v460_v5, 0  ;;  %v317_v25 = vshrl.u32 %v13725_v33, %v311_v61 }
  0xa4   :  { %13830 = vst [vmem:[#allocation8_spill] sm:$0xff] %v9181_v18  ;;  %v320_v27 = vshrl.u32 %v13731_v26, %v311_v61  ;;  %v322_v29 = vshll.u32 %v13731_v26, %v310_v50  ;;  %v323_v30 = vshrl.u32 %v13734_v28, %v311_v61  ;;  %v327_v34 = vor.u32 %v326_v12, %v325_v11 }
  0xa5   :  { %v464_v35 = vand.u32 31, %v462_v24  ;;  %v608_v38 = vshrl.u32 %v607_v13, 23  ;;  %v13723_v39 = vand.u32 65535, %v9161_v6  ;;  %v313_v40 = vshll.u32 %v13740_v45, %v310_v50 }
  0xa6   :  { %v314_v41 = vshrl.u32 %v13729_v37, %v311_v61  ;;  %vm331_vm8 = vcmp.lt.s32.totalorder %v9179_v17, 4  ;;  %v9197_v42 = vmul.u32 %v194_v19, %v9164_v7  ;;  %v216_v44 = vshrl.u32 %v9177_v16, 16 }
  0xa7   :  { %v9202_v46 = vand.u32 65535, %v9181_v18  ;;  %v318_v47 = vor.u32 %v317_v25, %v316_v20  ;;  %v321_v48 = vor.u32 %v320_v27, %v319_v22  ;;  %v324_v49 = vor.u32 %v323_v30, %v322_v29 }
  0xa8   :  { %vm328_vm9 = vcmp.lt.s32.totalorder %v9179_v17, 1  ;;  %vm330_vm10 = vcmp.lt.s32.totalorder %v9179_v17, 3  ;;  %v341_v50 = vsel %vm331_vm8, %v327_v34, 1326507024  ;;  %v465_v51 = vsub.s32 32, %v464_v35 }
  0xa9   :  { %v8524_v52 = vadd.s32 4294967169, %v608_v38  ;;  %v9211_v53 = vmul.u32 %v13723_v39, %v9164_v7  ;;  %v312_v55 = vshrl.u32 %v13740_v45, %v311_v61  ;;  %v315_v56 = vor.u32 %v314_v41, %v313_v40  ;;  %v9233_v2 = vpop.f32.mrf.mxu0 }
  0xaa   :  { %v9215_v57 = vshrl.u32 %v9181_v18, 16  ;;  %v9218_v58 = vmul.u32 %v194_v19, %v9167_v8  ;;  %v13724_v59 = vshll.u32 %v9197_v42, 16  ;;  %v9222_v60 = vmul.u32 %v216_v44, %v9164_v7  ;;  %13831 = vst [vmem:[#allocation9_spill] sm:$0xff] %v9233_v2 }
  0xab   :  { %v333_v62 = vsel %vm331_vm8, %v321_v48, 2102212464  ;;  %vm329_vm11 = vcmp.lt.s32.totalorder %v9179_v17, 2  ;;  %v337_v61 = vsel %vm331_vm8, %v324_v49, 920167782  ;;  %v340_v63 = vsel %vm328_vm9, %v318_v47, %v321_v48 }
  0xac   :  { %v342_v0 = vsel %vm330_vm10, %v324_v49, %v341_v50  ;;  %v457_v3 = vand.u32 8388607, %v13718_v10  ;;  %v479_v4 = vshll.u32 %v13734_v28, %v464_v35  ;;  %v480_v5 = vshrl.u32 %v13727_v23, %v465_v51 }
  0xad   :  { %v614_v11 = vadd.s32 1, %v8524_v52  ;;  %v332_v12 = vsel %vm328_vm9, %v312_v55, %v315_v56  ;;  %v334_v13 = vsel %vm330_vm10, %v318_v47, %v333_v62  ;;  %v336_v19 = vsel %vm328_vm9, %v315_v56, %v318_v47 }
  0xae   :  { %v9245_v20 = vshrl.u32 %v462_v24, 5  ;;  %v338_v22 = vsel %vm330_vm10, %v321_v48, %v337_v61  ;;  %v9251_v25 = vsel %vm329_vm11, %v340_v63, %v342_v0  ;;  %v470_v27 = vshll.u32 %v13729_v37, %v464_v35 }
  0xaf   :  { %v761_v29 = vand.u32 2139095040, %v9233_v2  ;;  %v471_v30 = vshrl.u32 %v13725_v33, %v465_v51  ;;  %v473_v34 = vshll.u32 %v13725_v33, %v464_v35  ;;  %v474_v38 = vshrl.u32 %v13731_v26, %v465_v51 }
  0xb0   :  { %vm615_vm12 = vcmp.gt.s32.totalorder %v614_v11, 0  ;;  %v9261_v24 = vadd.s32 %v13724_v59, %v9211_v53  ;;  %v9264_v40 = vmul.u32 %v216_v44, %v9167_v8  ;;  %v481_v41 = vor.u32 %v480_v5, %v479_v4 }
  0xb1   :  { %v13717_v47 = vand.u32 2147483647, %v9157_v1  ;;  %v9269_v48 = vsel %vm329_vm11, %v332_v12, %v334_v13  ;;  %v476_v49 = vshll.u32 %v13731_v26, %v464_v35  ;;  %v477_v50 = vshrl.u32 %v13734_v28, %v465_v51 }
  0xb2   :  { %13832 = vst [vmem:[#allocation10_spill] sm:$0xff] %v9269_v48  ;;  %vm485_vm13 = vcmp.lt.s32.totalorder %v9245_v20, 4  ;;  %v9276_v52 = vsel %vm329_vm11, %v336_v19, %v338_v22  ;;  %v348_v44 = vshrl.u32 %v9251_v25, 16  ;;  %v458_v55 = vor.u32 8388608, %v457_v3 }
  0xb3   :  { %v616_v56 = vsel %vm615_vm12, %v614_v11, 0  ;;  %v467_v62 = vshll.u32 %v13740_v45, %v464_v35  ;;  %v472_v61 = vor.u32 %v471_v30, %v470_v27  ;;  %v475_v63 = vor.u32 %v474_v38, %v473_v34 }
  0xb4   :  { %v762_v0 = vshrl.u32 %v761_v29, 23  ;;  %v468_v4 = vshrl.u32 %v13729_v37, %v465_v51  ;;  %vm482_vm14 = vcmp.lt.s32.totalorder %v9245_v20, 1  ;;  %vm484_vm15 = vcmp.lt.s32.totalorder %v9245_v20, 3 }
  0xb5   :  { %v495_v17 = vsel %vm485_vm13, %v481_v41, 1326507024  ;;  %v13721_v5 = vand.u32 65535, %v9251_v25  ;;  %v478_v11 = vor.u32 %v477_v50, %v476_v49  ;;  %v618_v12 = vand.u32 31, %v616_v56 }
  0xb6   :  { %v9289_v35 = vmul.u32 %v348_v44, %v9202_v46  ;;  %v370_v13 = vshrl.u32 %v9276_v52, 16  ;;  %v466_v19 = vshrl.u32 %v13740_v45, %v465_v51  ;;  %v611_v22 = vand.u32 8388607, %v13717_v47 }
  0xb7   :  { %vm483_vm1 = vcmp.lt.s32.totalorder %v9245_v20, 2  ;;  %v494_v27 = vsel %vm482_vm14, %v472_v61, %v475_v63  ;;  %v496_v29 = vsel %vm484_vm15, %v478_v11, %v495_v17  ;;  %v8527_v30 = vadd.s32 4294967169, %v762_v0 }
  0xb8   :  { %v469_v38 = vor.u32 %v468_v4, %v467_v62  ;;  %v487_v41 = vsel %vm485_vm13, %v475_v63, 2102212464  ;;  %v9303_v49 = vshll.u32 %v458_v55, 8  ;;  %v9308_v51 = vmul.u32 %v13721_v5, %v9202_v46 }
  0xb9   :  { %v9311_v50 = vmul.u32 %v348_v44, %v9215_v57  ;;  %v491_v17 = vsel %vm485_vm13, %v478_v11, 920167782  ;;  %v619_v0 = vsub.s32 32, %v618_v12  ;;  %v13722_v47 = vshll.u32 %v9289_v35, 16 }
  0xba   :  { %13833 = vst [vmem:[#allocation11_spill] sm:$0xff] %v9303_v49  ;;  %v9317_v62 = vmul.u32 %v370_v13, %v9202_v46  ;;  %v9320_v55 = vmul.u32 %v370_v13, %v9215_v57  ;;  %v9324_v4 = vsel %vm483_vm1, %v494_v27, %v496_v29  ;;  %v486_v44 = vsel %vm482_vm14, %v466_v19, %v469_v38 }
  0xbb   :  { %13835 = vst [vmem:[#allocation13_spill] sm:$0xff] %v9324_v4  ;;  %v488_v10 = vsel %vm484_vm15, %v472_v61, %v487_v41  ;;  %v612_v11 = vor.u32 8388608, %v611_v22  ;;  %v768_v36 = vadd.s32 1, %v8527_v30  ;;  %v490_v21 = vsel %vm482_vm14, %v469_v38, %v472_v61  ;;  %v9344_v30 = vpop.f32.mrf.mxu0 }
  0xbc   :  { %13834 = vst [vmem:[#allocation12_spill] sm:$0xff] %v9320_v55  ;;  %v492_v3 = vsel %vm484_vm15, %v475_v63, %v491_v17  ;;  %v9335_v13 = vand.u32 65535, %v9303_v49  ;;  %v9338_v27 = vshrl.u32 %v9303_v49, 16  ;;  %v502_v29 = vshrl.u32 %v9324_v4, 16 }
  0xbd   :  { %v633_v19 = vshll.u32 %v13734_v28, %v618_v12  ;;  %v634_v41 = vshrl.u32 %v13727_v23, %v619_v0  ;;  %13838 = vst [vmem:[#allocation16_spill] sm:$0xff] %v9344_v30  ;;  %v9349_v61 = vadd.s32 %v13722_v47, %v9308_v51  ;;  %v9353_v63 = vsel %vm483_vm1, %v486_v44, %v488_v10 }
  0xbe   :  { %13836 = vst [vmem:[#allocation14_spill] sm:$0xff] %v9335_v13  ;;  %v9355_v38 = vshrl.u32 %v616_v56, 5  ;;  %vm769_vm2 = vcmp.gt.s32.totalorder %v768_v36, 0  ;;  %v9359_v17 = vsel %vm483_vm1, %v490_v21, %v492_v3  ;;  %v13733_v32 = vand.u32 65535, %v9324_v4  ;;  %v2644_v4 = vld [vmem:[%s13857_s22 + $0x70] sm:$0xff] }
  0xbf   :  { %13837 = vst [vmem:[#allocation15_spill] sm:$0xff] %v9338_v27  ;;  %v624_v5 = vshll.u32 %v13729_v37, %v618_v12  ;;  %v9363_v34 = vshll.u32 %v612_v11, 8  ;;  %v625_v43 = vshrl.u32 %v13725_v33, %v619_v0  ;;  %v627_v47 = vshll.u32 %v13725_v33, %v618_v12 }
  0xc0   :  { %13839 = vst [vmem:[#allocation17_spill] sm:$0xff] %v9349_v61  ;;  %v628_v10 = vshrl.u32 %v13731_v26, %v619_v0  ;;  %v915_v56 = vand.u32 2139095040, %v9344_v30  ;;  %v9370_v44 = vmul.u32 %v502_v29, %v9335_v13  ;;  %v621_v21 = vshll.u32 %v13740_v45, %v618_v12 }
  0xc1   :  { %13840 = vst [vmem:[#allocation18_spill] sm:$0xff] %v9353_v63  ;;  %v635_v20 = vor.u32 %v634_v41, %v633_v19  ;;  %v770_v3 = vsel %vm769_vm2, %v768_v36, 0  ;;  %v622_v39 = vshrl.u32 %v13729_v37, %v619_v0  ;;  %v630_v11 = vshll.u32 %v13731_v26, %v618_v12 }
  0xc2   :  { %13841 = vst [vmem:[#allocation19_spill] sm:$0xff] %v9359_v17  ;;  %v631_v59 = vshrl.u32 %v13734_v28, %v619_v0  ;;  %vm639_vm3 = vcmp.lt.s32.totalorder %v9355_v38, 4  ;;  %v9380_v33 = vmul.u32 %v13733_v32, %v9335_v13  ;;  %v524_v22 = vshrl.u32 %v9359_v17, 16 }
  0xc3   :  { %13842 = vst [vmem:[#allocation20_spill] sm:$0xff] %v9363_v34  ;;  %v626_v19 = vor.u32 %v625_v43, %v624_v5  ;;  %v629_v41 = vor.u32 %v628_v10, %v627_v47  ;;  %v772_v37 = vand.u32 31, %v770_v3  ;;  %v916_v12 = vshrl.u32 %v915_v56, 23 }
  0xc4   :  { %v13746_v26 = vshll.u32 %v9370_v44, 16  ;;  %vm636_vm4 = vcmp.lt.s32.totalorder %v9355_v38, 1  ;;  %vm638_vm5 = vcmp.lt.s32.totalorder %v9355_v38, 3  ;;  %v649_v32 = vsel %vm639_vm3, %v635_v20, 1326507024 }
  0xc5   :  { %v620_v23 = vshrl.u32 %v13740_v45, %v619_v0  ;;  %v623_v28 = vor.u32 %v622_v39, %v621_v21  ;;  %v632_v1 = vor.u32 %v631_v59, %v630_v11  ;;  %v13843_v31 = vand.u32 2147483647, %v9233_v2  ;;  %v9417_v11 = vpop.f32.mrf.mxu0 }
  0xc6   :  { %vm637_vm6 = vcmp.lt.s32.totalorder %v9355_v38, 2  ;;  %v641_v43 = vsel %vm639_vm3, %v629_v41, 2102212464  ;;  %v9398_v47 = vand.u32 65535, %v9363_v34  ;;  %v9401_v5 = vshrl.u32 %v9363_v34, 16  ;;  %13849 = vst [vmem:[#allocation26_spill] sm:$0xff] %v9417_v11 }
  0xc7   :  { %v765_v36 = vand.u32 8388607, %v13843_v31  ;;  %v648_v10 = vsel %vm636_vm4, %v626_v19, %v629_v41  ;;  %v650_v39 = vsel %vm638_vm5, %v632_v1, %v649_v32  ;;  %v773_v59 = vsub.s32 32, %v772_v37 }
  0xc8   :  { %13844 = vst [vmem:[#allocation21_spill] sm:$0xff] %v9398_v47  ;;  %v8530_v0 = vadd.s32 4294967169, %v916_v12  ;;  %v9408_v31 = vmul.u32 %v502_v29, %v9338_v27  ;;  %v9411_v56 = vmul.u32 %v524_v22, %v9335_v13  ;;  %v9414_v21 = vmul.u32 %v524_v22, %v9338_v27  ;;  %v1377_v13 = vld [vmem:[%s13698_s3 + $0x18] sm:$0xff] }
  0xc9   :  { %13845 = vst [vmem:[#allocation22_spill] sm:$0xff] %v9401_v5  ;;  %v9422_v45 = vadd.s32 %v13746_v26, %v9380_v33  ;;  %v640_v32 = vsel %vm636_vm4, %v620_v23, %v623_v28  ;;  %v644_v29 = vsel %vm636_vm4, %v623_v28, %v626_v19  ;;  %v766_v12 = vor.u32 8388608, %v765_v36 }
  0xca   :  { %13846 = vst [vmem:[#allocation23_spill] sm:$0xff] %v9408_v31  ;;  %v642_v22 = vsel %vm638_vm5, %v626_v19, %v641_v43  ;;  %v645_v20 = vsel %vm639_vm3, %v632_v1, 920167782  ;;  %v9434_v2 = vsel %vm637_vm6, %v648_v10, %v650_v39  ;;  %v922_v14 = vadd.s32 1, %v8530_v0  ;;  %v2645_v0 = vld [vmem:[%s13857_s22 + $0x78] sm:$0xff] }
  0xcb   :  { %13847 = vst [vmem:[#allocation24_spill] sm:$0xff] %v9411_v56  ;;  %v9436_v26 = vshrl.u32 %v770_v3, 5  ;;  %v13852_v63 = vmov 920167782   ;;  %v13853_v23 = vmov 1326507024   ;;  %v9447_v10 = vsel %vm637_vm6, %v640_v32, %v642_v22  ;;  %2646 = vmatpush.msra.mxu1 %v2645_v0 }
  0xcc   :  { %13848 = vst [vmem:[#allocation25_spill] sm:$0xff] %v9414_v21  ;;  %v787_v49 = vshll.u32 %v13852_v63, %v772_v37  ;;  %v788_v9 = vshrl.u32 %v13853_v23, %v773_v59  ;;  %v1069_v28 = vand.u32 2139095040, %v9417_v11  ;;  %v13854_v36 = vmov 2131351028   ;;  %v1389_v21 = vld [vmem:[%s13698_s3 + $0x78] sm:$0xff] }
  0xcd   :  { %13850 = vst [vmem:[#allocation27_spill] sm:$0xff] %v9422_v45  ;;  %v781_v48 = vshll.u32 %v13854_v36, %v772_v37  ;;  %v13855_v18 = vmov 2102212464   ;;  %v785_v1 = vshrl.u32 %v13852_v63, %v773_v59  ;;  %v646_v3 = vsel %vm638_vm5, %v629_v41, %v645_v20  ;;  %2687 = vmatpush.msra.mxu2 %v1389_v21 }
  0xce   :  { %13851 = vst [vmem:[#allocation28_spill] sm:$0xff] %v9434_v2  ;;  %v782_v19 = vshrl.u32 %v13855_v18, %v773_v59  ;;  %v784_v43 = vshll.u32 %v13855_v18, %v772_v37  ;;  %vm923_vm7 = vcmp.gt.s32.totalorder %v922_v14, 0  ;;  %v13858_v45 = vmov 683565275   ;;  %2647 = vmatpush.msra.mxu1 %v2644_v4  ;;  %v1387_v4 = vld [vmem:[%s13698_s3 + $0x68] sm:$0xff] }
  0xcf   :  { %13856 = vst [vmem:[#allocation29_spill] sm:$0xff] %v9447_v10  ;;  %v775_v31 = vshll.u32 %v13858_v45, %v772_v37  ;;  %v13859_v15 = vmov 2475754826   ;;  %v779_v32 = vshrl.u32 %v13854_v36, %v773_v59  ;;  %v9461_v22 = vshll.u32 %v766_v12, 8 }
  0xd0   :  { %v778_v54 = vshll.u32 %v13859_v15, %v772_v37  ;;  %v776_v41 = vshrl.u32 %v13859_v15, %v773_v59  ;;  %v789_v20 = vor.u32 %v788_v9, %v787_v49  ;;  %v9464_v39 = vsel %vm923_vm7, %v922_v14, 0  ;;  %v1388_v37 = vld [vmem:[%s13698_s3 + $0x70] sm:$0xff] }
  0xd1   :  { %13860 = vst [vmem:[#allocation30_spill] sm:$0xff] %v9461_v22  ;;  %v1070_v56 = vshrl.u32 %v1069_v28, 23  ;;  %v9474_v12 = vsel %vm637_vm6, %v644_v29, %v646_v3  ;;  %v783_v0 = vor.u32 %v782_v19, %v781_v48  ;;  %v786_v27 = vor.u32 %v785_v1, %v784_v43  ;;  %2688 = vmatpush.msra.mxu2 %v1388_v37  ;;  %v2643_v48 = vld [vmem:[%s13857_s22 + $0x68] sm:$0xff]  ;;  %v1386_v3 = vld [vmem:[%s13698_s3 + $0x60] sm:$0xff] }
  0xd2   :  { %13861 = vst [vmem:[#allocation31_spill] sm:$0xff] %v9474_v12  ;;  %vm793_vm8 = vcmp.lt.s32.totalorder %v9436_v26, 4  ;;  %v13761_v9 = vand.u32 65535, %v9434_v2  ;;  %v13862_v14 = vshrl.u32 %v9434_v2, 16  ;;  %v774_v21 = vshrl.u32 %v13858_v45, %v773_v59  ;;  %2648 = vmatpush.msra.mxu1 %v2643_v48  ;;  %v1385_v48 = vld [vmem:[%s13698_s3 + $0x58] sm:$0xff] }
  0xd3   :  { %v13864_v28 = vand.u32 2147483647, %v9344_v30  ;;  %v780_v38 = vor.u32 %v779_v32, %v778_v54  ;;  %vm790_vm9 = vcmp.lt.s32.totalorder %v9436_v26, 1  ;;  %v795_v29 = vsel %vm793_vm8, %v783_v0, 2102212464  ;;  %2689 = vmatpush.msra.mxu2 %v1387_v4  ;;  %v2642_v54 = vld [vmem:[%s13857_s22 + $0x60] sm:$0xff] }
  0xd4   :  { %v9481_v49 = vmul.u32 %v13862_v14, %v9398_v47  ;;  %v9496_v59 = vand.u32 31, %v9464_v39  ;;  %v777_v19 = vor.u32 %v776_v41, %v775_v31  ;;  %vm792_vm10 = vcmp.lt.s32.totalorder %v9436_v26, 3  ;;  %2649 = vmatpush.msra.mxu1 %v2642_v54 }
  0xd5   :  { %v919_v17 = vand.u32 8388607, %v13864_v28  ;;  %v803_v43 = vsel %vm793_vm8, %v789_v20, 1326507024  ;;  %v8533_v1 = vadd.s32 4294967169, %v1070_v56  ;;  %v678_v37 = vshrl.u32 %v9474_v12, 16  ;;  %2690 = vmatpush.msra.mxu2 %v1386_v3 }
  0xd6   :  { %13863 = vst [vmem:[#allocation32_spill] sm:$0xff] %v9481_v49  ;;  %v799_v41 = vsel %vm793_vm8, %v786_v27, 920167782  ;;  %v9516_v56 = vmul.u32 %v13761_v9, %v9398_v47  ;;  %vm791_vm11 = vcmp.lt.s32.totalorder %v9436_v26, 2  ;;  %v794_v14 = vsel %vm790_vm9, %v774_v21, %v777_v19  ;;  %v2641_v28 = vld [vmem:[%s13857_s22 + $0x58] sm:$0xff] }
  0xd7   :  { %v796_v4 = vsel %vm792_vm10, %v780_v38, %v795_v29  ;;  %v802_v54 = vsel %vm790_vm9, %v780_v38, %v783_v0  ;;  %v804_v31 = vsel %vm792_vm10, %v786_v27, %v803_v43  ;;  %v9535_v21 = vsub.s32 32, %v9496_v59  ;;  %2650 = vmatpush.msra.mxu1 %v2641_v28  ;;  %2691 = vmatpush.msra.mxu2 %v1385_v48  ;;  %v2640_v29 = vld [vmem:[%s13857_s22 + $0x50] sm:$0xff]  ;;  %v2639_v48 = vld [vmem:[%s13857_s22 + $0x48] sm:$0xff] }
  0xd8   :  { %13865 = vst [vmem:[#allocation33_spill] sm:$0xff] %v9516_v56  ;;  %v798_v3 = vsel %vm790_vm9, %v777_v19, %v780_v38  ;;  %v800_v32 = vsel %vm792_vm10, %v783_v0, %v799_v41  ;;  %v920_v9 = vor.u32 8388608, %v919_v17  ;;  %v1076_v20 = vadd.s32 1, %v8533_v1  ;;  %v1384_v27 = vld [vmem:[%s13698_s3 + $0x50] sm:$0xff] }
  0xd9   :  { %v13866_v43 = vshrl.u32 %v9434_v2, 16  ;;  %v9553_v38 = vmul.u32 %v678_v37, %v9398_v47  ;;  %v9556_v17 = vand.u32 65535, %v9461_v22  ;;  %v9559_v0 = vshrl.u32 %v9461_v22, 16  ;;  %2651 = vmatpush.msra.mxu1 %v2640_v29  ;;  %2692 = vmatpush.msra.mxu2 %v1384_v27 }
  0xda   :  { %v9563_v19 = vsel %vm791_vm11, %v794_v14, %v796_v4  ;;  %v9567_v1 = vsel %vm791_vm11, %v802_v54, %v804_v31  ;;  %vm1077_vm12 = vcmp.gt.s32.totalorder %v1076_v20, 0  ;;  %v941_v14 = vshll.u32 %v13852_v63, %v9496_v59  ;;  %v1383_v54 = vld [vmem:[%s13698_s3 + $0x48] sm:$0xff] }
  0xdb   :  { %v9550_v28 = vmul.u32 %v13866_v43, %v9401_v5  ;;  %13868 = vst [vmem:[#allocation35_spill] sm:$0xff] %v9553_v38  ;;  %v9575_v43 = vsel %vm791_vm11, %v798_v3, %v800_v32  ;;  %v942_v4 = vshrl.u32 %v13853_v23, %v9535_v21  ;;  %v1078_v31 = vsel %vm1077_vm12, %v1076_v20, 0  ;;  %2652 = vmatpush.msra.mxu1 %v2639_v48  ;;  %v2638_v20 = vld [vmem:[%s13857_s22 + $0x40] sm:$0xff]  ;;  %v1379_v38 = vld [vmem:[%s13698_s3 + $0x28] sm:$0xff] }
  0xdc   :  { %13869 = vst [vmem:[#allocation36_spill] sm:$0xff] %v9556_v17  ;;  %v13871_v29 = vshll.u32 %v9481_v49, 16  ;;  %v9590_v26 = vmul.u32 %v678_v37, %v9401_v5  ;;  %v9593_v32 = vshrl.u32 %v9464_v39, 5  ;;  %v9595_v3 = vshll.u32 %v920_v9, 8  ;;  %2693 = vmatpush.msra.mxu2 %v1383_v54  ;;  %v1382_v48 = vld [vmem:[%s13698_s3 + $0x40] sm:$0xff]  ;;  %v9608_v9 = vpop.f32.mrf.mxu0  ;;  %v2637_v37 = vld [vmem:[%s13857_s22 + $0x38] sm:$0xff] }
  0xdd   :  { %13867 = vst [vmem:[#allocation34_spill] sm:$0xff] %v9550_v28  ;;  %2653 = vmatpush.msra.mxu1 %v2638_v20  ;;  %v932_v30 = vshll.u32 %v13859_v15, %v9496_v59  ;;  %v933_v10 = vshrl.u32 %v13854_v36, %v9535_v21  ;;  %v9615_v34 = vand.u32 31, %v1078_v31  ;;  %v1381_v39 = vld [vmem:[%s13698_s3 + $0x38] sm:$0xff]  ;;  %v935_v20 = vshll.u32 %v13854_v36, %v9496_v59  ;;  %v2635_v28 = vld [vmem:[%s13857_s22 + $0x28] sm:$0xff] }
  0xde   :  { %13870 = vst [vmem:[#allocation37_spill] sm:$0xff] %v9563_v19  ;;  %v9587_v27 = vadd.s32 %v13871_v29, %v9516_v56  ;;  %2694 = vmatpush.msra.mxu2 %v1382_v48  ;;  %v936_v54 = vshrl.u32 %v13855_v18, %v9535_v21  ;;  %v943_v41 = vor.u32 %v942_v4, %v941_v14  ;;  %v13876_v29 = vand.u32 2147483647, %v9417_v11  ;;  %v2636_v14 = vld [vmem:[%s13857_s22 + $0x30] sm:$0xff] }
  0xdf   :  { %13873 = vst [vmem:[#allocation39_spill] sm:$0xff] %v9590_v26  ;;  %2654 = vmatpush.msra.mxu1 %v2637_v37  ;;  %vm947_vm13 = vcmp.lt.s32.totalorder %v9593_v32, 4  ;;  %v9633_v48 = vand.u32 65535, %v9595_v3  ;;  %v9636_v22 = vsub.s32 32, %v9615_v34  ;;  %v1223_v26 = vand.u32 2139095040, %v9608_v9  ;;  %v1380_v4 = vld [vmem:[%s13698_s3 + $0x30] sm:$0xff] }
  0xe0   :  { %13872 = vst [vmem:[#allocation38_spill] sm:$0xff] %v9587_v27  ;;  %v9629_v19 = vand.u32 8388607, %v13876_v29  ;;  %2695 = vmatpush.msra.mxu2 %v1381_v39  ;;  %v929_v29 = vshll.u32 %v13858_v45, %v9496_v59  ;;  %v938_v37 = vshll.u32 %v13855_v18, %v9496_v59  ;;  %v939_v11 = vshrl.u32 %v13852_v63, %v9535_v21 }
  0xe1   :  { %13874 = vst [vmem:[#allocation40_spill] sm:$0xff] %v9595_v3  ;;  %v1095_v39 = vshll.u32 %v13852_v63, %v9615_v34  ;;  %2655 = vmatpush.msra.mxu1 %v2636_v14  ;;  %v930_v12 = vshrl.u32 %v13859_v15, %v9535_v21  ;;  %v9661_v47 = vor.u32 %v933_v10, %v932_v30  ;;  %vm944_vm14 = vcmp.lt.s32.totalorder %v9593_v32, 1  ;;  %v2634_v14 = vld [vmem:[%s13857_s22 + $0x20] sm:$0xff] }
  0xe2   :  { %13875 = vst [vmem:[#allocation41_spill] sm:$0xff] %v9608_v9  ;;  %v9664_v59 = vshrl.u32 %v1078_v31, 5  ;;  %2696 = vmatpush.msra.mxu2 %v1380_v4  ;;  %v937_v27 = vor.u32 %v936_v54, %v935_v20  ;;  %vm946_vm15 = vcmp.lt.s32.totalorder %v9593_v32, 3  ;;  %v957_v2 = vsel %vm947_vm13, %v943_v41, 1326507024  ;;  %v1378_v30 = vld [vmem:[%s13698_s3 + $0x20] sm:$0xff] }
  0xe3   :  { %v1096_v5 = vshrl.u32 %v13853_v23, %v9636_v22  ;;  %2656 = vmatpush.msra.mxu1 %v2635_v28  ;;  %v1086_v10 = vshll.u32 %v13859_v15, %v9615_v34  ;;  %v1087_v31 = vshrl.u32 %v13854_v36, %v9636_v22  ;;  %v1089_v54 = vshll.u32 %v13854_v36, %v9615_v34  ;;  %v2633_v28 = vld [vmem:[%s13857_s22 + $0x18] sm:$0xff] }
  0xe4   :  { %v1090_v41 = vshrl.u32 %v13855_v18, %v9636_v22  ;;  %2697 = vmatpush.msra.mxu2 %v1379_v38  ;;  %v13877_v20 = vand.u32 65535, %v9567_v1  ;;  %v940_v23 = vor.u32 %v939_v11, %v938_v37  ;;  %v9694_v56 = vshrl.u32 %v9595_v3, 16 }
  0xe5   :  { %v1097_v49 = vor.u32 %v1096_v5, %v1095_v39  ;;  %2657 = vmatpush.msra.mxu1 %v2634_v14  ;;  %v1074_v38 = vor.u32 8388608, %v9629_v19  ;;  %v1092_v55 = vshll.u32 %v13855_v18, %v9615_v34  ;;  %v1093_v61 = vshrl.u32 %v13852_v63, %v9636_v22  ;;  %v2632_v5 = vld [vmem:[%s13857_s22 + $0x10] sm:$0xff] }
  0xe6   :  { %v9691_v4 = vmul.u32 %v13877_v20, %v9556_v17  ;;  %vm1101_vm1 = vcmp.lt.s32.totalorder %v9664_v59, 4  ;;  %2698 = vmatpush.msra.mxu2 %v1378_v30  ;;  %v931_v11 = vor.u32 %v930_v12, %v929_v29  ;;  %vm945_vm2 = vcmp.lt.s32.totalorder %v9593_v32, 2  ;;  %v1376_v39 = vld [vmem:[%s13698_s3 + $0x10] sm:$0xff]  ;;  %v2631_v29 = vld [vmem:[%s13857_s22 + $0x8] sm:$0xff] }
  0xe7   :  { %v956_v19 = vsel %vm944_vm14, %v9661_v47, %v937_v27  ;;  %v958_v37 = vsel %vm946_vm15, %v940_v23, %v957_v2  ;;  %2658 = vmatpush.msra.mxu1 %v2633_v28  ;;  %v9717_v14 = vor.u32 %v1087_v31, %v1086_v10  ;;  %v1091_v30 = vor.u32 %v1090_v41, %v1089_v54 }
  0xe8   :  { %vm1098_vm3 = vcmp.lt.s32.totalorder %v9664_v59, 1  ;;  %v1224_v12 = vshrl.u32 %v1223_v26, 23  ;;  %2699 = vmatpush.msra.mxu2 %v1377_v13  ;;  %v13878_v20 = vshll.u32 %v9197_v42, 16  ;;  %v1083_v10 = vshll.u32 %v13858_v45, %v9615_v34  ;;  %v1375_v26 = vld [vmem:[%s13698_s3 + $0x8] sm:$0xff] }
  0xe9   :  { %v1084_v31 = vshrl.u32 %v13859_v15, %v9636_v22  ;;  %vm1100_vm5 = vcmp.lt.s32.totalorder %v9664_v59, 3  ;;  %v1111_v13 = vsel %vm1101_vm1, %v1097_v49, 1326507024  ;;  %2659 = vmatpush.msra.mxu1 %v2632_v5  ;;  %v953_v54 = vsel %vm947_vm13, %v940_v23, 920167782  ;;  %v2630_v49 = vld [vmem:[%s13857_s22] sm:$0xff] }
  0xea   :  { %vm9726_vm4 = vc.u32 %v9211_v53, %v13878_v20  ;;  %v928_v53 = vshrl.u32 %v13858_v45, %v9535_v21  ;;  %v9746_v34 = vsel %vm945_vm2, %v956_v19, %v958_v37  ;;  %v1094_v41 = vor.u32 %v1093_v61, %v1092_v55  ;;  %2700 = vmatpush.msra.mxu2 %v1376_v39  ;;  %v1374_v61 = vld [vmem:[%s13698_s3] sm:$0xff] }
  0xeb   :  { %v13881_v28 = vshrl.u32 %v9567_v1, 16  ;;  %v13884_v23 = vshrl.u32 %v9575_v43, 16  ;;  %v949_v55 = vsel %vm947_vm13, %v937_v27, 2102212464  ;;  %2660 = vmatpush.msra.mxu1 %v2631_v29  ;;  %vm1099_vm6 = vcmp.lt.s32.totalorder %v9664_v59, 2 }
  0xec   :  { %v1110_v37 = vsel %vm1098_vm3, %v9717_v14, %v1091_v30  ;;  %v1112_v39 = vsel %vm1100_vm5, %v1094_v41, %v1111_v13  ;;  %2701 = vmatpush.msra.mxu2 %v1375_v26  ;;  %v954_v29 = vsel %vm946_vm15, %v937_v27, %v953_v54  ;;  %v9787_v13 = vshll.u32 %v1074_v38, 8 }
  0xed   :  { %v9754_v5 = vmul.u32 %v13881_v28, %v9556_v17  ;;  %v13882_v21 = vmov %v13881_v28  ;;  %v9764_v19 = vmul.u32 %v13884_v23, %v9556_v17  ;;  %v8536_v28 = vadd.s32 4294967169, %v1224_v12  ;;  %2661 = vmatpush.msra.mxu1 %v2630_v49 }
  0xee   :  { %v9759_v20 = vmul.u32 %v13882_v21, %v9559_v0  ;;  %v952_v21 = vsel %vm944_vm14, %v931_v11, %v9661_v47  ;;  %v964_v23 = vshrl.u32 %v9746_v34, 16  ;;  %v948_v17 = vsel %vm944_vm14, %v928_v53, %v931_v11  ;;  %13886 = vst [vmem:[#allocation44_spill] sm:$0xff] %v9787_v13  ;;  %2702 = vmatpush.msra.mxu2 %v1374_v61 }
  0xef   :  { %13885 = vst [vmem:[#allocation43_spill] sm:$0xff] %v9764_v19  ;;  %v1085_v19 = vor.u32 %v1084_v31, %v1083_v10  ;;  %v13784_v12 = vand.u32 2147483647, %v9608_v9  ;;  %v1082_v26 = vshrl.u32 %v13858_v45, %v9636_v22  ;;  %v9794_v27 = vsel %vm1099_vm6, %v1110_v37, %v1112_v39 }
  0xf0   :  { %13883 = vst [vmem:[#allocation42_spill] sm:$0xff] %v9759_v20  ;;  %v1107_v20 = vsel %vm1101_vm1, %v1094_v41, 920167782  ;;  %v13888_v10 = vand.u32 65535, %v9161_v6  ;;  %v950_v38 = vsel %vm946_vm15, %v9661_v47, %v949_v55  ;;  %v9806_v11 = vsel %vm945_vm2, %v952_v21, %v954_v29 }
  0xf1   :  { %13887 = vst [vmem:[#allocation45_spill] sm:$0xff] %v9794_v27  ;;  %v13785_v53 = vand.u32 65535, %v9746_v34  ;;  %v1230_v22 = vadd.s32 1, %v8536_v28  ;;  %v13788_v54 = vmov 0   ;;  %v9812_v6 = vmul.u32 %v964_v23, %v9633_v48 }
  0xf2   :  { %v9799_v31 = vmul.u32 %v13888_v10, %v9167_v8  ;;  %8799 = vset.pattern.permute.xlu0 %v13788_v54  ;;  %8800 = vset.pattern.permute.xlu1 %v13788_v54  ;;  %v1103_v41 = vsel %vm1101_vm1, %v1091_v30, 2102212464  ;;  %v1106_v47 = vsel %vm1098_vm3, %v1085_v19, %v9717_v14  ;;  %v1108_v49 = vsel %vm1100_vm5, %v1091_v30, %v1107_v20 }
  0xf3   :  { %8798 = vset.pattern.permute.xlu2 %v13788_v54  ;;  %v13786_v55 = vshll.u32 %v9754_v5, 16  ;;  %v13889_v61 = vshrl.u32 %v9575_v43, 16  ;;  %v9829_v39 = vand.u32 65535, %v9787_v13  ;;  %v1118_v28 = vshrl.u32 %v9794_v27, 16 }
  0xf4   :  { %v9834_v21 = vsel %vm945_vm2, %v948_v17, %v950_v38  ;;  %v986_v30 = vshrl.u32 %v9806_v11, 16  ;;  %v1102_v20 = vsel %vm1098_vm3, %v1082_v26, %v1085_v19  ;;  %v201_v29 = vshll.u32 %v9799_v31, 16 }
  0xf5   :  { %v9826_v37 = vmul.u32 %v13889_v61, %v9559_v0  ;;  %13890 = vst [vmem:[#allocation46_spill] sm:$0xff] %v9829_v39  ;;  %v1104_v10 = vsel %vm1100_vm5, %v9717_v14, %v1103_v41  ;;  %v9845_v61 = vsel %vm1099_vm6, %v1106_v47, %v1108_v49  ;;  %vm1231_vm7 = vcmp.gt.s32.totalorder %v1230_v22, 0 }
  0xf6   :  { %13891 = vst [vmem:[#allocation47_spill] sm:$0xff] %v9834_v21  ;;  %v204_v17 = vsel %vm9726_vm4, 1, %v13788_v54  ;;  %v9853_v32 = vmul.u32 %v13785_v53, %v9633_v48  ;;  %v13787_v19 = vshll.u32 %v9812_v6, 16  ;;  %v1227_v26 = vand.u32 8388607, %v13784_v12 }
  0xf7   :  { %13892 = vst [vmem:[#allocation48_spill] sm:$0xff] %v9845_v61  ;;  %vm207_vm8 = vc.u32 %v9261_v24, %v201_v29  ;;  %v9862_v14 = vadd.s32 %v13786_v55, %v9691_v4  ;;  %v9868_v41 = vmul.u32 %v1118_v28, %v9829_v39  ;;  %v9872_v47 = vsel %vm1099_vm6, %v1102_v20, %v1104_v10 }
  0xf8   :  { %13894 = vst [vmem:[#allocation50_spill] sm:$0xff] %v9872_v47  ;;  %v1140_v49 = vshrl.u32 %v9845_v61, 16  ;;  %v1232_v24 = vsel %vm1231_vm7, %v1230_v22, 0  ;;  %v206_v29 = vadd.s32 %v204_v17, %v9218_v58  ;;  %v9877_v12 = vmul.u32 %v964_v23, %v9694_v56 }
  0xf9   :  { %13893 = vst [vmem:[#allocation49_spill] sm:$0xff] %v9868_v41  ;;  %v9881_v2 = vmul.u32 %v986_v30, %v9633_v48  ;;  %v208_v55 = vsel %vm207_vm8, 1, %v13788_v54  ;;  %v13895_v38 = vshll.u32 %v9289_v35, 16  ;;  %v9894_v58 = vadd.s32 %v13787_v19, %v9853_v32 }
  0xfa   :  { %v9897_v23 = vmul.u32 %v986_v30, %v9694_v56  ;;  %v9900_v22 = vshrl.u32 %v9787_v13, 16  ;;  %v1228_v20 = vor.u32 8388608, %v1227_v26  ;;  %v13900_v10 = vand.u32 65535, %v9794_v27 }
  0xfb   :  { %vm9887_vm9 = vc.u32 %v9308_v51, %v13895_v38  ;;  %v1234_v53 = vand.u32 31, %v1232_v24  ;;  %v9915_v54 = vmul.u32 %v1140_v49, %v9829_v39  ;;  %v210_v26 = vadd.s32 %v208_v55, %v206_v29 }
  0xfc   :  { %13898 = vst [vmem:[#allocation51_spill] sm:$0xff] %v9897_v23  ;;  %v9905_v17 = vmul.u32 %v13900_v10, %v9829_v39  ;;  %v9911_v19 = vmul.u32 %v1118_v28, %v9900_v22  ;;  %v9918_v9 = vmul.u32 %v1140_v49, %v9900_v22  ;;  %v200_v10 = vshrl.u32 %v9197_v42, 16 }
  0xfd   :  { %13899 = vst [vmem:[#allocation52_spill] sm:$0xff] %v9900_v22  ;;  %v13905_v51 = vand.u32 65535, %v9177_v16  ;;  %v221_v38 = vshll.u32 %v9222_v60, 16  ;;  %v9925_v47 = vshrl.u32 %v1232_v24, 5  ;;  %v9927_v28 = vshll.u32 %v1228_v20, 8 }
  0xfe   :  { %13901 = vst [vmem:[#allocation53_spill] sm:$0xff] %v9905_v17  ;;  %v202_v30 = vshrl.u32 %v9799_v31, 16  ;;  %v13907_v49 = vshll.u32 %v9868_v41, 16  ;;  %v9938_v13 = vsub.s32 32, %v1234_v53  ;;  %v9944_v24 = vshll.u32 %v13859_v15, %v1234_v53 }
  0xff   :  { %13902 = vst [vmem:[#allocation54_spill] sm:$0xff] %v9911_v19  ;;  %v219_v21 = vmul.u32 %v13905_v51, %v9167_v8  ;;  %v13906_v55 = vmov %v13905_v51  ;;  %v9941_v8 = vshll.u32 %v13858_v45, %v1234_v53  ;;  %v211_v20 = vadd.s32 %v210_v26, %v200_v10 }
 0x100   :  { %13903 = vst [vmem:[#allocation55_spill] sm:$0xff] %v9915_v54  ;;  %v217_v29 = vmul.u32 %v13906_v55, %v9164_v7  ;;  %v9936_v42 = vadd.s32 %v13907_v49, %v9905_v17  ;;  %v13910_v7 = vand.u32 65535, %v9276_v52  ;;  %v375_v61 = vshll.u32 %v9317_v62, 16  ;;  %v13927_v17 = vld [vmem:[#allocation7_spill] sm:$0xff] }
 0x101   :  { %13904 = vst [vmem:[#allocation56_spill] sm:$0xff] %v9918_v9  ;;  %v223_v51 = vshll.u32 %v219_v21, 16  ;;  %v13909_v9 = vmov 0   ;;  %v13912_v39 = vshll.u32 %v9370_v44, 16  ;;  %v9965_v10 = vshll.u32 %v13855_v18, %v1234_v53 }
 0x102   :  { %13908 = vst [vmem:[#allocation57_spill] sm:$0xff] %v9936_v42  ;;  %vm225_vm10 = vc.u32 %v217_v29, %v221_v38  ;;  %v227_v31 = vadd.s32 %v221_v38, %v217_v29  ;;  %v371_v55 = vmul.u32 %v13910_v7, %v9202_v46  ;;  %v13911_v49 = vmov %v13910_v7 }
 0x103   :  { %v226_v16 = vsel %vm225_vm10, 1, %v13909_v9  ;;  %v373_v54 = vmul.u32 %v13911_v49, %v9215_v57  ;;  %vm9957_vm11 = vc.u32 %v9380_v33, %v13912_v39  ;;  %v9962_v38 = vshll.u32 %v13854_v36, %v1234_v53 }
 0x104   :  { %v228_v46 = vadd.s32 %v226_v16, %v9264_v40  ;;  %vm229_vm12 = vc.u32 %v227_v31, %v223_v51  ;;  %v222_v52 = vshrl.u32 %v9222_v60, 16  ;;  %v13915_v7 = vand.u32 65535, %v9251_v25 }
 0x105   :  { %v230_v29 = vsel %vm229_vm12, 1, %v13909_v9  ;;  %v377_v39 = vshll.u32 %v373_v54, 16  ;;  %v9973_v49 = vadd.s32 %v211_v20, %v202_v30  ;;  %vm379_vm13 = vc.u32 %v371_v55, %v375_v61  ;;  %v13917_v20 = vld [vmem:[#allocation12_spill] sm:$0xff] }
 0x106   :  { %v351_v33 = vmul.u32 %v13915_v7, %v9215_v57  ;;  %v232_v19 = vadd.s32 %v230_v29, %v228_v46  ;;  %v381_v3 = vadd.s32 %v375_v61, %v371_v55  ;;  %v224_v42 = vshrl.u32 %v219_v21, 16  ;;  %v13916_v57 = vld [vmem:[#allocation17_spill] sm:$0xff]  ;;  %v13918_v46 = vld [vmem:[#allocation14_spill] sm:$0xff] }
 0x107   :  { %v9975_v27 = vadd.s32 %v227_v31, %v223_v51  ;;  %v358_v60 = vsel %vm9887_vm9, 1, %v13909_v9  ;;  %v380_v25 = vsel %vm379_vm13, 1, %v13909_v9  ;;  %v376_v30 = vshrl.u32 %v9317_v62, 16 }
 0x108   :  { %v355_v22 = vshll.u32 %v351_v33, 16  ;;  %v233_v40 = vadd.s32 %v232_v19, %v222_v52  ;;  %v360_v16 = vadd.s32 %v358_v60, %v9311_v50  ;;  %vm383_vm14 = vc.u32 %v381_v3, %v377_v39  ;;  %v13919_v52 = vld [vmem:[#allocation19_spill] sm:$0xff] }
 0x109   :  { %v382_v61 = vadd.s32 %v380_v25, %v13917_v20  ;;  %v384_v21 = vsel %vm383_vm14, 1, %v13909_v9  ;;  %vm237_vm1 = vc.u32 %v9973_v49, %v9975_v27  ;;  %v354_v59 = vshrl.u32 %v9289_v35, 16  ;;  %v13921_v60 = vld [vmem:[#allocation15_spill] sm:$0xff]  ;;  %v13922_v25 = vld [vmem:[#allocation13_spill] sm:$0xff] }
 0x10a   :  { %vm361_vm15 = vc.u32 %v13916_v57, %v355_v22  ;;  %v234_v51 = vadd.s32 %v233_v40, %v224_v42  ;;  %v378_v31 = vshrl.u32 %v373_v54, 16  ;;  %v13920_v22 = vand.u32 65535, %v13919_v52 }
 0x10b   :  { %v362_v19 = vsel %vm361_vm15, 1, %v13909_v9  ;;  %v386_v55 = vadd.s32 %v384_v21, %v382_v61  ;;  %v356_v7 = vshrl.u32 %v351_v33, 16  ;;  %v13923_v57 = vand.u32 65535, %v13922_v25  ;;  %v13925_v61 = vld [vmem:[#allocation24_spill] sm:$0xff] }
 0x10c   :  { %v364_v50 = vadd.s32 %v362_v19, %v360_v16  ;;  %v525_v29 = vmul.u32 %v13920_v22, %v13918_v46  ;;  %v238_v62 = vadd.s32 1, %v234_v51  ;;  %v13924_v40 = vmov %v13920_v22  ;;  %v13926_v22 = vld [vmem:[#allocation5_spill] sm:$0xff] }
 0x10d   :  { %v505_v42 = vmul.u32 %v13923_v57, %v13921_v60  ;;  %v527_v20 = vmul.u32 %v13924_v40, %v13921_v60  ;;  %v10000_v35 = vshll.u32 %v13852_v63, %v1234_v53  ;;  %v387_v54 = vadd.s32 %v386_v55, %v376_v30  ;;  %v13931_v40 = vld [vmem:[#allocation25_spill] sm:$0xff] }
 0x10e   :  { %v365_v16 = vadd.s32 %v364_v50, %v354_v59  ;;  %v529_v21 = vshll.u32 %v13925_v61, 16  ;;  %v239_v19 = vsel %vm237_vm1, %v238_v62, %v234_v51  ;;  %v10003_v23 = vadd.s32 %v381_v3, %v377_v39  ;;  %v13929_v59 = vld [vmem:[#allocation23_spill] sm:$0xff] }
 0x10f   :  { %v509_v46 = vshll.u32 %v505_v42, 16  ;;  %v531_v33 = vshll.u32 %v527_v20, 16  ;;  %v13928_v25 = vmul.u32 %v13926_v22, %v13927_v17  ;;  %v388_v52 = vadd.s32 %v387_v54, %v378_v31  ;;  %v13930_v50 = vld [vmem:[#allocation27_spill] sm:$0xff]  ;;  %v13932_v54 = vld [vmem:[#allocation32_spill] sm:$0xff]  ;;  %v13938_v22 = vld [vmem:[#allocation10_spill] sm:$0xff] }
 0x110   :  { %v10008_v41 = vadd.s32 %v365_v16, %v356_v7  ;;  %v512_v53 = vsel %vm9957_vm11, 1, %v13909_v9  ;;  %vm533_vm3 = vc.u32 %v525_v29, %v529_v21  ;;  %v535_v3 = vadd.s32 %v529_v21, %v525_v29 }
 0x111   :  { %v240_v57 = vadd.s32 %v239_v19, %v13928_v25  ;;  %v514_v30 = vadd.s32 %v512_v53, %v13929_v59  ;;  %vm515_vm2 = vc.u32 %v13930_v50, %v509_v46  ;;  %v392_v51 = vadd.s32 1, %v388_v52  ;;  %v13934_v19 = vld [vmem:[#allocation33_spill] sm:$0xff] }
 0x112   :  { %vm391_vm4 = vc.u32 %v10008_v41, %v10003_v23  ;;  %v516_v17 = vsel %vm515_vm2, 1, %v13909_v9  ;;  %v1236_v31 = vshrl.u32 %v13858_v45, %v9938_v13  ;;  %v508_v55 = vshrl.u32 %v9370_v44, 16  ;;  %v13937_v44 = vld [vmem:[#allocation8_spill] sm:$0xff] }
 0x113   :  { %v241_v39 = vadd.s32 536870912, %v240_v57  ;;  %v518_v26 = vadd.s32 %v516_v17, %v514_v30  ;;  %v534_v62 = vsel %vm533_vm3, 1, %v13909_v9  ;;  %v393_v60 = vsel %vm391_vm4, %v392_v51, %v388_v52 }
 0x114   :  { %v530_v29 = vshrl.u32 %v13925_v61, 16  ;;  %v536_v16 = vadd.s32 %v534_v62, %v13931_v40  ;;  %v13933_v21 = vshll.u32 %v13932_v54, 16  ;;  %vm1252_vm6 = vcmp.lt.s32.totalorder %v9925_v47, 1 }
 0x115   :  { %v10022_v7 = vshrl.u32 %v241_v39, 30  ;;  %v13939_v25 = vmul.u32 %v13937_v44, %v13938_v22  ;;  %v510_v59 = vshrl.u32 %v505_v42, 16  ;;  %v519_v30 = vadd.s32 %v518_v26, %v508_v55  ;;  %v13940_v26 = vld [vmem:[#allocation22_spill] sm:$0xff] }
 0x116   :  { %vm10029_vm5 = vc.u32 %v13934_v19, %v13933_v21  ;;  %vm537_vm7 = vc.u32 %v535_v3, %v531_v33  ;;  %v1238_v61 = vshrl.u32 %v13859_v15, %v9938_v13  ;;  %v1241_v52 = vshrl.u32 %v13854_v36, %v9938_v13  ;;  %v13941_v21 = vld [vmem:[#allocation28_spill] sm:$0xff]  ;;  %v13959_v15 = vld [vmem:[#allocation35_spill] sm:$0xff] }
 0x117   :  { %v394_v53 = vadd.s32 %v393_v60, %v13939_v25  ;;  %v243_v50 = vshll.u32 %v10022_v7, 30  ;;  %v538_v39 = vsel %vm537_vm7, 1, %v13909_v9  ;;  %v1244_v51 = vshrl.u32 %v13855_v18, %v9938_v13 }
 0x118   :  { %v532_v62 = vshrl.u32 %v527_v20, 16  ;;  %v540_v40 = vadd.s32 %v538_v39, %v536_v16  ;;  %v10047_v42 = vadd.s32 %v519_v30, %v510_v59  ;;  %v10049_v55 = vadd.s32 %v535_v3, %v531_v33  ;;  %v13944_v3 = vld [vmem:[#allocation2_spill] sm:$0xff] }
 0x119   :  { %v395_v17 = vadd.s32 536870912, %v394_v53  ;;  %v10045_v60 = vsub.s32 %v240_v57, %v243_v50  ;;  %v13942_v19 = vand.u32 65535, %v13941_v21  ;;  %v1247_v22 = vshrl.u32 %v13852_v63, %v9938_v13  ;;  %v13955_v63 = vld [vmem:[#allocation21_spill] sm:$0xff] }
 0x11a   :  { %v13943_v25 = vmov 1326507024   ;;  %v541_v57 = vadd.s32 %v540_v40, %v530_v29  ;;  %v1239_v16 = vor.u32 %v1238_v61, %v9941_v8  ;;  %vm1255_vm8 = vcmp.lt.s32.totalorder %v9925_v47, 4 }
 0x11b   :  { %v10054_v44 = vmul.u32 %v13942_v19, %v13940_v26  ;;  %v10060_v18 = vshrl.u32 %v13943_v25, %v9938_v13  ;;  %v10062_v20 = vshrl.u32 %v395_v17, 30  ;;  %vm245_vm9 = vcmp.lt.s32.totalorder %v10045_v60, 0 }
 0x11c   :  { %v246_v33 = vsub.s32 0, %v10045_v60  ;;  %vm144_vm10 = vcmp.lt.s32.totalorder %v13944_v3, 0  ;;  %v10070_v59 = vor.u32 %v1241_v52, %v9944_v24  ;;  %v10073_v30 = vor.u32 %v1244_v51, %v9962_v38 }
 0x11d   :  { %v397_v13 = vshll.u32 %v10062_v20, 30  ;;  %v542_v50 = vadd.s32 %v541_v57, %v532_v62  ;;  %v10077_v29 = vand.u32 65535, %v9927_v28  ;;  %vm545_vm11 = vc.u32 %v10047_v42, %v10049_v55  ;;  %v13949_v57 = vld [vmem:[#allocation11_spill] sm:$0xff] }
 0x11e   :  { %v247_v8 = vsel %vm245_vm9, %v246_v33, %v10045_v60  ;;  %v663_v61 = vshll.u32 %v10054_v44, 16  ;;  %v10084_v39 = vor.u32 %v1247_v22, %v9965_v10  ;;  %v10092_v17 = vsel %vm1252_vm6, %v1236_v31, %v1239_v16  ;;  %v13950_v33 = vld [vmem:[#allocation18_spill] sm:$0xff] }
 0x11f   :  { %v248_v24 = vclz %v247_v8  ;;  %v10086_v52 = vsub.s32 %v394_v53, %v397_v13  ;;  %v546_v38 = vadd.s32 1, %v542_v50  ;;  %v10097_v62 = vsel %vm1255_vm8, %v10073_v30, 2102212464 }
 0x120   :  { %v10100_v40 = vshrl.u32 %v9927_v28, 16  ;;  %v13946_v10 = vand.u32 2147483647, %v13944_v3  ;;  %v266_v22 = vsub.s32 4, %v10022_v7  ;;  %v13951_v13 = vmul.u32 %v13949_v57, %v13950_v33 }
 0x121   :  { %v8516_v21 = vadd.s32 4294967294, %v248_v24  ;;  %vm399_vm13 = vcmp.lt.s32.totalorder %v10086_v52, 0  ;;  %v400_v31 = vsub.s32 0, %v10086_v52  ;;  %v547_v19 = vsel %vm545_vm11, %v546_v38, %v542_v50  ;;  %v13956_v50 = vld [vmem:[#allocation31_spill] sm:$0xff] }
 0x122   :  { %13945 = vst [vmem:[#allocation17_spill] sm:$0xff] %v10100_v40  ;;  %vm10104_vm12 = vcmp.le.f32.partialorder %v13946_v10, 0.7853982  ;;  %v548_v8 = vadd.s32 %v547_v19, %v13951_v13  ;;  %v666_v51 = vsel %vm10029_vm5, 1, %v13909_v9  ;;  %v13952_v10 = vld [vmem:[#allocation38_spill] sm:$0xff]  ;;  %v13957_v38 = vand.u32 65535, %v13956_v50 }
 0x123   :  { %vm10118_vm14 = vc.u32 %v13952_v10, %v663_v61  ;;  %vm8517_vm15 = vcmp.lt.s32.totalorder %v8516_v21, 0  ;;  %v401_v24 = vsel %vm399_vm13, %v400_v31, %v10086_v52  ;;  %v683_v61 = vshll.u32 %v13959_v15, 16 }
 0x124   :  { %v679_v36 = vmul.u32 %v13957_v38, %v13955_v63  ;;  %v13958_v57 = vmov %v13957_v38  ;;  %v251_v33 = vsel %vm8517_vm15, 0, %v8516_v21  ;;  %v402_v46 = vclz %v401_v24  ;;  %v13960_v24 = vld [vmem:[#allocation34_spill] sm:$0xff] }
 0x125   :  { %v10129_v19 = vmul.u32 %v13958_v57, %v13940_v26  ;;  %v549_v13 = vadd.s32 536870912, %v548_v8  ;;  %v10135_v10 = vsel %vm1252_vm6, %v1239_v16, %v10070_v59  ;;  %v236_v31 = vadd.s32 %v9975_v27, %v9973_v49 }
 0x126   :  { %v252_v45 = vsub.s32 32, %v251_v33  ;;  %v256_v63 = vsub.s32 4294967266, %v251_v33  ;;  %v267_v26 = vsel %vm144_vm10, %v266_v22, %v10022_v7  ;;  %v8519_v50 = vadd.s32 4294967294, %v402_v46  ;;  %v13961_v22 = vld [vmem:[#allocation3_spill] sm:$0xff] }
 0x127   :  { %v10142_v21 = vshrl.u32 %v549_v13, 30  ;;  %v668_v38 = vadd.s32 %v666_v51, %v13960_v24  ;;  %vm1254_vm1 = vcmp.lt.s32.totalorder %v9925_v47, 3  ;;  %v253_v57 = vshll.u32 %v10045_v60, %v251_v33  ;;  %v2728_v60 = vld [vmem:[%s13699_s5] sm:$0xff] }
 0x128   :  { %v254_v16 = vshrl.u32 %v236_v31, %v252_v45  ;;  %v257_v40 = vadd.s32 127, %v256_v63  ;;  %v670_v27 = vsel %vm10118_vm14, 1, %v13909_v9  ;;  %vm8520_vm2 = vcmp.lt.s32.totalorder %v8519_v50, 0  ;;  %2744 = vmatpush.msra.mxu3 %v2728_v60 }
 0x129   :  { %v551_v49 = vshll.u32 %v10142_v21, 30  ;;  %v685_v7 = vshll.u32 %v10129_v19, 16  ;;  %vm687_vm3 = vc.u32 %v679_v36, %v683_v61  ;;  %vm298_vm4 = vcmp.lt.s32.totalorder %v13961_v22, 0 }
 0x12a   :  { %v255_v46 = vor.u32 %v254_v16, %v253_v57  ;;  %v258_v51 = vshll.u32 %v257_v40, 23  ;;  %v405_v13 = vsel %vm8520_vm2, 0, %v8519_v50  ;;  %v10153_v24 = vadd.s32 %v683_v61, %v679_v36 }
 0x12b   :  { %v269_v45 = vsel %vm10104_vm12, 0, %v267_v26  ;;  %v390_v25 = vadd.s32 %v10003_v23, %v10008_v41  ;;  %v406_v33 = vsub.s32 32, %v405_v13  ;;  %v407_v31 = vshll.u32 %v10086_v52, %v405_v13  ;;  %v8963_v26 = vld [vmem:[%s13823_s19] sm:$0xff] }
 0x12c   :  { %v259_v63 = vor.u32 4788187, %v258_v51  ;;  %v410_v57 = vsub.s32 4294967266, %v405_v13  ;;  %v662_v40 = vshrl.u32 %v13932_v54, 16  ;;  %v688_v36 = vsel %vm687_vm3, 1, %v13909_v9  ;;  %8563 = vmatmul.msk.f32.vlgmr.msra.gmra.mxu3 %vm13814_vm0, %v8963_v26  ;;  %v13962_v13 = vld [vmem:[#allocation39_spill] sm:$0xff] }
 0x12d   :  { %v262_v61 = vcvt.s32.f32 %v255_v46  ;;  %v408_v50 = vshrl.u32 %v390_v25, %v406_v33  ;;  %v10169_v16 = vsub.s32 %v548_v8, %v551_v49  ;;  %v672_v41 = vadd.s32 %v670_v27, %v668_v38 }
 0x12e   :  { %v260_v23 = vand.u32 2147483647, %v259_v63  ;;  %v411_v52 = vadd.s32 127, %v410_v57  ;;  %v420_v51 = vsub.s32 4, %v10062_v20  ;;  %vm691_vm5 = vc.u32 %v10153_v24, %v685_v7 }
 0x12f   :  { %v409_v54 = vor.u32 %v408_v50, %v407_v31  ;;  %vm553_vm7 = vcmp.lt.s32.totalorder %v10169_v16, 0  ;;  %v554_v46 = vsub.s32 0, %v10169_v16  ;;  %v690_v60 = vadd.s32 %v688_v36, %v13962_v13 }
 0x130   :  { %v10182_v8 = vsel %vm1252_vm6, %v10070_v59, %v10073_v30  ;;  %v263_v38 = vmul.f32 %v262_v61, %v260_v23  ;;  %v412_v27 = vshll.u32 %v411_v52, 23  ;;  %v692_v49 = vsel %vm691_vm5, 1, %v13909_v9 }
 0x131   :  { %v10189_v25 = vsel %vm1254_vm1, %v10070_v59, %v10097_v62  ;;  %v1534_v33 = vadd.s32 3, %v269_v45  ;;  %v555_v31 = vsel %vm553_vm7, %v554_v46, %v10169_v16  ;;  %v664_v63 = vshrl.u32 %v10054_v44, 16 }
 0x132   :  { %v264_v57 = vxor.u32 2147483648, %v263_v38  ;;  %v413_v36 = vor.u32 4788187, %v412_v27  ;;  %v416_v26 = vcvt.s32.f32 %v409_v54  ;;  %v556_v50 = vclz %v555_v31 }
 0x133   :  { %v421_v61 = vsel %vm298_vm4, %v420_v51, %v10062_v20  ;;  %v673_v23 = vadd.s32 %v672_v41, %v662_v40  ;;  %v684_v52 = vshrl.u32 %v13959_v15, 16  ;;  %v694_v13 = vadd.s32 %v692_v49, %v690_v60  ;;  %v8965_v41 = vld [vmem:[%s13823_s19 + $0x10] sm:$0xff] }
 0x134   :  { %v1261_v59 = vsel %vm1255_vm8, %v10084_v39, 920167782  ;;  %v13963_v62 = vor.u32 %v10060_v18, %v10000_v35  ;;  %v265_v54 = vsel %vm144_vm10, %v264_v57, %v263_v38  ;;  %v414_v46 = vand.u32 2147483647, %v413_v36  ;;  %v8964_v18 = vld [vmem:[%s13823_s19 + $0x8] sm:$0xff]  ;;  %v13967_v38 = vld [vmem:[#allocation4_spill] sm:$0xff] }
 0x135   :  { %v10212_v15 = vsel %vm10104_vm12, %v13944_v3, %v265_v54  ;;  %v10214_v20 = vand.u32 3, %v269_v45  ;;  %v13964_v40 = vand.u32 2147483647, %v13961_v22  ;;  %8564 = vmatmul.msk.f32.gmra.mxu3 %vm13814_vm0, %v8964_v18  ;;  %v686_v35 = vshrl.u32 %v10129_v19, 16 }
 0x136   :  { %v10205_v44 = vsel %vm1255_vm8, %v13963_v62, 1326507024  ;;  %v270_v53 = vmul.f32 %v10212_v15, %v10212_v15  ;;  %v417_v51 = vmul.f32 %v416_v26, %v414_v46  ;;  %v8522_v60 = vadd.s32 4294967294, %v556_v50 }
 0x137   :  { %vm10218_vm6 = vcmp.le.f32.partialorder %v13964_v40, 0.7853982  ;;  %vm452_vm8 = vcmp.lt.s32.totalorder %v13967_v38, 0  ;;  %v10234_v27 = vand.u32 3, %v1534_v33  ;;  %v544_v49 = vadd.s32 %v10049_v55, %v10047_v42 }
 0x138   :  { %v10231_v45 = vsel %vm10218_vm6, 0, %v421_v61  ;;  %v10238_v31 = vadd.s32 %v673_v23, %v664_v63  ;;  %v695_v57 = vadd.s32 %v694_v13, %v684_v52  ;;  %v271_v36 = vmul.f32 -0.001358992, %v270_v53 }
 0x139   :  { %v278_v62 = vmul.f32 -0.00019511016, %v270_v53  ;;  %v418_v54 = vxor.u32 2147483648, %v417_v51  ;;  %vm8523_vm9 = vcmp.lt.s32.totalorder %v8522_v60, 0  ;;  %v1689_v26 = vadd.s32 3, %v10231_v45 }
 0x13a   :  { %v559_v46 = vsel %vm8523_vm9, 0, %v8522_v60  ;;  %v10244_v50 = vadd.s32 %v10153_v24, %v685_v7  ;;  %v696_v33 = vadd.s32 %v695_v57, %v686_v35  ;;  %v272_v61 = vadd.f32 0.041655596, %v271_v36 }
 0x13b   :  { %v279_v40 = vadd.f32 0.008332121, %v278_v62  ;;  %v419_v42 = vsel %vm298_vm4, %v418_v54, %v417_v51  ;;  %v560_v55 = vsub.s32 32, %v559_v46  ;;  %v561_v23 = vshll.u32 %v10169_v16, %v559_v46 }
 0x13c   :  { %v10251_v63 = vsel %vm10218_vm6, %v13961_v22, %v419_v42  ;;  %v564_v52 = vsub.s32 4294967266, %v559_v46  ;;  %v574_v19 = vsub.s32 4, %v10142_v21  ;;  %v273_v13 = vmul.f32 %v272_v61, %v270_v53 }
 0x13d   :  { %v280_v7 = vmul.f32 %v279_v40, %v270_v53  ;;  %v424_v24 = vmul.f32 %v10251_v63, %v10251_v63  ;;  %v562_v18 = vshrl.u32 %v544_v49, %v560_v55  ;;  %v10260_v35 = vsel %vm1254_vm1, %v10073_v30, %v1261_v59  ;;  %8565 = vmatmul.msk.f32.gmra.mxu3 %vm13814_vm0, %v8965_v41 }
 0x13e   :  { %v565_v51 = vadd.s32 127, %v564_v52  ;;  %vm699_vm10 = vc.u32 %v10238_v31, %v10244_v50  ;;  %v700_v16 = vadd.s32 1, %v696_v33  ;;  %v274_v60 = vadd.f32 -0.4999988, %v273_v13 }
 0x13f   :  { %v281_v57 = vadd.f32 -0.16666654, %v280_v7  ;;  %vm291_vm11 = vcmp.eq.s32.totalorder %v10214_v20, 2  ;;  %v425_v49 = vmul.f32 -0.001358992, %v424_v24  ;;  %v563_v36 = vor.u32 %v562_v18, %v561_v23 }
 0x140   :  { %vm1537_vm12 = vcmp.eq.s32.totalorder %v10234_v27, 0  ;;  %vm288_vm13 = vcmp.eq.s32.totalorder %v10214_v20, 0  ;;  %v432_v30 = vmul.f32 -0.00019511016, %v424_v24  ;;  %v10271_v59 = vand.u32 3, %v1689_v26 }
 0x141   :  { %v566_v62 = vshll.u32 %v565_v51, 23  ;;  %v275_v54 = vmul.f32 %v274_v60, %v270_v53  ;;  %v282_v46 = vmul.f32 %v281_v57, %v270_v53  ;;  %vm1536_vm14 = vcmp.lt.s32.totalorder %v10234_v27, 2 }
 0x142   :  { %vm287_vm15 = vcmp.lt.s32.totalorder %v10214_v20, 2  ;;  %v426_v61 = vadd.f32 0.041655596, %v425_v49  ;;  %v575_v40 = vsel %vm452_vm8, %v574_v19, %v10142_v21  ;;  %vm285_vm2 = vweird.f32 %v13944_v3 }
 0x143   :  { %v433_v42 = vadd.f32 0.008332121, %v432_v30  ;;  %v567_v55 = vor.u32 4788187, %v566_v62  ;;  %v570_v23 = vcvt.s32.f32 %v563_v36  ;;  %v701_v26 = vsel %vm699_vm10, %v700_v16, %v696_v33  ;;  %v13975_v36 = vld [vmem:[#allocation20_spill] sm:$0xff]  ;;  %v13976_v30 = vld [vmem:[#allocation29_spill] sm:$0xff] }
 0x144   :  { %v13968_v53 = vshll.u32 %v9754_v5, 16  ;;  %v276_v13 = vadd.f32 1.0, %v275_v54  ;;  %v283_v7 = vadd.f32 1.0, %v282_v46  ;;  %v427_v18 = vmul.f32 %v426_v61, %v424_v24 }
 0x145   :  { %v13971_v21 = vand.u32 2147483647, %v13967_v38  ;;  %v434_v51 = vmul.f32 %v433_v42, %v424_v24  ;;  %v568_v41 = vand.u32 2147483647, %v567_v55  ;;  %v13977_v62 = vmul.u32 %v13975_v36, %v13976_v30 }
 0x146   :  { %vm10285_vm3 = vc.u32 %v9691_v4, %v13968_v53  ;;  %v13974_v4 = vand.u32 65535, %v9567_v1  ;;  %v284_v60 = vmul.f32 %v283_v7, %v10212_v15  ;;  %v292_v57 = vxor.u32 2147483648, %v276_v13  ;;  %v8966_v1 = vld [vmem:[%s13823_s19 + $0x18] sm:$0xff] }
 0x147   :  { %vm10291_vm4 = vcmp.le.f32.partialorder %v13971_v21, 0.7853982  ;;  %v428_v49 = vadd.f32 -0.4999988, %v427_v18  ;;  %v702_v54 = vadd.s32 %v701_v26, %v13977_v62  ;;  %vm1540_vm5 = vcmp.eq.s32.totalorder %v10234_v27, 2  ;;  %8566 = vmatmul.msk.f32.gmra.mxu3 %vm13814_vm0, %v8966_v1 }
 0x148   :  { %v10297_v33 = vsel %vm10291_vm4, 0, %v575_v40  ;;  %v10302_v16 = vmul.u32 %v13974_v4, %v9559_v0  ;;  %v435_v46 = vadd.f32 -0.16666654, %v434_v51  ;;  %v440_v61 = vand.u32 3, %v10231_v45 }
 0x149   :  { %v571_v40 = vmul.f32 %v570_v23, %v568_v41  ;;  %v289_v42 = vxor.u32 2147483648, %v284_v60  ;;  %v1542_v15 = vsel %vm1540_vm5, %v292_v57, %v284_v60  ;;  %v429_v55 = vmul.f32 %v428_v49, %v424_v24 }
 0x14a   :  { %v1844_v53 = vadd.s32 3, %v10297_v33  ;;  %v293_v26 = vsel %vm291_vm11, %v292_v57, %v284_v60  ;;  %v436_v7 = vmul.f32 %v435_v46, %v424_v24  ;;  %vm1691_vm7 = vcmp.lt.s32.totalorder %v10271_v59, 2 }
 0x14b   :  { %v572_v18 = vxor.u32 2147483648, %v571_v40  ;;  %v703_v45 = vadd.s32 536870912, %v702_v54  ;;  %v1539_v23 = vsel %vm1537_vm12, %v276_v13, %v289_v42  ;;  %v290_v21 = vsel %vm288_vm13, %v276_v13, %v289_v42 }
 0x14c   :  { %v430_v51 = vadd.f32 1.0, %v429_v55  ;;  %vm439_vm6 = vweird.f32 %v13961_v22  ;;  %v817_v41 = vshll.u32 %v10302_v16, 16  ;;  %vm1253_vm9 = vcmp.lt.s32.totalorder %v9925_v47, 2 }
 0x14d   :  { %v1543_v24 = vsel %vm1536_vm14, %v1539_v23, %v1542_v15  ;;  %v294_v4 = vsel %vm287_vm15, %v290_v21, %v293_v26  ;;  %v437_v60 = vadd.f32 1.0, %v436_v7  ;;  %v573_v57 = vsel %vm452_vm8, %v572_v18, %v571_v40  ;;  %v8967_v40 = vld [vmem:[%s13823_s19 + $0x20] sm:$0xff] }
 0x14e   :  { %v1544_v13 = vsel %vm285_vm2, nan, %v1543_v24  ;;  %v295_v49 = vsel %vm285_vm2, nan, %v294_v4  ;;  %v446_v36 = vxor.u32 2147483648, %v430_v51  ;;  %v10338_v30 = vsel %vm10291_vm4, %v13967_v38, %v573_v57  ;;  %v13980_v4 = vld [vmem:[#allocation42_spill] sm:$0xff] }
 0x14f   :  { %2662 = vmatmul.f32.vlgmr.msra.gmra.mxu1 %v1544_v13  ;;  %2703 = vmatmul.f32.vlgmr.msra.gmra.mxu2 %v295_v49  ;;  %v438_v20 = vmul.f32 %v437_v60, %v10251_v63  ;;  %vm1692_vm10 = vcmp.eq.s32.totalorder %v10271_v59, 0  ;;  %v578_v27 = vmul.f32 %v10338_v30, %v10338_v30  ;;  %v10344_v62 = vshrl.u32 %v703_v45, 30 }
 0x150   :  { %vm1695_vm8 = vcmp.eq.s32.totalorder %v10271_v59, 2  ;;  %vm441_vm11 = vcmp.lt.s32.totalorder %v440_v61, 2  ;;  %vm442_vm12 = vcmp.eq.s32.totalorder %v440_v61, 0  ;;  %vm445_vm13 = vcmp.eq.s32.totalorder %v440_v61, 2  ;;  %8567 = vmatmul.msk.f32.gmra.mxu3 %vm13814_vm0, %v8967_v40 }
 0x151   :  { %v443_v3 = vxor.u32 2147483648, %v438_v20  ;;  %v579_v19 = vmul.f32 -0.001358992, %v578_v27  ;;  %v10347_v46 = vand.u32 3, %v1844_v53  ;;  %v820_v63 = vsel %vm10285_vm3, 1, %v13909_v9 }
 0x152   :  { %v1697_v1 = vsel %vm1695_vm8, %v446_v36, %v438_v20  ;;  %v586_v42 = vmul.f32 -0.00019511016, %v578_v27  ;;  %v705_v15 = vshll.u32 %v10344_v62, 30  ;;  %vm10358_vm14 = vc.u32 %v9862_v14, %v817_v41 }
 0x153   :  { %v1694_v53 = vsel %vm1692_vm10, %v430_v51, %v443_v3  ;;  %v444_v52 = vsel %vm442_vm12, %v430_v51, %v443_v3  ;;  %v447_v26 = vsel %vm445_vm13, %v446_v36, %v438_v20  ;;  %v580_v7 = vadd.f32 0.041655596, %v579_v19 }
 0x154   :  { %v1698_v18 = vsel %vm1691_vm7, %v1694_v53, %v1697_v1  ;;  %v448_v45 = vsel %vm441_vm11, %v444_v52, %v447_v26  ;;  %v587_v23 = vadd.f32 0.008332121, %v586_v42  ;;  %v10367_v21 = vsub.s32 %v702_v54, %v705_v15 }
 0x155   :  { %v1699_v14 = vsel %vm439_vm6, nan, %v1698_v18  ;;  %v449_v41 = vsel %vm439_vm6, nan, %v448_v45  ;;  %v581_v24 = vmul.f32 %v580_v7, %v578_v27  ;;  %v822_v60 = vadd.s32 %v820_v63, %v13980_v4 }
 0x156   :  { %v588_v51 = vmul.f32 %v587_v23, %v578_v27  ;;  %vm707_vm15 = vcmp.lt.s32.totalorder %v10367_v21, 0  ;;  %v708_v59 = vsub.s32 0, %v10367_v21  ;;  %v824_v61 = vsel %vm10358_vm14, 1, %v13909_v9 }
 0x157   :  { %v10383_v54 = vsel %vm1253_vm9, %v10092_v17, %v10189_v25  ;;  %v10389_v22 = vsel %vm1254_vm1, %v10084_v39, %v10205_v44  ;;  %2665 = vmatmul.f32.gmra.mxu1 %v1699_v14  ;;  %2706 = vmatmul.f32.gmra.mxu2 %v449_v41  ;;  %v582_v57 = vadd.f32 -0.4999988, %v581_v24  ;;  %v594_v13 = vand.u32 3, %v10297_v33  ;;  %v8968_v33 = vld [vmem:[%s13823_s19 + $0x28] sm:$0xff] }
 0x158   :  { %v10396_v49 = vsel %vm1253_vm9, %v10135_v10, %v10260_v35  ;;  %v589_v36 = vadd.f32 -0.16666654, %v588_v51  ;;  %v709_v17 = vsel %vm707_vm15, %v708_v59, %v10367_v21  ;;  %v816_v25 = vshrl.u32 %v9754_v5, 16  ;;  %8568 = vmatmul.msk.f32.gmra.mxu3 %vm13814_vm0, %v8968_v33  ;;  %v13981_v10 = vld [vmem:[#allocation36_spill] sm:$0xff]  ;;  %v13988_v59 = vld [vmem:[#allocation6_spill] sm:$0xff] }
 0x159   :  { %v583_v20 = vmul.f32 %v582_v57, %v578_v27  ;;  %v698_v39 = vadd.s32 %v10244_v50, %v10238_v31  ;;  %v710_v44 = vclz %v709_v17  ;;  %v826_v3 = vadd.s32 %v824_v61, %v822_v60 }
 0x15a   :  { %v590_v19 = vmul.f32 %v589_v36, %v578_v27  ;;  %vm1846_vm1 = vcmp.lt.s32.totalorder %v10347_v46, 2  ;;  %vm1847_vm2 = vcmp.eq.s32.totalorder %v10347_v46, 0  ;;  %v13982_v5 = vand.u32 65535, %v9575_v43  ;;  %v13987_v43 = vld [vmem:[#allocation43_spill] sm:$0xff] }
 0x15b   :  { %v13984_v63 = vshll.u32 %v9812_v6, 16  ;;  %v584_v27 = vadd.f32 1.0, %v583_v20  ;;  %vm593_vm4 = vweird.f32 %v13967_v38  ;;  %vm1850_vm5 = vcmp.eq.s32.totalorder %v10347_v46, 2 }
 0x15c   :  { %v833_v35 = vmul.u32 %v13982_v5, %v13981_v10  ;;  %v13983_v31 = vmov %v13982_v5  ;;  %vm595_vm7 = vcmp.lt.s32.totalorder %v594_v13, 2  ;;  %v8525_v1 = vadd.s32 4294967294, %v710_v44 }
 0x15d   :  { %v10414_v50 = vmul.u32 %v13983_v31, %v9559_v0  ;;  %vm10419_vm3 = vc.u32 %v9853_v32, %v13984_v63  ;;  %v591_v42 = vadd.f32 1.0, %v590_v19  ;;  %vm596_vm6 = vcmp.eq.s32.totalorder %v594_v13, 0 }
 0x15e   :  { %vm599_vm10 = vcmp.eq.s32.totalorder %v594_v13, 2  ;;  %v837_v0 = vshll.u32 %v13987_v43, 16  ;;  %v600_v15 = vxor.u32 2147483648, %v584_v27  ;;  %vm8526_vm8 = vcmp.lt.s32.totalorder %v8525_v1, 0 }
 0x15f   :  { %v818_v55 = vshrl.u32 %v10302_v16, 16  ;;  %v827_v32 = vadd.s32 %v826_v3, %v816_v25  ;;  %v592_v53 = vmul.f32 %v591_v42, %v10338_v30  ;;  %v713_v52 = vsel %vm8526_vm8, 0, %v8525_v1 }
 0x160   :  { %v839_v26 = vshll.u32 %v10414_v50, 16  ;;  %vm841_vm11 = vc.u32 %v833_v35, %v837_v0  ;;  %v714_v7 = vsub.s32 32, %v713_v52  ;;  %v715_v18 = vshll.u32 %v10367_v21, %v713_v52  ;;  %v8969_v21 = vld [vmem:[%s13823_s19 + $0x30] sm:$0xff] }
 0x161   :  { %v718_v45 = vsub.s32 4294967266, %v713_v52  ;;  %v842_v23 = vsel %vm841_vm11, 1, %v13909_v9  ;;  %v597_v14 = vxor.u32 2147483648, %v592_v53  ;;  %v1852_v41 = vsel %vm1850_vm5, %v600_v15, %v592_v53  ;;  %8569 = vmatmul.msk.f32.gmra.mxu3 %vm13814_vm0, %v8969_v21 }
 0x162   :  { %v838_v24 = vshrl.u32 %v13987_v43, 16  ;;  %v843_v16 = vadd.s32 %v837_v0, %v833_v35  ;;  %v601_v4 = vsel %vm599_vm10, %v600_v15, %v592_v53  ;;  %v716_v30 = vshrl.u32 %v698_v39, %v714_v7  ;;  %v13997_v53 = vld [vmem:[#allocation53_spill] sm:$0xff] }
 0x163   :  { %v719_v60 = vadd.s32 127, %v718_v45  ;;  %v844_v51 = vadd.s32 %v842_v23, %v9826_v37  ;;  %vm606_vm12 = vcmp.lt.s32.totalorder %v13988_v59, 0  ;;  %v1849_v61 = vsel %vm1847_vm2, %v584_v27, %v597_v14 }
 0x164   :  { %v598_v57 = vsel %vm596_vm6, %v584_v27, %v597_v14  ;;  %vm845_vm13 = vc.u32 %v843_v16, %v839_v26  ;;  %v13989_v36 = vand.u32 65535, %v9746_v34  ;;  %v1853_v37 = vsel %vm1846_vm1, %v1849_v61, %v1852_v41  ;;  %v14001_v61 = vld [vmem:[#allocation30_spill] sm:$0xff] }
 0x165   :  { %v602_v25 = vsel %vm595_vm7, %v598_v57, %v601_v4  ;;  %v13990_v20 = vand.u32 2147483647, %v13988_v59  ;;  %v717_v44 = vor.u32 %v716_v30, %v715_v18  ;;  %v720_v3 = vshll.u32 %v719_v60, 23  ;;  %v14002_v57 = vld [vmem:[#allocation37_spill] sm:$0xff] }
 0x166   :  { %v10447_v17 = vmul.u32 %v13989_v36, %v9694_v56  ;;  %v1854_v33 = vsel %vm593_vm4, nan, %v1853_v37  ;;  %v603_v34 = vsel %vm593_vm4, nan, %v602_v25  ;;  %v840_v19 = vshrl.u32 %v10414_v50, 16 }
 0x167   :  { %vm10454_vm14 = vcmp.le.f32.partialorder %v13990_v20, 0.7853982  ;;  %v846_v46 = vsel %vm845_vm13, 1, %v13909_v9  ;;  %v10468_v13 = vsel %vm1253_vm9, %v10182_v8, %v10389_v22  ;;  %2668 = vmatmul.f32.gmra.mxu1 %v1854_v33  ;;  %2709 = vmatmul.f32.gmra.mxu2 %v603_v34  ;;  %v721_v10 = vor.u32 4788187, %v720_v3  ;;  %v14004_v3 = vld [vmem:[#allocation52_spill] sm:$0xff] }
 0x168   :  { %v724_v5 = vcvt.s32.f32 %v717_v44  ;;  %v848_v35 = vadd.s32 %v846_v46, %v844_v51  ;;  %v10470_v31 = vadd.s32 %v827_v32, %v818_v55  ;;  %v10472_v63 = vadd.s32 %v843_v16, %v839_v26 }
 0x169   :  { %v971_v38 = vshll.u32 %v10447_v17, 16  ;;  %v974_v50 = vsel %vm10419_vm3, 1, %v13909_v9  ;;  %v722_v27 = vand.u32 2147483647, %v721_v10  ;;  %v13993_v8 = vand.u32 65535, %v9806_v11 }
 0x16a   :  { %v849_v1 = vadd.s32 %v848_v35, %v838_v24  ;;  %v976_v47 = vadd.s32 %v974_v50, %v9877_v12  ;;  %v970_v42 = vshrl.u32 %v9812_v6, 16  ;;  %v991_v15 = vshll.u32 %v9881_v2, 16  ;;  %v14000_v24 = vld [vmem:[#allocation51_spill] sm:$0xff] }
 0x16b   :  { %v987_v22 = vmul.u32 %v13993_v8, %v9633_v48  ;;  %vm977_vm9 = vc.u32 %v9894_v58, %v971_v38  ;;  %v13994_v43 = vmov %v13993_v8  ;;  %v725_v40 = vmul.f32 %v724_v5, %v722_v27  ;;  %v8970_v48 = vld [vmem:[%s13823_s19 + $0x38] sm:$0xff] }
 0x16c   :  { %v989_v0 = vmul.u32 %v13994_v43, %v9694_v56  ;;  %v728_v55 = vsub.s32 4, %v10344_v62  ;;  %v850_v32 = vadd.s32 %v849_v1, %v840_v19  ;;  %v978_v12 = vsel %vm977_vm9, 1, %v13909_v9  ;;  %8570 = vmatmul.msk.f32.gmra.mxu3 %vm13814_vm0, %v8970_v48  ;;  %v13995_v56 = vld [vmem:[#allocation49_spill] sm:$0xff] }
 0x16d   :  { %vm853_vm15 = vc.u32 %v10470_v31, %v10472_v63  ;;  %v980_v6 = vadd.s32 %v978_v12, %v976_v47  ;;  %vm995_vm1 = vc.u32 %v987_v22, %v991_v15  ;;  %v13996_v58 = vshll.u32 %v13995_v56, 16 }
 0x16e   :  { %v993_v11 = vshll.u32 %v989_v0, 16  ;;  %v726_v26 = vxor.u32 2147483648, %v725_v40  ;;  %v854_v7 = vadd.s32 1, %v850_v32  ;;  %v996_v18 = vsel %vm995_vm1, 1, %v13909_v9 }
 0x16f   :  { %vm10499_vm2 = vc.u32 %v13997_v53, %v13996_v58  ;;  %v997_v45 = vadd.s32 %v991_v15, %v987_v22  ;;  %v1272_v23 = vshrl.u32 %v10468_v13, 16  ;;  %v972_v14 = vshrl.u32 %v10447_v17, 16 }
 0x170   :  { %v981_v41 = vadd.s32 %v980_v6, %v970_v42  ;;  %v998_v16 = vadd.s32 %v996_v18, %v14000_v24  ;;  %v727_v4 = vsel %vm606_vm12, %v726_v26, %v725_v40  ;;  %v855_v30 = vsel %vm853_vm15, %v854_v7, %v850_v32 }
 0x171   :  { %v992_v60 = vshrl.u32 %v9881_v2, 16  ;;  %vm999_vm3 = vc.u32 %v997_v45, %v993_v11  ;;  %v729_v51 = vsel %vm606_vm12, %v728_v55, %v10344_v62  ;;  %v730_v21 = vsel %vm10454_vm14, %v13988_v59, %v727_v4  ;;  %v14005_v2 = vld [vmem:[#allocation45_spill] sm:$0xff]  ;;  %v14008_v4 = vld [vmem:[#allocation40_spill] sm:$0xff] }
 0x172   :  { %v14003_v36 = vmul.u32 %v14001_v61, %v14002_v57  ;;  %v1000_v37 = vsel %vm999_vm3, 1, %v13909_v9  ;;  %v732_v25 = vmul.f32 %v730_v21, %v730_v21  ;;  %v994_v20 = vshrl.u32 %v989_v0, 16  ;;  %v14011_v61 = vld [vmem:[#allocation54_spill] sm:$0xff] }
 0x173   :  { %v1002_v44 = vadd.s32 %v1000_v37, %v998_v16  ;;  %v14006_v33 = vand.u32 65535, %v14005_v2  ;;  %v1313_v62 = vmul.u32 %v9927_v28, %v10383_v54  ;;  %v10527_v46 = vadd.s32 %v981_v41, %v972_v14  ;;  %v14013_v37 = vld [vmem:[#allocation48_spill] sm:$0xff] }
 0x174   :  { %v856_v17 = vadd.s32 %v855_v30, %v14003_v36  ;;  %v10529_v10 = vadd.s32 %v997_v45, %v993_v11  ;;  %v731_v5 = vsel %vm10454_vm14, 0, %v729_v51  ;;  %v733_v35 = vmul.f32 -0.001358992, %v732_v25  ;;  %v14007_v45 = vld [vmem:[#allocation57_spill] sm:$0xff]  ;;  %v14009_v30 = vld [vmem:[#allocation47_spill] sm:$0xff] }
 0x175   :  { %v10523_v34 = vmul.u32 %v14006_v33, %v14004_v3  ;;  %v740_v38 = vmul.f32 -0.00019511016, %v732_v25  ;;  %v1003_v50 = vadd.s32 %v1002_v44, %v992_v60  ;;  %v1271_v27 = vand.u32 65535, %v10468_v13 }
 0x176   :  { %v857_v19 = vadd.s32 536870912, %v856_v17  ;;  %v10537_v1 = vmul.u32 %v1272_v23, %v10077_v29  ;;  %v1293_v47 = vand.u32 65535, %v10396_v49  ;;  %v734_v22 = vadd.f32 0.041655596, %v733_v35 }
 0x177   :  { %v741_v42 = vadd.f32 0.008332121, %v740_v38  ;;  %v1004_v43 = vadd.s32 %v1003_v50, %v994_v20  ;;  %v1125_v39 = vshll.u32 %v10523_v34, 16  ;;  %v1999_v0 = vadd.s32 3, %v731_v5  ;;  %v14016_v38 = vld [vmem:[#allocation9_spill] sm:$0xff] }
 0x178   :  { %v10540_v8 = vshrl.u32 %v857_v19, 30  ;;  %v748_v15 = vand.u32 3, %v731_v5  ;;  %vm1007_vm4 = vc.u32 %v10527_v46, %v10529_v10  ;;  %v1294_v55 = vshrl.u32 %v10396_v49, 16  ;;  %v14015_v19 = vld [vmem:[#allocation55_spill] sm:$0xff] }
 0x179   :  { %v735_v32 = vmul.f32 %v734_v22, %v732_v25  ;;  %v742_v12 = vmul.f32 %v741_v42, %v732_v25  ;;  %v1008_v48 = vadd.s32 1, %v1004_v43  ;;  %v10550_v6 = vmul.u32 %v1271_v27, %v10077_v29 }
 0x17a   :  { %v859_v40 = vshll.u32 %v10540_v8, 30  ;;  %v1277_v11 = vshll.u32 %v10537_v1, 16  ;;  %v1128_v53 = vsel %vm10499_vm2, 1, %v13909_v9  ;;  %vm1131_vm5 = vc.u32 %v14007_v45, %v1125_v39 }
 0x17b   :  { %v736_v26 = vadd.f32 -0.4999988, %v735_v32  ;;  %v743_v7 = vadd.f32 -0.16666654, %v742_v12  ;;  %v1009_v18 = vsel %vm1007_vm4, %v1008_v48, %v1004_v43  ;;  %v2000_v14 = vand.u32 3, %v1999_v0 }
 0x17c   :  { %v10553_v58 = vsub.s32 %v856_v17, %v859_v40  ;;  %vm750_vm7 = vcmp.eq.s32.totalorder %v748_v15, 0  ;;  %vm749_vm10 = vcmp.lt.s32.totalorder %v748_v15, 2  ;;  %vm753_vm8 = vcmp.eq.s32.totalorder %v748_v15, 2  ;;  %v14012_v17 = vld [vmem:[#allocation46_spill] sm:$0xff] }
 0x17d   :  { %v737_v24 = vmul.f32 %v736_v26, %v732_v25  ;;  %v744_v16 = vmul.f32 %v743_v7, %v732_v25  ;;  %v14010_v60 = vmul.u32 %v14008_v4, %v14009_v30  ;;  %vm747_vm11 = vweird.f32 %v13988_v59 }
 0x17e   :  { %vm861_vm6 = vcmp.lt.s32.totalorder %v10553_v58, 0  ;;  %v862_v41 = vsub.s32 0, %v10553_v58  ;;  %v1130_v57 = vadd.s32 %v1128_v53, %v14011_v61  ;;  %v1132_v36 = vsel %vm1131_vm5, 1, %v13909_v9 }
 0x17f   :  { %v1010_v52 = vadd.s32 %v1009_v18, %v14010_v60  ;;  %v14014_v20 = vand.u32 65535, %v14013_v37  ;;  %v738_v2 = vadd.f32 1.0, %v737_v24  ;;  %v745_v25 = vadd.f32 1.0, %v744_v16 }
 0x180   :  { %v863_v51 = vsel %vm861_vm6, %v862_v41, %v10553_v58  ;;  %v1145_v5 = vshll.u32 %v14015_v19, 16  ;;  %vm2001_vm12 = vcmp.lt.s32.totalorder %v2000_v14, 2  ;;  %vm2002_vm13 = vcmp.eq.s32.totalorder %v2000_v14, 0 }
 0x181   :  { %v1141_v44 = vmul.u32 %v14014_v20, %v14012_v17  ;;  %v864_v33 = vclz %v863_v51  ;;  %vm2005_vm14 = vcmp.eq.s32.totalorder %v2000_v14, 2  ;;  %v1011_v35 = vadd.s32 536870912, %v1010_v52  ;;  %v14020_v14 = vld [vmem:[#allocation17_spill] sm:$0xff] }
 0x182   :  { %vm760_vm9 = vcmp.lt.s32.totalorder %v14016_v38, 0  ;;  %v746_v50 = vmul.f32 %v745_v25, %v730_v21  ;;  %v754_v22 = vxor.u32 2147483648, %v738_v2  ;;  %v852_v42 = vadd.s32 %v10472_v63, %v10470_v31 }
 0x183   :  { %v8528_v43 = vadd.s32 4294967294, %v864_v33  ;;  %v882_v39 = vsub.s32 4, %v10540_v8  ;;  %v10576_v0 = vshrl.u32 %v1011_v35, 30  ;;  %v1124_v40 = vshrl.u32 %v13995_v56, 16  ;;  %v14023_v35 = vld [vmem:[#allocation56_spill] sm:$0xff] }
 0x184   :  { %v1134_v32 = vadd.s32 %v1132_v36, %v1130_v57  ;;  %v751_v12 = vxor.u32 2147483648, %v746_v50  ;;  %v14017_v48 = vmov %v14014_v20  ;;  %vm10584_vm1 = vc.u32 %v1141_v44, %v1145_v5 }
 0x185   :  { %vm8529_vm15 = vcmp.lt.s32.totalorder %v8528_v43, 0  ;;  %v10582_v53 = vmul.u32 %v14017_v48, %v14004_v3  ;;  %v2007_v31 = vsel %vm2005_vm14, %v754_v22, %v746_v50  ;;  %v755_v63 = vsel %vm753_vm8, %v754_v22, %v746_v50 }
 0x186   :  { %v867_v26 = vsel %vm8529_vm15, 0, %v8528_v43  ;;  %v1013_v7 = vshll.u32 %v10576_v0, 30  ;;  %v2004_v56 = vsel %vm2002_vm13, %v738_v2, %v751_v12  ;;  %v752_v18 = vsel %vm750_vm7, %v738_v2, %v751_v12 }
 0x187   :  { %v868_v45 = vsub.s32 32, %v867_v26  ;;  %v869_v41 = vshll.u32 %v10553_v58, %v867_v26  ;;  %v2008_v3 = vsel %vm2001_vm12, %v2004_v56, %v2007_v31  ;;  %v756_v24 = vsel %vm749_vm10, %v752_v18, %v755_v63 }
 0x188   :  { %v872_v16 = vsub.s32 4294967266, %v867_v26  ;;  %v1014_v4 = vsub.s32 %v1010_v52, %v1013_v7  ;;  %v2009_v30 = vsel %vm747_vm11, nan, %v2008_v3  ;;  %v757_v60 = vsel %vm747_vm11, nan, %v756_v24 }
 0x189   :  { %v870_v51 = vshrl.u32 %v852_v42, %v868_v45  ;;  %v1147_v61 = vshll.u32 %v10582_v53, 16  ;;  %2671 = vmatmul.f32.gmra.mxu1 %v2009_v30  ;;  %2712 = vmatmul.f32.gmra.mxu2 %v757_v60  ;;  %v1150_v15 = vsel %vm10584_vm1, 1, %v13909_v9  ;;  %v10606_v52 = vmul.u32 %v1272_v23, %v14020_v14 }
 0x18a   :  { %v873_v57 = vadd.s32 127, %v872_v16  ;;  %vm1015_vm2 = vcmp.lt.s32.totalorder %v1014_v4, 0  ;;  %v1016_v58 = vsub.s32 0, %v1014_v4  ;;  %v1126_v59 = vshrl.u32 %v10523_v34, 16 }
 0x18b   :  { %v871_v36 = vor.u32 %v870_v51, %v869_v41  ;;  %v1135_v17 = vadd.s32 %v1134_v32, %v1124_v40  ;;  %v883_v20 = vsel %vm760_vm9, %v882_v39, %v10540_v8  ;;  %v1151_v25 = vadd.s32 %v1145_v5, %v1141_v44 }
 0x18c   :  { %v874_v37 = vshll.u32 %v873_v57, 23  ;;  %v1017_v2 = vsel %vm1015_vm2, %v1016_v58, %v1014_v4  ;;  %vm10615_vm3 = vc.u32 %v10550_v6, %v1277_v11  ;;  %v10622_v23 = vmul.u32 %v1294_v55, %v10077_v29 }
 0x18d   :  { %v1018_v34 = vclz %v1017_v2  ;;  %v1152_v50 = vadd.s32 %v1150_v15, %v14023_v35  ;;  %v14024_v22 = vand.u32 2147483647, %v14016_v38  ;;  %v878_v5 = vcvt.s32.f32 %v871_v36  ;;  %v14029_v2 = vld [vmem:[#allocation50_spill] sm:$0xff] }
 0x18e   :  { %v875_v44 = vor.u32 4788187, %v874_v37  ;;  %vm1153_vm5 = vc.u32 %v1151_v25, %v1147_v61  ;;  %v1006_v43 = vadd.s32 %v10529_v10, %v10527_v46  ;;  %v1146_v40 = vshrl.u32 %v14015_v19, 16 }
 0x18f   :  { %vm10627_vm4 = vcmp.le.f32.partialorder %v14024_v22, 0.7853982  ;;  %v8531_v39 = vadd.s32 4294967294, %v1018_v34  ;;  %v10636_v12 = vadd.s32 %v1135_v17, %v1126_v59  ;;  %v1154_v48 = vsel %vm1153_vm5, 1, %v13909_v9 }
 0x190   :  { %v885_v42 = vsel %vm10627_vm4, 0, %v883_v20  ;;  %v876_v32 = vand.u32 2147483647, %v875_v44  ;;  %v10642_v21 = vmul.u32 %v1271_v27, %v14020_v14  ;;  %v1148_v31 = vshrl.u32 %v10582_v53, 16  ;;  %v14028_v20 = vld [vmem:[#allocation44_spill] sm:$0xff] }
 0x191   :  { %vm8532_vm7 = vcmp.lt.s32.totalorder %v8531_v39, 0  ;;  %v10645_v63 = vadd.s32 %v1151_v25, %v1147_v61  ;;  %v1156_v26 = vadd.s32 %v1154_v48, %v1152_v50  ;;  %v1283_v46 = vadd.s32 %v1277_v11, %v10550_v6 }
 0x192   :  { %v1298_v10 = vmul.u32 %v1294_v55, %v14020_v14  ;;  %v879_v19 = vmul.f32 %v878_v5, %v876_v32  ;;  %v1021_v7 = vsel %vm8532_vm7, 0, %v8531_v39  ;;  %v2154_v41 = vadd.s32 3, %v885_v42  ;;  %v14027_v55 = vld [vmem:[#allocation16_spill] sm:$0xff] }
 0x193   :  { %v1022_v56 = vsub.s32 32, %v1021_v7  ;;  %v1023_v13 = vshll.u32 %v1014_v4, %v1021_v7  ;;  %v1026_v27 = vsub.s32 4294967266, %v1021_v7  ;;  %v1157_v18 = vadd.s32 %v1156_v26, %v1146_v40 }
 0x194   :  { %v880_v45 = vxor.u32 2147483648, %v879_v19  ;;  %v1279_v53 = vshll.u32 %v10642_v21, 16  ;;  %v1282_v3 = vsel %vm10615_vm3, 1, %v13909_v9  ;;  %vm1161_vm6 = vc.u32 %v10636_v12, %v10645_v63 }
 0x195   :  { %v1024_v24 = vshrl.u32 %v1006_v43, %v1022_v56  ;;  %v1027_v6 = vadd.s32 127, %v1026_v27  ;;  %v1158_v11 = vadd.s32 %v1157_v18, %v1148_v31  ;;  %vm914_vm10 = vcmp.lt.s32.totalorder %v14027_v55, 0 }
 0x196   :  { %v881_v16 = vsel %vm760_vm9, %v880_v45, %v879_v19  ;;  %v1295_v4 = vmul.u32 %v1293_v47, %v10077_v29  ;;  %v10668_v30 = vmul.u32 %v1293_v47, %v14020_v14  ;;  %v1299_v60 = vshll.u32 %v10622_v23, 16 }
 0x197   :  { %v10674_v51 = vsel %vm10627_vm4, %v14016_v38, %v881_v16  ;;  %v1025_v61 = vor.u32 %v1024_v24, %v1023_v13  ;;  %v1028_v57 = vshll.u32 %v1027_v6, 23  ;;  %v1162_v58 = vadd.s32 1, %v1158_v11 }
 0x198   :  { %v886_v15 = vmul.f32 %v10674_v51, %v10674_v51  ;;  %v10678_v36 = vand.u32 3, %v885_v42  ;;  %v1036_v29 = vsub.s32 4, %v10576_v0  ;;  %vm1285_vm8 = vc.u32 %v1283_v46, %v1279_v53 }
 0x199   :  { %v1029_v49 = vor.u32 4788187, %v1028_v57  ;;  %v1032_v47 = vcvt.s32.f32 %v1025_v61  ;;  %v1163_v14 = vsel %vm1161_vm6, %v1162_v58, %v1158_v11  ;;  %v1301_v59 = vshll.u32 %v10668_v30, 16 }
 0x19a   :  { %v887_v17 = vmul.f32 -0.001358992, %v886_v15  ;;  %v894_v37 = vmul.f32 -0.00019511016, %v886_v15  ;;  %v14030_v25 = vmul.u32 %v14028_v20, %v14029_v2  ;;  %v1284_v34 = vadd.s32 %v1282_v3, %v10606_v52 }
 0x19b   :  { %v1030_v35 = vand.u32 2147483647, %v1029_v49  ;;  %v1286_v50 = vsel %vm1285_vm8, 1, %v13909_v9  ;;  %vm1303_vm11 = vc.u32 %v1295_v4, %v1299_v60  ;;  %v1305_v22 = vadd.s32 %v1299_v60, %v1295_v4 }
 0x19c   :  { %v1164_v33 = vadd.s32 %v1163_v14, %v14030_v25  ;;  %v888_v8 = vadd.f32 0.041655596, %v887_v17  ;;  %v895_v44 = vadd.f32 0.008332121, %v894_v37  ;;  %v1304_v42 = vsel %vm1303_vm11, 1, %v13909_v9 }
 0x19d   :  { %v14031_v43 = vand.u32 2147483647, %v14027_v55  ;;  %v1033_v40 = vmul.f32 %v1032_v47, %v1030_v35  ;;  %v1306_v32 = vadd.s32 %v1304_v42, %v1298_v10  ;;  %vm1307_vm13 = vc.u32 %v1305_v22, %v1301_v59 }
 0x19e   :  { %v1165_v5 = vadd.s32 536870912, %v1164_v33  ;;  %v889_v52 = vmul.f32 %v888_v8, %v886_v15  ;;  %v896_v48 = vmul.f32 %v895_v44, %v886_v15  ;;  %v2155_v31 = vand.u32 3, %v2154_v41 }
 0x19f   :  { %vm10693_vm12 = vcmp.le.f32.partialorder %v14031_v43, 0.7853982  ;;  %v1034_v46 = vxor.u32 2147483648, %v1033_v40  ;;  %v1278_v19 = vshrl.u32 %v10537_v1, 16  ;;  %v1288_v7 = vadd.s32 %v1286_v50, %v1284_v34 }
 0x1a0   :  { %v10699_v26 = vshrl.u32 %v1165_v5, 30  ;;  %v1308_v56 = vsel %vm1307_vm13, 1, %v13909_v9  ;;  %v890_v13 = vadd.f32 -0.4999988, %v889_v52  ;;  %v897_v27 = vadd.f32 -0.16666654, %v896_v48 }
 0x1a1   :  { %v1037_v10 = vsel %vm914_vm10, %v1036_v29, %v10576_v0  ;;  %vm904_vm14 = vcmp.eq.s32.totalorder %v10678_v36, 0  ;;  %vm907_vm9 = vcmp.eq.s32.totalorder %v10678_v36, 2  ;;  %v1035_v45 = vsel %vm914_vm10, %v1034_v46, %v1033_v40 }
 0x1a2   :  { %v1167_v18 = vshll.u32 %v10699_v26, 30  ;;  %v1300_v1 = vshrl.u32 %v10622_v23, 16  ;;  %v1310_v41 = vadd.s32 %v1308_v56, %v1306_v32  ;;  %v891_v53 = vmul.f32 %v890_v13, %v886_v15 }
 0x1a3   :  { %v898_v3 = vmul.f32 %v897_v27, %v886_v15  ;;  %vm2156_vm15 = vcmp.lt.s32.totalorder %v2155_v31, 2  ;;  %vm903_vm1 = vcmp.lt.s32.totalorder %v10678_v36, 2  ;;  %v1038_v0 = vsel %vm10693_vm12, %v14027_v55, %v1035_v45 }
 0x1a4   :  { %v10716_v24 = vsub.s32 %v1164_v33, %v1167_v18  ;;  %vm901_vm2 = vweird.f32 %v14016_v38  ;;  %v1039_v6 = vsel %vm10693_vm12, 0, %v1037_v10  ;;  %v1040_v11 = vmul.f32 %v1038_v0, %v1038_v0 }
 0x1a5   :  { %v1280_v23 = vshrl.u32 %v10642_v21, 16  ;;  %v1289_v16 = vadd.s32 %v1288_v7, %v1278_v19  ;;  %v892_v4 = vadd.f32 1.0, %v891_v53  ;;  %v899_v60 = vadd.f32 1.0, %v898_v3 }
 0x1a6   :  { %vm1169_vm3 = vcmp.lt.s32.totalorder %v10716_v24, 0  ;;  %v1170_v61 = vsub.s32 0, %v10716_v24  ;;  %v1041_v57 = vmul.f32 -0.001358992, %v1040_v11  ;;  %v1048_v58 = vmul.f32 -0.00019511016, %v1040_v11 }
 0x1a7   :  { %v1302_v15 = vshrl.u32 %v10668_v30, 16  ;;  %v1311_v29 = vadd.s32 %v1310_v41, %v1300_v1  ;;  %v900_v49 = vmul.f32 %v899_v60, %v10674_v51  ;;  %v908_v47 = vxor.u32 2147483648, %v892_v4 }
 0x1a8   :  { %vm2157_vm4 = vcmp.eq.s32.totalorder %v2155_v31, 0  ;;  %v1171_v14 = vsel %vm1169_vm3, %v1170_v61, %v10716_v24  ;;  %vm2160_vm5 = vcmp.eq.s32.totalorder %v2155_v31, 2  ;;  %v1042_v21 = vadd.f32 0.041655596, %v1041_v57 }
 0x1a9   :  { %v1049_v17 = vadd.f32 0.008332121, %v1048_v58  ;;  %v1172_v37 = vclz %v1171_v14  ;;  %v905_v20 = vxor.u32 2147483648, %v900_v49  ;;  %v2309_v2 = vadd.s32 3, %v1039_v6 }
 0x1aa   :  { %v10727_v25 = vadd.s32 %v1289_v16, %v1280_v23  ;;  %v10731_v33 = vadd.s32 %v1305_v22, %v1301_v59  ;;  %v1043_v34 = vmul.f32 %v1042_v21, %v1040_v11  ;;  %v1312_v51 = vadd.s32 %v1311_v29, %v1302_v15  ;;  %v14034_v29 = vld [vmem:[#allocation26_spill] sm:$0xff] }
 0x1ab   :  { %v1050_v35 = vmul.f32 %v1049_v17, %v1040_v11  ;;  %v8534_v50 = vadd.s32 4294967294, %v1172_v37  ;;  %v2159_v8 = vsel %vm2157_vm4, %v892_v4, %v905_v20  ;;  %v2162_v44 = vsel %vm2160_vm5, %v908_v47, %v900_v49 }
 0x1ac   :  { %v906_v5 = vsel %vm904_vm14, %v892_v4, %v905_v20  ;;  %v909_v42 = vsel %vm907_vm9, %v908_v47, %v900_v49  ;;  %v2163_v43 = vsel %vm2156_vm15, %v2159_v8, %v2162_v44  ;;  %v1044_v30 = vadd.f32 -0.4999988, %v1043_v34 }
 0x1ad   :  { %v910_v39 = vsel %vm903_vm1, %v906_v5, %v909_v42  ;;  %v1051_v59 = vadd.f32 -0.16666654, %v1050_v35  ;;  %v2164_v22 = vsel %vm901_vm2, nan, %v2163_v43  ;;  %v1160_v32 = vadd.s32 %v10645_v63, %v10636_v12 }
 0x1ae   :  { %v911_v40 = vsel %vm901_vm2, nan, %v910_v39  ;;  %vm8535_vm7 = vcmp.lt.s32.totalorder %v8534_v50, 0  ;;  %2674 = vmatmul.f32.gmra.mxu1 %v2164_v22  ;;  %v1045_v52 = vmul.f32 %v1044_v30, %v1040_v11  ;;  %v1056_v31 = vand.u32 3, %v1039_v6 }
 0x1af   :  { %2715 = vmatmul.f32.gmra.mxu2 %v911_v40  ;;  %v1052_v48 = vmul.f32 %v1051_v59, %v1040_v11  ;;  %v1175_v46 = vsel %vm8535_vm7, 0, %v8534_v50  ;;  %vm1315_vm6 = vc.u32 %v10727_v25, %v10731_v33  ;;  %v2310_v13 = vand.u32 3, %v2309_v2 }
 0x1b0   :  { %v1176_v36 = vsub.s32 32, %v1175_v46  ;;  %v1177_v19 = vshll.u32 %v10716_v24, %v1175_v46  ;;  %v1180_v7 = vsub.s32 4294967266, %v1175_v46  ;;  %v1046_v56 = vadd.f32 1.0, %v1045_v52 }
 0x1b1   :  { %v1053_v38 = vadd.f32 1.0, %v1052_v48  ;;  %v1316_v27 = vadd.s32 1, %v1312_v51  ;;  %vm1055_vm10 = vweird.f32 %v14027_v55  ;;  %vm1057_vm8 = vcmp.lt.s32.totalorder %v1056_v31, 2 }
 0x1b2   :  { %v1178_v12 = vshrl.u32 %v1160_v32, %v1176_v36  ;;  %v1181_v63 = vadd.s32 127, %v1180_v7  ;;  %v1062_v18 = vxor.u32 2147483648, %v1046_v56  ;;  %vm1058_vm11 = vcmp.eq.s32.totalorder %v1056_v31, 0 }
 0x1b3   :  { %v1054_v10 = vmul.f32 %v1053_v38, %v1038_v0  ;;  %v1317_v45 = vsel %vm1315_vm6, %v1316_v27, %v1312_v51  ;;  %vm2311_vm12 = vcmp.lt.s32.totalorder %v2310_v13, 2  ;;  %vm2312_vm13 = vcmp.eq.s32.totalorder %v2310_v13, 0 }
 0x1b4   :  { %v1179_v1 = vor.u32 %v1178_v12, %v1177_v19  ;;  %v1182_v41 = vshll.u32 %v1181_v63, 23  ;;  %v1318_v53 = vadd.s32 %v1317_v45, %v1313_v62  ;;  %vm1061_vm14 = vcmp.eq.s32.totalorder %v1056_v31, 2  ;;  %v10785_v63 = vld [vmem:[%s13701_s9 + $0x30] sm:$0xff] }
 0x1b5   :  { %v1059_v3 = vxor.u32 2147483648, %v1054_v10  ;;  %vm2315_vm9 = vcmp.eq.s32.totalorder %v2310_v13, 2  ;;  %v1063_v4 = vsel %vm1061_vm14, %v1062_v18, %v1054_v10  ;;  %vm1068_vm15 = vcmp.lt.s32.totalorder %v14034_v29, 0 }
 0x1b6   :  { %v1183_v24 = vor.u32 4788187, %v1182_v41  ;;  %v1186_v6 = vcvt.s32.f32 %v1179_v1  ;;  %v1319_v11 = vadd.s32 536870912, %v1318_v53  ;;  %v2317_v0 = vsel %vm2315_vm9, %v1062_v18, %v1054_v10  ;;  %v10792_v41 = vld [vmem:[%s13701_s9 + $0x28] sm:$0xff] }
 0x1b7   :  { %v2314_v23 = vsel %vm2312_vm13, %v1046_v56, %v1059_v3  ;;  %v1060_v16 = vsel %vm1058_vm11, %v1046_v56, %v1059_v3  ;;  %v14035_v49 = vand.u32 2147483647, %v14034_v29  ;;  %v1190_v37 = vsub.s32 4, %v10699_v26 }
 0x1b8   :  { %v2318_v60 = vsel %vm2311_vm12, %v2314_v23, %v2317_v0  ;;  %v1064_v61 = vsel %vm1057_vm8, %v1060_v16, %v1063_v4  ;;  %v1184_v57 = vand.u32 2147483647, %v1183_v24  ;;  %v10754_v58 = vshrl.u32 %v1319_v11, 30 }
 0x1b9   :  { %v2319_v28 = vsel %vm1055_vm10, nan, %v2318_v60  ;;  %v1065_v54 = vsel %vm1055_vm10, nan, %v1064_v61  ;;  %vm10764_vm1 = vcmp.le.f32.partialorder %v14035_v49, 0.7853982  ;;  %v1191_v50 = vsel %vm1068_vm15, %v1190_v37, %v10699_v26  ;;  %v10838_v37 = vld [vmem:[%s13701_s9 + $0x8] sm:$0xff] }
 0x1ba   :  { %2677 = vmatmul.f32.gmra.mxu1 %v2319_v28  ;;  %2718 = vmatmul.f32.gmra.mxu2 %v1065_v54  ;;  %v1187_v62 = vmul.f32 %v1186_v6, %v1184_v57  ;;  %v1321_v15 = vshll.u32 %v10754_v58, 30  ;;  %v1193_v43 = vsel %vm10764_vm1, 0, %v1191_v50  ;;  %v1314_v39 = vadd.s32 %v10731_v33, %v10727_v25  ;;  %v10780_v33 = vld [vmem:[%s13701_s9 + $0x38] sm:$0xff]  ;;  %v10801_v6 = vld [vmem:[%s13701_s9 + $0x20] sm:$0xff] }
 0x1bb   :  { %v2464_v31 = vadd.s32 3, %v1193_v43  ;;  %v1210_v25 = vand.u32 3, %v1193_v43  ;;  %2823 = vmatpush.msrb.mxu0 %v10780_v33  ;;  %2904 = vmatpush.msrb.mxu3 %v10780_v33  ;;  %vm1209_vm5 = vweird.f32 %v14034_v29  ;;  %vm2790_vm14 = vcmask 523264  }
 0x1bc   :  { %v1188_v14 = vxor.u32 2147483648, %v1187_v62  ;;  %v1322_v21 = vsub.s32 %v1318_v53, %v1321_v15  ;;  %v14038_v53 = vld [vmem:[#allocation41_spill] sm:$0xff] }
 0x1bd   :  { %v2465_v12 = vand.u32 3, %v2464_v31  ;;  %vm1222_vm4 = vcmp.lt.s32.totalorder %v14038_v53, 0  ;;  %2824 = vmatpush.msrb.mxu0 %v10785_v63  ;;  %2905 = vmatpush.msrb.mxu3 %v10785_v63  ;;  %vm1211_vm10 = vcmp.lt.s32.totalorder %v1210_v25, 2  ;;  %vm1212_vm11 = vcmp.eq.s32.totalorder %v1210_v25, 0 }
 0x1be   :  { %v1189_v17 = vsel %vm1068_vm15, %v1188_v14, %v1187_v62  ;;  %vm1323_vm2 = vcmp.lt.s32.totalorder %v1322_v21, 0  ;;  %v1324_v55 = vsub.s32 0, %v1322_v21  ;;  %vm1215_vm12 = vcmp.eq.s32.totalorder %v1210_v25, 2  ;;  %v10815_v62 = vld [vmem:[%s13701_s9 + $0x18] sm:$0xff]  ;;  %v10827_v14 = vld [vmem:[%s13701_s9 + $0x10] sm:$0xff] }
 0x1bf   :  { %v1192_v20 = vsel %vm10764_vm1, %v14034_v29, %v1189_v17  ;;  %vm2466_vm7 = vcmp.lt.s32.totalorder %v2465_v12, 2  ;;  %vm2467_vm6 = vcmp.eq.s32.totalorder %v2465_v12, 0  ;;  %vm2470_vm8 = vcmp.eq.s32.totalorder %v2465_v12, 2  ;;  %2825 = vmatpush.msrb.mxu0 %v10792_v41  ;;  %2906 = vmatpush.msrb.mxu3 %v10792_v41 }
 0x1c0   :  { %v1194_v2 = vmul.f32 %v1192_v20, %v1192_v20  ;;  %v1325_v34 = vsel %vm1323_vm2, %v1324_v55, %v1322_v21  ;;  %v14039_v57 = vand.u32 2147483647, %v14038_v53  ;;  %v2746_v55 = vpop.f32.mrf.mxu3 }
 0x1c1   :  { %v1326_v35 = vclz %v1325_v34  ;;  %2826 = vmatpush.msrb.mxu0 %v10801_v6  ;;  %2907 = vmatpush.msrb.mxu3 %v10801_v6 }
 0x1c2   :  { %v1195_v51 = vmul.f32 -0.001358992, %v1194_v2  ;;  %v1202_v8 = vmul.f32 -0.00019511016, %v1194_v2  ;;  %vm10807_vm13 = vcmp.le.f32.partialorder %v14039_v57, 0.7853982 }
 0x1c3   :  { %v8537_v44 = vadd.s32 4294967294, %v1326_v35  ;;  %2827 = vmatpush.msrb.mxu0 %v10815_v62  ;;  %2908 = vmatpush.msrb.mxu3 %v10815_v62  ;;  %v10845_v35 = vld [vmem:[%s13701_s9] sm:$0xff] }
 0x1c4   :  { %v1196_v5 = vadd.f32 0.041655596, %v1195_v51  ;;  %v1203_v42 = vadd.f32 0.008332121, %v1202_v8 }
 0x1c5   :  { %vm8538_vm3 = vcmp.lt.s32.totalorder %v8537_v44, 0  ;;  %2828 = vmatpush.msrb.mxu0 %v10827_v14  ;;  %2909 = vmatpush.msrb.mxu3 %v10827_v14 }
 0x1c6   :  { %v1197_v30 = vmul.f32 %v1196_v5, %v1194_v2  ;;  %v1204_v59 = vmul.f32 %v1203_v42, %v1194_v2  ;;  %v1329_v22 = vsel %vm8538_vm3, 0, %v8537_v44  ;;  %v10855_v42 = vld [vmem:[%s13700_s6] ss:$0 sm:$0xff] }
 0x1c7   :  { %v1330_v40 = vsub.s32 32, %v1329_v22  ;;  %v1331_v32 = vshll.u32 %v1322_v21, %v1329_v22  ;;  %v1334_v52 = vsub.s32 4294967266, %v1329_v22  ;;  %v1344_v21 = vsub.s32 4, %v10754_v58  ;;  %2829 = vmatpush.msrb.mxu0 %v10838_v37  ;;  %2910 = vmatpush.msrb.mxu3 %v10838_v37 }
 0x1c8   :  { %v1198_v48 = vadd.f32 -0.4999988, %v1197_v30  ;;  %v1205_v26 = vadd.f32 -0.16666654, %v1204_v59 }
 0x1c9   :  { %v1332_v46 = vshrl.u32 %v1314_v39, %v1330_v40  ;;  %v1335_v36 = vadd.s32 127, %v1334_v52  ;;  %v1345_v50 = vsel %vm1222_vm4, %v1344_v21, %v10754_v58  ;;  %2830 = vmatpush.msrb.mxu0 %v10845_v35  ;;  %2911 = vmatpush.msrb.mxu3 %v10845_v35 }
 0x1ca   :  { %v1199_v19 = vmul.f32 %v1198_v48, %v1194_v2  ;;  %v1206_v7 = vmul.f32 %v1205_v26, %v1194_v2  ;;  %v1347_v58 = vsel %vm10807_vm13, 0, %v1345_v50  ;;  %v2749_v26 = vpop.f32.mrf.mxu3 }
 0x1cb   :  { %v1333_v56 = vor.u32 %v1332_v46, %v1331_v32  ;;  %v1336_v38 = vshll.u32 %v1335_v36, 23  ;;  %v2619_v32 = vadd.s32 3, %v1347_v58 }
 0x1cc   :  { %v1200_v13 = vadd.f32 1.0, %v1199_v19  ;;  %v1207_v27 = vadd.f32 1.0, %v1206_v7  ;;  %v1364_v7 = vand.u32 3, %v1347_v58 }
 0x1cd   :  { %v1337_v10 = vor.u32 4788187, %v1336_v38  ;;  %v1340_v18 = vcvt.s32.f32 %v1333_v56  ;;  %v2620_v38 = vand.u32 3, %v2619_v32 }
 0x1ce   :  { %v1208_v45 = vmul.f32 %v1207_v27, %v1192_v20  ;;  %v1216_v1 = vxor.u32 2147483648, %v1200_v13  ;;  %v2663_v20 = vpop.f32.mrf.mxu1  ;;  %vm1365_vm9 = vcmp.lt.s32.totalorder %v1364_v7, 2  ;;  %vm1366_vm15 = vcmp.eq.s32.totalorder %v1364_v7, 0 }
 0x1cf   :  { %v1338_v3 = vand.u32 2147483647, %v1337_v10  ;;  %vm2621_vm1 = vcmp.lt.s32.totalorder %v2620_v38, 2  ;;  %vm2622_vm2 = vcmp.eq.s32.totalorder %v2620_v38, 0  ;;  %vm2625_vm3 = vcmp.eq.s32.totalorder %v2620_v38, 2 }
 0x1d0   :  { %v1213_v24 = vxor.u32 2147483648, %v1208_v45  ;;  %v2472_v0 = vsel %vm2470_vm8, %v1216_v1, %v1208_v45  ;;  %v1217_v4 = vsel %vm1215_vm12, %v1216_v1, %v1208_v45 }
 0x1d1   :  { %v1341_v11 = vmul.f32 %v1340_v18, %v1338_v3 }
 0x1d2   :  { %v2469_v23 = vsel %vm2467_vm6, %v1200_v13, %v1213_v24  ;;  %v1214_v16 = vsel %vm1212_vm11, %v1200_v13, %v1213_v24  ;;  %v2704_v51 = vpop.f32.mrf.mxu2 }
 0x1d3   :  { %v2473_v60 = vsel %vm2466_vm7, %v2469_v23, %v2472_v0  ;;  %v1218_v61 = vsel %vm1211_vm10, %v1214_v16, %v1217_v4  ;;  %v1342_v54 = vxor.u32 2147483648, %v1341_v11  ;;  %v2705_v5 = vadd.f32 %v2704_v51, %v2663_v20  ;;  %v2752_v16 = vpop.f32.mrf.mxu3 }
 0x1d4   :  { %v2474_v15 = vsel %vm1209_vm5, nan, %v2473_v60  ;;  %v1219_v49 = vsel %vm1209_vm5, nan, %v1218_v61  ;;  %vm1363_vm5 = vweird.f32 %v14038_v53 }
 0x1d5   :  { %2680 = vmatmul.f32.gmra.mxu1 %v2474_v15  ;;  %2721 = vmatmul.f32.gmra.mxu2 %v1219_v49  ;;  %v1343_v47 = vsel %vm1222_vm4, %v1342_v54, %v1341_v11  ;;  %v2770_v30 = vadd.f32 %v2746_v55, %v2705_v5  ;;  %vm1369_vm4 = vcmp.eq.s32.totalorder %v1364_v7, 2 }
 0x1d6   :  { %v1346_v17 = vsel %vm10807_vm13, %v14038_v53, %v1343_v47  ;;  %v2666_v31 = vpop.f32.mrf.mxu1 }
 0x1d7   :  { %v1348_v29 = vmul.f32 %v1346_v17, %v1346_v17  ;;  %v10862_v40 = vadd.f32 %v10855_v42, %v2770_v30 }
 0x1d9   :  { %v1349_v2 = vmul.f32 -0.001358992, %v1348_v29  ;;  %v1356_v34 = vmul.f32 -0.00019511016, %v1348_v29  ;;  %8571 = vmatmul.msk.f32.vlgmr.msrb.gmra.mxu0 %vm2790_vm14, %v10862_v40 }
 0x1da   :  { %v2707_v46 = vpop.f32.mrf.mxu2 }
 0x1db   :  { %v1350_v8 = vadd.f32 0.041655596, %v1349_v2  ;;  %v1357_v44 = vadd.f32 0.008332121, %v1356_v34  ;;  %v2708_v56 = vadd.f32 %v2707_v46, %v2666_v31  ;;  %v2755_v49 = vpop.f32.mrf.mxu3 }
 0x1dd   :  { %v1351_v43 = vmul.f32 %v1350_v8, %v1348_v29  ;;  %v1358_v39 = vmul.f32 %v1357_v44, %v1348_v29  ;;  %v2771_v12 = vadd.f32 %v2749_v26, %v2708_v56 }
 0x1df   :  { %v1352_v59 = vadd.f32 -0.4999988, %v1351_v43  ;;  %v1359_v22 = vadd.f32 -0.16666654, %v1358_v39  ;;  %v2783_v10 = vadd.f32 %v10855_v42, %v2771_v12 }
 0x1e1   :  { %v1353_v52 = vmul.f32 %v1352_v59, %v1348_v29  ;;  %v1360_v48 = vmul.f32 %v1359_v22, %v1348_v29  ;;  %8572 = vmatmul.msk.f32.gmra.mxu0 %vm2790_vm14, %v2783_v10 }
 0x1e3   :  { %v1354_v36 = vadd.f32 1.0, %v1353_v52  ;;  %v1361_v19 = vadd.f32 1.0, %v1360_v48 }
 0x1e4   :  { %v2669_v4 = vpop.f32.mrf.mxu1 }
 0x1e5   :  { %v1362_v13 = vmul.f32 %v1361_v19, %v1346_v17  ;;  %v1370_v27 = vxor.u32 2147483648, %v1354_v36  ;;  %v2758_v17 = vpop.f32.mrf.mxu3 }
 0x1e7   :  { %v1367_v25 = vxor.u32 2147483648, %v1362_v13  ;;  %v2627_v45 = vsel %vm2625_vm3, %v1370_v27, %v1362_v13  ;;  %v1371_v3 = vsel %vm1369_vm4, %v1370_v27, %v1362_v13 }
 0x1e9   :  { %v2624_v18 = vsel %vm2622_vm2, %v1354_v36, %v1367_v25  ;;  %v1368_v1 = vsel %vm1366_vm15, %v1354_v36, %v1367_v25 }
 0x1ea   :  { %v2628_v24 = vsel %vm2621_vm1, %v2624_v18, %v2627_v45  ;;  %v1372_v11 = vsel %vm1365_vm9, %v1368_v1, %v1371_v3  ;;  %v2710_v60 = vpop.f32.mrf.mxu2 }
 0x1eb   :  { %v2629_v23 = vsel %vm1363_vm5, nan, %v2628_v24  ;;  %v1373_v0 = vsel %vm1363_vm5, nan, %v1372_v11  ;;  %v2711_v61 = vadd.f32 %v2710_v60, %v2669_v4  ;;  %v3408_v60 = vld [vmem:[%s13704_s10 + $0x38] sm:$0xff] }
 0x1ec   :  { %2683 = vmatmul.f32.gmra.mxu1 %v2629_v23  ;;  %2724 = vmatmul.f32.gmra.mxu2 %v1373_v0 }
 0x1ed   :  { %v2772_v57 = vadd.f32 %v2752_v16, %v2711_v61  ;;  %v2761_v50 = vpop.f32.mrf.mxu3  ;;  %3445 = vmatpush.msra.mxu0 %v3408_v60  ;;  %8781 = vmatpush.msrb.mxu1 %v3408_v60  ;;  %v3407_v61 = vld [vmem:[%s13704_s10 + $0x30] sm:$0xff] }
 0x1ef   :  { %v2784_v28 = vadd.f32 %v10855_v42, %v2772_v57  ;;  %3446 = vmatpush.msra.mxu0 %v3407_v61  ;;  %8782 = vmatpush.msrb.mxu1 %v3407_v61 }
 0x1f1   :  { %8573 = vmatmul.msk.f32.gmra.mxu0 %vm2790_vm14, %v2784_v28 }
 0x1f5   :  { %v2764_v43 = vpop.f32.mrf.mxu3 }
 0x1fd   :  { %v2767_v19 = vpop.f32.mrf.mxu3 }
 0x206   :  { %v2672_v54 = vpop.f32.mrf.mxu1 }
 0x20c   :  { %v2713_v15 = vpop.f32.mrf.mxu2 }
 0x20d   :  { %v2714_v47 = vadd.f32 %v2713_v15, %v2672_v54 }
 0x20f   :  { %v2773_v53 = vadd.f32 %v2755_v49, %v2714_v47  ;;  %v3406_v47 = vld [vmem:[%s13704_s10 + $0x28] sm:$0xff] }
 0x210   :  { %3447 = vmatpush.msra.mxu0 %v3406_v47  ;;  %8783 = vmatpush.msrb.mxu1 %v3406_v47 }
 0x211   :  { %v2785_v21 = vadd.f32 %v10855_v42, %v2773_v53 }
 0x213   :  { %8574 = vmatmul.msk.f32.gmra.mxu0 %vm2790_vm14, %v2785_v21 }
 0x22b   :  { %v2675_v29 = vpop.f32.mrf.mxu1 }
 0x232   :  { %v2716_v55 = vpop.f32.mrf.mxu2 }
 0x233   :  { %v2717_v20 = vadd.f32 %v2716_v55, %v2675_v29 }
 0x235   :  { %v2774_v2 = vadd.f32 %v2758_v17, %v2717_v20 }
 0x237   :  { %v2786_v34 = vadd.f32 %v10855_v42, %v2774_v2  ;;  %v2678_v51 = vpop.f32.mrf.mxu1 }
 0x239   :  { %8575 = vmatmul.msk.f32.gmra.mxu0 %vm2790_vm14, %v2786_v34 }
 0x23d   :  { %v2719_v8 = vpop.f32.mrf.mxu2 }
 0x23e   :  { %v2720_v44 = vadd.f32 %v2719_v8, %v2678_v51 }
 0x240   :  { %v2775_v5 = vadd.f32 %v2761_v50, %v2720_v44 }
 0x242   :  { %v2787_v58 = vadd.f32 %v10855_v42, %v2775_v5 }
 0x244   :  { %8576 = vmatmul.msk.f32.gmra.mxu0 %vm2790_vm14, %v2787_v58 }
 0x252   :  { %v2681_v39 = vpop.f32.mrf.mxu1 }
 0x256   :  { %v2832_v52 = vpop.f32.mrf.mxu0 }
 0x257   :  { %v10880_v48 = vsub.f32 %v10862_v40, %v2832_v52 }
 0x258   :  { %v2722_v30 = vpop.f32.mrf.mxu2 }
 0x259   :  { %v2723_v59 = vadd.f32 %v2722_v30, %v2681_v39  ;;  %v2864_v26 = vmul.f32 %v10880_v48, %v10880_v48 }
 0x25b   :  { %v2776_v22 = vadd.f32 %v2764_v43, %v2723_v59  ;;  %8579 = vmatmul.msk.f32.vlgmr.msrb.gmra.mxu3 %vm2790_vm14, %v2864_v26 }
 0x25d   :  { %v2788_v32 = vadd.f32 %v10855_v42, %v2776_v22  ;;  %v10937_v22 = vld [vmem:[%s13702_s7] ss:$0 sm:$0xff] }
 0x25e   :  { %v2835_v31 = vpop.f32.mrf.mxu0 }
 0x25f   :  { %8577 = vmatmul.msk.f32.gmra.mxu0 %vm2790_vm14, %v2788_v32  ;;  %v10885_v46 = vsub.f32 %v2783_v10, %v2835_v31  ;;  %v10944_v31 = vld [vmem:[%s13703_s8] ss:$0 sm:$0xff] }
 0x261   :  { %v2865_v36 = vmul.f32 %v10885_v46, %v10885_v46 }
 0x263   :  { %8580 = vmatmul.msk.f32.gmra.mxu3 %vm2790_vm14, %v2865_v36 }
 0x269   :  { %v2684_v7 = vpop.f32.mrf.mxu1 }
 0x26e   :  { %v2838_v27 = vpop.f32.mrf.mxu0 }
 0x26f   :  { %v2725_v56 = vpop.f32.mrf.mxu2  ;;  %v10891_v12 = vsub.f32 %v2784_v28, %v2838_v27 }
 0x270   :  { %v2726_v38 = vadd.f32 %v2725_v56, %v2684_v7 }
 0x271   :  { %v2866_v25 = vmul.f32 %v10891_v12, %v10891_v12 }
 0x272   :  { %v2777_v13 = vadd.f32 %v2767_v19, %v2726_v38 }
 0x273   :  { %8581 = vmatmul.msk.f32.gmra.mxu3 %vm2790_vm14, %v2866_v25 }
 0x274   :  { %v2789_v40 = vadd.f32 %v10855_v42, %v2777_v13 }
 0x276   :  { %8578 = vmatmul.msk.f32.gmra.mxu0 %vm2790_vm14, %v2789_v40 }
 0x290   :  { %v2841_v10 = vpop.f32.mrf.mxu0 }
 0x291   :  { %v10897_v18 = vsub.f32 %v2785_v21, %v2841_v10 }
 0x293   :  { %v2867_v45 = vmul.f32 %v10897_v18, %v10897_v18 }
 0x295   :  { %8582 = vmatmul.msk.f32.gmra.mxu3 %vm2790_vm14, %v2867_v45 }
 0x2b6   :  { %v2844_v1 = vpop.f32.mrf.mxu0 }
 0x2b7   :  { %v10902_v42 = vsub.f32 %v2786_v34, %v2844_v1 }
 0x2b9   :  { %v2868_v3 = vmul.f32 %v10902_v42, %v10902_v42 }
 0x2bb   :  { %8583 = vmatmul.msk.f32.gmra.mxu3 %vm2790_vm14, %v2868_v3 }
 0x2c1   :  { %v2847_v24 = vpop.f32.mrf.mxu0 }
 0x2c2   :  { %v10907_v11 = vsub.f32 %v2787_v58, %v2847_v24 }
 0x2c4   :  { %v2869_v23 = vmul.f32 %v10907_v11, %v10907_v11 }
 0x2c6   :  { %8584 = vmatmul.msk.f32.gmra.mxu3 %vm2790_vm14, %v2869_v23  ;;  %v3404_v23 = vld [vmem:[%s13704_s10 + $0x18] sm:$0xff] }
 0x2dc   :  { %v2850_v0 = vpop.f32.mrf.mxu0 }
 0x2dd   :  { %v10912_v16 = vsub.f32 %v2788_v32, %v2850_v0 }
 0x2de   :  { %v2913_v15 = vpop.f32.mrf.mxu3 }
 0x2df   :  { %v2870_v4 = vmul.f32 %v10912_v16, %v10912_v16  ;;  %v2914_v49 = vadd.f32 1e-05, %v2913_v15 }
 0x2e1   :  { %8585 = vmatmul.msk.f32.gmra.mxu3 %vm2790_vm14, %v2870_v4  ;;  %8817 = vrsqrt.f32 %v2914_v49  ;;  %vm2943_vm6 = vweird.f32 %v2914_v49 }
 0x2e6   :  { %v2916_v21 = vpop.f32.mrf.mxu3 }
 0x2e7   :  { %v8818_v53 = vpop.eup %8817  ;;  %v2917_v29 = vadd.f32 1e-05, %v2916_v21 }
 0x2e8   :  { %v2938_v17 = vmul.f32 %v8818_v53, %v2914_v49  ;;  %vm2944_vm7 = vweird.f32 %v8818_v53 }
 0x2e9   :  { %8819 = vrsqrt.f32 %v2917_v29  ;;  %vm2945_vm10 = vmor %vm2943_vm6, %vm2944_vm7  ;;  %vm2953_vm11 = vweird.f32 %v2917_v29 }
 0x2ea   :  { %v2939_v55 = vmul.f32 %v8818_v53, %v2938_v17 }
 0x2ec   :  { %v2940_v20 = vmul.f32 0.5, %v2939_v55 }
 0x2ee   :  { %v2941_v34 = vsub.f32 1.5, %v2940_v20 }
 0x2ef   :  { %v8820_v50 = vpop.eup %8819 }
 0x2f0   :  { %v2942_v8 = vmul.f32 %v8818_v53, %v2941_v34  ;;  %v2948_v44 = vmul.f32 %v8820_v50, %v2917_v29  ;;  %vm2954_vm8 = vweird.f32 %v8820_v50 }
 0x2f1   :  { %vm2955_vm12 = vmor %vm2953_vm11, %vm2954_vm8 }
 0x2f2   :  { %v2946_v58 = vsel %vm2945_vm10, %v8818_v53, %v2942_v8  ;;  %v2949_v43 = vmul.f32 %v8820_v50, %v2948_v44 }
 0x2f3   :  { %v2853_v57 = vpop.f32.mrf.mxu0  ;;  %v3017_v59 = vmul.f32 %v2946_v58, %v10880_v48  ;;  %v3405_v48 = vld [vmem:[%s13704_s10 + $0x20] sm:$0xff] }
 0x2f4   :  { %v10923_v28 = vsub.f32 %v2789_v40, %v2853_v57  ;;  %v2950_v32 = vmul.f32 0.5, %v2949_v43  ;;  %3448 = vmatpush.msra.mxu0 %v3405_v48  ;;  %8784 = vmatpush.msrb.mxu1 %v3405_v48 }
 0x2f5   :  { %v3029_v26 = vmul.f32 %v10937_v22, %v3017_v59 }
 0x2f6   :  { %v2871_v54 = vmul.f32 %v10923_v28, %v10923_v28  ;;  %v2919_v2 = vpop.f32.mrf.mxu3  ;;  %v2951_v36 = vsub.f32 1.5, %v2950_v32  ;;  %3449 = vmatpush.msra.mxu0 %v3404_v23  ;;  %8785 = vmatpush.msrb.mxu1 %v3404_v23 }
 0x2f7   :  { %v2920_v51 = vadd.f32 1e-05, %v2919_v2  ;;  %v10950_v7 = vadd.f32 %v10944_v31, %v3029_v26 }
 0x2f8   :  { %8586 = vmatmul.msk.f32.gmra.mxu3 %vm2790_vm14, %v2871_v54  ;;  %v2952_v38 = vmul.f32 %v8820_v50, %v2951_v36 }
 0x2f9   :  { %8821 = vrsqrt.f32 %v2920_v51  ;;  %v10953_v40 = vmul.f32 0.70710677, %v10950_v7  ;;  %vm2963_vm9 = vweird.f32 %v2920_v51 }
 0x2fa   :  { %v2956_v25 = vsel %vm2955_vm12, %v8820_v50, %v2952_v38 }
 0x2fb   :  { %v3065_v45 = vmul.f32 %v10953_v40, %v10953_v40  ;;  %v3018_v1 = vmul.f32 %v2956_v25, %v10885_v46 }
 0x2fd   :  { %v10964_v60 = vmin.f32 %v3065_v45, 16.0  ;;  %v3030_v61 = vmul.f32 %v10937_v22, %v3018_v1 }
 0x2ff   :  { %v8822_v30 = vpop.eup %8821  ;;  %v3067_v15 = vmul.f32 2.1237322e-06, %v10964_v60  ;;  %v3078_v49 = vmul.f32 3.8918573e-05, %v10964_v60  ;;  %v10971_v47 = vadd.f32 %v10944_v31, %v3030_v61 }
 0x300   :  { %v2958_v52 = vmul.f32 %v8822_v30, %v2920_v51  ;;  %vm2964_vm13 = vweird.f32 %v8822_v30 }
 0x301   :  { %vm2965_vm15 = vmor %vm2963_vm9, %vm2964_vm13  ;;  %v3068_v53 = vadd.f32 0.00028619796, %v3067_v15  ;;  %v3079_v21 = vadd.f32 0.001143296, %v3078_v49  ;;  %v10977_v55 = vmul.f32 0.70710677, %v10971_v47 }
 0x302   :  { %v2959_v19 = vmul.f32 %v8822_v30, %v2958_v52 }
 0x303   :  { %v3069_v34 = vmul.f32 %v3068_v53, %v10964_v60  ;;  %v3080_v50 = vmul.f32 %v3079_v21, %v10964_v60  ;;  %v3105_v8 = vmul.f32 %v10977_v55, %v10977_v55 }
 0x304   :  { %v2960_v13 = vmul.f32 0.5, %v2959_v19 }
 0x305   :  { %v3081_v58 = vadd.f32 0.014752088, %v3080_v50  ;;  %v10989_v43 = vmin.f32 %v3105_v8, 16.0 }
 0x306   :  { %v2961_v10 = vsub.f32 1.5, %v2960_v13 }
 0x307   :  { %v3082_v52 = vmul.f32 %v3081_v58, %v10964_v60  ;;  %v3107_v26 = vmul.f32 2.1237322e-06, %v10989_v43  ;;  %v3118_v36 = vmul.f32 3.8918573e-05, %v10989_v43 }
 0x308   :  { %v2962_v0 = vmul.f32 %v8822_v30, %v2961_v10 }
 0x309   :  { %v3083_v13 = vadd.f32 0.112945676, %v3082_v52 }
 0x30a   :  { %v2966_v46 = vsel %vm2965_vm15, %v8822_v30, %v2962_v0 }
 0x30b   :  { %v3019_v29 = vmul.f32 %v2966_v46, %v10891_v12  ;;  %v3084_v45 = vmul.f32 %v3083_v13, %v10964_v60  ;;  %v11053_v13 = vmul.f32 0.5, %v10950_v7 }
 0x30d   :  { %v3031_v30 = vmul.f32 %v10937_v22, %v3019_v29  ;;  %v3085_v61 = vadd.f32 0.4994258, %v3084_v45 }
 0x30f   :  { %v10998_v19 = vadd.f32 %v10944_v31, %v3031_v30  ;;  %v3086_v21 = vmul.f32 %v3085_v61, %v10964_v60 }
 0x311   :  { %v11002_v10 = vmul.f32 0.70710677, %v10998_v19  ;;  %v11031_v8 = vadd.f32 1.0, %v3086_v21 }
 0x313   :  { %vm3093_vm11 = vweird.f32 %v11031_v8 }
 0x318   :  { %v2922_v5 = vpop.f32.mrf.mxu3 }
 0x319   :  { %v10931_v39 = vadd.f32 1e-05, %v2922_v5  ;;  %v3070_v5 = vadd.f32 0.0036580483, %v3069_v34 }
 0x31b   :  { %8823 = vrsqrt.f32 %v10931_v39  ;;  %vm2973_vm2 = vweird.f32 %v10931_v39 }
 0x321   :  { %v8824_v56 = vpop.eup %8823 }
 0x322   :  { %v2968_v27 = vmul.f32 %v8824_v56, %v10931_v39  ;;  %vm2974_vm1 = vweird.f32 %v8824_v56  ;;  %v3071_v39 = vmul.f32 %v3070_v5, %v10964_v60 }
 0x323   :  { %vm2975_vm3 = vmor %vm2973_vm2, %vm2974_vm1 }
 0x324   :  { %v2969_v3 = vmul.f32 %v8824_v56, %v2968_v27  ;;  %v3072_v48 = vadd.f32 0.05243302, %v3071_v39  ;;  %v3108_v27 = vadd.f32 0.00028619796, %v3107_v26 }
 0x326   :  { %v2970_v57 = vmul.f32 0.5, %v2969_v3  ;;  %v3109_v1 = vmul.f32 %v3108_v27, %v10989_v43  ;;  %v3073_v23 = vmul.f32 %v3072_v48, %v10964_v60 }
 0x328   :  { %v2971_v54 = vsub.f32 1.5, %v2970_v57  ;;  %v3074_v29 = vadd.f32 0.18741608, %v3073_v23 }
 0x32a   :  { %v2972_v20 = vmul.f32 %v8824_v56, %v2971_v54  ;;  %v3110_v54 = vadd.f32 0.0036580483, %v3109_v1  ;;  %v3075_v52 = vmul.f32 %v3074_v29, %v10964_v60 }
 0x32c   :  { %v2976_v59 = vsel %vm2975_vm3, %v8824_v56, %v2972_v20  ;;  %v3119_v56 = vadd.f32 0.001143296, %v3118_v36  ;;  %v3111_v20 = vmul.f32 %v3110_v54, %v10989_v43  ;;  %v3076_v1 = vadd.f32 1.1283791, %v3075_v52 }
 0x32d   :  { %v3020_v38 = vmul.f32 %v2976_v59, %v10897_v18  ;;  %v3145_v18 = vmul.f32 %v11002_v10, %v11002_v10  ;;  %v3403_v59 = vld [vmem:[%s13704_s10 + $0x10] sm:$0xff]  ;;  %v3099_v54 = vand.u32 2147483648, %v11031_v8 }
 0x32e   :  { %v3120_v3 = vmul.f32 %v3119_v56, %v10989_v43  ;;  %3450 = vmatpush.msra.mxu0 %v3403_v59  ;;  %8786 = vmatpush.msrb.mxu1 %v3403_v59 }
 0x32f   :  { %v3032_v57 = vmul.f32 %v10937_v22, %v3020_v38  ;;  %v11017_v49 = vmin.f32 %v3145_v18, 16.0  ;;  %v3100_v52 = vor.u32 1.1754944e-38, %v3099_v54 }
 0x330   :  { %v3121_v15 = vadd.f32 0.014752088, %v3120_v3 }
 0x331   :  { %v3147_v34 = vmul.f32 2.1237322e-06, %v11017_v49 }
 0x333   :  { %v3148_v30 = vadd.f32 0.00028619796, %v3147_v34  ;;  %v3077_v34 = vmul.f32 %v3076_v1, %v10953_v40 }
 0x335   :  { %v3149_v36 = vmul.f32 %v3148_v30, %v11017_v49 }
 0x337   :  { %v3150_v60 = vadd.f32 0.0036580483, %v3149_v36 }
 0x339   :  { %v3151_v7 = vmul.f32 %v3150_v60, %v11017_v49 }
 0x33e   :  { %v2925_v24 = vpop.f32.mrf.mxu3 }
 0x33f   :  { %v10962_v4 = vadd.f32 1e-05, %v2925_v24 }
 0x341   :  { %8825 = vrsqrt.f32 %v10962_v4  ;;  %vm2983_vm5 = vweird.f32 %v10962_v4 }
 0x347   :  { %v10973_v17 = vpop.eup %8825 }
 0x348   :  { %v2978_v2 = vmul.f32 %v10973_v17, %v10962_v4  ;;  %vm2984_vm4 = vweird.f32 %v10973_v17  ;;  %v3158_v4 = vmul.f32 3.8918573e-05, %v11017_v49 }
 0x349   :  { %v2928_v51 = vpop.f32.mrf.mxu3  ;;  %vm11027_vm7 = vmor %vm2983_vm5, %vm2984_vm4 }
 0x34a   :  { %v2979_v12 = vmul.f32 %v10973_v17, %v2978_v2  ;;  %v10987_v44 = vadd.f32 1e-05, %v2928_v51  ;;  %v3122_v2 = vmul.f32 %v3121_v15, %v10989_v43  ;;  %v3159_v48 = vadd.f32 0.001143296, %v3158_v4 }
 0x34b   :  { %v3152_v4 = vadd.f32 0.05243302, %v3151_v7 }
 0x34c   :  { %v2980_v32 = vmul.f32 0.5, %v2979_v12  ;;  %8827 = vrsqrt.f32 %v10987_v44  ;;  %v11035_v12 = vadd.f32 %v10944_v31, %v3032_v57  ;;  %v3123_v58 = vadd.f32 0.112945676, %v3122_v2 }
 0x34d   :  { %8829 = vrcp.f32 %v11031_v8  ;;  %vm2993_vm6 = vweird.f32 %v10987_v44 }
 0x34e   :  { %v2981_v25 = vsub.f32 1.5, %v2980_v32  ;;  %v3112_v32 = vadd.f32 0.05243302, %v3111_v20  ;;  %v3124_v26 = vmul.f32 %v3123_v58, %v10989_v43  ;;  %v11049_v38 = vmul.f32 0.70710677, %v11035_v12 }
 0x350   :  { %v2982_v46 = vmul.f32 %v10973_v17, %v2981_v25  ;;  %v3125_v27 = vadd.f32 0.4994258, %v3124_v26  ;;  %v3113_v56 = vmul.f32 %v3112_v32, %v10989_v43  ;;  %v3160_v25 = vmul.f32 %v3159_v48, %v11017_v49 }
 0x351   :  { %v3185_v45 = vmul.f32 %v11049_v38, %v11049_v38 }
 0x352   :  { %v11007_v24 = vpop.eup %8827  ;;  %v2986_v5 = vsel %vm11027_vm7, %v10973_v17, %v2982_v46  ;;  %v3126_v3 = vmul.f32 %v3125_v27, %v10989_v43  ;;  %v3161_v18 = vadd.f32 0.014752088, %v3160_v25  ;;  %v3097_v46 = vand.u32 2147483647, %v11031_v8 }
 0x353   :  { %v2988_v0 = vmul.f32 %v11007_v24, %v10987_v44  ;;  %v3021_v17 = vmul.f32 %v2986_v5, %v10902_v42  ;;  %vm2994_vm10 = vweird.f32 %v11007_v24  ;;  %v8830_v23 = vpop.eup %8829 }
 0x354   :  { %v3089_v57 = vmul.f32 %v8830_v23, %v11031_v8  ;;  %v11069_v15 = vadd.f32 1.0, %v3126_v3  ;;  %v3162_v21 = vmul.f32 %v3161_v18, %v11017_v49  ;;  %vm11078_vm8 = vmor %vm2993_vm6, %vm2994_vm10  ;;  %vm3094_vm12 = vweird.f32 %v8830_v23 }
 0x355   :  { %v2989_v53 = vmul.f32 %v11007_v24, %v2988_v0  ;;  %v11063_v0 = vmin.f32 %v3185_v45, 16.0  ;;  %v3033_v61 = vmul.f32 %v10937_v22, %v3021_v17  ;;  %vm11093_vm13 = vcmp.eq.f32.partialorder %v3097_v46, 8.507059e+37  ;;  %vm3095_vm9 = vmor %vm3093_vm11, %vm3094_vm12 }
 0x356   :  { %v3090_v50 = vsub.f32 1.0, %v3089_v57  ;;  %8831 = vrcp.f32 %v11069_v15  ;;  %v3163_v5 = vadd.f32 0.112945676, %v3162_v21  ;;  %v3139_v54 = vand.u32 2147483648, %v11069_v15 }
 0x357   :  { %v2990_v51 = vmul.f32 0.5, %v2989_v53  ;;  %v3114_v53 = vadd.f32 0.18741608, %v3113_v56  ;;  %v3187_v29 = vmul.f32 2.1237322e-06, %v11063_v0  ;;  %v11089_v58 = vadd.f32 %v10944_v31, %v3033_v61 }
 0x358   :  { %v3198_v20 = vmul.f32 3.8918573e-05, %v11063_v0  ;;  %v3091_v30 = vmul.f32 %v8830_v23, %v3090_v50  ;;  %v3164_v36 = vmul.f32 %v3163_v5, %v11017_v49  ;;  %v3153_v56 = vmul.f32 %v3152_v4, %v11017_v49  ;;  %v3402_v50 = vld [vmem:[%s13704_s10 + $0x8] sm:$0xff] }
 0x359   :  { %v2991_v39 = vsub.f32 1.5, %v2990_v51  ;;  %v3188_v59 = vadd.f32 0.00028619796, %v3187_v29  ;;  %v3115_v26 = vmul.f32 %v3114_v53, %v10989_v43  ;;  %v11107_v60 = vmul.f32 0.70710677, %v11089_v58  ;;  %3451 = vmatpush.msra.mxu0 %v3402_v50  ;;  %8787 = vmatpush.msrb.mxu1 %v3402_v50 }
 0x35a   :  { %v3199_v32 = vadd.f32 0.001143296, %v3198_v20  ;;  %v3165_v45 = vadd.f32 0.4994258, %v3164_v36  ;;  %v3154_v53 = vadd.f32 0.18741608, %v3153_v56  ;;  %vm3133_vm1 = vweird.f32 %v11069_v15 }
 0x35b   :  { %v2992_v42 = vmul.f32 %v11007_v24, %v2991_v39  ;;  %v3189_v17 = vmul.f32 %v3188_v59, %v11063_v0  ;;  %v3116_v7 = vadd.f32 1.1283791, %v3115_v26  ;;  %v3225_v21 = vmul.f32 %v11107_v60, %v11107_v60  ;;  %v3401_v39 = vld [vmem:[%s13704_s10] sm:$0xff] }
 0x35c   :  { %v3200_v48 = vmul.f32 %v3199_v32, %v11063_v0  ;;  %v8832_v43 = vpop.eup %8831  ;;  %v3166_v61 = vmul.f32 %v3165_v45, %v11017_v49  ;;  %v3140_v26 = vor.u32 1.1754944e-38, %v3139_v54  ;;  %3452 = vmatpush.msra.mxu0 %v3401_v39  ;;  %8788 = vmatpush.msrb.mxu1 %v3401_v39 }
 0x35d   :  { %v2996_v51 = vsel %vm11078_vm8, %v11007_v24, %v2992_v42  ;;  %v3092_v24 = vadd.f32 %v8830_v23, %v3091_v30  ;;  %v3190_v42 = vadd.f32 0.0036580483, %v3189_v17  ;;  %v3129_v8 = vmul.f32 %v8832_v43, %v11069_v15 }
 0x35e   :  { %v3022_v27 = vmul.f32 %v2996_v51, %v10907_v11  ;;  %v3201_v1 = vadd.f32 0.014752088, %v3200_v48  ;;  %v11112_v11 = vmul.f32 0.5, %v10971_v47  ;;  %v3137_v47 = vand.u32 2147483647, %v11069_v15 }
 0x35f   :  { %v3096_v25 = vsel %vm3095_vm9, %v8830_v23, %v3092_v24  ;;  %v3191_v57 = vmul.f32 %v3190_v42, %v11063_v0  ;;  %v3130_v23 = vsub.f32 1.0, %v3129_v8  ;;  %v11122_v20 = vadd.f32 1.0, %v3166_v61 }
 0x360   :  { %v3101_v3 = vsel %vm11093_vm13, %v3100_v52, %v3096_v25  ;;  %v3202_v46 = vmul.f32 %v3201_v1, %v11063_v0  ;;  %v3034_v2 = vmul.f32 %v10937_v22, %v3022_v27  ;;  %vm3134_vm15 = vweird.f32 %v8832_v43 }
 0x361   :  { %v3102_v18 = vmul.f32 %v3101_v3, %v3077_v34  ;;  %v3131_v51 = vmul.f32 %v8832_v43, %v3130_v23  ;;  %v11130_v5 = vmin.f32 %v3225_v21, 16.0  ;;  %v3192_v32 = vadd.f32 0.05243302, %v3191_v57  ;;  %vm3135_vm2 = vmor %vm3133_vm1, %vm3134_vm15 }
 0x362   :  { %v3203_v4 = vadd.f32 0.112945676, %v3202_v46  ;;  %v3155_v24 = vmul.f32 %v3154_v53, %v11017_v49  ;;  %v11148_v27 = vadd.f32 %v10944_v31, %v3034_v2  ;;  %v3117_v56 = vmul.f32 %v3116_v7, %v10977_v55 }
 0x363   :  { %v8587_v29 = vclamps-f32 %v3102_v18, 1.0  ;;  %v3132_v52 = vadd.f32 %v8832_v43, %v3131_v51  ;;  %v3227_v48 = vmul.f32 2.1237322e-06, %v11130_v5  ;;  %vm3138_vm3 = vcmp.eq.f32.partialorder %v3137_v47, 8.507059e+37 }
 0x364   :  { %v2931_v44 = vpop.f32.mrf.mxu3  ;;  %v3204_v15 = vmul.f32 %v3203_v4, %v11063_v0  ;;  %v3238_v8 = vmul.f32 3.8918573e-05, %v11130_v5  ;;  %v3156_v7 = vadd.f32 1.1283791, %v3155_v24  ;;  %v11159_v18 = vmul.f32 0.70710677, %v11148_v27 }
 0x365   :  { %v11091_v40 = vadd.f32 1e-05, %v2931_v44  ;;  %v8619_v44 = vld [vmem:[%s13822_s29 + $0x8] sm:$0xff]  ;;  %v3385_v59 = vadd.f32 1.0, %v8587_v29  ;;  %v3136_v25 = vsel %vm3135_vm2, %v8832_v43, %v3132_v52  ;;  %v3228_v42 = vadd.f32 0.00028619796, %v3227_v48 }
 0x366   :  { %4148 = vmatpush.msrb.mxu0 %v8619_v44  ;;  %v3141_v45 = vsel %vm3138_vm3, %v3140_v26, %v3136_v25  ;;  %v3205_v3 = vadd.f32 0.4994258, %v3204_v15  ;;  %v3177_v46 = vand.u32 2147483647, %v11122_v20  ;;  %v3239_v21 = vadd.f32 0.001143296, %v3238_v8 }
 0x367   :  { %8833 = vrsqrt.f32 %v11091_v40  ;;  %v3393_v17 = vmul.f32 %v3385_v59, %v11053_v13  ;;  %v3193_v13 = vmul.f32 %v3192_v32, %v11063_v0  ;;  %vm3003_vm4 = vweird.f32 %v11091_v40 }
 0x368   :  { %8835 = vrcp.f32 %v11122_v20  ;;  %v3142_v1 = vmul.f32 %v3141_v45, %v3117_v56  ;;  %v3206_v23 = vmul.f32 %v3205_v3, %v11063_v0  ;;  %v3229_v53 = vmul.f32 %v3228_v42, %v11130_v5 }
 0x369   :  { %8595 = vmatmul.msk.f32.vlgmr.msra.gmra.mxu0 %vm2790_vm14, %v3393_v17  ;;  %v3265_v50 = vmul.f32 %v11159_v18, %v11159_v18  ;;  %v3179_v51 = vand.u32 2147483648, %v11122_v20  ;;  %v3240_v4 = vmul.f32 %v3239_v21, %v11130_v5  ;;  %v3157_v59 = vmul.f32 %v3156_v7, %v11002_v10 }
 0x36a   :  { %6858 = vmatpush.msra.mxu0 %v10780_v33  ;;  %v8588_v61 = vclamps-f32 %v3142_v1, 1.0  ;;  %v3194_v33 = vadd.f32 0.18741608, %v3193_v13  ;;  %v11169_v2 = vadd.f32 1.0, %v3206_v23  ;;  %v3230_v32 = vadd.f32 0.0036580483, %v3229_v53 }
 0x36b   :  { %vm3173_vm10 = vweird.f32 %v11122_v20  ;;  %v3241_v52 = vadd.f32 0.014752088, %v3240_v4  ;;  %vm3178_vm11 = vcmp.eq.f32.partialorder %v3177_v46, 8.507059e+37  ;;  %v3051_v45 = vmul.f32 0.5, %v10998_v19 }
 0x36c   :  { %6859 = vmatpush.msra.mxu0 %v10785_v63  ;;  %v3386_v29 = vadd.f32 1.0, %v8588_v61  ;;  %8837 = vrcp.f32 %v11169_v2  ;;  %v3231_v17 = vmul.f32 %v3230_v32, %v11130_v5  ;;  %v3217_v42 = vand.u32 2147483647, %v11169_v2 }
 0x36d   :  { %v11125_v34 = vpop.eup %8833  ;;  %v3242_v26 = vmul.f32 %v3241_v52, %v11130_v5  ;;  %vm3213_vm13 = vweird.f32 %v11169_v2 }
 0x36e   :  { %v2998_v30 = vmul.f32 %v11125_v34, %v11091_v40  ;;  %v8836_v55 = vpop.eup %8835  ;;  %vm3004_vm5 = vweird.f32 %v11125_v34  ;;  %6860 = vmatpush.msra.mxu0 %v10792_v41  ;;  %v3394_v40 = vmul.f32 %v3386_v29, %v11112_v11  ;;  %v3195_v41 = vmul.f32 %v3194_v33, %v11063_v0 }
 0x36f   :  { %v3169_v57 = vmul.f32 %v8836_v55, %v11122_v20  ;;  %vm3005_vm7 = vmor %vm3003_vm4, %vm3004_vm5  ;;  %vm3174_vm6 = vweird.f32 %v8836_v55  ;;  %v3243_v25 = vadd.f32 0.112945676, %v3242_v26  ;;  %v3232_v19 = vadd.f32 0.05243302, %v3231_v17 }
 0x370   :  { %v2999_v36 = vmul.f32 %v11125_v34, %v2998_v30  ;;  %6861 = vmatpush.msra.mxu0 %v10801_v6  ;;  %8596 = vmatmul.msk.f32.vlgmr.msrb.gmra.mxu1 %vm2790_vm14, %v3394_v40  ;;  %vm3175_vm8 = vmor %vm3173_vm10, %vm3174_vm6  ;;  %v3180_v6 = vor.u32 1.1754944e-38, %v3179_v51  ;;  %vm3218_vm15 = vcmp.eq.f32.partialorder %v3217_v42, 8.507059e+37 }
 0x371   :  { %v3170_v47 = vsub.f32 1.0, %v3169_v57  ;;  %v3244_v3 = vmul.f32 %v3243_v25, %v11130_v5  ;;  %v3219_v57 = vand.u32 2147483648, %v11169_v2 }
 0x372   :  { %v3000_v49 = vmul.f32 0.5, %v2999_v36  ;;  %6862 = vmatpush.msra.mxu0 %v10815_v62  ;;  %v3196_v36 = vadd.f32 1.1283791, %v3195_v41  ;;  %v8838_v48 = vpop.eup %8837 }
 0x373   :  { %v3171_v30 = vmul.f32 %v8836_v55, %v3170_v47  ;;  %v3209_v13 = vmul.f32 %v8838_v48, %v11169_v2  ;;  %v3245_v46 = vadd.f32 0.4994258, %v3244_v3  ;;  %vm3214_vm12 = vweird.f32 %v8838_v48 }
 0x374   :  { %v3001_v43 = vsub.f32 1.5, %v3000_v49  ;;  %6863 = vmatpush.msra.mxu0 %v10827_v14  ;;  %vm3215_vm9 = vmor %vm3213_vm13, %vm3214_vm12 }
 0x375   :  { %v3172_v39 = vadd.f32 %v8836_v55, %v3171_v30  ;;  %v3246_v29 = vmul.f32 %v3245_v46, %v11130_v5 }
 0x376   :  { %v3002_v54 = vmul.f32 %v11125_v34, %v3001_v43  ;;  %6864 = vmatpush.msra.mxu0 %v10838_v37  ;;  %v3197_v37 = vmul.f32 %v3196_v36, %v11049_v38  ;;  %v3210_v43 = vsub.f32 1.0, %v3209_v13 }
 0x377   :  { %v3176_v0 = vsel %vm3175_vm8, %v8836_v55, %v3172_v39  ;;  %v3247_v40 = vadd.f32 1.0, %v3246_v29 }
 0x378   :  { %v3006_v63 = vsel %vm3005_vm7, %v11125_v34, %v3002_v54  ;;  %v3181_v62 = vsel %vm3178_vm11, %v3180_v6, %v3176_v0  ;;  %6865 = vmatpush.msra.mxu0 %v10845_v35  ;;  %v3211_v33 = vmul.f32 %v8838_v48, %v3210_v43 }
 0x379   :  { %v3023_v44 = vmul.f32 %v3006_v63, %v10912_v16  ;;  %v11185_v16 = vmin.f32 %v3265_v50, 16.0  ;;  %v3182_v56 = vmul.f32 %v3181_v62, %v3157_v59  ;;  %v3233_v50 = vmul.f32 %v3232_v19, %v11130_v5 }
 0x37a   :  { %v3212_v47 = vadd.f32 %v8838_v48, %v3211_v33  ;;  %v3257_v19 = vand.u32 2147483647, %v3247_v40  ;;  %vm3253_vm5 = vweird.f32 %v3247_v40 }
 0x37b   :  { %v2934_v34 = vpop.f32.mrf.mxu3  ;;  %v3035_v10 = vmul.f32 %v10937_v22, %v3023_v44  ;;  %v3267_v24 = vmul.f32 2.1237322e-06, %v11185_v16  ;;  %v3278_v20 = vmul.f32 3.8918573e-05, %v11185_v16  ;;  %v8589_v1 = vclamps-f32 %v3182_v56, 1.0 }
 0x37c   :  { %v11188_v11 = vadd.f32 1e-05, %v2934_v34  ;;  %v3220_v44 = vor.u32 1.1754944e-38, %v3219_v57  ;;  %v3216_v59 = vsel %vm3215_vm9, %v8838_v48, %v3212_v47  ;;  %v3234_v52 = vadd.f32 0.18741608, %v3233_v50 }
 0x37d   :  { %v3268_v15 = vadd.f32 0.00028619796, %v3267_v24  ;;  %v3279_v49 = vadd.f32 0.001143296, %v3278_v20  ;;  %v11203_v14 = vadd.f32 %v10944_v31, %v3035_v10  ;;  %v3387_v61 = vadd.f32 1.0, %v8589_v1 }
 0x37e   :  { %8839 = vrsqrt.f32 %v11188_v11  ;;  %v3221_v34 = vsel %vm3218_vm15, %v3220_v44, %v3216_v59  ;;  %vm3013_vm2 = vweird.f32 %v11188_v11  ;;  %v3052_v48 = vmul.f32 0.5, %v11035_v12 }
 0x37f   :  { %v3269_v8 = vmul.f32 %v3268_v15, %v11185_v16  ;;  %v3280_v55 = vmul.f32 %v3279_v49, %v11185_v16  ;;  %v11211_v7 = vmul.f32 0.70710677, %v11203_v14  ;;  %v3395_v38 = vmul.f32 %v3387_v61, %v3051_v45 }
 0x380   :  { %8841 = vrcp.f32 %v3247_v40  ;;  %v3222_v39 = vmul.f32 %v3221_v34, %v3197_v37  ;;  %v3235_v25 = vmul.f32 %v3234_v52, %v11130_v5  ;;  %v3259_v61 = vand.u32 2147483648, %v3247_v40 }
 0x381   :  { %v3270_v23 = vadd.f32 0.0036580483, %v3269_v8  ;;  %v3281_v53 = vadd.f32 0.014752088, %v3280_v55  ;;  %v3305_v21 = vmul.f32 %v11211_v7, %v11211_v7  ;;  %8597 = vmatmul.msk.f32.gmra.mxu1 %vm2790_vm14, %v3395_v38  ;;  %vm3258_vm6 = vcmp.eq.f32.partialorder %v3257_v19, 8.507059e+37 }
 0x382   :  { %v8590_v24 = vclamps-f32 %v3222_v39, 1.0  ;;  %v3236_v12 = vadd.f32 1.1283791, %v3235_v25 }
 0x383   :  { %v3282_v63 = vmul.f32 %v3281_v53, %v11185_v16  ;;  %v11221_v51 = vmin.f32 %v3305_v21, 16.0  ;;  %v3271_v30 = vmul.f32 %v3270_v23, %v11185_v16 }
 0x384   :  { %v8840_v54 = vpop.eup %8839  ;;  %v3388_v56 = vadd.f32 1.0, %v8590_v24  ;;  %v3237_v21 = vmul.f32 %v3236_v12, %v11107_v60 }
 0x385   :  { %v3008_v35 = vmul.f32 %v8840_v54, %v11188_v11  ;;  %v3283_v2 = vadd.f32 0.112945676, %v3282_v63  ;;  %v3307_v41 = vmul.f32 2.1237322e-06, %v11221_v51  ;;  %vm3014_vm1 = vweird.f32 %v8840_v54 }
 0x386   :  { %v3272_v10 = vadd.f32 0.05243302, %v3271_v30  ;;  %v3318_v26 = vmul.f32 3.8918573e-05, %v11221_v51  ;;  %vm3015_vm3 = vmor %vm3013_vm2, %vm3014_vm1  ;;  %v8842_v15 = vpop.eup %8841  ;;  %v3396_v3 = vmul.f32 %v3388_v56, %v3052_v48 }
 0x387   :  { %v3009_v4 = vmul.f32 %v8840_v54, %v3008_v35  ;;  %v3284_v0 = vmul.f32 %v3283_v2, %v11185_v16  ;;  %v3308_v20 = vadd.f32 0.00028619796, %v3307_v41  ;;  %v3249_v11 = vmul.f32 %v8842_v15, %v3247_v40 }
 0x388   :  { %v3319_v17 = vadd.f32 0.001143296, %v3318_v26  ;;  %v3273_v45 = vmul.f32 %v3272_v10, %v11185_v16  ;;  %vm3254_vm4 = vweird.f32 %v8842_v15  ;;  %v3053_v40 = vmul.f32 0.5, %v11089_v58 }
 0x389   :  { %v3010_v32 = vmul.f32 0.5, %v3009_v4  ;;  %v3285_v36 = vadd.f32 0.4994258, %v3284_v0  ;;  %v3309_v8 = vmul.f32 %v3308_v20, %v11221_v51  ;;  %8598 = vmatmul.msk.f32.gmra.mxu1 %vm2790_vm14, %v3396_v3  ;;  %v3250_v5 = vsub.f32 1.0, %v3249_v11  ;;  %vm3255_vm7 = vmor %vm3253_vm5, %vm3254_vm4 }
 0x38a   :  { %v3320_v42 = vmul.f32 %v3319_v17, %v11221_v51  ;;  %v3274_v57 = vadd.f32 0.18741608, %v3273_v45 }
 0x38b   :  { %v3011_v6 = vsub.f32 1.5, %v3010_v32  ;;  %v3286_v13 = vmul.f32 %v3285_v36, %v11185_v16  ;;  %v3251_v46 = vmul.f32 %v8842_v15, %v3250_v5  ;;  %v3310_v23 = vadd.f32 0.0036580483, %v3309_v8 }
 0x38c   :  { %v3321_v37 = vadd.f32 0.014752088, %v3320_v42  ;;  %v3275_v29 = vmul.f32 %v3274_v57, %v11185_v16 }
 0x38d   :  { %v3012_v62 = vmul.f32 %v8840_v54, %v3011_v6  ;;  %v3287_v55 = vadd.f32 1.0, %v3286_v13  ;;  %v3252_v33 = vadd.f32 %v8842_v15, %v3251_v46  ;;  %v3311_v47 = vmul.f32 %v3310_v23, %v11221_v51 }
 0x38e   :  { %v3276_v41 = vadd.f32 1.1283791, %v3275_v29 }
 0x38f   :  { %v3016_v49 = vsel %vm3015_vm3, %v8840_v54, %v3012_v62  ;;  %8843 = vrcp.f32 %v3287_v55  ;;  %v3256_v38 = vsel %vm3255_vm7, %v8842_v15, %v3252_v33  ;;  %v3312_v16 = vadd.f32 0.05243302, %v3311_v47 }
 0x390   :  { %v3024_v1 = vmul.f32 %v3016_v49, %v10923_v28  ;;  %v3322_v28 = vmul.f32 %v3321_v37, %v11221_v51  ;;  %v3299_v34 = vand.u32 2147483648, %v3287_v55  ;;  %v3297_v26 = vand.u32 2147483647, %v3287_v55 }
 0x391   :  { %vm3293_vm8 = vweird.f32 %v3287_v55  ;;  %v3313_v17 = vmul.f32 %v3312_v16, %v11221_v51  ;;  %v3277_v48 = vmul.f32 %v3276_v41, %v11159_v18 }
 0x392   :  { %v3036_v43 = vmul.f32 %v10937_v22, %v3024_v1  ;;  %v3323_v53 = vadd.f32 0.112945676, %v3322_v28  ;;  %v3260_v22 = vor.u32 1.1754944e-38, %v3259_v61  ;;  %v3300_v56 = vor.u32 1.1754944e-38, %v3299_v34 }
 0x393   :  { %vm3298_vm12 = vcmp.eq.f32.partialorder %v3297_v26, 8.507059e+37  ;;  %v3314_v42 = vadd.f32 0.18741608, %v3313_v17  ;;  %v8804_v17 = vld [vmem:[%s13705_s11] ss:$0 sm:$0xff] }
 0x394   :  { %v11240_v54 = vadd.f32 %v10944_v31, %v3036_v43  ;;  %v3324_v50 = vmul.f32 %v3323_v53, %v11221_v51  ;;  %v3261_v63 = vsel %vm3258_vm6, %v3260_v22, %v3256_v38 }
 0x395   :  { %v8844_v31 = vpop.eup %8843  ;;  %v3262_v44 = vmul.f32 %v3261_v63, %v3237_v21  ;;  %v3315_v12 = vmul.f32 %v3314_v42, %v11221_v51 }
 0x396   :  { %v11244_v35 = vmul.f32 0.70710677, %v11240_v54  ;;  %v3289_v60 = vmul.f32 %v8844_v31, %v3287_v55  ;;  %v3325_v30 = vadd.f32 0.4994258, %v3324_v50  ;;  %vm3294_vm10 = vweird.f32 %v8844_v31 }
 0x397   :  { %v8591_v2 = vclamps-f32 %v3262_v44, 1.0  ;;  %vm3295_vm11 = vmor %vm3293_vm8, %vm3294_vm10  ;;  %v3054_v55 = vmul.f32 0.5, %v11148_v27  ;;  %v3316_v28 = vadd.f32 1.1283791, %v3315_v12 }
 0x398   :  { %v3345_v4 = vmul.f32 %v11244_v35, %v11244_v35  ;;  %v3290_v32 = vsub.f32 1.0, %v3289_v60  ;;  %v3326_v39 = vmul.f32 %v3325_v30, %v11221_v51  ;;  %v3055_v60 = vmul.f32 0.5, %v11203_v14 }
 0x399   :  { %v3389_v10 = vadd.f32 1.0, %v8591_v2  ;;  %v3317_v29 = vmul.f32 %v3316_v28, %v11211_v7 }
 0x39a   :  { %v11252_v59 = vmin.f32 %v3345_v4, 16.0  ;;  %v3291_v0 = vmul.f32 %v8844_v31, %v3290_v32  ;;  %v3327_v24 = vadd.f32 1.0, %v3326_v39 }
 0x39b   :  { %v3397_v62 = vmul.f32 %v3389_v10, %v3053_v40 }
 0x39c   :  { %v3347_v52 = vmul.f32 2.1237322e-06, %v11252_v59  ;;  %v3358_v6 = vmul.f32 3.8918573e-05, %v11252_v59  ;;  %v3292_v36 = vadd.f32 %v8844_v31, %v3291_v0  ;;  %8845 = vrcp.f32 %v3327_v24 }
 0x39d   :  { %8599 = vmatmul.msk.f32.gmra.mxu1 %vm2790_vm14, %v3397_v62  ;;  %v3339_v46 = vand.u32 2147483648, %v3327_v24  ;;  %v3337_v53 = vand.u32 2147483647, %v3327_v24  ;;  %vm3333_vm9 = vweird.f32 %v3327_v24 }
 0x39e   :  { %v3348_v58 = vadd.f32 0.00028619796, %v3347_v52  ;;  %v3359_v20 = vadd.f32 0.001143296, %v3358_v6  ;;  %v3296_v25 = vsel %vm3295_vm11, %v8844_v31, %v3292_v36 }
 0x39f   :  { %v3301_v45 = vsel %vm3298_vm12, %v3300_v56, %v3296_v25  ;;  %v3340_v51 = vor.u32 1.1754944e-38, %v3339_v46  ;;  %vm3338_vm1 = vcmp.eq.f32.partialorder %v3337_v53, 8.507059e+37 }
 0x3a0   :  { %v3349_v15 = vmul.f32 %v3348_v58, %v11252_v59  ;;  %v3360_v49 = vmul.f32 %v3359_v20, %v11252_v59  ;;  %v3302_v13 = vmul.f32 %v3301_v45, %v3277_v48 }
 0x3a2   :  { %v3361_v1 = vadd.f32 0.014752088, %v3360_v49  ;;  %v8592_v3 = vclamps-f32 %v3302_v13, 1.0  ;;  %v3350_v11 = vadd.f32 0.0036580483, %v3349_v15  ;;  %v8846_v18 = vpop.eup %8845 }
 0x3a3   :  { %v3329_v5 = vmul.f32 %v8846_v18, %v3327_v24  ;;  %vm3334_vm13 = vweird.f32 %v8846_v18 }
 0x3a4   :  { %v3362_v8 = vmul.f32 %v3361_v1, %v11252_v59  ;;  %v3390_v37 = vadd.f32 1.0, %v8592_v3  ;;  %v3351_v57 = vmul.f32 %v3350_v11, %v11252_v59  ;;  %vm3335_vm15 = vmor %vm3333_vm9, %vm3334_vm13 }
 0x3a5   :  { %v3330_v61 = vsub.f32 1.0, %v3329_v5 }
 0x3a6   :  { %v3363_v43 = vadd.f32 0.112945676, %v3362_v8  ;;  %v3398_v19 = vmul.f32 %v3390_v37, %v3054_v55  ;;  %v3352_v22 = vadd.f32 0.05243302, %v3351_v57 }
 0x3a7   :  { %v3331_v33 = vmul.f32 %v8846_v18, %v3330_v61  ;;  %v8995_v61 = vmov 8.0  }
 0x3a8   :  { %v3364_v23 = vmul.f32 %v3363_v43, %v11252_v59  ;;  %8600 = vmatmul.msk.f32.gmra.mxu1 %vm2790_vm14, %v3398_v19  ;;  %v3353_v4 = vmul.f32 %v3352_v22, %v11252_v59 }
 0x3a9   :  { %v3332_v27 = vadd.f32 %v8846_v18, %v3331_v33 }
 0x3aa   :  { %v3365_v21 = vadd.f32 0.4994258, %v3364_v23  ;;  %v3354_v30 = vadd.f32 0.18741608, %v3353_v4 }
 0x3ab   :  { %v3336_v47 = vsel %vm3335_vm15, %v8846_v18, %v3332_v27 }
 0x3ac   :  { %v3366_v38 = vmul.f32 %v3365_v21, %v11252_v59  ;;  %v3341_v50 = vsel %vm3338_vm1, %v3340_v51, %v3336_v47  ;;  %v3355_v32 = vmul.f32 %v3354_v30, %v11252_v59  ;;  %v3056_v59 = vmul.f32 0.5, %v11240_v54 }
 0x3ad   :  { %v3342_v63 = vmul.f32 %v3341_v50, %v3317_v29 }
 0x3ae   :  { %v3367_v31 = vadd.f32 1.0, %v3366_v38  ;;  %v3356_v39 = vadd.f32 1.1283791, %v3355_v32 }
 0x3af   :  { %v8593_v44 = vclamps-f32 %v3342_v63, 1.0 }
 0x3b0   :  { %8847 = vrcp.f32 %v3367_v31  ;;  %v3379_v34 = vand.u32 2147483648, %v3367_v31  ;;  %v3377_v6 = vand.u32 2147483647, %v3367_v31  ;;  %vm3373_vm3 = vweird.f32 %v3367_v31 }
 0x3b1   :  { %v3391_v40 = vadd.f32 1.0, %v8593_v44  ;;  %v3357_v14 = vmul.f32 %v3356_v39, %v11244_v35  ;;  %8849 = vrcp.f32 %v8995_v61  ;;  %v11343_v61 = vld [vmem:[%s13706_s12] ss:$0 sm:$0xff] }
 0x3b2   :  { %v3380_v0 = vor.u32 1.1754944e-38, %v3379_v34  ;;  %vm3378_vm5 = vcmp.eq.f32.partialorder %v3377_v6, 8.507059e+37 }
 0x3b3   :  { %v3399_v2 = vmul.f32 %v3391_v40, %v3055_v60 }
 0x3b5   :  { %8601 = vmatmul.msk.f32.gmra.mxu1 %vm2790_vm14, %v3399_v2 }
 0x3b6   :  { %v8848_v41 = vpop.eup %8847 }
 0x3b7   :  { %v3369_v7 = vmul.f32 %v8848_v41, %v3367_v31  ;;  %vm3374_vm2 = vweird.f32 %v8848_v41  ;;  %v8850_v57 = vpop.eup %8849 }
 0x3b8   :  { %vm3375_vm4 = vmor %vm3373_vm3, %vm3374_vm2  ;;  %v3505_v46 = vmul.f32 8.0, %v8850_v57  ;;  %vm3509_vm7 = vweird.f32 %v8850_v57 }
 0x3b9   :  { %v3370_v16 = vsub.f32 1.0, %v3369_v7 }
 0x3ba   :  { %v3506_v23 = vsub.f32 1.0, %v3505_v46 }
 0x3bb   :  { %v3371_v52 = vmul.f32 %v8848_v41, %v3370_v16 }
 0x3bc   :  { %v3507_v28 = vmul.f32 %v8850_v57, %v3506_v23 }
 0x3bd   :  { %v3372_v10 = vadd.f32 %v8848_v41, %v3371_v52 }
 0x3be   :  { %v3508_v33 = vadd.f32 %v8850_v57, %v3507_v28 }
 0x3bf   :  { %v3376_v26 = vsel %vm3375_vm4, %v8848_v41, %v3372_v10 }
 0x3c0   :  { %v3381_v24 = vsel %vm3378_vm5, %v3380_v0, %v3376_v26  ;;  %v11287_v53 = vsel %vm3509_vm7, %v8850_v57, %v3508_v33 }
 0x3c1   :  { %v3382_v58 = vmul.f32 %v3381_v24, %v3357_v14  ;;  %14048 = vst [vmem:[#allocation12_spill] sm:$0xff] %v11287_v53 }
 0x3c3   :  { %v8594_v20 = vclamps-f32 %v3382_v58, 1.0 }
 0x3c5   :  { %v3392_v62 = vadd.f32 1.0, %v8594_v20 }
 0x3c7   :  { %v3400_v36 = vmul.f32 %v3392_v62, %v3056_v59 }
 0x3c9   :  { %8602 = vmatmul.msk.f32.gmra.mxu1 %vm2790_vm14, %v3400_v36 }
 0x3e6   :  { %v3454_v48 = vpop.f32.mrf.mxu0 }
 0x3e7   :  { %v3455_v56 = vadd.f32 %v8804_v17, %v3454_v48 }
 0x3e9   :  { %v3480_v25 = vsel %vm13814_vm0, %v3455_v56, 0.0 }
 0x3ea   :  { %3481 = vadd.xlane.f32.xlu0 %v3480_v25 }
 0x3ed   :  { %v3457_v35 = vpop.f32.mrf.mxu1 }
 0x3ee   :  { %v3458_v15 = vadd.f32 %v8804_v17, %v3457_v35 }
 0x3f0   :  { %v3483_v49 = vsel %vm13814_vm0, %v3458_v15, 0.0 }
 0x3f2   :  { %3484 = vadd.xlane.f32.xlu0 %v3483_v49 }
 0x3fe   :  { %v3460_v45 = vpop.f32.mrf.mxu1 }
 0x3ff   :  { %v3461_v54 = vadd.f32 %v8804_v17, %v3460_v45 }
 0x401   :  { %v3486_v13 = vsel %vm13814_vm0, %v3461_v54, 0.0 }
 0x402   :  { %3487 = vadd.xlane.f32.xlu1 %v3486_v13 }
 0x406   :  { %v3463_v42 = vpop.f32.mrf.mxu1 }
 0x407   :  { %v3464_v1 = vadd.f32 %v8804_v17, %v3463_v42 }
 0x409   :  { %v3489_v3 = vsel %vm13814_vm0, %v3464_v1, 0.0 }
 0x40a   :  { %3490 = vadd.xlane.f32.xlu1 %v3489_v3 }
 0x41a   :  { %v3466_v11 = vpop.f32.mrf.mxu1 }
 0x41b   :  { %v3467_v8 = vadd.f32 %v8804_v17, %v3466_v11 }
 0x41d   :  { %v3492_v18 = vsel %vm13814_vm0, %v3467_v8, 0.0 }
 0x41e   :  { %3493 = vadd.xlane.f32.xlu2 %v3492_v18 }
 0x425   :  { %v3469_v55 = vpop.f32.mrf.mxu1 }
 0x426   :  { %v3470_v37 = vadd.f32 %v8804_v17, %v3469_v55 }
 0x428   :  { %v3495_v12 = vsel %vm13814_vm0, %v3470_v37, 0.0 }
 0x429   :  { %3496 = vadd.xlane.f32.xlu2 %v3495_v12 }
 0x432   :  { %v3472_v5 = vpop.f32.mrf.mxu1 }
 0x433   :  { %v3473_v43 = vadd.f32 %v8804_v17, %v3472_v5 }
 0x435   :  { %v3498_v19 = vsel %vm13814_vm0, %v3473_v43, 0.0 }
 0x436   :  { %3499 = vadd.xlane.f32.xlu1 %v3498_v19 }
 0x446   :  { %v3475_v29 = vpop.f32.mrf.mxu1 }
 0x447   :  { %v3476_v31 = vadd.f32 %v8804_v17, %v3475_v29 }
 0x449   :  { %v3501_v44 = vsel %vm13814_vm0, %v3476_v31, 0.0 }
 0x45d   :  { %v3482_v21 = vpop.xlane.xlu0 %3481 }
 0x45e   :  { %v3511_v27 = vmul.f32 %v11287_v53, %v3482_v21 }
 0x460   :  { %v11290_v22 = vsub.f32 %v3455_v56, %v3511_v27 }
 0x462   :  { %v3527_v51 = vmul.f32 %v11290_v22, %v11290_v22 }
 0x464   :  { %v3535_v38 = vsel %vm13814_vm0, %v3527_v51, 0.0 }
 0x465   :  { %3536 = vadd.xlane.f32.xlu0 %v3535_v38  ;;  %v3485_v47 = vpop.xlane.xlu0 %3484 }
 0x466   :  { %v3512_v50 = vmul.f32 %v11287_v53, %v3485_v47  ;;  %v11351_v47 = vld [vmem:[%s13707_s13] ss:$0 sm:$0xff] }
 0x468   :  { %v11296_v63 = vsub.f32 %v3458_v15, %v3512_v50 }
 0x46a   :  { %v3528_v4 = vmul.f32 %v11296_v63, %v11296_v63 }
 0x46c   :  { %v3538_v60 = vsel %vm13814_vm0, %v3528_v4, 0.0 }
 0x46d   :  { %3502 = vadd.xlane.f32.xlu0 %v3501_v44  ;;  %3539 = vadd.xlane.f32.xlu2 %v3538_v60 }
 0x475   :  { %v3488_v40 = vpop.xlane.xlu1 %3487 }
 0x476   :  { %v3513_v30 = vmul.f32 %v11287_v53, %v3488_v40 }
 0x478   :  { %v11303_v2 = vsub.f32 %v3461_v54, %v3513_v30 }
 0x47a   :  { %v3529_v41 = vmul.f32 %v11303_v2, %v11303_v2 }
 0x47c   :  { %v3541_v32 = vsel %vm13814_vm0, %v3529_v41, 0.0 }
 0x47d   :  { %3542 = vadd.xlane.f32.xlu1 %v3541_v32  ;;  %v3491_v7 = vpop.xlane.xlu1 %3490 }
 0x47e   :  { %v3514_v16 = vmul.f32 %v11287_v53, %v3491_v7 }
 0x480   :  { %v11309_v34 = vsub.f32 %v3464_v1, %v3514_v16 }
 0x482   :  { %v3530_v39 = vmul.f32 %v11309_v34, %v11309_v34 }
 0x484   :  { %v3544_v52 = vsel %vm13814_vm0, %v3530_v39, 0.0 }
 0x485   :  { %3545 = vadd.xlane.f32.xlu2 %v3544_v52 }
 0x491   :  { %v3494_v6 = vpop.xlane.xlu2 %3493 }
 0x492   :  { %v3515_v10 = vmul.f32 %v11287_v53, %v3494_v6 }
 0x494   :  { %v11315_v0 = vsub.f32 %v3467_v8, %v3515_v10 }
 0x496   :  { %v3531_v14 = vmul.f32 %v11315_v0, %v11315_v0 }
 0x498   :  { %v3547_v26 = vsel %vm13814_vm0, %v3531_v14, 0.0 }
 0x499   :  { %3548 = vadd.xlane.f32.xlu0 %v3547_v26 }
 0x49c   :  { %v3497_v24 = vpop.xlane.xlu2 %3496 }
 0x49d   :  { %v3516_v58 = vmul.f32 %v11287_v53, %v3497_v24 }
 0x49f   :  { %v11321_v20 = vsub.f32 %v3470_v37, %v3516_v58 }
 0x4a1   :  { %v3532_v59 = vmul.f32 %v11321_v20, %v11321_v20 }
 0x4a3   :  { %v3550_v62 = vsel %vm13814_vm0, %v3532_v59, 0.0 }
 0x4a4   :  { %3551 = vadd.xlane.f32.xlu1 %v3550_v62 }
 0x4a9   :  { %v3500_v36 = vpop.xlane.xlu1 %3499 }
 0x4aa   :  { %v3517_v17 = vmul.f32 %v11287_v53, %v3500_v36 }
 0x4ac   :  { %v11327_v48 = vsub.f32 %v3473_v43, %v3517_v17 }
 0x4ae   :  { %v3533_v56 = vmul.f32 %v11327_v48, %v11327_v48 }
 0x4b0   :  { %v3553_v25 = vsel %vm13814_vm0, %v3533_v56, 0.0 }
 0x4b1   :  { %3554 = vadd.xlane.f32.xlu2 %v3553_v25 }
 0x4d8   :  { %v3537_v35 = vpop.xlane.xlu0 %3536 }
 0x4d9   :  { %v3559_v15 = vmul.f32 %v3537_v35, %v11287_v53 }
 0x4db   :  { %v3567_v49 = vadd.f32 1e-05, %v3559_v15 }
 0x4dd   :  { %8851 = vrsqrt.f32 %v3567_v49  ;;  %vm3581_vm10 = vweird.f32 %v3567_v49 }
 0x4e0   :  { %v3503_v45 = vpop.xlane.xlu0 %3502  ;;  %v3540_v54 = vpop.xlane.xlu2 %3539 }
 0x4e1   :  { %v3518_v13 = vmul.f32 %v11287_v53, %v3503_v45  ;;  %v3560_v42 = vmul.f32 %v3540_v54, %v11287_v53 }
 0x4e3   :  { %v8852_v1 = vpop.eup %8851  ;;  %v11335_v3 = vsub.f32 %v3476_v31, %v3518_v13  ;;  %v3568_v8 = vadd.f32 1e-05, %v3560_v42 }
 0x4e4   :  { %v3576_v11 = vmul.f32 %v8852_v1, %v3567_v49  ;;  %vm3582_vm6 = vweird.f32 %v8852_v1 }
 0x4e5   :  { %v3534_v18 = vmul.f32 %v11335_v3, %v11335_v3  ;;  %8853 = vrsqrt.f32 %v3568_v8  ;;  %vm3583_vm8 = vmor %vm3581_vm10, %vm3582_vm6  ;;  %vm3591_vm12 = vweird.f32 %v3568_v8 }
 0x4e6   :  { %v3577_v55 = vmul.f32 %v8852_v1, %v3576_v11 }
 0x4e7   :  { %v3556_v37 = vsel %vm13814_vm0, %v3534_v18, 0.0 }
 0x4e8   :  { %v3578_v12 = vmul.f32 0.5, %v3577_v55  ;;  %3557 = vadd.xlane.f32.xlu0 %v3556_v37 }
 0x4ea   :  { %v3579_v5 = vsub.f32 1.5, %v3578_v12 }
 0x4eb   :  { %v8854_v43 = vpop.eup %8853 }
 0x4ec   :  { %v3580_v19 = vmul.f32 %v8852_v1, %v3579_v5  ;;  %v3586_v57 = vmul.f32 %v8854_v43, %v3568_v8  ;;  %vm3592_vm11 = vweird.f32 %v8854_v43 }
 0x4ed   :  { %vm3593_vm13 = vmor %vm3591_vm12, %vm3592_vm11 }
 0x4ee   :  { %v3584_v23 = vsel %vm3583_vm8, %v8852_v1, %v3580_v19  ;;  %v3587_v21 = vmul.f32 %v8854_v43, %v3586_v57 }
 0x4ef   :  { %v3655_v33 = vmul.f32 %v3584_v23, %v11290_v22 }
 0x4f0   :  { %v3543_v46 = vpop.xlane.xlu1 %3542  ;;  %v3588_v38 = vmul.f32 0.5, %v3587_v21 }
 0x4f1   :  { %v3561_v28 = vmul.f32 %v3543_v46, %v11287_v53  ;;  %v3666_v51 = vmul.f32 %v11343_v61, %v3655_v33 }
 0x4f2   :  { %v3589_v29 = vsub.f32 1.5, %v3588_v38 }
 0x4f3   :  { %v3569_v27 = vadd.f32 1e-05, %v3561_v28  ;;  %v11354_v31 = vadd.f32 %v11351_v47, %v3666_v51 }
 0x4f4   :  { %v3590_v50 = vmul.f32 %v8854_v43, %v3589_v29 }
 0x4f5   :  { %8855 = vrsqrt.f32 %v3569_v27  ;;  %v11357_v4 = vmul.f32 0.70710677, %v11354_v31  ;;  %vm3601_vm15 = vweird.f32 %v3569_v27 }
 0x4f6   :  { %v3594_v22 = vsel %vm3593_vm13, %v8854_v43, %v3590_v50 }
 0x4f7   :  { %v3656_v60 = vmul.f32 %v3594_v22, %v11296_v63  ;;  %v3701_v32 = vmul.f32 %v11357_v4, %v11357_v4 }
 0x4f8   :  { %v3546_v40 = vpop.xlane.xlu2 %3545 }
 0x4f9   :  { %v3562_v41 = vmul.f32 %v3546_v40, %v11287_v53  ;;  %v11363_v39 = vmin.f32 %v3701_v32, 16.0  ;;  %v3667_v52 = vmul.f32 %v11343_v61, %v3656_v60 }
 0x4fb   :  { %v8856_v44 = vpop.eup %8855  ;;  %v3570_v16 = vadd.f32 1e-05, %v3562_v41  ;;  %v3703_v10 = vmul.f32 2.1237322e-06, %v11363_v39  ;;  %v3714_v14 = vmul.f32 3.8918573e-05, %v11363_v39  ;;  %v11369_v63 = vadd.f32 %v11351_v47, %v3667_v52 }
 0x4fc   :  { %v3596_v30 = vmul.f32 %v8856_v44, %v3569_v27  ;;  %vm3602_vm9 = vweird.f32 %v8856_v44 }
 0x4fd   :  { %8857 = vrsqrt.f32 %v3570_v16  ;;  %v3704_v24 = vadd.f32 0.00028619796, %v3703_v10  ;;  %v3715_v58 = vadd.f32 0.001143296, %v3714_v14  ;;  %v11372_v59 = vmul.f32 0.70710677, %v11369_v63  ;;  %vm3603_vm1 = vmor %vm3601_vm15, %vm3602_vm9 }
 0x4fe   :  { %v3597_v7 = vmul.f32 %v8856_v44, %v3596_v30  ;;  %vm3611_vm3 = vweird.f32 %v3570_v16 }
 0x4ff   :  { %v3705_v36 = vmul.f32 %v3704_v24, %v11363_v39  ;;  %v3716_v17 = vmul.f32 %v3715_v58, %v11363_v39  ;;  %v3741_v56 = vmul.f32 %v11372_v59, %v11372_v59 }
 0x500   :  { %v3598_v6 = vmul.f32 0.5, %v3597_v7 }
 0x501   :  { %v3706_v15 = vadd.f32 0.0036580483, %v3705_v36  ;;  %v3717_v54 = vadd.f32 0.014752088, %v3716_v17  ;;  %v11380_v42 = vmin.f32 %v3741_v56, 16.0 }
 0x502   :  { %v3599_v26 = vsub.f32 1.5, %v3598_v6 }
 0x503   :  { %v8858_v25 = vpop.eup %8857  ;;  %v3707_v13 = vmul.f32 %v3706_v15, %v11363_v39  ;;  %v3718_v11 = vmul.f32 %v3717_v54, %v11363_v39  ;;  %v3743_v18 = vmul.f32 2.1237322e-06, %v11380_v42  ;;  %v3754_v55 = vmul.f32 3.8918573e-05, %v11380_v42  ;;  %v8708_v54 = vld [vmem:[%s13699_s5 + $0x8] sm:$0xff] }
 0x504   :  { %v3600_v62 = vmul.f32 %v8856_v44, %v3599_v26  ;;  %v3606_v45 = vmul.f32 %v8858_v25, %v3570_v16  ;;  %vm3612_vm2 = vweird.f32 %v8858_v25 }
 0x505   :  { %v3719_v5 = vadd.f32 0.112945676, %v3718_v11  ;;  %v3708_v19 = vadd.f32 0.05243302, %v3707_v13  ;;  %v3744_v57 = vadd.f32 0.00028619796, %v3743_v18  ;;  %vm3613_vm4 = vmor %vm3611_vm3, %vm3612_vm2 }
 0x506   :  { %v3604_v35 = vsel %vm3603_vm1, %v8856_v44, %v3600_v62  ;;  %v3607_v1 = vmul.f32 %v8858_v25, %v3606_v45  ;;  %v3755_v46 = vadd.f32 0.001143296, %v3754_v55 }
 0x507   :  { %v3657_v49 = vmul.f32 %v3604_v35, %v11303_v2  ;;  %v3720_v28 = vmul.f32 %v3719_v5, %v11363_v39  ;;  %v3745_v27 = vmul.f32 %v3744_v57, %v11380_v42  ;;  %v3709_v22 = vmul.f32 %v3708_v19, %v11363_v39 }
 0x508   :  { %v3608_v37 = vmul.f32 0.5, %v3607_v1  ;;  %v3756_v51 = vmul.f32 %v3755_v46, %v11380_v42 }
 0x509   :  { %v3668_v8 = vmul.f32 %v11343_v61, %v3657_v49  ;;  %v3721_v29 = vadd.f32 0.4994258, %v3720_v28  ;;  %v3746_v44 = vadd.f32 0.0036580483, %v3745_v27  ;;  %v3710_v10 = vadd.f32 0.18741608, %v3709_v22 }
 0x50a   :  { %v3609_v23 = vsub.f32 1.5, %v3608_v37  ;;  %v3757_v30 = vadd.f32 0.014752088, %v3756_v51 }
 0x50b   :  { %v11387_v2 = vadd.f32 %v11351_v47, %v3668_v8  ;;  %v3722_v40 = vmul.f32 %v3721_v29, %v11363_v39  ;;  %v3747_v7 = vmul.f32 %v3746_v44, %v11380_v42  ;;  %v3711_v15 = vmul.f32 %v3710_v10, %v11363_v39  ;;  %v4037_v39 = vld [vmem:[%s13709_s14] sm:$0xff] }
 0x50c   :  { %v3549_v12 = vpop.xlane.xlu0 %3548  ;;  %v3610_v38 = vmul.f32 %v8858_v25, %v3609_v23  ;;  %v3758_v52 = vmul.f32 %v3757_v30, %v11380_v42  ;;  %v11438_v8 = vmul.f32 0.5, %v11354_v31  ;;  %4081 = vmatpush.msrb.mxu2 %v4037_v39 }
 0x50d   :  { %v3563_v43 = vmul.f32 %v3549_v12, %v11287_v53  ;;  %v11392_v33 = vmul.f32 0.70710677, %v11387_v2  ;;  %v11407_v16 = vadd.f32 1.0, %v3722_v40  ;;  %v3748_v14 = vadd.f32 0.05243302, %v3747_v7 }
 0x50e   :  { %v3614_v60 = vsel %vm3613_vm4, %v8858_v25, %v3610_v38  ;;  %v3759_v36 = vadd.f32 0.112945676, %v3758_v52  ;;  %v3712_v19 = vadd.f32 1.1283791, %v3711_v15  ;;  %6779 = vmatpush.msra.mxu2 %v8708_v54 }
 0x50f   :  { %v11394_v21 = vadd.f32 1e-05, %v3563_v43  ;;  %v3781_v50 = vmul.f32 %v11392_v33, %v11392_v33  ;;  %v3658_v32 = vmul.f32 %v3614_v60, %v11309_v34  ;;  %v3749_v25 = vmul.f32 %v3748_v14, %v11380_v42 }
 0x510   :  { %v3760_v49 = vmul.f32 %v3759_v36, %v11380_v42  ;;  %v3733_v46 = vand.u32 2147483647, %v11407_v16  ;;  %v3735_v38 = vand.u32 2147483648, %v11407_v16  ;;  %v3713_v7 = vmul.f32 %v3712_v19, %v11357_v4 }
 0x511   :  { %8859 = vrsqrt.f32 %v11394_v21  ;;  %v11403_v41 = vmin.f32 %v3781_v50, 16.0  ;;  %v3669_v58 = vmul.f32 %v11343_v61, %v3658_v32  ;;  %vm3621_vm5 = vweird.f32 %v11394_v21 }
 0x512   :  { %8861 = vrcp.f32 %v11407_v16  ;;  %v3761_v18 = vadd.f32 0.4994258, %v3760_v49  ;;  %v3750_v12 = vadd.f32 0.18741608, %v3749_v25  ;;  %vm3729_vm8 = vweird.f32 %v11407_v16 }
 0x513   :  { %v3783_v6 = vmul.f32 2.1237322e-06, %v11403_v41  ;;  %v3794_v24 = vmul.f32 3.8918573e-05, %v11403_v41  ;;  %v11430_v11 = vadd.f32 %v11351_v47, %v3669_v58  ;;  %vm11470_vm11 = vcmp.eq.f32.partialorder %v3733_v46, 8.507059e+37 }
 0x514   :  { %v3762_v23 = vmul.f32 %v3761_v18, %v11380_v42  ;;  %v3751_v44 = vmul.f32 %v3750_v12, %v11380_v42  ;;  %v3736_v4 = vor.u32 1.1754944e-38, %v3735_v38 }
 0x515   :  { %v3784_v17 = vadd.f32 0.00028619796, %v3783_v6  ;;  %v3795_v1 = vadd.f32 0.001143296, %v3794_v24  ;;  %v11446_v27 = vmul.f32 0.70710677, %v11430_v11 }
 0x516   :  { %v11449_v29 = vadd.f32 1.0, %v3762_v23  ;;  %v3752_v58 = vadd.f32 1.1283791, %v3751_v44 }
 0x517   :  { %v3552_v26 = vpop.xlane.xlu1 %3551  ;;  %v11414_v62 = vpop.eup %8859  ;;  %v3785_v45 = vmul.f32 %v3784_v17, %v11403_v41  ;;  %v3796_v43 = vmul.f32 %v3795_v1, %v11403_v41  ;;  %v3821_v40 = vmul.f32 %v11446_v27, %v11446_v27 }
 0x518   :  { %v3564_v34 = vmul.f32 %v3552_v26, %v11287_v53  ;;  %v3616_v56 = vmul.f32 %v11414_v62, %v11394_v21  ;;  %v8862_v55 = vpop.eup %8861  ;;  %vm3622_vm7 = vweird.f32 %v11414_v62  ;;  %vm3769_vm2 = vweird.f32 %v11449_v29 }
 0x519   :  { %v3786_v5 = vadd.f32 0.0036580483, %v3785_v45  ;;  %v3725_v57 = vmul.f32 %v8862_v55, %v11407_v16  ;;  %v3797_v31 = vadd.f32 0.014752088, %v3796_v43  ;;  %vm11459_vm6 = vmor %vm3621_vm5, %vm3622_vm7  ;;  %vm3730_vm10 = vweird.f32 %v8862_v55 }
 0x51a   :  { %v11420_v35 = vadd.f32 1e-05, %v3564_v34  ;;  %v3617_v13 = vmul.f32 %v11414_v62, %v3616_v56  ;;  %vm3731_vm13 = vmor %vm3729_vm8, %vm3730_vm10  ;;  %v11475_v36 = vmin.f32 %v3821_v40, 16.0  ;;  %v3773_v56 = vand.u32 2147483647, %v11449_v29  ;;  %v8771_v40 = vld [vmem:[%s13709_s14 + $0x8] sm:$0xff] }
 0x51b   :  { %v3726_v51 = vsub.f32 1.0, %v3725_v57  ;;  %v3787_v50 = vmul.f32 %v3786_v5, %v11403_v41  ;;  %v3798_v60 = vmul.f32 %v3797_v31, %v11403_v41  ;;  %v3775_v5 = vand.u32 2147483648, %v11449_v29 }
 0x51c   :  { %8863 = vrsqrt.f32 %v11420_v35  ;;  %v3618_v37 = vmul.f32 0.5, %v3617_v13  ;;  %vm3631_vm12 = vweird.f32 %v11420_v35  ;;  %v3823_v45 = vmul.f32 2.1237322e-06, %v11475_v36 }
 0x51d   :  { %v3727_v52 = vmul.f32 %v8862_v55, %v3726_v51  ;;  %8865 = vrcp.f32 %v11449_v29  ;;  %v3788_v14 = vadd.f32 0.05243302, %v3787_v50  ;;  %v3799_v34 = vadd.f32 0.112945676, %v3798_v60 }
 0x51e   :  { %v3619_v28 = vsub.f32 1.5, %v3618_v37  ;;  %v3824_v23 = vadd.f32 0.00028619796, %v3823_v45  ;;  %vm3774_vm4 = vcmp.eq.f32.partialorder %v3773_v56, 8.507059e+37 }
 0x51f   :  { %v3728_v10 = vadd.f32 %v8862_v55, %v3727_v52  ;;  %v3800_v49 = vmul.f32 %v3799_v34, %v11403_v41  ;;  %v3789_v39 = vmul.f32 %v3788_v14, %v11403_v41 }
 0x520   :  { %v3620_v22 = vmul.f32 %v11414_v62, %v3619_v28  ;;  %v3825_v44 = vmul.f32 %v3824_v23, %v11475_v36 }
 0x521   :  { %v3732_v17 = vsel %vm3731_vm13, %v8862_v55, %v3728_v10  ;;  %v3801_v37 = vadd.f32 0.4994258, %v3800_v49  ;;  %v3790_v31 = vadd.f32 0.18741608, %v3789_v39 }
 0x522   :  { %v8864_v30 = vpop.eup %8863  ;;  %v3624_v42 = vsel %vm11459_vm6, %v11414_v62, %v3620_v22  ;;  %v3737_v15 = vsel %vm11470_vm11, %v3736_v4, %v3732_v17 }
 0x523   :  { %v3626_v6 = vmul.f32 %v8864_v30, %v11420_v35  ;;  %v3659_v62 = vmul.f32 %v3624_v42, %v11315_v0  ;;  %v8866_v54 = vpop.eup %8865  ;;  %v3738_v1 = vmul.f32 %v3737_v15, %v3713_v7  ;;  %v3834_v0 = vmul.f32 3.8918573e-05, %v11475_v36 }
 0x524   :  { %v3555_v24 = vpop.xlane.xlu2 %3554  ;;  %vm3632_vm9 = vweird.f32 %v8864_v30  ;;  %v3765_v55 = vmul.f32 %v8866_v54, %v11449_v29  ;;  %v3802_v46 = vmul.f32 %v3801_v37, %v11403_v41  ;;  %vm3770_vm1 = vweird.f32 %v8866_v54 }
 0x525   :  { %v3627_v26 = vmul.f32 %v8864_v30, %v3626_v6  ;;  %v3565_v16 = vmul.f32 %v3555_v24, %v11287_v53  ;;  %v8603_v12 = vclamps-f32 %v3738_v1, 1.0  ;;  %v3670_v43 = vmul.f32 %v11343_v61, %v3659_v62  ;;  %vm3633_vm15 = vmor %vm3631_vm12, %vm3632_vm9 }
 0x526   :  { %v3766_v57 = vsub.f32 1.0, %v3765_v55  ;;  %v3835_v51 = vadd.f32 0.001143296, %v3834_v0  ;;  %v11495_v22 = vadd.f32 1.0, %v3802_v46  ;;  %v3753_v35 = vmul.f32 %v3752_v58, %v11372_v59  ;;  %vm3771_vm3 = vmor %vm3769_vm2, %vm3770_vm1 }
 0x527   :  { %v3628_v25 = vmul.f32 0.5, %v3627_v26  ;;  %v11484_v13 = vadd.f32 1e-05, %v3565_v16  ;;  %v4021_v28 = vadd.f32 1.0, %v8603_v12  ;;  %v3826_v6 = vadd.f32 0.0036580483, %v3825_v44 }
 0x528   :  { %v3767_v50 = vmul.f32 %v8866_v54, %v3766_v57  ;;  %v3836_v7 = vmul.f32 %v3835_v51, %v11475_v36  ;;  %v3791_v29 = vmul.f32 %v3790_v31, %v11403_v41  ;;  %v3686_v16 = vmul.f32 0.5, %v11369_v63 }
 0x529   :  { %v3629_v18 = vsub.f32 1.5, %v3628_v25  ;;  %8867 = vrsqrt.f32 %v11484_v13  ;;  %v4029_v32 = vmul.f32 %v4021_v28, %v11438_v8  ;;  %v3827_v14 = vmul.f32 %v3826_v6, %v11475_v36 }
 0x52a   :  { %v3768_v52 = vadd.f32 %v8866_v54, %v3767_v50  ;;  %8869 = vrcp.f32 %v11495_v22  ;;  %v3837_v8 = vadd.f32 0.014752088, %v3836_v7  ;;  %vm3641_vm5 = vweird.f32 %v11484_v13 }
 0x52b   :  { %v3630_v19 = vmul.f32 %v8864_v30, %v3629_v18  ;;  %8611 = vmatmul.msk.f32.vlgmr.msrb.gmra.mxu2 %vm13814_vm0, %v4029_v32  ;;  %v3828_v17 = vadd.f32 0.05243302, %v3827_v14  ;;  %v3792_v49 = vadd.f32 1.1283791, %v3791_v29  ;;  %v3813_v1 = vand.u32 2147483647, %v11495_v22 }
 0x52c   :  { %v3772_v10 = vsel %vm3771_vm3, %v8866_v54, %v3768_v52  ;;  %8117 = vmatpush.msrb.mxu2 %v8771_v40  ;;  %v3838_v26 = vmul.f32 %v3837_v8, %v11475_v36  ;;  %v3815_v12 = vand.u32 2147483648, %v11495_v22  ;;  %vm3809_vm8 = vweird.f32 %v11495_v22 }
 0x52d   :  { %v3634_v38 = vsel %vm3633_vm15, %v8864_v30, %v3630_v19  ;;  %v11508_v30 = vadd.f32 %v11351_v47, %v3670_v43  ;;  %vm3814_vm12 = vcmp.eq.f32.partialorder %v3813_v1, 8.507059e+37 }
 0x52e   :  { %v3660_v60 = vmul.f32 %v3634_v38, %v11321_v20  ;;  %v3776_v20 = vor.u32 1.1754944e-38, %v3775_v5  ;;  %v3839_v41 = vadd.f32 0.112945676, %v3838_v26  ;;  %v3829_v5 = vmul.f32 %v3828_v17, %v11475_v36 }
 0x52f   :  { %v8868_v42 = vpop.eup %8867  ;;  %v11518_v34 = vmul.f32 0.70710677, %v11508_v30  ;;  %v3816_v40 = vor.u32 1.1754944e-38, %v3815_v12 }
 0x530   :  { %v3671_v59 = vmul.f32 %v11343_v61, %v3660_v60  ;;  %v3636_v21 = vmul.f32 %v8868_v42, %v11484_v13  ;;  %v3777_v4 = vsel %vm3774_vm4, %v3776_v20, %v3772_v10  ;;  %v8870_v56 = vpop.eup %8869  ;;  %vm3642_vm7 = vweird.f32 %v8868_v42 }
 0x531   :  { %v3778_v58 = vmul.f32 %v3777_v4, %v3753_v35  ;;  %v3861_v45 = vmul.f32 %v11518_v34, %v11518_v34  ;;  %v3805_v54 = vmul.f32 %v8870_v56, %v11495_v22  ;;  %v3840_v39 = vmul.f32 %v3839_v41, %v11475_v36  ;;  %vm3643_vm6 = vmor %vm3641_vm5, %vm3642_vm7 }
 0x532   :  { %v3637_v24 = vmul.f32 %v8868_v42, %v3636_v21  ;;  %v11521_v62 = vadd.f32 %v11351_v47, %v3671_v59  ;;  %vm3810_vm10 = vweird.f32 %v8870_v56  ;;  %v3830_v32 = vadd.f32 0.18741608, %v3829_v5 }
 0x533   :  { %v8604_v15 = vclamps-f32 %v3778_v58, 1.0  ;;  %v11530_v55 = vmin.f32 %v3861_v45, 16.0  ;;  %v3806_v37 = vsub.f32 1.0, %v3805_v54  ;;  %v3841_v43 = vadd.f32 0.4994258, %v3840_v39  ;;  %vm3811_vm11 = vmor %vm3809_vm8, %vm3810_vm10 }
 0x534   :  { %v3638_v25 = vmul.f32 0.5, %v3637_v24  ;;  %v11533_v63 = vmul.f32 0.70710677, %v11521_v62  ;;  %v3831_v29 = vmul.f32 %v3830_v32, %v11475_v36  ;;  %v3687_v58 = vmul.f32 0.5, %v11387_v2 }
 0x535   :  { %v4022_v18 = vadd.f32 1.0, %v8604_v15  ;;  %v3863_v46 = vmul.f32 2.1237322e-06, %v11530_v55  ;;  %v3874_v23 = vmul.f32 3.8918573e-05, %v11530_v55  ;;  %v3807_v28 = vmul.f32 %v8870_v56, %v3806_v37 }
 0x536   :  { %v3639_v0 = vsub.f32 1.5, %v3638_v25  ;;  %v3842_v31 = vmul.f32 %v3841_v43, %v11475_v36  ;;  %v3901_v51 = vmul.f32 %v11533_v63, %v11533_v63  ;;  %v3832_v54 = vadd.f32 1.1283791, %v3831_v29 }
 0x537   :  { %v4030_v57 = vmul.f32 %v4022_v18, %v3686_v16  ;;  %v3864_v50 = vadd.f32 0.00028619796, %v3863_v46  ;;  %v3875_v44 = vadd.f32 0.001143296, %v3874_v23  ;;  %v3808_v60 = vadd.f32 %v8870_v56, %v3807_v28 }
 0x538   :  { %v3640_v19 = vmul.f32 %v8868_v42, %v3639_v0  ;;  %v3843_v35 = vadd.f32 1.0, %v3842_v31  ;;  %v11550_v20 = vmin.f32 %v3901_v51, 16.0  ;;  %v3833_v23 = vmul.f32 %v3832_v54, %v11446_v27 }
 0x539   :  { %8612 = vmatmul.msk.f32.gmra.mxu2 %vm13814_vm0, %v4030_v57  ;;  %v3865_v7 = vmul.f32 %v3864_v50, %v11530_v55  ;;  %v3876_v52 = vmul.f32 %v3875_v44, %v11530_v55  ;;  %v3812_v6 = vsel %vm3811_vm11, %v8870_v56, %v3808_v60  ;;  %v3688_v29 = vmul.f32 0.5, %v11430_v11 }
 0x53a   :  { %v3644_v38 = vsel %vm3643_vm6, %v8868_v42, %v3640_v19  ;;  %v3793_v42 = vmul.f32 %v3792_v49, %v11392_v33  ;;  %8871 = vrcp.f32 %v3843_v35  ;;  %v3817_v22 = vsel %vm3814_vm12, %v3816_v40, %v3812_v6 }
 0x53b   :  { %v3661_v13 = vmul.f32 %v3644_v38, %v11327_v48  ;;  %v3866_v8 = vadd.f32 0.0036580483, %v3865_v7  ;;  %v3877_v21 = vadd.f32 0.014752088, %v3876_v52  ;;  %v3903_v10 = vmul.f32 2.1237322e-06, %v11550_v20 }
 0x53c   :  { %v3818_v59 = vmul.f32 %v3817_v22, %v3793_v42  ;;  %v3914_v48 = vmul.f32 3.8918573e-05, %v11550_v20  ;;  %v3855_v37 = vand.u32 2147483648, %v3843_v35  ;;  %v3853_v57 = vand.u32 2147483647, %v3843_v35 }
 0x53d   :  { %v3672_v4 = vmul.f32 %v11343_v61, %v3661_v13  ;;  %v3878_v26 = vmul.f32 %v3877_v21, %v11530_v55  ;;  %v3904_v24 = vadd.f32 0.00028619796, %v3903_v10  ;;  %v3867_v16 = vmul.f32 %v3866_v8, %v11530_v55 }
 0x53e   :  { %v8605_v14 = vclamps-f32 %v3818_v59, 1.0  ;;  %v3915_v33 = vadd.f32 0.001143296, %v3914_v48  ;;  %vm3849_vm9 = vweird.f32 %v3843_v35  ;;  %v3856_v44 = vor.u32 1.1754944e-38, %v3855_v37 }
 0x53f   :  { %v11561_v17 = vadd.f32 %v11351_v47, %v3672_v4  ;;  %v3879_v25 = vadd.f32 0.112945676, %v3878_v26  ;;  %v3905_v15 = vmul.f32 %v3904_v24, %v11550_v20  ;;  %v3868_v2 = vadd.f32 0.05243302, %v3867_v16 }
 0x540   :  { %v8872_v41 = vpop.eup %8871  ;;  %v4023_v56 = vadd.f32 1.0, %v8605_v14  ;;  %v3916_v36 = vmul.f32 %v3915_v33, %v11550_v20  ;;  %vm3854_vm1 = vcmp.eq.f32.partialorder %v3853_v57, 8.507059e+37 }
 0x541   :  { %v3845_v49 = vmul.f32 %v8872_v41, %v3843_v35  ;;  %v3880_v1 = vmul.f32 %v3879_v25, %v11530_v55  ;;  %v11567_v18 = vmul.f32 0.70710677, %v11561_v17  ;;  %v3906_v5 = vadd.f32 0.0036580483, %v3905_v15 }
 0x542   :  { %v4031_v45 = vmul.f32 %v4023_v56, %v3687_v58  ;;  %v3917_v39 = vadd.f32 0.014752088, %v3916_v36  ;;  %vm3850_vm13 = vweird.f32 %v8872_v41  ;;  %v3869_v38 = vmul.f32 %v3868_v2, %v11530_v55 }
 0x543   :  { %v3846_v0 = vsub.f32 1.0, %v3845_v49  ;;  %v3881_v12 = vadd.f32 0.4994258, %v3880_v1  ;;  %v3941_v46 = vmul.f32 %v11567_v18, %v11567_v18  ;;  %vm3851_vm15 = vmor %vm3849_vm9, %vm3850_vm13  ;;  %v3907_v40 = vmul.f32 %v3906_v5, %v11550_v20 }
 0x544   :  { %8613 = vmatmul.msk.f32.gmra.mxu2 %vm13814_vm0, %v4031_v45  ;;  %v3918_v43 = vmul.f32 %v3917_v39, %v11550_v20  ;;  %v3870_v42 = vadd.f32 0.18741608, %v3869_v38 }
 0x545   :  { %v3847_v19 = vmul.f32 %v8872_v41, %v3846_v0  ;;  %v3882_v28 = vmul.f32 %v3881_v12, %v11530_v55  ;;  %v11576_v50 = vmin.f32 %v3941_v46, 16.0  ;;  %v3908_v22 = vadd.f32 0.05243302, %v3907_v40 }
 0x546   :  { %v3919_v31 = vadd.f32 0.112945676, %v3918_v43  ;;  %v3871_v33 = vmul.f32 %v3870_v42, %v11530_v55 }
 0x547   :  { %v3848_v51 = vadd.f32 %v8872_v41, %v3847_v19  ;;  %v3883_v60 = vadd.f32 1.0, %v3882_v28  ;;  %v3943_v27 = vmul.f32 2.1237322e-06, %v11576_v50  ;;  %v3954_v7 = vmul.f32 3.8918573e-05, %v11576_v50 }
 0x548   :  { %v3920_v32 = vmul.f32 %v3919_v31, %v11550_v20  ;;  %v3909_v58 = vmul.f32 %v3908_v22, %v11550_v20  ;;  %v3872_v11 = vadd.f32 1.1283791, %v3871_v33 }
 0x549   :  { %v3852_v13 = vsel %vm3851_vm15, %v8872_v41, %v3848_v51  ;;  %8873 = vrcp.f32 %v3883_v60  ;;  %v3944_v8 = vadd.f32 0.00028619796, %v3943_v27  ;;  %v3955_v59 = vadd.f32 0.001143296, %v3954_v7 }
 0x54a   :  { %v3857_v52 = vsel %vm3854_vm1, %v3856_v44, %v3852_v13  ;;  %v3921_v6 = vadd.f32 0.4994258, %v3920_v32  ;;  %v3895_v49 = vand.u32 2147483648, %v3883_v60  ;;  %v3910_v45 = vadd.f32 0.18741608, %v3909_v58 }
 0x54b   :  { %v3858_v35 = vmul.f32 %v3857_v52, %v3833_v23  ;;  %v3956_v48 = vmul.f32 %v3955_v59, %v11576_v50  ;;  %v3945_v26 = vmul.f32 %v3944_v8, %v11576_v50  ;;  %v3893_v1 = vand.u32 2147483647, %v3883_v60 }
 0x54c   :  { %v3922_v10 = vmul.f32 %v3921_v6, %v11550_v20  ;;  %vm3889_vm3 = vweird.f32 %v3883_v60  ;;  %v3896_v12 = vor.u32 1.1754944e-38, %v3895_v49  ;;  %v3911_v5 = vmul.f32 %v3910_v45, %v11550_v20 }
 0x54d   :  { %v8606_v21 = vclamps-f32 %v3858_v35, 1.0  ;;  %v3957_v16 = vadd.f32 0.014752088, %v3956_v48  ;;  %v3946_v15 = vadd.f32 0.0036580483, %v3945_v26  ;;  %v3873_v43 = vmul.f32 %v3872_v11, %v11518_v34 }
 0x54e   :  { %v3923_v14 = vadd.f32 1.0, %v3922_v10  ;;  %vm3894_vm5 = vcmp.eq.f32.partialorder %v3893_v1, 8.507059e+37  ;;  %v3912_v38 = vadd.f32 1.1283791, %v3911_v5  ;;  %v3689_v34 = vmul.f32 0.5, %v11508_v30 }
 0x54f   :  { %v4024_v4 = vadd.f32 1.0, %v8606_v21  ;;  %v8874_v24 = vpop.eup %8873  ;;  %v3958_v36 = vmul.f32 %v3957_v16, %v11576_v50  ;;  %v3947_v0 = vmul.f32 %v3946_v15, %v11576_v50  ;;  %v3690_v26 = vmul.f32 0.5, %v11521_v62 }
 0x550   :  { %v3885_v56 = vmul.f32 %v8874_v24, %v3883_v60  ;;  %8875 = vrcp.f32 %v3923_v14  ;;  %vm3890_vm2 = vweird.f32 %v8874_v24  ;;  %v3933_v44 = vand.u32 2147483647, %v3923_v14 }
 0x551   :  { %v4032_v41 = vmul.f32 %v4024_v4, %v3688_v29  ;;  %v3959_v39 = vadd.f32 0.112945676, %v3958_v36  ;;  %vm3891_vm4 = vmor %vm3889_vm3, %vm3890_vm2  ;;  %v3948_v51 = vadd.f32 0.05243302, %v3947_v0  ;;  %v3935_v60 = vand.u32 2147483648, %v3923_v14 }
 0x552   :  { %v3886_v25 = vsub.f32 1.0, %v3885_v56  ;;  %vm3929_vm6 = vweird.f32 %v3923_v14  ;;  %v3913_v22 = vmul.f32 %v3912_v38, %v11533_v63  ;;  %vm3934_vm8 = vcmp.eq.f32.partialorder %v3933_v44, 8.507059e+37 }
 0x553   :  { %8614 = vmatmul.msk.f32.gmra.mxu2 %vm13814_vm0, %v4032_v41  ;;  %v3960_v2 = vmul.f32 %v3959_v39, %v11576_v50  ;;  %v3949_v42 = vmul.f32 %v3948_v51, %v11576_v50  ;;  %v3936_v8 = vor.u32 1.1754944e-38, %v3935_v60  ;;  %v3691_v5 = vmul.f32 0.5, %v11561_v17 }
 0x554   :  { %v3887_v54 = vmul.f32 %v8874_v24, %v3886_v25 }
 0x555   :  { %v3961_v23 = vadd.f32 0.4994258, %v3960_v2  ;;  %v3950_v48 = vadd.f32 0.18741608, %v3949_v42 }
 0x556   :  { %v3888_v55 = vadd.f32 %v8874_v24, %v3887_v54  ;;  %v8876_v37 = vpop.eup %8875 }
 0x557   :  { %v3925_v57 = vmul.f32 %v8876_v37, %v3923_v14  ;;  %v3962_v40 = vmul.f32 %v3961_v23, %v11576_v50  ;;  %vm3930_vm7 = vweird.f32 %v8876_v37  ;;  %v3951_v63 = vmul.f32 %v3950_v48, %v11576_v50 }
 0x558   :  { %v3892_v19 = vsel %vm3891_vm4, %v8874_v24, %v3888_v55  ;;  %vm3931_vm10 = vmor %vm3929_vm6, %vm3930_vm7 }
 0x559   :  { %v3897_v46 = vsel %vm3894_vm5, %v3896_v12, %v3892_v19  ;;  %v3926_v31 = vsub.f32 1.0, %v3925_v57  ;;  %v3963_v7 = vadd.f32 1.0, %v3962_v40  ;;  %v3952_v15 = vadd.f32 1.1283791, %v3951_v63 }
 0x55a   :  { %v3898_v28 = vmul.f32 %v3897_v46, %v3873_v43 }
 0x55b   :  { %v3558_v32 = vpop.xlane.xlu0 %3557  ;;  %v3927_v27 = vmul.f32 %v8876_v37, %v3926_v31  ;;  %8877 = vrcp.f32 %v3963_v7  ;;  %v3975_v56 = vand.u32 2147483648, %v3963_v7  ;;  %v3973_v11 = vand.u32 2147483647, %v3963_v7 }
 0x55c   :  { %v8607_v13 = vclamps-f32 %v3898_v28, 1.0  ;;  %v3566_v20 = vmul.f32 %v3558_v32, %v11287_v53  ;;  %vm3969_vm12 = vweird.f32 %v3963_v7  ;;  %v3953_v50 = vmul.f32 %v3952_v15, %v11567_v18 }
 0x55d   :  { %v3928_v35 = vadd.f32 %v8876_v37, %v3927_v27  ;;  %v3976_v62 = vor.u32 1.1754944e-38, %v3975_v56  ;;  %vm3974_vm15 = vcmp.eq.f32.partialorder %v3973_v11, 8.507059e+37 }
 0x55e   :  { %v4025_v52 = vadd.f32 1.0, %v8607_v13  ;;  %v3574_v6 = vadd.f32 1e-05, %v3566_v20 }
 0x55f   :  { %v3932_v21 = vsel %vm3931_vm10, %v8876_v37, %v3928_v35 }
 0x560   :  { %v4033_v59 = vmul.f32 %v4025_v52, %v3689_v34  ;;  %8879 = vrsqrt.f32 %v3574_v6  ;;  %v3937_v10 = vsel %vm3934_vm8, %v3936_v8, %v3932_v21  ;;  %vm3651_vm1 = vweird.f32 %v3574_v6 }
 0x561   :  { %v3938_v30 = vmul.f32 %v3937_v10, %v3913_v22  ;;  %v8878_v4 = vpop.eup %8877 }
 0x562   :  { %8615 = vmatmul.msk.f32.gmra.mxu2 %vm13814_vm0, %v4033_v59  ;;  %v3965_v33 = vmul.f32 %v8878_v4, %v3963_v7  ;;  %vm3970_vm11 = vweird.f32 %v8878_v4 }
 0x563   :  { %v8608_v29 = vclamps-f32 %v3938_v30, 1.0  ;;  %vm3971_vm13 = vmor %vm3969_vm12, %vm3970_vm11 }
 0x564   :  { %v3966_v41 = vsub.f32 1.0, %v3965_v33 }
 0x565   :  { %v4026_v24 = vadd.f32 1.0, %v8608_v29 }
 0x566   :  { %v8880_v14 = vpop.eup %8879  ;;  %v3967_v36 = vmul.f32 %v8878_v4, %v3966_v41 }
 0x567   :  { %v3646_v58 = vmul.f32 %v8880_v14, %v3574_v6  ;;  %v4034_v16 = vmul.f32 %v4026_v24, %v3690_v26  ;;  %vm3652_vm9 = vweird.f32 %v8880_v14 }
 0x568   :  { %v3968_v45 = vadd.f32 %v8878_v4, %v3967_v36  ;;  %vm3653_vm2 = vmor %vm3651_vm1, %vm3652_vm9 }
 0x569   :  { %v3647_v25 = vmul.f32 %v8880_v14, %v3646_v58 }
 0x56a   :  { %8616 = vmatmul.msk.f32.gmra.mxu2 %vm13814_vm0, %v4034_v16  ;;  %v3972_v1 = vsel %vm3971_vm13, %v8878_v4, %v3968_v45  ;;  %v8807_v16 = vld [vmem:[%s13708_s15] ss:$0 sm:$0xff] }
 0x56b   :  { %v3648_v49 = vmul.f32 0.5, %v3647_v25  ;;  %v3977_v39 = vsel %vm3974_vm15, %v3976_v62, %v3972_v1 }
 0x56c   :  { %v3978_v0 = vmul.f32 %v3977_v39, %v3953_v50 }
 0x56d   :  { %v3649_v54 = vsub.f32 1.5, %v3648_v49 }
 0x56e   :  { %v8609_v37 = vclamps-f32 %v3978_v0, 1.0 }
 0x56f   :  { %v3650_v55 = vmul.f32 %v8880_v14, %v3649_v54 }
 0x570   :  { %v4027_v43 = vadd.f32 1.0, %v8609_v37 }
 0x571   :  { %v3654_v2 = vsel %vm3653_vm2, %v8880_v14, %v3650_v55 }
 0x572   :  { %v3662_v12 = vmul.f32 %v3654_v2, %v11335_v3  ;;  %v4035_v19 = vmul.f32 %v4027_v43, %v3691_v5 }
 0x574   :  { %v3673_v57 = vmul.f32 %v11343_v61, %v3662_v12  ;;  %8617 = vmatmul.msk.f32.gmra.mxu2 %vm13814_vm0, %v4035_v19 }
 0x576   :  { %v3684_v18 = vadd.f32 %v11351_v47, %v3673_v57 }
 0x578   :  { %v3700_v46 = vmul.f32 0.70710677, %v3684_v18  ;;  %v3692_v33 = vmul.f32 0.5, %v3684_v18 }
 0x57a   :  { %v3981_v23 = vmul.f32 %v3700_v46, %v3700_v46 }
 0x57c   :  { %v3982_v28 = vmin.f32 %v3981_v23, 16.0 }
 0x57e   :  { %v3983_v31 = vmul.f32 2.1237322e-06, %v3982_v28  ;;  %v3994_v51 = vmul.f32 3.8918573e-05, %v3982_v28 }
 0x580   :  { %v3984_v38 = vadd.f32 0.00028619796, %v3983_v31  ;;  %v3995_v44 = vadd.f32 0.001143296, %v3994_v51 }
 0x582   :  { %v3985_v60 = vmul.f32 %v3984_v38, %v3982_v28  ;;  %v3996_v40 = vmul.f32 %v3995_v44, %v3982_v28 }
 0x584   :  { %v3997_v3 = vadd.f32 0.014752088, %v3996_v40  ;;  %v3986_v32 = vadd.f32 0.0036580483, %v3985_v60 }
 0x586   :  { %v3998_v17 = vmul.f32 %v3997_v3, %v3982_v28  ;;  %v3987_v27 = vmul.f32 %v3986_v32, %v3982_v28 }
 0x588   :  { %v3999_v13 = vadd.f32 0.112945676, %v3998_v17  ;;  %v3988_v34 = vadd.f32 0.05243302, %v3987_v27  ;;  %v14053_v17 = vmov 683565275  }
 0x589   :  { %v14054_v27 = vmov 2475754826  }
 0x58a   :  { %v4000_v20 = vmul.f32 %v3999_v13, %v3982_v28  ;;  %v3989_v47 = vmul.f32 %v3988_v34, %v3982_v28 }
 0x58c   :  { %v4001_v61 = vadd.f32 0.4994258, %v4000_v20  ;;  %v3990_v35 = vadd.f32 0.18741608, %v3989_v47 }
 0x58e   :  { %v4002_v7 = vmul.f32 %v4001_v61, %v3982_v28  ;;  %v3991_v6 = vmul.f32 %v3990_v35, %v3982_v28  ;;  %v14055_v61 = vmov 2131351028  }
 0x590   :  { %v4003_v52 = vadd.f32 1.0, %v4002_v7  ;;  %v3992_v21 = vadd.f32 1.1283791, %v3991_v6  ;;  %v14056_v7 = vmov 2102212464  }
 0x591   :  { %v14057_v6 = vmov 920167782  }
 0x592   :  { %8881 = vrcp.f32 %v4003_v52  ;;  %v4015_v59 = vand.u32 2147483648, %v4003_v52  ;;  %v4013_v30 = vand.u32 2147483647, %v4003_v52  ;;  %vm4009_vm4 = vweird.f32 %v4003_v52 }
 0x593   :  { %v3993_v4 = vmul.f32 %v3992_v21, %v3700_v46 }
 0x594   :  { %v4016_v29 = vor.u32 1.1754944e-38, %v4015_v59  ;;  %vm4014_vm7 = vcmp.eq.f32.partialorder %v4013_v30, 8.507059e+37  ;;  %v14058_v59 = vmov 1326507024  }
 0x598   :  { %v8882_v42 = vpop.eup %8881 }
 0x599   :  { %v4005_v22 = vmul.f32 %v8882_v42, %v4003_v52  ;;  %vm4010_vm3 = vweird.f32 %v8882_v42 }
 0x59a   :  { %vm4011_vm5 = vmor %vm4009_vm4, %vm4010_vm3 }
 0x59b   :  { %v4006_v8 = vsub.f32 1.0, %v4005_v22 }
 0x59d   :  { %v4007_v10 = vmul.f32 %v8882_v42, %v4006_v8 }
 0x59f   :  { %v4008_v48 = vadd.f32 %v8882_v42, %v4007_v10 }
 0x5a1   :  { %v4012_v14 = vsel %vm4011_vm5, %v8882_v42, %v4008_v48 }
 0x5a2   :  { %v4017_v26 = vsel %vm4014_vm7, %v4016_v29, %v4012_v14 }
 0x5a3   :  { %v4018_v24 = vmul.f32 %v4017_v26, %v3993_v4 }
 0x5a5   :  { %v8610_v63 = vclamps-f32 %v4018_v24, 1.0 }
 0x5a7   :  { %v4028_v58 = vadd.f32 1.0, %v8610_v63 }
 0x5a9   :  { %v4036_v41 = vmul.f32 %v4028_v58, %v3692_v33 }
 0x5ab   :  { %8618 = vmatmul.msk.f32.gmra.mxu2 %vm13814_vm0, %v4036_v41 }
 0x5ae   :  { %v4083_v56 = vpop.f32.mrf.mxu2 }
 0x5af   :  { %v4084_v25 = vadd.f32 %v8807_v16, %v4083_v56 }
 0x5b1   :  { %8620 = vmatmul.msk.f32.vlgmr.msrb.gmra.mxu0 %vm13814_vm0, %v4084_v25 }
 0x5b3   :  { %8709 = vmatmul.msk.f32.vlgmr.msra.gmra.mxu2 %vm13814_vm0, %v4084_v25 }
 0x5bc   :  { %v4086_v15 = vpop.f32.mrf.mxu2 }
 0x5bd   :  { %v4087_v36 = vadd.f32 %v8807_v16, %v4086_v15 }
 0x5bf   :  { %8621 = vmatmul.msk.f32.gmra.mxu0 %vm13814_vm0, %v4087_v36  ;;  %8710 = vmatmul.msk.f32.gmra.mxu2 %vm13814_vm0, %v4087_v36 }
 0x5c7   :  { %v4089_v11 = vpop.f32.mrf.mxu2 }
 0x5c8   :  { %v4090_v49 = vadd.f32 %v8807_v16, %v4089_v11 }
 0x5ca   :  { %8622 = vmatmul.msk.f32.gmra.mxu0 %vm13814_vm0, %v4090_v49  ;;  %8711 = vmatmul.msk.f32.gmra.mxu2 %vm13814_vm0, %v4090_v49 }
 0x5d6   :  { %v4092_v45 = vpop.f32.mrf.mxu2 }
 0x5d7   :  { %v4093_v62 = vadd.f32 %v8807_v16, %v4092_v45 }
 0x5d9   :  { %8623 = vmatmul.msk.f32.gmra.mxu0 %vm13814_vm0, %v4093_v62  ;;  %8712 = vmatmul.msk.f32.gmra.mxu2 %vm13814_vm0, %v4093_v62 }
 0x5e5   :  { %v4095_v54 = vpop.f32.mrf.mxu2 }
 0x5e6   :  { %v4096_v50 = vadd.f32 %v8807_v16, %v4095_v54 }
 0x5e8   :  { %8624 = vmatmul.msk.f32.gmra.mxu0 %vm13814_vm0, %v4096_v50  ;;  %8713 = vmatmul.msk.f32.gmra.mxu2 %vm13814_vm0, %v4096_v50 }
 0x5ed   :  { %v4098_v1 = vpop.f32.mrf.mxu2 }
 0x5ee   :  { %v4099_v39 = vadd.f32 %v8807_v16, %v4098_v1 }
 0x5f0   :  { %8625 = vmatmul.msk.f32.gmra.mxu0 %vm13814_vm0, %v4099_v39  ;;  %8714 = vmatmul.msk.f32.gmra.mxu2 %vm13814_vm0, %v4099_v39 }
 0x5f7   :  { %v4101_v55 = vpop.f32.mrf.mxu2 }
 0x5f8   :  { %v4102_v0 = vadd.f32 %v8807_v16, %v4101_v55 }
 0x5fa   :  { %8626 = vmatmul.msk.f32.gmra.mxu0 %vm13814_vm0, %v4102_v0  ;;  %8715 = vmatmul.msk.f32.gmra.mxu2 %vm13814_vm0, %v4102_v0 }
 0x62e   :  { %v11627_v2 = vpop.f32.mrf.mxu0  ;;  %v4104_v5 = vpop.f32.mrf.mxu2 }
 0x62f   :  { %v4174_v37 = vand.u32 2147483647, %v11627_v2  ;;  %v4177_v12 = vand.u32 2139095040, %v11627_v2  ;;  %v4105_v57 = vadd.f32 %v8807_v16, %v4104_v5 }
 0x631   :  { %v4178_v43 = vshrl.u32 %v4177_v12, 23  ;;  %v4181_v19 = vand.u32 8388607, %v4174_v37  ;;  %8627 = vmatmul.msk.f32.gmra.mxu0 %vm13814_vm0, %v4105_v57  ;;  %8716 = vmatmul.msk.f32.gmra.mxu2 %vm13814_vm0, %v4105_v57 }
 0x633   :  { %v8628_v18 = vadd.s32 4294967169, %v4178_v43  ;;  %v4182_v46 = vor.u32 8388608, %v4181_v19 }
 0x635   :  { %v4184_v23 = vadd.s32 1, %v8628_v18  ;;  %v11635_v28 = vshll.u32 %v4182_v46, 8 }
 0x637   :  { %vm4185_vm6 = vcmp.gt.s32.totalorder %v4184_v23, 0  ;;  %v4223_v40 = vand.u32 65535, %v11635_v28  ;;  %v4224_v62 = vshrl.u32 %v11635_v28, 16 }
 0x638   :  { %v4186_v31 = vsel %vm4185_vm6, %v4184_v23, 0 }
 0x639   :  { %v4188_v51 = vand.u32 31, %v4186_v31  ;;  %v4187_v44 = vshrl.u32 %v4186_v31, 5 }
 0x63b   :  { %v4189_v60 = vsub.s32 32, %v4188_v51  ;;  %v4191_v13 = vshll.u32 %v14053_v17, %v4188_v51  ;;  %v4194_v20 = vshll.u32 %v14054_v27, %v4188_v51  ;;  %v4197_v34 = vshll.u32 %v14055_v61, %v4188_v51 }
 0x63c   :  { %v11637_v38 = vpop.f32.mrf.mxu0  ;;  %v4200_v52 = vshll.u32 %v14056_v7, %v4188_v51  ;;  %v4203_v22 = vshll.u32 %v14057_v6, %v4188_v51  ;;  %vm4206_vm10 = vcmp.lt.s32.totalorder %v4187_v44, 1  ;;  %vm4207_vm8 = vcmp.lt.s32.totalorder %v4187_v44, 2 }
 0x63d   :  { %v4328_v3 = vand.u32 2147483647, %v11637_v38  ;;  %v4331_v32 = vand.u32 2139095040, %v11637_v38  ;;  %v4192_v47 = vshrl.u32 %v14054_v27, %v4189_v60  ;;  %v4195_v35 = vshrl.u32 %v14055_v61, %v4189_v60 }
 0x63e   :  { %v4198_v42 = vshrl.u32 %v14056_v7, %v4189_v60  ;;  %v4201_v8 = vshrl.u32 %v14057_v6, %v4189_v60  ;;  %v4204_v21 = vshrl.u32 %v14058_v59, %v4189_v60  ;;  %v4190_v10 = vshrl.u32 %v14053_v17, %v4189_v60 }
 0x63f   :  { %v4193_v30 = vor.u32 %v4192_v47, %v4191_v13  ;;  %v4196_v48 = vor.u32 %v4195_v35, %v4194_v20  ;;  %vm4209_vm11 = vcmp.lt.s32.totalorder %v4187_v44, 4  ;;  %v4332_v26 = vshrl.u32 %v4331_v32, 23 }
 0x640   :  { %v4199_v29 = vor.u32 %v4198_v42, %v4197_v34  ;;  %v4202_v4 = vor.u32 %v4201_v8, %v4200_v52  ;;  %v4205_v14 = vor.u32 %v4204_v21, %v4203_v22  ;;  %v11657_v58 = vand.u32 8388607, %v4328_v3 }
 0x641   :  { %v4214_v63 = vsel %vm4206_vm10, %v4193_v30, %v4196_v48  ;;  %vm4208_vm12 = vcmp.lt.s32.totalorder %v4187_v44, 3  ;;  %v8631_v56 = vadd.s32 4294967169, %v4332_v26  ;;  %v4210_v25 = vsel %vm4206_vm10, %v4190_v10, %v4193_v30 }
 0x642   :  { %v4211_v24 = vsel %vm4209_vm11, %v4199_v29, 2102212464  ;;  %v4218_v33 = vsel %vm4206_vm10, %v4196_v48, %v4199_v29  ;;  %v4215_v16 = vsel %vm4209_vm11, %v4202_v4, 920167782  ;;  %v4219_v41 = vsel %vm4209_vm11, %v4205_v14, 1326507024 }
 0x643   :  { %v4212_v15 = vsel %vm4208_vm12, %v4196_v48, %v4211_v24  ;;  %v4216_v36 = vsel %vm4208_vm12, %v4199_v29, %v4215_v16  ;;  %v4220_v11 = vsel %vm4208_vm12, %v4202_v4, %v4219_v41  ;;  %v4338_v54 = vadd.s32 1, %v8631_v56 }
 0x644   :  { %v4217_v49 = vsel %vm4207_vm8, %v4214_v63, %v4216_v36  ;;  %v4221_v45 = vsel %vm4207_vm8, %v4218_v33, %v4220_v11  ;;  %v11664_v0 = vsel %vm4207_vm8, %v4210_v25, %v4212_v15  ;;  %v4336_v43 = vor.u32 8388608, %v11657_v58 }
 0x645   :  { %v4225_v50 = vand.u32 65535, %v4221_v45  ;;  %v4226_v1 = vshrl.u32 %v4221_v45, 16  ;;  %v4247_v39 = vand.u32 65535, %v4217_v49  ;;  %v4248_v55 = vshrl.u32 %v4217_v49, 16 }
 0x646   :  { %vm4339_vm13 = vcmp.gt.s32.totalorder %v4338_v54, 0 }
 0x647   :  { %v4228_v12 = vmul.u32 %v4226_v1, %v4223_v40  ;;  %v4229_v5 = vmul.u32 %v4225_v50, %v4224_v62  ;;  %v4227_v19 = vmul.u32 %v4225_v50, %v4223_v40  ;;  %v4230_v57 = vmul.u32 %v4226_v1, %v4224_v62 }
 0x648   :  { %v4250_v18 = vmul.u32 %v4248_v55, %v4223_v40  ;;  %v4251_v46 = vmul.u32 %v4247_v39, %v4224_v62  ;;  %v4249_v51 = vmul.u32 %v4247_v39, %v4223_v40  ;;  %v4252_v60 = vmul.u32 %v4248_v55, %v4224_v62 }
 0x649   :  { %v4231_v23 = vshll.u32 %v4228_v12, 16  ;;  %v4232_v31 = vshrl.u32 %v4228_v12, 16  ;;  %v4233_v32 = vshll.u32 %v4229_v5, 16  ;;  %v4234_v13 = vshrl.u32 %v4229_v5, 16 }
 0x64a   :  { %v4253_v20 = vshll.u32 %v4250_v18, 16  ;;  %v4254_v34 = vshrl.u32 %v4250_v18, 16  ;;  %v4255_v52 = vshll.u32 %v4251_v46, 16  ;;  %v4340_v47 = vsel %vm4339_vm13, %v4338_v54, 0 }
 0x64b   :  { %vm4235_vm9 = vc.u32 %v4227_v19, %v4231_v23  ;;  %v4237_v44 = vadd.s32 %v4231_v23, %v4227_v19  ;;  %v4256_v42 = vshrl.u32 %v4251_v46, 16  ;;  %v4342_v40 = vand.u32 31, %v4340_v47 }
 0x64c   :  { %v4236_v35 = vsel %vm4235_vm9, 1, %v13909_v9  ;;  %vm4257_vm15 = vc.u32 %v4249_v51, %v4253_v20  ;;  %v4259_v22 = vadd.s32 %v4253_v20, %v4249_v51  ;;  %v11671_v48 = vshrl.u32 %v4340_v47, 5 }
 0x64d   :  { %v4238_v8 = vadd.s32 %v4236_v35, %v4230_v57  ;;  %vm4239_vm1 = vc.u32 %v4237_v44, %v4233_v32  ;;  %v4258_v21 = vsel %vm4257_vm15, 1, %v13909_v9  ;;  %v4343_v26 = vsub.s32 32, %v4342_v40 }
 0x64e   :  { %v4240_v10 = vsel %vm4239_vm1, 1, %v13909_v9  ;;  %v4260_v30 = vadd.s32 %v4258_v21, %v4252_v60  ;;  %vm4261_vm2 = vc.u32 %v4259_v22, %v4255_v52  ;;  %v11674_v14 = vadd.s32 %v4259_v22, %v4255_v52 }
 0x64f   :  { %v4242_v29 = vadd.s32 %v4240_v10, %v4238_v8  ;;  %v4262_v4 = vsel %vm4261_vm2, 1, %v13909_v9  ;;  %v4345_v63 = vshll.u32 %v14053_v17, %v4342_v40  ;;  %v4348_v33 = vshll.u32 %v14054_v27, %v4342_v40 }
 0x650   :  { %v4264_v24 = vadd.s32 %v4262_v4, %v4260_v30  ;;  %v4351_v58 = vshll.u32 %v14055_v61, %v4342_v40  ;;  %v4346_v41 = vshrl.u32 %v14054_v27, %v4343_v26  ;;  %v4349_v56 = vshrl.u32 %v14055_v61, %v4343_v26 }
 0x651   :  { %v4243_v16 = vadd.s32 %v4242_v29, %v4232_v31  ;;  %v4354_v25 = vshll.u32 %v14056_v7, %v4342_v40  ;;  %v4352_v36 = vshrl.u32 %v14056_v7, %v4343_v26  ;;  %v4355_v11 = vshrl.u32 %v14057_v6, %v4343_v26 }
 0x652   :  { %v4265_v15 = vadd.s32 %v4264_v24, %v4254_v34  ;;  %v4357_v49 = vshll.u32 %v14057_v6, %v4342_v40  ;;  %v11687_v62 = vor.u32 %v4346_v41, %v4345_v63  ;;  %v11689_v54 = vor.u32 %v4349_v56, %v4348_v33 }
 0x653   :  { %v11685_v45 = vadd.s32 %v4243_v16, %v4234_v13  ;;  %v4358_v50 = vshrl.u32 %v14058_v59, %v4343_v26  ;;  %v4353_v39 = vor.u32 %v4352_v36, %v4351_v58  ;;  %v4356_v55 = vor.u32 %v4355_v11, %v4354_v25 }
 0x654   :  { %v4266_v1 = vadd.s32 %v4265_v15, %v4256_v42  ;;  %v4267_v12 = vmul.u32 %v11635_v28, %v11664_v0  ;;  %vm4360_vm4 = vcmp.lt.s32.totalorder %v11671_v48, 1  ;;  %vm4363_vm5 = vcmp.lt.s32.totalorder %v11671_v48, 4 }
 0x655   :  { %vm4269_vm3 = vc.u32 %v11685_v45, %v11674_v14  ;;  %v4359_v5 = vor.u32 %v4358_v50, %v4357_v49  ;;  %v11698_v57 = vshll.u32 %v4336_v43, 8  ;;  %vm4362_vm7 = vcmp.lt.s32.totalorder %v11671_v48, 3 }
 0x656   :  { %v4270_v19 = vadd.s32 1, %v4266_v1  ;;  %v4368_v18 = vsel %vm4360_vm4, %v11687_v62, %v11689_v54  ;;  %v4369_v28 = vsel %vm4363_vm5, %v4356_v55, 920167782  ;;  %v4372_v0 = vsel %vm4360_vm4, %v11689_v54, %v4353_v39 }
 0x657   :  { %vm4361_vm6 = vcmp.lt.s32.totalorder %v11671_v48, 2  ;;  %v4370_v43 = vsel %vm4362_vm7, %v4353_v39, %v4369_v28  ;;  %v4373_v23 = vsel %vm4363_vm5, %v4359_v5, 1326507024  ;;  %v4377_v13 = vand.u32 65535, %v11698_v57 }
 0x658   :  { %v4271_v46 = vsel %vm4269_vm3, %v4270_v19, %v4266_v1  ;;  %v4371_v51 = vsel %vm4361_vm6, %v4368_v18, %v4370_v43  ;;  %v4374_v60 = vsel %vm4362_vm7, %v4356_v55, %v4373_v23  ;;  %v4378_v52 = vshrl.u32 %v11698_v57, 16  ;;  %v11729_v1 = vpop.f32.mrf.mxu0 }
 0x659   :  { %v4272_v31 = vadd.s32 %v4271_v46, %v4267_v12  ;;  %v4375_v32 = vsel %vm4361_vm6, %v4372_v0, %v4374_v60  ;;  %v4401_v20 = vand.u32 65535, %v4371_v51  ;;  %v4402_v34 = vshrl.u32 %v4371_v51, 16 }
 0x65a   :  { %v4379_v47 = vand.u32 65535, %v4375_v32  ;;  %v4380_v35 = vshrl.u32 %v4375_v32, 16  ;;  %v4344_v63 = vshrl.u32 %v14053_v17, %v4343_v26  ;;  %v4365_v26 = vsel %vm4363_vm5, %v4353_v39, 2102212464 }
 0x65b   :  { %v4273_v44 = vadd.s32 536870912, %v4272_v31  ;;  %v4404_v42 = vmul.u32 %v4402_v34, %v4377_v13  ;;  %v4403_v40 = vmul.u32 %v4401_v20, %v4377_v13  ;;  %v4405_v10 = vmul.u32 %v4401_v20, %v4378_v52 }
 0x65c   :  { %v4382_v8 = vmul.u32 %v4380_v35, %v4377_v13  ;;  %v4383_v21 = vmul.u32 %v4379_v47, %v4378_v52  ;;  %v4381_v4 = vmul.u32 %v4379_v47, %v4377_v13  ;;  %v4384_v33 = vmul.u32 %v4380_v35, %v4378_v52 }
 0x65d   :  { %v11723_v22 = vshrl.u32 %v4273_v44, 30  ;;  %v4407_v30 = vshll.u32 %v4404_v42, 16  ;;  %v4406_v58 = vmul.u32 %v4402_v34, %v4378_v52  ;;  %v4409_v15 = vshll.u32 %v4405_v10, 16 }
 0x65e   :  { %v4385_v24 = vshll.u32 %v4382_v8, 16  ;;  %v4387_v41 = vshll.u32 %v4383_v21, 16  ;;  %v4386_v19 = vshrl.u32 %v4382_v8, 16  ;;  %v4408_v46 = vshrl.u32 %v4404_v42, 16 }
 0x65f   :  { %v4275_v29 = vshll.u32 %v11723_v22, 30  ;;  %vm4411_vm10 = vc.u32 %v4403_v40, %v4407_v30  ;;  %v4413_v11 = vadd.s32 %v4407_v30, %v4403_v40  ;;  %v4485_v23 = vand.u32 2139095040, %v11729_v1 }
 0x660   :  { %vm4389_vm8 = vc.u32 %v4381_v4, %v4385_v24  ;;  %v4391_v56 = vadd.s32 %v4385_v24, %v4381_v4  ;;  %v4412_v36 = vsel %vm4411_vm10, 1, %v13909_v9  ;;  %v4366_v39 = vsel %vm4362_vm7, %v11689_v54, %v4365_v26 }
 0x661   :  { %v4276_v16 = vsub.s32 %v4272_v31, %v4275_v29  ;;  %v4390_v25 = vsel %vm4389_vm8, 1, %v13909_v9  ;;  %v4414_v12 = vadd.s32 %v4412_v36, %v4406_v58  ;;  %vm4415_vm13 = vc.u32 %v4413_v11, %v4409_v15 }
 0x662   :  { %v4392_v50 = vadd.s32 %v4390_v25, %v4384_v33  ;;  %vm4393_vm12 = vc.u32 %v4391_v56, %v4387_v41  ;;  %v4416_v28 = vsel %vm4415_vm13, 1, %v13909_v9  ;;  %v4364_v31 = vsel %vm4360_vm4, %v4344_v63, %v11687_v62  ;;  %v11756_v41 = vpop.f32.mrf.mxu0 }
 0x663   :  { %vm4277_vm11 = vcmp.lt.s32.totalorder %v4276_v16, 0  ;;  %v4278_v49 = vsub.s32 0, %v4276_v16  ;;  %v4394_v55 = vsel %vm4393_vm12, 1, %v13909_v9  ;;  %v4418_v43 = vadd.s32 %v4416_v28, %v4414_v12 }
 0x664   :  { %v4396_v18 = vadd.s32 %v4394_v55, %v4392_v50  ;;  %v4388_v51 = vshrl.u32 %v4383_v21, 16  ;;  %v4410_v13 = vshrl.u32 %v4405_v10, 16  ;;  %v4486_v34 = vshrl.u32 %v4485_v23, 23 }
 0x665   :  { %v4279_v5 = vsel %vm4277_vm11, %v4278_v49, %v4276_v16  ;;  %v4419_v20 = vadd.s32 %v4418_v43, %v4408_v46  ;;  %v11744_v52 = vadd.s32 %v4413_v11, %v4409_v15  ;;  %v4482_v47 = vand.u32 2147483647, %v11729_v1 }
 0x666   :  { %v4280_v0 = vclz %v4279_v5  ;;  %v4397_v60 = vadd.s32 %v4396_v18, %v4386_v19  ;;  %v4367_v62 = vsel %vm4361_vm6, %v4364_v31, %v4366_v39  ;;  %v8634_v42 = vadd.s32 4294967169, %v4486_v34 }
 0x667   :  { %v4420_v35 = vadd.s32 %v4419_v20, %v4410_v13  ;;  %v4268_v54 = vadd.s32 %v11674_v14, %v11685_v45  ;;  %v4421_v30 = vmul.u32 %v11698_v57, %v4367_v62  ;;  %v4489_v29 = vand.u32 8388607, %v4482_v47 }
 0x668   :  { %v8629_v32 = vadd.s32 4294967294, %v4280_v0  ;;  %v11742_v44 = vadd.s32 %v4397_v60, %v4388_v51  ;;  %v4492_v4 = vadd.s32 1, %v8634_v42  ;;  %v4636_v57 = vand.u32 2147483647, %v11756_v41 }
 0x669   :  { %v4424_v10 = vadd.s32 1, %v4420_v35  ;;  %v4490_v11 = vor.u32 8388608, %v4489_v29  ;;  %v4639_v26 = vand.u32 2139095040, %v11756_v41  ;;  %vm4176_vm6 = vcmp.lt.s32.totalorder %v11627_v2, 0 }
 0x66a   :  { %vm8630_vm9 = vcmp.lt.s32.totalorder %v8629_v32, 0  ;;  %vm4423_vm15 = vc.u32 %v11742_v44, %v11744_v52  ;;  %vm4493_vm1 = vcmp.gt.s32.totalorder %v4492_v4, 0  ;;  %vm11813_vm8 = vcmp.le.f32.partialorder %v4174_v37, 0.7853982 }
 0x66b   :  { %v4283_v8 = vsel %vm8630_vm9, 0, %v8629_v32  ;;  %v4425_v33 = vsel %vm4423_vm15, %v4424_v10, %v4420_v35  ;;  %v4494_v14 = vsel %vm4493_vm1, %v4492_v4, 0 }
 0x66c   :  { %v4284_v21 = vsub.s32 32, %v4283_v8  ;;  %v4288_v40 = vsub.s32 4294967266, %v4283_v8  ;;  %v4285_v48 = vshll.u32 %v4276_v16, %v4283_v8  ;;  %v4426_v58 = vadd.s32 %v4425_v33, %v4421_v30 }
 0x66d   :  { %v4496_v15 = vand.u32 31, %v4494_v14  ;;  %v11761_v50 = vshrl.u32 %v4494_v14, 5  ;;  %v4640_v30 = vshrl.u32 %v4639_v26, 23 }
 0x66e   :  { %v4286_v24 = vshrl.u32 %v4268_v54, %v4284_v21  ;;  %v4289_v63 = vadd.s32 127, %v4288_v40  ;;  %v4427_v45 = vadd.s32 536870912, %v4426_v58  ;;  %v11783_v54 = vshll.u32 %v4490_v11, 8 }
 0x66f   :  { %v4497_v16 = vsub.s32 32, %v4496_v15  ;;  %v4499_v5 = vshll.u32 %v14053_v17, %v4496_v15  ;;  %v4502_v19 = vshll.u32 %v14054_v27, %v4496_v15  ;;  %v4505_v46 = vshll.u32 %v14055_v61, %v4496_v15 }
 0x670   :  { %v4287_v56 = vor.u32 %v4286_v24, %v4285_v48  ;;  %v4290_v25 = vshll.u32 %v4289_v63, 23  ;;  %v11759_v49 = vshrl.u32 %v4427_v45, 30  ;;  %v4508_v23 = vshll.u32 %v14056_v7, %v4496_v15 }
 0x671   :  { %v4500_v28 = vshrl.u32 %v14054_v27, %v4497_v16  ;;  %v4503_v0 = vshrl.u32 %v14055_v61, %v4497_v16  ;;  %v4506_v43 = vshrl.u32 %v14056_v7, %v4497_v16  ;;  %v4509_v31 = vshrl.u32 %v14057_v6, %v4497_v16 }
 0x672   :  { %v4291_v36 = vor.u32 4788187, %v4290_v25  ;;  %v4294_v12 = vcvt.s32.f32 %v4287_v56  ;;  %v4429_v18 = vshll.u32 %v11759_v49, 30  ;;  %v4512_v39 = vshrl.u32 %v14058_v59, %v4497_v16 }
 0x673   :  { %v4501_v60 = vor.u32 %v4500_v28, %v4499_v5  ;;  %v4504_v32 = vor.u32 %v4503_v0, %v4502_v19  ;;  %v4511_v13 = vshll.u32 %v14057_v6, %v4496_v15  ;;  %v4507_v34 = vor.u32 %v4506_v43, %v4505_v46 }
 0x674   :  { %v4292_v55 = vand.u32 2147483647, %v4291_v36  ;;  %v11774_v51 = vsub.s32 %v4426_v58, %v4429_v18  ;;  %v4510_v62 = vor.u32 %v4509_v31, %v4508_v23  ;;  %vm4514_vm3 = vcmp.lt.s32.totalorder %v11761_v50, 1 }
 0x675   :  { %v4513_v42 = vor.u32 %v4512_v39, %v4511_v13  ;;  %vm4517_vm4 = vcmp.lt.s32.totalorder %v11761_v50, 4  ;;  %v4522_v8 = vsel %vm4514_vm3, %v4501_v60, %v4504_v32  ;;  %v4643_v21 = vand.u32 8388607, %v4636_v57 }
 0x676   :  { %v4295_v20 = vmul.f32 %v4294_v12, %v4292_v55  ;;  %vm4431_vm2 = vcmp.lt.s32.totalorder %v11774_v51, 0  ;;  %v4432_v35 = vsub.s32 0, %v11774_v51  ;;  %vm4516_vm5 = vcmp.lt.s32.totalorder %v11761_v50, 3 }
 0x677   :  { %v4523_v10 = vsel %vm4517_vm4, %v4510_v62, 920167782  ;;  %vm4515_vm7 = vcmp.lt.s32.totalorder %v11761_v50, 2  ;;  %v4526_v63 = vsel %vm4514_vm3, %v4504_v32, %v4507_v34  ;;  %v4527_v33 = vsel %vm4517_vm4, %v4513_v42, 1326507024 }
 0x678   :  { %v4433_v40 = vsel %vm4431_vm2, %v4432_v35, %v11774_v51  ;;  %v4296_v29 = vxor.u32 2147483648, %v4295_v20  ;;  %v4524_v48 = vsel %vm4516_vm5, %v4507_v34, %v4523_v10  ;;  %v4528_v56 = vsel %vm4516_vm5, %v4510_v62, %v4527_v33 }
 0x679   :  { %v4434_v4 = vclz %v4433_v40  ;;  %v4525_v24 = vsel %vm4515_vm7, %v4522_v8, %v4524_v48  ;;  %v4531_v25 = vand.u32 65535, %v11783_v54  ;;  %v4529_v14 = vsel %vm4515_vm7, %v4526_v63, %v4528_v56 }
 0x67a   :  { %v4556_v45 = vshrl.u32 %v4525_v24, 16  ;;  %v8637_v15 = vadd.s32 4294967169, %v4640_v30  ;;  %v4644_v36 = vor.u32 8388608, %v4643_v21  ;;  %v4297_v11 = vsel %vm4176_vm6, %v4296_v29, %v4295_v20 }
 0x67b   :  { %v8632_v58 = vadd.s32 4294967294, %v4434_v4  ;;  %v4533_v26 = vand.u32 65535, %v4529_v14  ;;  %v4534_v55 = vshrl.u32 %v4529_v14, 16  ;;  %v4532_v5 = vshrl.u32 %v11783_v54, 16 }
 0x67c   :  { %v4519_v18 = vsel %vm4517_vm4, %v4507_v34, 2102212464  ;;  %v4555_v28 = vand.u32 65535, %v4525_v24  ;;  %v4558_v0 = vmul.u32 %v4556_v45, %v4531_v25  ;;  %v11822_v46 = vsel %vm11813_vm8, %v11627_v2, %v4297_v11 }
 0x67d   :  { %vm8633_vm10 = vcmp.lt.s32.totalorder %v8632_v58, 0  ;;  %v4498_v43 = vshrl.u32 %v14053_v17, %v4497_v16  ;;  %v4536_v23 = vmul.u32 %v4534_v55, %v4531_v25  ;;  %v4537_v31 = vmul.u32 %v4533_v26, %v4532_v5 }
 0x67e   :  { %v11808_v12 = vsel %vm8633_vm10, 0, %v8632_v58  ;;  %v4646_v37 = vadd.s32 1, %v8637_v15  ;;  %v11826_v13 = vshll.u32 %v4644_v36, 8  ;;  %v4520_v34 = vsel %vm4516_vm5, %v4504_v32, %v4519_v18 }
 0x67f   :  { %v4442_v39 = vsub.s32 4294967266, %v11808_v12  ;;  %v4518_v20 = vsel %vm4514_vm3, %v4498_v43, %v4501_v60  ;;  %v4535_v62 = vmul.u32 %v4533_v26, %v4531_v25  ;;  %v4539_v35 = vshll.u32 %v4536_v23, 16 }
 0x680   :  { %v11834_v42 = vmul.f32 %v11822_v46, %v11822_v46  ;;  %v4557_v16 = vmul.u32 %v4555_v28, %v4531_v25  ;;  %v4559_v8 = vmul.u32 %v4555_v28, %v4532_v5  ;;  %v4561_v21 = vshll.u32 %v4558_v0, 16 }
 0x681   :  { %v4538_v40 = vmul.u32 %v4534_v55, %v4532_v5  ;;  %v4541_v10 = vshll.u32 %v4537_v31, 16  ;;  %vm4543_vm11 = vc.u32 %v4535_v62, %v4539_v35  ;;  %v4545_v30 = vadd.s32 %v4539_v35, %v4535_v62 }
 0x682   :  { %v4443_v29 = vadd.s32 127, %v4442_v39  ;;  %v11838_v60 = vsel %vm4515_vm7, %v4518_v20, %v4520_v34  ;;  %v4544_v32 = vsel %vm4543_vm11, 1, %v13909_v9  ;;  %vm4647_vm12 = vcmp.gt.s32.totalorder %v4646_v37, 0 }
 0x683   :  { %v4546_v4 = vadd.s32 %v4544_v32, %v4538_v40  ;;  %vm4547_vm13 = vc.u32 %v4545_v30, %v4541_v10  ;;  %v4560_v48 = vmul.u32 %v4556_v45, %v4532_v5  ;;  %vm4565_vm9 = vc.u32 %v4557_v16, %v4561_v21 }
 0x684   :  { %v4540_v24 = vshrl.u32 %v4536_v23, 16  ;;  %v4548_v63 = vsel %vm4547_vm13, 1, %v13909_v9  ;;  %v4563_v33 = vshll.u32 %v4559_v8, 16  ;;  %v4566_v58 = vsel %vm4565_vm9, 1, %v13909_v9 }
 0x685   :  { %v4550_v56 = vadd.s32 %v4548_v63, %v4546_v4  ;;  %v4567_v25 = vadd.s32 %v4561_v21, %v4557_v16  ;;  %v4568_v14 = vadd.s32 %v4566_v58, %v4560_v48  ;;  %v4648_v15 = vsel %vm4647_vm12, %v4646_v37, 0 }
 0x686   :  { %v4298_v50 = vsub.s32 4, %v11723_v22  ;;  %v4422_v36 = vadd.s32 %v11744_v52, %v11742_v44  ;;  %v4650_v11 = vand.u32 31, %v4648_v15  ;;  %v11847_v26 = vand.u32 65535, %v11826_v13 }
 0x687   :  { %v4310_v45 = vmul.f32 -0.00019511016, %v11834_v42  ;;  %v4551_v55 = vadd.s32 %v4550_v56, %v4540_v24  ;;  %vm4569_vm15 = vc.u32 %v4567_v25, %v4563_v33  ;;  %v4575_v5 = vmul.u32 %v11783_v54, %v11838_v60 }
 0x688   :  { %v4438_v18 = vsub.s32 32, %v11808_v12  ;;  %v4542_v28 = vshrl.u32 %v4537_v31, 16  ;;  %v4570_v43 = vsel %vm4569_vm15, 1, %v13909_v9  ;;  %v4651_v23 = vsub.s32 32, %v4650_v11 }
 0x689   :  { %v4444_v39 = vshll.u32 %v4443_v29, 23  ;;  %v4562_v37 = vshrl.u32 %v4558_v0, 16  ;;  %v4572_v44 = vadd.s32 %v4570_v43, %v4568_v14  ;;  %v4653_v52 = vshll.u32 %v14053_v17, %v4650_v11 }
 0x68a   :  { %v11855_v20 = vadd.s32 %v4551_v55, %v4542_v28  ;;  %v4654_v34 = vshrl.u32 %v14054_v27, %v4651_v23  ;;  %v4656_v62 = vshll.u32 %v14054_v27, %v4650_v11  ;;  %v4657_v35 = vshrl.u32 %v14055_v61, %v4651_v23 }
 0x68b   :  { %v4564_v54 = vshrl.u32 %v4559_v8, 16  ;;  %v11860_v16 = vadd.s32 %v4567_v25, %v4563_v33  ;;  %v4573_v31 = vadd.s32 %v4572_v44, %v4562_v37  ;;  %v11862_v21 = vshrl.u32 %v4648_v15, 5 }
 0x68c   :  { %v11864_v40 = vor.u32 %v4654_v34, %v4653_v52  ;;  %v11866_v0 = vor.u32 %v4657_v35, %v4656_v62  ;;  %v4659_v10 = vshll.u32 %v14055_v61, %v4650_v11  ;;  %v4660_v30 = vshrl.u32 %v14056_v7, %v4651_v23 }
 0x68d   :  { %v4311_v29 = vadd.f32 0.008332121, %v4310_v45  ;;  %v4574_v60 = vadd.s32 %v4573_v31, %v4564_v54  ;;  %v4662_v32 = vshll.u32 %v14056_v7, %v4650_v11  ;;  %v4663_v4 = vshrl.u32 %v14057_v6, %v4651_v23 }
 0x68e   :  { %vm4577_vm1 = vc.u32 %v11855_v20, %v11860_v16  ;;  %v4661_v8 = vor.u32 %v4660_v30, %v4659_v10  ;;  %v4665_v48 = vshll.u32 %v14057_v6, %v4650_v11  ;;  %v4666_v24 = vshrl.u32 %v14058_v59, %v4651_v23 }
 0x68f   :  { %v4440_v63 = vshrl.u32 %v4422_v36, %v4438_v18  ;;  %v4578_v33 = vadd.s32 1, %v4574_v60  ;;  %v4664_v58 = vor.u32 %v4663_v4, %v4662_v32  ;;  %vm4668_vm2 = vcmp.lt.s32.totalorder %v11862_v21, 1 }
 0x690   :  { %v11877_v56 = vor.u32 4788187, %v4444_v39  ;;  %v4667_v25 = vor.u32 %v4666_v24, %v4665_v48  ;;  %vm4671_vm3 = vcmp.lt.s32.totalorder %v11862_v21, 4  ;;  %v4676_v14 = vsel %vm4668_vm2, %v11864_v40, %v11866_v0 }
 0x691   :  { %v4579_v15 = vsel %vm4577_vm1, %v4578_v33, %v4574_v60  ;;  %vm4670_vm4 = vcmp.lt.s32.totalorder %v11862_v21, 3  ;;  %v4677_v36 = vsel %vm4671_vm3, %v4664_v58, 920167782  ;;  %v4680_v11 = vsel %vm4668_vm2, %v11866_v0, %v4661_v8 }
 0x692   :  { %v4580_v45 = vadd.s32 %v4579_v15, %v4575_v5  ;;  %vm4669_vm5 = vcmp.lt.s32.totalorder %v11862_v21, 2  ;;  %v4678_v55 = vsel %vm4670_vm4, %v4661_v8, %v4677_v36  ;;  %v4681_v18 = vsel %vm4671_vm3, %v4667_v25, 1326507024 }
 0x693   :  { %v4439_v28 = vshll.u32 %v11774_v51, %v11808_v12  ;;  %v4679_v43 = vsel %vm4669_vm5, %v4676_v14, %v4678_v55  ;;  %v4682_v39 = vsel %vm4670_vm4, %v4664_v58, %v4681_v18  ;;  %v4686_v37 = vshrl.u32 %v11826_v13, 16  ;;  %v11907_v12 = vpop.f32.mrf.mxu0 }
 0x694   :  { %v4581_v5 = vadd.s32 536870912, %v4580_v45  ;;  %v4683_v44 = vsel %vm4669_vm5, %v4680_v11, %v4682_v39  ;;  %v4709_v52 = vand.u32 65535, %v4679_v43  ;;  %v4710_v34 = vshrl.u32 %v4679_v43, 16 }
 0x695   :  { %v4312_v62 = vmul.f32 %v4311_v29, %v11834_v42  ;;  %v11905_v35 = vor.u32 %v4440_v63, %v4439_v28  ;;  %v4687_v54 = vand.u32 65535, %v4683_v44  ;;  %v4688_v51 = vshrl.u32 %v4683_v44, 16 }
 0x696   :  { %v4446_v31 = vand.u32 2147483647, %v11877_v56  ;;  %v11910_v10 = vshrl.u32 %v4581_v5, 30  ;;  %v4712_v30 = vmul.u32 %v4710_v34, %v11847_v26  ;;  %v4713_v60 = vmul.u32 %v4709_v52, %v4686_v37 }
 0x697   :  { %v4652_v32 = vshrl.u32 %v14053_v17, %v4651_v23  ;;  %v4673_v4 = vsel %vm4671_vm3, %v4661_v8, 2102212464  ;;  %v4690_v29 = vmul.u32 %v4688_v51, %v11847_v26  ;;  %v4691_v48 = vmul.u32 %v4687_v54, %v4686_v37 }
 0x698   :  { %v4583_v24 = vshll.u32 %v11910_v10, 30  ;;  %v4711_v63 = vmul.u32 %v4709_v52, %v11847_v26  ;;  %v4715_v33 = vshll.u32 %v4712_v30, 16  ;;  %v4793_v58 = vand.u32 2139095040, %v11907_v12 }
 0x699   :  { %v4689_v56 = vmul.u32 %v4687_v54, %v11847_v26  ;;  %v4692_v25 = vmul.u32 %v4688_v51, %v4686_v37  ;;  %v4693_v14 = vshll.u32 %v4690_v29, 16  ;;  %v4714_v15 = vmul.u32 %v4710_v34, %v4686_v37 }
 0x69a   :  { %v11921_v36 = vsub.s32 %v4580_v45, %v4583_v24  ;;  %v4695_v23 = vshll.u32 %v4691_v48, 16  ;;  %v4717_v11 = vshll.u32 %v4713_v60, 16  ;;  %vm4719_vm7 = vc.u32 %v4711_v63, %v4715_v33 }
 0x69b   :  { %vm4697_vm10 = vc.u32 %v4689_v56, %v4693_v14  ;;  %v4699_v8 = vadd.s32 %v4693_v14, %v4689_v56  ;;  %v4720_v55 = vsel %vm4719_vm7, 1, %v13909_v9  ;;  %v4721_v18 = vadd.s32 %v4715_v33, %v4711_v63 }
 0x69c   :  { %vm4585_vm11 = vcmp.lt.s32.totalorder %v11921_v36, 0  ;;  %v4586_v28 = vsub.s32 0, %v11921_v36  ;;  %v4698_v43 = vsel %vm4697_vm10, 1, %v13909_v9  ;;  %v4722_v26 = vadd.s32 %v4720_v55, %v4714_v15 }
 0x69d   :  { %v4700_v39 = vadd.s32 %v4698_v43, %v4692_v25  ;;  %vm4701_vm12 = vc.u32 %v4699_v8, %v4695_v23  ;;  %v4716_v37 = vshrl.u32 %v4712_v30, 16  ;;  %vm4723_vm13 = vc.u32 %v4721_v18, %v4717_v11  ;;  %v11940_v43 = vpop.f32.mrf.mxu0 }
 0x69e   :  { %v4587_v45 = vsel %vm4585_vm11, %v4586_v28, %v11921_v36  ;;  %v4702_v5 = vsel %vm4701_vm12, 1, %v13909_v9  ;;  %v4724_v44 = vsel %vm4723_vm13, 1, %v13909_v9  ;;  %v4794_v52 = vshrl.u32 %v4793_v58, 23 }
 0x69f   :  { %v4588_v34 = vclz %v4587_v45  ;;  %v4694_v54 = vshrl.u32 %v4690_v29, 16  ;;  %v4704_v51 = vadd.s32 %v4702_v5, %v4700_v39  ;;  %v4726_v24 = vadd.s32 %v4724_v44, %v4722_v26 }
 0x6a0   :  { %v4672_v63 = vsel %vm4668_vm2, %v4652_v32, %v11864_v40  ;;  %v4674_v30 = vsel %vm4670_vm4, %v11866_v0, %v4673_v4  ;;  %v13813_v33 = vand.u32 2147483647, %v11907_v12  ;;  %v8640_v56 = vadd.s32 4294967169, %v4794_v52 }
 0x6a1   :  { %v4696_v25 = vshrl.u32 %v4691_v48, 16  ;;  %v4705_v14 = vadd.s32 %v4704_v51, %v4694_v54  ;;  %v4718_v15 = vshrl.u32 %v4713_v60, 16  ;;  %v4727_v23 = vadd.s32 %v4726_v24, %v4716_v37 }
 0x6a2   :  { %v4800_v58 = vadd.s32 1, %v8640_v56  ;;  %v4448_v29 = vcvt.s32.f32 %v11905_v35  ;;  %v8635_v8 = vadd.s32 4294967294, %v4588_v34  ;;  %v4313_v40 = vadd.f32 -0.16666654, %v4312_v62 }
 0x6a3   :  { %v11938_v55 = vadd.s32 %v4705_v14, %v4696_v25  ;;  %v4728_v28 = vadd.s32 %v4727_v23, %v4718_v15  ;;  %v4675_v0 = vsel %vm4669_vm5, %v4672_v63, %v4674_v30  ;;  %v11944_v32 = vadd.s32 %v4721_v18, %v4717_v11 }
 0x6a4   :  { %vm4801_vm9 = vcmp.gt.s32.totalorder %v4800_v58, 0  ;;  %v4299_v60 = vsel %vm4176_vm6, %v4298_v50, %v11723_v22  ;;  %v4449_v35 = vmul.f32 %v4448_v29, %v4446_v31  ;;  %v4797_v4 = vand.u32 8388607, %v13813_v33 }
 0x6a5   :  { %vm4731_vm15 = vc.u32 %v11938_v55, %v11944_v32  ;;  %v4732_v62 = vadd.s32 1, %v4728_v28  ;;  %v4802_v48 = vsel %vm4801_vm9, %v4800_v58, 0  ;;  %v4947_v21 = vand.u32 2139095040, %v11940_v43 }
 0x6a6   :  { %vm8636_vm1 = vcmp.lt.s32.totalorder %v8635_v8, 0  ;;  %v4729_v11 = vmul.u32 %v11826_v13, %v4675_v0  ;;  %v4804_v18 = vand.u32 31, %v4802_v48  ;;  %v11959_v26 = vsel %vm11813_vm8, 0, %v4299_v60 }
 0x6a7   :  { %v4314_v22 = vmul.f32 %v4313_v40, %v11834_v42  ;;  %vm4330_vm6 = vcmp.lt.s32.totalorder %v11637_v38, 0  ;;  %v4733_v50 = vsel %vm4731_vm15, %v4732_v62, %v4728_v28  ;;  %v4450_v31 = vxor.u32 2147483648, %v4449_v35 }
 0x6a8   :  { %v4734_v39 = vadd.s32 %v4733_v50, %v4729_v11  ;;  %v4798_v37 = vor.u32 8388608, %v4797_v4  ;;  %v4805_v45 = vsub.s32 32, %v4804_v18  ;;  %v11963_v5 = vsel %vm8636_vm1, 0, %v8635_v8 }
 0x6a9   :  { %v4807_v44 = vshll.u32 %v14053_v17, %v4804_v18  ;;  %v13812_v13 = vand.u32 2147483647, %v11940_v43  ;;  %v4948_v52 = vshrl.u32 %v4947_v21, 23  ;;  %v4810_v19 = vshll.u32 %v14054_v27, %v4804_v18 }
 0x6aa   :  { %v4735_v34 = vadd.s32 536870912, %v4734_v39  ;;  %v4813_v54 = vshll.u32 %v14055_v61, %v4804_v18  ;;  %v4816_v51 = vshll.u32 %v14056_v7, %v4804_v18  ;;  %v4808_v24 = vshrl.u32 %v14054_v27, %v4805_v45 }
 0x6ab   :  { %v4811_v63 = vshrl.u32 %v14055_v61, %v4805_v45  ;;  %v4814_v30 = vshrl.u32 %v14056_v7, %v4805_v45  ;;  %v4817_v56 = vshrl.u32 %v14057_v6, %v4805_v45  ;;  %v11976_v14 = vshrl.u32 %v4802_v48, 5 }
 0x6ac   :  { %v11974_v25 = vshrl.u32 %v4735_v34, 30  ;;  %v4819_v15 = vshll.u32 %v14057_v6, %v4804_v18  ;;  %v4820_v23 = vshrl.u32 %v14058_v59, %v4805_v45  ;;  %v4809_v58 = vor.u32 %v4808_v24, %v4807_v44 }
 0x6ad   :  { %v4812_v29 = vor.u32 %v4811_v63, %v4810_v19  ;;  %v4815_v8 = vor.u32 %v4814_v30, %v4813_v54  ;;  %v4818_v28 = vor.u32 %v4817_v56, %v4816_v51  ;;  %v11980_v40 = vadd.f32 1.0, %v4314_v22 }
 0x6ae   :  { %v11984_v0 = vsel %vm4330_vm6, %v4450_v31, %v4449_v35  ;;  %v4737_v60 = vshll.u32 %v11974_v25, 30  ;;  %v4821_v4 = vor.u32 %v4820_v23, %v4819_v15  ;;  %v4576_v62 = vadd.s32 %v11860_v16, %v11855_v20 }
 0x6af   :  { %v11989_v48 = vshll.u32 %v4798_v37, 8  ;;  %v8643_v21 = vadd.s32 4294967169, %v4948_v52  ;;  %v4951_v11 = vand.u32 8388607, %v13812_v13  ;;  %v4596_v18 = vsub.s32 4294967266, %v11963_v5  ;;  %v8703_v13 = vld [vmem:[%s13857_s22 + $0xd8] sm:$0xff] }
 0x6b0   :  { %v11994_v22 = vsub.s32 %v4734_v39, %v4737_v60  ;;  %vm4822_vm8 = vcmp.lt.s32.totalorder %v11976_v14, 1  ;;  %vm4825_vm2 = vcmp.lt.s32.totalorder %v11976_v14, 4  ;;  %v4592_v31 = vsub.s32 32, %v11963_v5 }
 0x6b1   :  { %v4830_v35 = vsel %vm4822_vm8, %v4809_v58, %v4812_v29  ;;  %v4831_v20 = vsel %vm4825_vm2, %v4818_v28, 920167782  ;;  %v4834_v16 = vsel %vm4822_vm8, %v4812_v29, %v4815_v8  ;;  %v4835_v50 = vsel %vm4825_vm2, %v4821_v4, 1326507024 }
 0x6b2   :  { %vm4739_vm3 = vcmp.lt.s32.totalorder %v11994_v22, 0  ;;  %v4740_v39 = vsub.s32 0, %v11994_v22  ;;  %vm4824_vm4 = vcmp.lt.s32.totalorder %v11976_v14, 3  ;;  %vm4823_vm5 = vcmp.lt.s32.totalorder %v11976_v14, 2 }
 0x6b3   :  { %v4832_v37 = vsel %vm4824_vm4, %v4815_v8, %v4831_v20  ;;  %v4836_v44 = vsel %vm4824_vm4, %v4818_v28, %v4835_v50  ;;  %v4952_v52 = vor.u32 8388608, %v4951_v11  ;;  %v4839_v51 = vand.u32 65535, %v11989_v48 }
 0x6b4   :  { %v4741_v34 = vsel %vm4739_vm3, %v4740_v39, %v11994_v22  ;;  %v4833_v19 = vsel %vm4823_vm5, %v4830_v35, %v4832_v37  ;;  %v4837_v54 = vsel %vm4823_vm5, %v4834_v16, %v4836_v44  ;;  %v4597_v24 = vadd.s32 127, %v4596_v18 }
 0x6b5   :  { %v4742_v63 = vclz %v4741_v34  ;;  %v4841_v30 = vand.u32 65535, %v4837_v54  ;;  %v4842_v56 = vshrl.u32 %v4837_v54, 16  ;;  %v4594_v15 = vshrl.u32 %v4576_v62, %v4592_v31 }
 0x6b6   :  { %v4840_v23 = vshrl.u32 %v11989_v48, 16  ;;  %v4863_v60 = vand.u32 65535, %v4833_v19  ;;  %v4864_v28 = vshrl.u32 %v4833_v19, 16  ;;  %v4593_v4 = vshll.u32 %v11921_v36, %v11963_v5 }
 0x6b7   :  { %v4844_v11 = vmul.u32 %v4842_v56, %v4839_v51  ;;  %v4954_v20 = vadd.s32 1, %v8643_v21  ;;  %v12024_v35 = vshll.u32 %v4952_v52, 8  ;;  %v4806_v16 = vshrl.u32 %v14053_v17, %v4805_v45 }
 0x6b8   :  { %v4827_v18 = vsel %vm4825_vm2, %v4815_v8, 2102212464  ;;  %v4845_v50 = vmul.u32 %v4841_v30, %v4840_v23  ;;  %v4866_v39 = vmul.u32 %v4864_v28, %v4839_v51  ;;  %v4598_v37 = vshll.u32 %v4597_v24, 23 }
 0x6b9   :  { %v8638_v62 = vadd.s32 4294967294, %v4742_v63  ;;  %v4843_v31 = vmul.u32 %v4841_v30, %v4839_v51  ;;  %v4847_v44 = vshll.u32 %v4844_v11, 16  ;;  %v12029_v34 = vor.u32 %v4594_v15, %v4593_v4 }
 0x6ba   :  { %v4826_v36 = vsel %vm4822_vm8, %v4806_v16, %v4809_v58  ;;  %v4867_v5 = vmul.u32 %v4863_v60, %v4840_v23  ;;  %v4869_v21 = vshll.u32 %v4866_v39, 16  ;;  %v4828_v52 = vsel %vm4824_vm4, %v4812_v29, %v4827_v18 }
 0x6bb   :  { %v4846_v45 = vmul.u32 %v4842_v56, %v4840_v23  ;;  %vm4851_vm7 = vc.u32 %v4843_v31, %v4847_v44  ;;  %vm4955_vm10 = vcmp.gt.s32.totalorder %v4954_v20, 0  ;;  %v4849_v8 = vshll.u32 %v4845_v50, 16 }
 0x6bc   :  { %v4852_v19 = vsel %vm4851_vm7, 1, %v13909_v9  ;;  %v4853_v54 = vadd.s32 %v4847_v44, %v4843_v31  ;;  %v4865_v24 = vmul.u32 %v4863_v60, %v4839_v51  ;;  %v12036_v63 = vor.u32 4788187, %v4598_v37 }
 0x6bd   :  { %vm8639_vm11 = vcmp.lt.s32.totalorder %v8638_v62, 0  ;;  %v4854_v30 = vadd.s32 %v4852_v19, %v4846_v45  ;;  %v4868_v15 = vmul.u32 %v4864_v28, %v4840_v23  ;;  %v4871_v58 = vshll.u32 %v4867_v5, 16 }
 0x6be   :  { %vm4855_vm12 = vc.u32 %v4853_v54, %v4849_v8  ;;  %vm4873_vm13 = vc.u32 %v4865_v24, %v4869_v21  ;;  %v4875_v4 = vadd.s32 %v4869_v21, %v4865_v24  ;;  %v4829_v29 = vsel %vm4823_vm5, %v4826_v36, %v4828_v52 }
 0x6bf   :  { %v4856_v56 = vsel %vm4855_vm12, 1, %v13909_v9  ;;  %v4874_v16 = vsel %vm4873_vm13, 1, %v13909_v9  ;;  %v4956_v18 = vsel %vm4955_vm10, %v4954_v20, 0  ;;  %v4848_v31 = vshrl.u32 %v4844_v11, 16 }
 0x6c0   :  { %v4858_v51 = vadd.s32 %v4856_v56, %v4854_v30  ;;  %v4876_v60 = vadd.s32 %v4874_v16, %v4868_v15  ;;  %vm4877_vm9 = vc.u32 %v4875_v4, %v4871_v58  ;;  %v4730_v23 = vadd.s32 %v11944_v32, %v11938_v55 }
 0x6c1   :  { %v12046_v28 = vsel %vm8639_vm11, 0, %v8638_v62  ;;  %v4850_v37 = vshrl.u32 %v4845_v50, 16  ;;  %v4878_v14 = vsel %vm4877_vm9, 1, %v13909_v9  ;;  %v4870_v36 = vshrl.u32 %v4866_v39, 16 }
 0x6c2   :  { %v4859_v44 = vadd.s32 %v4858_v51, %v4848_v31  ;;  %v4880_v21 = vadd.s32 %v4878_v14, %v4876_v60  ;;  %v4958_v52 = vand.u32 31, %v4956_v18  ;;  %v4600_v45 = vand.u32 2147483647, %v12036_v63 }
 0x6c3   :  { %v4602_v11 = vcvt.s32.f32 %v12029_v34  ;;  %v4883_v20 = vmul.u32 %v11989_v48, %v4829_v29  ;;  %v12053_v8 = vand.u32 65535, %v12024_v35  ;;  %v4872_v32 = vshrl.u32 %v4867_v5, 16 }
 0x6c4   :  { %v12055_v55 = vadd.s32 %v4859_v44, %v4850_v37  ;;  %v4881_v62 = vadd.s32 %v4880_v21, %v4870_v36  ;;  %v12057_v50 = vsub.s32 32, %v4958_v52  ;;  %v4746_v19 = vsub.s32 32, %v12046_v28 }
 0x6c5   :  { %v12060_v39 = vadd.s32 %v4875_v4, %v4871_v58  ;;  %v12062_v54 = vshrl.u32 %v4956_v18, 5  ;;  %v4961_v24 = vshll.u32 %v14053_v17, %v4958_v52  ;;  %v4964_v48 = vshll.u32 %v14054_v27, %v4958_v52 }
 0x6c6   :  { %v4882_v34 = vadd.s32 %v4881_v62, %v4872_v32  ;;  %v4967_v63 = vshll.u32 %v14055_v61, %v4958_v52  ;;  %v4970_v30 = vshll.u32 %v14056_v7, %v4958_v52  ;;  %v4962_v5 = vshrl.u32 %v14054_v27, %v12057_v50 }
 0x6c7   :  { %vm4885_vm15 = vc.u32 %v12055_v55, %v12060_v39  ;;  %v4965_v15 = vshrl.u32 %v14055_v61, %v12057_v50  ;;  %v4968_v58 = vshrl.u32 %v14056_v7, %v12057_v50  ;;  %v4971_v29 = vshrl.u32 %v14057_v6, %v12057_v50 }
 0x6c8   :  { %v4886_v4 = vadd.s32 1, %v4882_v34  ;;  %v4973_v56 = vshll.u32 %v14057_v6, %v4958_v52  ;;  %v4974_v16 = vshrl.u32 %v14058_v59, %v12057_v50  ;;  %v12081_v18 = vor.u32 %v4962_v5, %v4961_v24 }
 0x6c9   :  { %v12083_v31 = vor.u32 %v4965_v15, %v4964_v48  ;;  %v12085_v51 = vor.u32 %v4968_v58, %v4967_v63  ;;  %v4994_v60 = vshrl.u32 %v12024_v35, 16  ;;  %v4750_v37 = vsub.s32 4294967266, %v12046_v28  ;;  %v8707_v48 = vld [vmem:[%s13857_s22 + $0xf8] sm:$0xff] }
 0x6ca   :  { %v4887_v14 = vsel %vm4885_vm15, %v4886_v4, %v4882_v34  ;;  %v4972_v44 = vor.u32 %v4971_v29, %v4970_v30  ;;  %v4975_v36 = vor.u32 %v4974_v16, %v4973_v56  ;;  %v4748_v21 = vshrl.u32 %v4730_v23, %v4746_v19  ;;  %v12108_v34 = vpop.f32.mrf.mxu0  ;;  %v8667_v63 = vld [vmem:[%s13698_s3 + $0xf8] sm:$0xff]  ;;  %6680 = vmatpush.msra.mxu3 %v8707_v48 }
 0x6cb   :  { %v4888_v32 = vadd.s32 %v4887_v14, %v4883_v20  ;;  %vm4976_vm1 = vcmp.lt.s32.totalorder %v12062_v54, 1  ;;  %vm4979_vm8 = vcmp.lt.s32.totalorder %v12062_v54, 4  ;;  %vm4978_vm2 = vcmp.lt.s32.totalorder %v12062_v54, 3  ;;  %6721 = vmatpush.msra.mxu1 %v8667_v63 }
 0x6cc   :  { %v4984_v52 = vsel %vm4976_vm1, %v12081_v18, %v12083_v31  ;;  %v4985_v62 = vsel %vm4979_vm8, %v4972_v44, 920167782  ;;  %v4988_v23 = vsel %vm4976_vm1, %v12083_v31, %v12085_v51  ;;  %vm4977_vm3 = vcmp.lt.s32.totalorder %v12062_v54, 2 }
 0x6cd   :  { %v4889_v20 = vadd.s32 536870912, %v4888_v32  ;;  %v4986_v19 = vsel %vm4978_vm2, %v12085_v51, %v4985_v62  ;;  %v4989_v24 = vsel %vm4979_vm8, %v4975_v36, 1326507024  ;;  %v4747_v30 = vshll.u32 %v11994_v22, %v12046_v28  ;;  %v8706_v22 = vld [vmem:[%s13857_s22 + $0xf0] sm:$0xff] }
 0x6ce   :  { %v12118_v5 = vadd.s32 127, %v4750_v37  ;;  %v4987_v15 = vsel %vm4977_vm3, %v4984_v52, %v4986_v19  ;;  %v4990_v58 = vsel %vm4978_vm2, %v4972_v44, %v4989_v24  ;;  %v8666_v28 = vld [vmem:[%s13698_s3 + $0xf0] sm:$0xff]  ;;  %v12134_v37 = vmul.f32 %v4602_v11, %v4600_v45  ;;  %6681 = vmatpush.msra.mxu3 %v8706_v22  ;;  %v8705_v45 = vld [vmem:[%s13857_s22 + $0xe8] sm:$0xff] }
 0x6cf   :  { %v12124_v4 = vshrl.u32 %v4889_v20, 30  ;;  %v4991_v29 = vsel %vm4977_vm3, %v4988_v23, %v4990_v58  ;;  %v5017_v56 = vand.u32 65535, %v4987_v15  ;;  %v5018_v16 = vshrl.u32 %v4987_v15, 16  ;;  %6722 = vmatpush.msra.mxu1 %v8666_v28  ;;  %v8665_v11 = vld [vmem:[%s13698_s3 + $0xe8] sm:$0xff] }
 0x6d0   :  { %v4995_v14 = vand.u32 65535, %v4991_v29  ;;  %v4996_v44 = vshrl.u32 %v4991_v29, 16  ;;  %v13815_v36 = vand.u32 2147483647, %v12108_v34  ;;  %v12137_v52 = vor.u32 %v4748_v21, %v4747_v30  ;;  %6682 = vmatpush.msra.mxu3 %v8705_v45  ;;  %v8704_v29 = vld [vmem:[%s13857_s22 + $0xe0] sm:$0xff] }
 0x6d1   :  { %v4891_v62 = vshll.u32 %v12124_v4, 30  ;;  %v12141_v23 = vmul.u32 %v5018_v16, %v12053_v8  ;;  %v12143_v20 = vmul.u32 %v5017_v56, %v4994_v60  ;;  %v4752_v19 = vshll.u32 %v12118_v5, 23  ;;  %6723 = vmatpush.msra.mxu1 %v8665_v11  ;;  %v8698_v5 = vld [vmem:[%s13857_s22 + $0xb0] sm:$0xff] }
 0x6d2   :  { %v4960_v21 = vshrl.u32 %v14053_v17, %v12057_v50  ;;  %v12155_v24 = vmul.u32 %v4996_v44, %v12053_v8  ;;  %v12157_v48 = vmul.u32 %v4995_v14, %v4994_v60  ;;  %v5019_v30 = vmul.u32 %v5017_v56, %v12053_v8  ;;  %v8664_v50 = vld [vmem:[%s13698_s3 + $0xe0] sm:$0xff]  ;;  %6683 = vmatpush.msra.mxu3 %v8704_v29 }
 0x6d3   :  { %v12159_v63 = vsub.s32 %v4888_v32, %v4891_v62  ;;  %v5023_v15 = vshll.u32 %v12141_v23, 16  ;;  %v5101_v58 = vand.u32 2139095040, %v12108_v34  ;;  %v4997_v22 = vmul.u32 %v4995_v14, %v12053_v8  ;;  %6724 = vmatpush.msra.mxu1 %v8664_v50  ;;  %v8663_v8 = vld [vmem:[%s13698_s3 + $0xd8] sm:$0xff] }
 0x6d4   :  { %v5000_v28 = vmul.u32 %v4996_v44, %v4994_v60  ;;  %v5001_v32 = vshll.u32 %v12155_v24, 16  ;;  %v5022_v62 = vmul.u32 %v5018_v16, %v4994_v60  ;;  %v5003_v45 = vshll.u32 %v12157_v48, 16  ;;  %6684 = vmatpush.msra.mxu3 %v8703_v13  ;;  %v8662_v13 = vld [vmem:[%s13698_s3 + $0xd0] sm:$0xff] }
 0x6d5   :  { %vm4893_vm4 = vcmp.lt.s32.totalorder %v12159_v63, 0  ;;  %v4894_v56 = vsub.s32 0, %v12159_v63  ;;  %v5025_v11 = vshll.u32 %v12143_v20, 16  ;;  %vm5027_vm7 = vc.u32 %v5019_v30, %v5023_v15  ;;  %6725 = vmatpush.msra.mxu1 %v8663_v8  ;;  %v8701_v8 = vld [vmem:[%s13857_s22 + $0xc8] sm:$0xff] }
 0x6d6   :  { %vm5005_vm5 = vc.u32 %v4997_v22, %v5001_v32  ;;  %v5007_v60 = vadd.s32 %v5001_v32, %v4997_v22  ;;  %v5029_v16 = vadd.s32 %v5023_v15, %v5019_v30  ;;  %vm12184_vm10 = vcmp.le.f32.partialorder %v4328_v3, 0.7853982  ;;  %v8702_v22 = vld [vmem:[%s13857_s22 + $0xd0] sm:$0xff] }
 0x6d7   :  { %v4895_v44 = vsel %vm4893_vm4, %v4894_v56, %v12159_v63  ;;  %v5006_v29 = vsel %vm5005_vm5, 1, %v13909_v9  ;;  %v5028_v50 = vsel %vm5027_vm7, 1, %v13909_v9  ;;  %v5102_v33 = vshrl.u32 %v5101_v58, 23  ;;  %6685 = vmatpush.msra.mxu3 %v8702_v22  ;;  %6726 = vmatpush.msra.mxu1 %v8662_v13  ;;  %v8700_v22 = vld [vmem:[%s13857_s22 + $0xc0] sm:$0xff] }
 0x6d8   :  { %v4896_v3 = vclz %v4895_v44  ;;  %v5008_v30 = vadd.s32 %v5006_v29, %v5000_v28  ;;  %vm5009_vm11 = vc.u32 %v5007_v60, %v5003_v45  ;;  %v5030_v15 = vadd.s32 %v5028_v50, %v5022_v62  ;;  %v8661_v28 = vld [vmem:[%s13698_s3 + $0xc8] sm:$0xff] }
 0x6d9   :  { %v4981_v32 = vsel %vm4979_vm8, %v12085_v51, 2102212464  ;;  %v5010_v58 = vsel %vm5009_vm11, 1, %v13909_v9  ;;  %vm5031_vm12 = vc.u32 %v5029_v16, %v5025_v11  ;;  %v8646_v56 = vadd.s32 4294967169, %v5102_v33  ;;  %6686 = vmatpush.msra.mxu3 %v8701_v8  ;;  %6727 = vmatpush.msra.mxu1 %v8661_v28 }
 0x6da   :  { %v8641_v45 = vadd.s32 4294967294, %v4896_v3  ;;  %v5002_v62 = vshrl.u32 %v12155_v24, 16  ;;  %v5012_v60 = vadd.s32 %v5010_v58, %v5008_v30  ;;  %v5032_v44 = vsel %vm5031_vm12, 1, %v13909_v9  ;;  %v8660_v24 = vld [vmem:[%s13698_s3 + $0xc0] sm:$0xff]  ;;  %v8659_v58 = vld [vmem:[%s13698_s3 + $0xb8] sm:$0xff] }
 0x6db   :  { %v4980_v33 = vsel %vm4976_vm1, %v4960_v21, %v12081_v18  ;;  %v5024_v51 = vshrl.u32 %v12141_v23, 16  ;;  %v5034_v29 = vadd.s32 %v5032_v44, %v5030_v15  ;;  %v5108_v50 = vadd.s32 1, %v8646_v56  ;;  %6687 = vmatpush.msra.mxu3 %v8700_v22  ;;  %6728 = vmatpush.msra.mxu1 %v8660_v24  ;;  %v8699_v15 = vld [vmem:[%s13857_s22 + $0xb8] sm:$0xff] }
 0x6dc   :  { %vm8642_vm13 = vcmp.lt.s32.totalorder %v8641_v45, 0  ;;  %v4982_v13 = vsel %vm4978_vm2, %v12083_v31, %v4981_v32  ;;  %v5004_v18 = vshrl.u32 %v12157_v48, 16  ;;  %v5013_v21 = vadd.s32 %v5012_v60, %v5002_v62 }
 0x6dd   :  { %v12223_v23 = vsel %vm8642_vm13, 0, %v8641_v45  ;;  %v5026_v3 = vshrl.u32 %v12143_v20, 16  ;;  %v5035_v30 = vadd.s32 %v5034_v29, %v5024_v51  ;;  %vm5109_vm9 = vcmp.gt.s32.totalorder %v5108_v50, 0  ;;  %6688 = vmatpush.msra.mxu3 %v8699_v15  ;;  %6729 = vmatpush.msra.mxu1 %v8659_v58 }
 0x6de   :  { %v12234_v31 = vor.u32 4788187, %v4752_v19  ;;  %v4904_v48 = vsub.s32 4294967266, %v12223_v23  ;;  %v12237_v32 = vadd.s32 %v5013_v21, %v5004_v18  ;;  %v12239_v20 = vadd.s32 %v5029_v16, %v5025_v11  ;;  %v8658_v19 = vld [vmem:[%s13698_s3 + $0xb0] sm:$0xff]  ;;  %v8696_v18 = vld [vmem:[%s13857_s22 + $0xa0] sm:$0xff] }
 0x6df   :  { %v4983_v56 = vsel %vm4977_vm3, %v4980_v33, %v4982_v13  ;;  %v5036_v8 = vadd.s32 %v5035_v30, %v5026_v3  ;;  %v5105_v28 = vand.u32 8388607, %v13815_v36  ;;  %v5110_v45 = vsel %vm5109_vm9, %v5108_v50, 0  ;;  %6689 = vmatpush.msra.mxu3 %v8698_v5  ;;  %6730 = vmatpush.msra.mxu1 %v8658_v19 }
 0x6e0   :  { %v12253_v11 = vmul.f32 %v11980_v40, %v11822_v46  ;;  %v12259_v54 = vsel %vm12184_vm10, %v11637_v38, %v11984_v0  ;;  %v4905_v16 = vadd.s32 127, %v4904_v48  ;;  %vm5039_vm15 = vc.u32 %v12237_v32, %v12239_v20  ;;  %v8697_v46 = vld [vmem:[%s13857_s22 + $0xa8] sm:$0xff]  ;;  %v8695_v48 = vld [vmem:[%s13857_s22 + $0x98] sm:$0xff] }
 0x6e1   :  { %v4604_v62 = vxor.u32 2147483648, %v12134_v37  ;;  %v4756_v60 = vcvt.s32.f32 %v12137_v52  ;;  %v5040_v44 = vadd.s32 1, %v5036_v8  ;;  %v5112_v33 = vand.u32 31, %v5110_v45  ;;  %v8657_v40 = vld [vmem:[%s13698_s3 + $0xa8] sm:$0xff]  ;;  %6690 = vmatpush.msra.mxu3 %v8697_v46 }
 0x6e2   :  { %v4754_v0 = vand.u32 2147483647, %v12234_v31  ;;  %v4884_v51 = vadd.s32 %v12060_v39, %v12055_v55  ;;  %v5037_v29 = vmul.u32 %v12024_v35, %v4983_v56  ;;  %v12276_v52 = vmul.f32 -0.001358992, %v11834_v42  ;;  %6731 = vmatpush.msra.mxu1 %v8657_v40  ;;  %v8656_v55 = vld [vmem:[%s13698_s3 + $0xa0] sm:$0xff]  ;;  %v8655_v56 = vld [vmem:[%s13698_s3 + $0x98] sm:$0xff] }
 0x6e3   :  { %v4900_v50 = vsub.s32 32, %v12223_v23  ;;  %v5041_v22 = vsel %vm5039_vm15, %v5040_v44, %v5036_v8  ;;  %v5106_v24 = vor.u32 8388608, %v5105_v28  ;;  %v12279_v13 = vsub.s32 32, %v5112_v33  ;;  %6691 = vmatpush.msra.mxu3 %v8696_v18 }
 0x6e4   :  { %v4906_v35 = vshll.u32 %v4905_v16, 23  ;;  %v5042_v39 = vadd.s32 %v5041_v22, %v5037_v29  ;;  %v5115_v21 = vshll.u32 %v14053_v17, %v5112_v33  ;;  %v5118_v3 = vshll.u32 %v14054_v27, %v5112_v33  ;;  %6732 = vmatpush.msra.mxu1 %v8656_v55  ;;  %v8694_v29 = vld [vmem:[%s13857_s22 + $0x90] sm:$0xff] }
 0x6e5   :  { %v5116_v30 = vshrl.u32 %v14054_v27, %v12279_v13  ;;  %v5119_v15 = vshrl.u32 %v14055_v61, %v12279_v13  ;;  %v5121_v58 = vshll.u32 %v14055_v61, %v5112_v33  ;;  %v5122_v31 = vshrl.u32 %v14056_v7, %v12279_v13  ;;  %6692 = vmatpush.msra.mxu3 %v8695_v48 }
 0x6e6   :  { %v5043_v8 = vadd.s32 536870912, %v5042_v39  ;;  %v12302_v28 = vshrl.u32 %v5110_v45, 5  ;;  %v5124_v5 = vshll.u32 %v14056_v7, %v5112_v33  ;;  %v5125_v19 = vshrl.u32 %v14057_v6, %v12279_v13  ;;  %6733 = vmatpush.msra.mxu1 %v8655_v56  ;;  %v8654_v45 = vld [vmem:[%s13698_s3 + $0x90] sm:$0xff] }
 0x6e7   :  { %v4902_v16 = vshrl.u32 %v4884_v51, %v4900_v50  ;;  %v12307_v44 = vor.u32 %v5116_v30, %v5115_v21  ;;  %v12309_v46 = vor.u32 %v5119_v15, %v5118_v3  ;;  %v12311_v40 = vor.u32 %v5122_v31, %v5121_v58  ;;  %6693 = vmatpush.msra.mxu3 %v8694_v29  ;;  %v8693_v15 = vld [vmem:[%s13857_s22 + $0x88] sm:$0xff] }
 0x6e8   :  { %vm4484_vm1 = vcmp.lt.s32.totalorder %v11729_v1, 0  ;;  %v12320_v22 = vshrl.u32 %v5043_v8, 30  ;;  %v5126_v51 = vor.u32 %v5125_v19, %v5124_v5  ;;  %v5127_v50 = vshll.u32 %v14057_v6, %v5112_v33  ;;  %6734 = vmatpush.msra.mxu1 %v8654_v45  ;;  %v8653_v33 = vld [vmem:[%s13698_s3 + $0x88] sm:$0xff] }
 0x6e9   :  { %v5128_v18 = vshrl.u32 %v14058_v59, %v12279_v13  ;;  %v12325_v55 = vmul.f32 %v4756_v60, %v4754_v0  ;;  %v4901_v21 = vshll.u32 %v12159_v63, %v12223_v23  ;;  %v4907_v3 = vor.u32 4788187, %v4906_v35  ;;  %6694 = vmatpush.msra.mxu3 %v8693_v15  ;;  %v8692_v0 = vld [vmem:[%s13857_s22 + $0x80] sm:$0xff]  ;;  %v8977_v59 = vld [vmem:[%s13701_s9 + $0x8] sm:$0xff] }
 0x6ea   :  { %v12329_v30 = vshll.u32 %v5106_v24, 8  ;;  %v5045_v58 = vshll.u32 %v12320_v22, 30  ;;  %vm5130_vm8 = vcmp.lt.s32.totalorder %v12302_v28, 1  ;;  %vm5133_vm2 = vcmp.lt.s32.totalorder %v12302_v28, 4  ;;  %6735 = vmatpush.msra.mxu1 %v8653_v33  ;;  %v8652_v24 = vld [vmem:[%s13698_s3 + $0x80] sm:$0xff]  ;;  %v8972_v33 = vld [vmem:[%s13701_s9 + $0x30] sm:$0xff] }
 0x6eb   :  { %v5129_v31 = vor.u32 %v5128_v18, %v5127_v50  ;;  %v4903_v63 = vor.u32 %v4902_v16, %v4901_v21  ;;  %vm5132_vm3 = vcmp.lt.s32.totalorder %v12302_v28, 3  ;;  %v5138_v23 = vsel %vm5130_vm8, %v12307_v44, %v12309_v46  ;;  %6695 = vmatpush.msra.mxu3 %v8692_v0  ;;  %v8971_v16 = vld [vmem:[%s13701_s9 + $0x38] sm:$0xff] }
 0x6ec   :  { %v5139_v60 = vsel %vm5133_vm2, %v5126_v51, 920167782  ;;  %v12353_v35 = vsub.s32 %v5042_v39, %v5045_v58  ;;  %vm5131_vm4 = vcmp.lt.s32.totalorder %v12302_v28, 2  ;;  %v5142_v56 = vsel %vm5130_vm8, %v12309_v46, %v12311_v40  ;;  %6736 = vmatpush.msra.mxu1 %v8652_v24 }
 0x6ed   :  { %v5140_v48 = vsel %vm5132_vm3, %v12311_v40, %v5139_v60  ;;  %v5143_v5 = vsel %vm5133_vm2, %v5129_v31, 1326507024  ;;  %v5147_v39 = vand.u32 65535, %v12329_v30  ;;  %v4304_v19 = vadd.f32 0.041655596, %v12276_v52  ;;  %6939 = vmatpush.msrb.mxu3 %v8971_v16 }
 0x6ee   :  { %v5141_v8 = vsel %vm5131_vm4, %v5138_v23, %v5140_v48  ;;  %vm4638_vm5 = vcmp.lt.s32.totalorder %v11756_v41, 0  ;;  %v4908_v29 = vand.u32 2147483647, %v4907_v3  ;;  %vm5047_vm7 = vcmp.lt.s32.totalorder %v12353_v35, 0 }
 0x6ef   :  { %v5048_v45 = vsub.s32 0, %v12353_v35  ;;  %v5144_v50 = vsel %vm5132_vm3, %v5126_v51, %v5143_v5  ;;  %v5148_v52 = vshrl.u32 %v12329_v30, 16  ;;  %v5171_v21 = vand.u32 65535, %v5141_v8  ;;  %6940 = vmatpush.msrb.mxu3 %v8972_v33 }
 0x6f0   :  { %v5145_v18 = vsel %vm5131_vm4, %v5142_v56, %v5144_v50  ;;  %v5172_v15 = vshrl.u32 %v5141_v8, 16  ;;  %v4910_v3 = vcvt.s32.f32 %v4903_v63  ;;  %v12386_v51 = vmul.f32 %v12259_v54, %v12259_v54  ;;  %v8973_v63 = vld [vmem:[%s13701_s9 + $0x28] sm:$0xff] }
 0x6f1   :  { %v5049_v58 = vsel %vm5047_vm7, %v5048_v45, %v12353_v35  ;;  %v5149_v31 = vand.u32 65535, %v5145_v18  ;;  %v5150_v23 = vshrl.u32 %v5145_v18, 16  ;;  %v12393_v60 = vsel %vm4484_vm1, %v4604_v62, %v12134_v37  ;;  %6941 = vmatpush.msrb.mxu3 %v8973_v63  ;;  %v8974_v62 = vld [vmem:[%s13701_s9 + $0x20] sm:$0xff] }
 0x6f2   :  { %v5050_v0 = vclz %v5049_v58  ;;  %v12395_v24 = vmul.u32 %v5172_v15, %v5147_v39  ;;  %v4758_v48 = vxor.u32 2147483648, %v12325_v55  ;;  %vm4792_vm11 = vcmp.lt.s32.totalorder %v11907_v12, 0 }
 0x6f3   :  { %v4911_v56 = vmul.f32 %v4910_v3, %v4908_v29  ;;  %v5152_v8 = vmul.u32 %v5150_v23, %v5147_v39  ;;  %v5153_v5 = vmul.u32 %v5149_v31, %v5148_v52  ;;  %v5173_v45 = vmul.u32 %v5171_v21, %v5147_v39  ;;  %6942 = vmatpush.msrb.mxu3 %v8974_v62 }
 0x6f4   :  { %v8644_v16 = vadd.s32 4294967294, %v5050_v0  ;;  %v12402_v50 = vmul.u32 %v5171_v21, %v5148_v52  ;;  %v5177_v37 = vshll.u32 %v12395_v24, 16  ;;  %v5151_v18 = vmul.u32 %v5149_v31, %v5147_v39  ;;  %v8975_v21 = vld [vmem:[%s13701_s9 + $0x18] sm:$0xff] }
 0x6f5   :  { %v5154_v33 = vmul.u32 %v5150_v23, %v5148_v52  ;;  %v5155_v58 = vshll.u32 %v5152_v8, 16  ;;  %v4305_v63 = vmul.f32 %v4304_v19, %v11834_v42  ;;  %v5157_v29 = vshll.u32 %v5153_v5, 16  ;;  %6943 = vmatpush.msrb.mxu3 %v8975_v21 }
 0x6f6   :  { %vm8645_vm12 = vcmp.lt.s32.totalorder %v8644_v16, 0  ;;  %v5176_v3 = vmul.u32 %v5172_v15, %v5148_v52  ;;  %vm5181_vm13 = vc.u32 %v5173_v45, %v5177_v37  ;;  %vm12414_vm9 = vcmp.le.f32.partialorder %v4482_v47, 0.7853982 }
 0x6f7   :  { %vm12420_vm15 = vcmp.le.f32.partialorder %v4636_v57, 0.7853982  ;;  %v14067_v19 = vand.u32 2147483647, %v11907_v12  ;;  %v12430_v15 = vsel %vm8645_vm12, 0, %v8644_v16  ;;  %vm5159_vm0 = vc.u32 %v5151_v18, %v5155_v58 }
 0x6f8   :  { %v5161_v31 = vadd.s32 %v5155_v58, %v5151_v18  ;;  %v5182_v47 = vsel %vm5181_vm13, 1, %v13909_v9  ;;  %v4759_v23 = vsel %vm4638_vm5, %v4758_v48, %v12325_v55  ;;  %v4912_v57 = vxor.u32 2147483648, %v4911_v56 }
 0x6f9   :  { %vm12426_vm7 = vcmp.le.f32.partialorder %v14067_v19, 0.7853982  ;;  %v5160_v62 = vsel %vm5159_vm0, 1, %v13909_v9  ;;  %v5179_v21 = vshll.u32 %v12402_v50, 16  ;;  %v8976_v19 = vld [vmem:[%s13701_s9 + $0x10] sm:$0xff]  ;;  %v5183_v36 = vadd.s32 %v5177_v37, %v5173_v45 }
 0x6fa   :  { %6944 = vmatpush.msrb.mxu3 %v8976_v19  ;;  %v5162_v16 = vadd.s32 %v5160_v62, %v5154_v33  ;;  %vm5163_vm12 = vc.u32 %v5161_v31, %v5157_v29  ;;  %v5184_v18 = vadd.s32 %v5182_v47, %v5176_v3  ;;  %v5038_v58 = vadd.s32 %v12239_v20, %v12237_v32 }
 0x6fb   :  { %v5058_v53 = vsub.s32 4294967266, %v12430_v15  ;;  %v5164_v55 = vsel %vm5163_vm12, 1, %v13909_v9  ;;  %v4306_v48 = vadd.f32 -0.4999988, %v4305_v63  ;;  %v5135_v33 = vsel %vm5133_vm2, %v12311_v40, 2102212464 }
 0x6fc   :  { %6945 = vmatpush.msrb.mxu3 %v8977_v59  ;;  %v5156_v29 = vshrl.u32 %v5152_v8, 16  ;;  %v5166_v45 = vadd.s32 %v5164_v55, %v5162_v16  ;;  %vm5185_vm0 = vc.u32 %v5183_v36, %v5179_v21  ;;  %v4913_v32 = vsel %vm4792_vm11, %v4912_v57, %v4911_v56  ;;  %v8978_v59 = vld [vmem:[%s13701_s9] sm:$0xff] }
 0x6fd   :  { %v5114_v20 = vshrl.u32 %v14053_v17, %v12279_v13  ;;  %v5178_v37 = vshrl.u32 %v12395_v24, 16  ;;  %v5186_v63 = vsel %vm5185_vm0, 1, %v13909_v9  ;;  %v5054_v40 = vsub.s32 32, %v12430_v15 }
 0x6fe   :  { %6946 = vmatpush.msrb.mxu3 %v8978_v59  ;;  %v5158_v8 = vshrl.u32 %v5153_v5, 16  ;;  %v5167_v3 = vadd.s32 %v5166_v45, %v5156_v29  ;;  %v5188_v31 = vadd.s32 %v5186_v63, %v5184_v18  ;;  %v5059_v47 = vadd.s32 127, %v5058_v53 }
 0x6ff   :  { %v5134_v56 = vsel %vm5130_vm8, %v5114_v20, %v12307_v44  ;;  %v5136_v13 = vsel %vm5132_vm3, %v12309_v46, %v5135_v33  ;;  %v4452_v24 = vsub.s32 4, %v11759_v49  ;;  %v5180_v62 = vshrl.u32 %v12402_v50, 16 }
 0x700   :  { %v12468_v57 = vadd.s32 %v5167_v3, %v5158_v8  ;;  %v5189_v19 = vadd.s32 %v5188_v31, %v5178_v37  ;;  %v5567_v5 = vadd.s32 3, %v11959_v26  ;;  %v12476_v53 = vsel %vm12414_vm9, %v11729_v1, %v12393_v60 }
 0x701   :  { %v12481_v44 = vsel %vm12420_vm15, %v11756_v41, %v4759_v23  ;;  %v12486_v46 = vsel %vm12426_vm7, %v11907_v12, %v4913_v32  ;;  %v12488_v50 = vadd.s32 %v5183_v36, %v5179_v21  ;;  %v5056_v16 = vshrl.u32 %v5038_v58, %v5054_v40 }
 0x702   :  { %v5137_v18 = vsel %vm5131_vm4, %v5134_v56, %v5136_v13  ;;  %v5190_v55 = vadd.s32 %v5189_v19, %v5180_v62  ;;  %v4307_v60 = vmul.f32 %v4306_v48, %v11834_v42  ;;  %v5060_v33 = vshll.u32 %v5059_v47, 23 }
 0x703   :  { %vm5193_vm8 = vc.u32 %v12468_v57, %v12488_v50  ;;  %v4318_v23 = vand.u32 3, %v11959_v26  ;;  %v4453_v29 = vsel %vm4330_vm6, %v4452_v24, %v11759_v49  ;;  %v12501_v36 = vmul.f32 %v12476_v53, %v12476_v53 }
 0x704   :  { %v5194_v21 = vadd.s32 1, %v5190_v55  ;;  %v5568_v28 = vand.u32 3, %v5567_v5  ;;  %v4606_v58 = vsub.s32 4, %v11910_v10  ;;  %v12506_v42 = vmul.f32 %v12481_v44, %v12481_v44 }
 0x705   :  { %v5055_v48 = vshll.u32 %v12353_v35, %v12430_v15  ;;  %v5191_v26 = vmul.u32 %v12329_v30, %v5137_v18  ;;  %vm4317_vm2 = vweird.f32 %v11627_v2  ;;  %v12514_v49 = vmul.f32 %v12486_v46, %v12486_v46  ;;  %v8979_v2 = vld [vmem:[%s13709_s14 + $0x8] sm:$0xff] }
 0x706   :  { %v5195_v45 = vsel %vm5193_vm8, %v5194_v21, %v5190_v55  ;;  %v4308_v32 = vadd.f32 1.0, %v4307_v60  ;;  %v4455_v20 = vsel %vm12184_vm10, 0, %v4453_v29  ;;  %v12520_v63 = vor.u32 4788187, %v5060_v33 }
 0x707   :  { %v12518_v37 = vor.u32 %v5056_v16, %v5055_v48  ;;  %v5196_v59 = vadd.s32 %v5195_v45, %v5191_v26  ;;  %vm4319_vm6 = vcmp.lt.s32.totalorder %v4318_v23, 2  ;;  %vm5569_vm3 = vcmp.lt.s32.totalorder %v5568_v28, 2 }
 0x708   :  { %vm5570_vm4 = vcmp.eq.s32.totalorder %v5568_v28, 0  ;;  %vm4320_vm13 = vcmp.eq.s32.totalorder %v4318_v23, 0  ;;  %v4607_v30 = vsel %vm4484_vm1, %v4606_v58, %v11910_v10  ;;  %vm5573_vm12 = vcmp.eq.s32.totalorder %v5568_v28, 2 }
 0x709   :  { %v5197_v35 = vadd.s32 536870912, %v5196_v59  ;;  %vm4323_vm0 = vcmp.eq.s32.totalorder %v4318_v23, 2  ;;  %v5722_v15 = vadd.s32 3, %v4455_v20  ;;  %v4321_v14 = vxor.u32 2147483648, %v12253_v11 }
 0x70a   :  { %v4324_v40 = vxor.u32 2147483648, %v4308_v32  ;;  %v4457_v8 = vmul.f32 -0.001358992, %v12386_v51  ;;  %v4464_v3 = vmul.f32 -0.00019511016, %v12386_v51  ;;  %v4609_v47 = vsel %vm12414_vm9, 0, %v4607_v30 }
 0x70b   :  { %v12528_v31 = vshrl.u32 %v5197_v35, 30  ;;  %v4611_v56 = vmul.f32 -0.001358992, %v12501_v36  ;;  %v4618_v10 = vmul.f32 -0.00019511016, %v12501_v36  ;;  %v5572_v13 = vsel %vm5570_vm4, %v4308_v32, %v4321_v14 }
 0x70c   :  { %v5575_v24 = vsel %vm5573_vm12, %v4324_v40, %v12253_v11  ;;  %v4322_v62 = vsel %vm4320_vm13, %v4308_v32, %v4321_v14  ;;  %v4325_v19 = vsel %vm4323_vm0, %v4324_v40, %v12253_v11  ;;  %v4458_v55 = vadd.f32 0.041655596, %v4457_v8 }
 0x70d   :  { %v5199_v5 = vshll.u32 %v12528_v31, 30  ;;  %v5576_v16 = vsel %vm5569_vm3, %v5572_v13, %v5575_v24  ;;  %v4326_v18 = vsel %vm4319_vm6, %v4322_v62, %v4325_v19  ;;  %v4465_v33 = vadd.f32 0.008332121, %v4464_v3 }
 0x70e   :  { %v5577_v0 = vsel %vm4317_vm2, nan, %v5576_v16  ;;  %v4327_v60 = vsel %vm4317_vm2, nan, %v4326_v18  ;;  %v4612_v29 = vadd.f32 0.041655596, %v4611_v56  ;;  %v4459_v11 = vmul.f32 %v4458_v55, %v12386_v51 }
 0x70f   :  { %v12544_v21 = vsub.s32 %v5196_v59, %v5199_v5  ;;  %6696 = vmatmul.f32.vlgmr.msra.gmra.mxu3 %v5577_v0  ;;  %6737 = vmatmul.f32.vlgmr.msra.gmra.mxu1 %v4327_v60  ;;  %v4472_v58 = vand.u32 3, %v4455_v20  ;;  %v4619_v28 = vadd.f32 0.008332121, %v4618_v10  ;;  %v4466_v23 = vmul.f32 %v4465_v33, %v12386_v51 }
 0x710   :  { %v5723_v48 = vand.u32 3, %v5722_v15  ;;  %v4613_v26 = vmul.f32 %v4612_v29, %v12501_v36  ;;  %v5877_v45 = vadd.s32 3, %v4609_v47  ;;  %8789 = vmatpush.msra.mxu3 %v8979_v2  ;;  %v4460_v59 = vadd.f32 -0.4999988, %v4459_v11 }
 0x711   :  { %vm5201_vm10 = vcmp.lt.s32.totalorder %v12544_v21, 0  ;;  %v5202_v32 = vsub.s32 0, %v12544_v21  ;;  %v4620_v30 = vmul.f32 %v4619_v28, %v12501_v36  ;;  %v5062_v20 = vand.u32 2147483647, %v12520_v63 }
 0x712   :  { %v5064_v35 = vcvt.s32.f32 %v12518_v37  ;;  %v4467_v15 = vadd.f32 -0.16666654, %v4466_v23  ;;  %v4614_v14 = vadd.f32 -0.4999988, %v4613_v26  ;;  %v4461_v8 = vmul.f32 %v4460_v59, %v12386_v51 }
 0x713   :  { %v5203_v40 = vsel %vm5201_vm10, %v5202_v32, %v12544_v21  ;;  %vm4474_vm1 = vcmp.eq.s32.totalorder %v4472_v58, 0  ;;  %v4621_v3 = vadd.f32 -0.16666654, %v4620_v30  ;;  %vm4473_vm9 = vcmp.lt.s32.totalorder %v4472_v58, 2 }
 0x714   :  { %v5204_v56 = vclz %v5203_v40  ;;  %v4468_v10 = vmul.f32 %v4467_v15, %v12386_v51  ;;  %vm4477_vm8 = vcmp.eq.s32.totalorder %v4472_v58, 2  ;;  %v4615_v13 = vmul.f32 %v4614_v14, %v12501_v36 }
 0x715   :  { %v4462_v24 = vadd.f32 1.0, %v4461_v8  ;;  %vm4471_vm2 = vweird.f32 %v11637_v38  ;;  %vm5724_vm6 = vcmp.lt.s32.totalorder %v5723_v48, 2  ;;  %v4622_v62 = vmul.f32 %v4621_v3, %v12501_v36 }
 0x716   :  { %v5878_v19 = vand.u32 3, %v5877_v45  ;;  %v8647_v5 = vadd.s32 4294967294, %v5204_v56  ;;  %v4469_v16 = vadd.f32 1.0, %v4468_v10  ;;  %v4616_v18 = vadd.f32 1.0, %v4615_v13 }
 0x717   :  { %v4760_v55 = vsub.s32 4, %v11974_v25  ;;  %vm5725_vm3 = vcmp.eq.s32.totalorder %v5723_v48, 0  ;;  %vm5728_vm4 = vcmp.eq.s32.totalorder %v5723_v48, 2  ;;  %v4623_v0 = vadd.f32 1.0, %v4622_v62 }
 0x718   :  { %v4765_v51 = vmul.f32 -0.001358992, %v12506_v42  ;;  %vm8648_vm13 = vcmp.lt.s32.totalorder %v8647_v5, 0  ;;  %v4470_v60 = vmul.f32 %v4469_v16, %v12259_v54  ;;  %v4478_v33 = vxor.u32 2147483648, %v4462_v24 }
 0x719   :  { %v4626_v29 = vand.u32 3, %v4609_v47  ;;  %v12566_v11 = vsel %vm8648_vm13, 0, %v8647_v5  ;;  %v4624_v36 = vmul.f32 %v4623_v0, %v12476_v53  ;;  %vm5879_vm12 = vcmp.lt.s32.totalorder %v5878_v19, 2 }
 0x71a   :  { %vm5880_vm0 = vcmp.eq.s32.totalorder %v5878_v19, 0  ;;  %v4475_v28 = vxor.u32 2147483648, %v4470_v60  ;;  %v4632_v23 = vxor.u32 2147483648, %v4616_v18  ;;  %vm5883_vm10 = vcmp.eq.s32.totalorder %v5878_v19, 2 }
 0x71b   :  { %v4761_v26 = vsel %vm4638_vm5, %v4760_v55, %v11974_v25  ;;  %v5212_v45 = vsub.s32 4294967266, %v12566_v11  ;;  %v4629_v2 = vxor.u32 2147483648, %v4624_v36  ;;  %v4766_v32 = vadd.f32 0.041655596, %v4765_v51 }
 0x71c   :  { %v4772_v54 = vmul.f32 -0.00019511016, %v12506_v42  ;;  %v5727_v47 = vsel %vm5725_vm3, %v4462_v24, %v4475_v28  ;;  %v5730_v59 = vsel %vm5728_vm4, %v4478_v33, %v4470_v60  ;;  %v4476_v53 = vsel %vm4474_vm1, %v4462_v24, %v4475_v28 }
 0x71d   :  { %v4479_v30 = vsel %vm4477_vm8, %v4478_v33, %v4470_v60  ;;  %v5731_v15 = vsel %vm5724_vm6, %v5727_v47, %v5730_v59  ;;  %vm4627_vm13 = vcmp.lt.s32.totalorder %v4626_v29, 2  ;;  %vm4628_vm5 = vcmp.eq.s32.totalorder %v4626_v29, 0 }
 0x71e   :  { %v4480_v14 = vsel %vm4473_vm9, %v4476_v53, %v4479_v30  ;;  %v5732_v25 = vsel %vm4471_vm2, nan, %v5731_v15  ;;  %v5882_v8 = vsel %vm5880_vm0, %v4616_v18, %v4629_v2  ;;  %v4630_v3 = vsel %vm4628_vm5, %v4616_v18, %v4629_v2 }
 0x71f   :  { %v4481_v40 = vsel %vm4471_vm2, nan, %v4480_v14  ;;  %6699 = vmatmul.f32.gmra.mxu3 %v5732_v25  ;;  %vm4631_vm1 = vcmp.eq.s32.totalorder %v4626_v29, 2  ;;  %v4763_v48 = vsel %vm12420_vm15, 0, %v4761_v26  ;;  %v4767_v58 = vmul.f32 %v4766_v32, %v12506_v42 }
 0x720   :  { %6740 = vmatmul.f32.gmra.mxu1 %v4481_v40  ;;  %v4773_v56 = vadd.f32 0.008332121, %v4772_v54  ;;  %v5208_v10 = vsub.s32 32, %v12566_v11  ;;  %v5213_v13 = vadd.s32 127, %v5212_v45  ;;  %v5885_v24 = vsel %vm5883_vm10, %v4632_v23, %v4624_v36  ;;  %v12617_v40 = vpop.f32.mrf.mxu0 }
 0x721   :  { %v4633_v62 = vsel %vm4631_vm1, %v4632_v23, %v4624_v36  ;;  %v5886_v38 = vsel %vm5879_vm12, %v5882_v8, %v5885_v24  ;;  %v4768_v16 = vadd.f32 -0.4999988, %v4767_v58  ;;  %v5192_v39 = vadd.s32 %v12488_v50, %v12468_v57 }
 0x722   :  { %v4634_v5 = vsel %vm4627_vm13, %v4630_v3, %v4633_v62  ;;  %v4774_v18 = vmul.f32 %v4773_v56, %v12506_v42  ;;  %v6032_v55 = vadd.s32 3, %v4763_v48  ;;  %v4914_v0 = vsub.s32 4, %v12124_v4 }
 0x723   :  { %v4919_v51 = vmul.f32 -0.001358992, %v12514_v49  ;;  %vm4625_vm15 = vweird.f32 %v11729_v1  ;;  %v4769_v60 = vmul.f32 %v4768_v16, %v12506_v42  ;;  %v5065_v19 = vmul.f32 %v5064_v35, %v5062_v20 }
 0x724   :  { %v4775_v33 = vadd.f32 -0.16666654, %v4774_v18  ;;  %v5210_v29 = vshrl.u32 %v5192_v39, %v5208_v10  ;;  %v5887_v36 = vsel %vm4625_vm15, nan, %v5886_v38  ;;  %v4635_v28 = vsel %vm4625_vm15, nan, %v4634_v5 }
 0x725   :  { %v5209_v57 = vshll.u32 %v12544_v21, %v12566_v11  ;;  %v5214_v50 = vshll.u32 %v5213_v13, 23  ;;  %v4770_v23 = vadd.f32 1.0, %v4769_v60  ;;  %v6033_v45 = vand.u32 3, %v6032_v55 }
 0x726   :  { %v4776_v26 = vmul.f32 %v4775_v33, %v12506_v42  ;;  %v4915_v1 = vsel %vm4792_vm11, %v4914_v0, %v12124_v4  ;;  %v4920_v2 = vadd.f32 0.041655596, %v4919_v51  ;;  %v4926_v63 = vmul.f32 -0.00019511016, %v12514_v49 }
 0x727   :  { %6702 = vmatmul.f32.gmra.mxu3 %v5887_v36  ;;  %vm4779_vm9 = vweird.f32 %v11756_v41  ;;  %v4780_v20 = vand.u32 3, %v4763_v48  ;;  %v5066_v35 = vxor.u32 2147483648, %v5065_v19  ;;  %v5211_v21 = vor.u32 %v5210_v29, %v5209_v57 }
 0x728   :  { %6743 = vmatmul.f32.gmra.mxu1 %v4635_v28  ;;  %v4777_v37 = vadd.f32 1.0, %v4776_v26  ;;  %v4921_v11 = vmul.f32 %v4920_v2, %v12514_v49  ;;  %v4927_v32 = vadd.f32 0.008332121, %v4926_v63  ;;  %v5215_v42 = vor.u32 4788187, %v5214_v50 }
 0x729   :  { %v4786_v47 = vxor.u32 2147483648, %v4770_v23  ;;  %v4917_v4 = vsel %vm12426_vm7, 0, %v4915_v1  ;;  %vm6034_vm11 = vcmp.lt.s32.totalorder %v6033_v45, 2  ;;  %vm6035_vm8 = vcmp.eq.s32.totalorder %v6033_v45, 0 }
 0x72a   :  { %v4778_v54 = vmul.f32 %v4777_v37, %v12481_v44  ;;  %v4922_v59 = vadd.f32 -0.4999988, %v4921_v11  ;;  %v4928_v53 = vmul.f32 %v4927_v32, %v12514_v49  ;;  %vm6038_vm2 = vcmp.eq.s32.totalorder %v6033_v45, 2 }
 0x72b   :  { %vm4781_vm6 = vcmp.lt.s32.totalorder %v4780_v20, 2  ;;  %vm4782_vm3 = vcmp.eq.s32.totalorder %v4780_v20, 0  ;;  %vm4785_vm4 = vcmp.eq.s32.totalorder %v4780_v20, 2  ;;  %v6187_v25 = vadd.s32 3, %v4917_v4 }
 0x72c   :  { %v4783_v30 = vxor.u32 2147483648, %v4778_v54  ;;  %v4923_v15 = vmul.f32 %v4922_v59, %v12514_v49  ;;  %v4929_v14 = vadd.f32 -0.16666654, %v4928_v53  ;;  %v6040_v8 = vsel %vm6038_vm2, %v4786_v47, %v4778_v54 }
 0x72d   :  { %v4787_v3 = vsel %vm4785_vm4, %v4786_v47, %v4778_v54  ;;  %v5216_v13 = vand.u32 2147483647, %v5215_v42  ;;  %v5255_v38 = vand.u32 2139095040, %v12617_v40  ;;  %v6188_v16 = vand.u32 3, %v6187_v25 }
 0x72e   :  { %v6037_v44 = vsel %vm6035_vm8, %v4770_v23, %v4783_v30  ;;  %v4784_v52 = vsel %vm4782_vm3, %v4770_v23, %v4783_v30  ;;  %v4924_v56 = vadd.f32 1.0, %v4923_v15  ;;  %v4930_v10 = vmul.f32 %v4929_v14, %v12514_v49 }
 0x72f   :  { %v6041_v48 = vsel %vm6034_vm11, %v6037_v44, %v6040_v8  ;;  %v4788_v58 = vsel %vm4781_vm6, %v4784_v52, %v4787_v3  ;;  %v4934_v18 = vand.u32 3, %v4917_v4  ;;  %v5218_v39 = vcvt.s32.f32 %v5211_v21 }
 0x730   :  { %v6042_v24 = vsel %vm4779_vm9, nan, %v6041_v48  ;;  %v4789_v62 = vsel %vm4779_vm9, nan, %v4788_v58  ;;  %v4931_v5 = vadd.f32 1.0, %v4930_v10  ;;  %v5256_v55 = vshrl.u32 %v5255_v38, 23 }
 0x731   :  { %6705 = vmatmul.f32.gmra.mxu3 %v6042_v24  ;;  %6746 = vmatmul.f32.gmra.mxu1 %v4789_v62  ;;  %vm4946_vm7 = vcmp.lt.s32.totalorder %v11940_v43, 0  ;;  %vm4933_vm12 = vweird.f32 %v11907_v12  ;;  %v4940_v0 = vxor.u32 2147483648, %v4924_v56  ;;  %v5219_v51 = vmul.f32 %v5218_v39, %v5216_v13 }
 0x732   :  { %v4932_v49 = vmul.f32 %v4931_v5, %v12486_v46  ;;  %v5067_v41 = vsel %vm4946_vm7, %v5066_v35, %v5065_v19  ;;  %v5252_v60 = vand.u32 2147483647, %v12617_v40  ;;  %v8649_v33 = vadd.s32 4294967169, %v5256_v55 }
 0x733   :  { %vm6189_vm0 = vcmp.lt.s32.totalorder %v6188_v16, 2  ;;  %vm4935_vm10 = vcmp.lt.s32.totalorder %v4934_v18, 2  ;;  %vm4936_vm13 = vcmp.eq.s32.totalorder %v4934_v18, 0  ;;  %vm6190_vm5 = vcmp.eq.s32.totalorder %v6188_v16, 0 }
 0x734   :  { %v4937_v29 = vxor.u32 2147483648, %v4932_v49  ;;  %vm6193_vm1 = vcmp.eq.s32.totalorder %v6188_v16, 2  ;;  %vm4939_vm15 = vcmp.eq.s32.totalorder %v4934_v18, 2  ;;  %v5262_v36 = vadd.s32 1, %v8649_v33 }
 0x735   :  { %v6195_v46 = vsel %vm6193_vm1, %v4940_v0, %v4932_v49  ;;  %v4941_v50 = vsel %vm4939_vm15, %v4940_v0, %v4932_v49  ;;  %v5220_v23 = vxor.u32 2147483648, %v5219_v51  ;;  %v5259_v2 = vand.u32 8388607, %v5252_v60 }
 0x736   :  { %v6192_v28 = vsel %vm6190_vm5, %v4924_v56, %v4937_v29  ;;  %v4938_v57 = vsel %vm4936_vm13, %v4924_v56, %v4937_v29  ;;  %vm5263_vm9 = vcmp.gt.s32.totalorder %v5262_v36, 0  ;;  %v14070_v20 = vand.u32 2147483647, %v11940_v43 }
 0x737   :  { %v6196_v26 = vsel %vm6189_vm0, %v6192_v28, %v6195_v46  ;;  %v4942_v45 = vsel %vm4935_vm10, %v4938_v57, %v4941_v50  ;;  %v5264_v63 = vsel %vm5263_vm9, %v5262_v36, 0  ;;  %v14073_v21 = vand.u32 2147483647, %v12108_v34 }
 0x738   :  { %v6197_v19 = vsel %vm4933_vm12, nan, %v6196_v26  ;;  %v4943_v1 = vsel %vm4933_vm12, nan, %v4942_v45  ;;  %v5266_v37 = vand.u32 31, %v5264_v63  ;;  %vm12640_vm11 = vcmp.le.f32.partialorder %v14070_v20, 0.7853982 }
 0x739   :  { %6708 = vmatmul.f32.gmra.mxu3 %v6197_v19  ;;  %6749 = vmatmul.f32.gmra.mxu1 %v4943_v1  ;;  %vm12646_vm8 = vcmp.le.f32.partialorder %v14073_v21, 0.7853982  ;;  %vm5100_vm2 = vcmp.lt.s32.totalorder %v12108_v34, 0  ;;  %v12654_v12 = vsel %vm12640_vm11, %v11940_v43, %v5067_v41  ;;  %v5068_v54 = vsub.s32 4, %v12320_v22 }
 0x73a   :  { %v5221_v32 = vsel %vm5100_vm2, %v5220_v23, %v5219_v51  ;;  %v5267_v42 = vsub.s32 32, %v5266_v37  ;;  %v5260_v47 = vor.u32 8388608, %v5259_v2  ;;  %v12659_v4 = vshrl.u32 %v5264_v63, 5 }
 0x73b   :  { %v5269_v59 = vshll.u32 %v14053_v17, %v5266_v37  ;;  %v5272_v53 = vshll.u32 %v14054_v27, %v5266_v37  ;;  %v5275_v14 = vshll.u32 %v14055_v61, %v5266_v37  ;;  %v5278_v44 = vshll.u32 %v14056_v7, %v5266_v37 }
 0x73c   :  { %v5270_v30 = vshrl.u32 %v14054_v27, %v5267_v42  ;;  %v5273_v15 = vshrl.u32 %v14055_v61, %v5267_v42  ;;  %v5276_v25 = vshrl.u32 %v14056_v7, %v5267_v42  ;;  %v5279_v8 = vshrl.u32 %v14057_v6, %v5267_v42 }
 0x73d   :  { %v5281_v52 = vshll.u32 %v14057_v6, %v5266_v37  ;;  %v14076_v3 = vmov 1326507024   ;;  %v5069_v27 = vsel %vm4946_vm7, %v5068_v54, %v12320_v22  ;;  %vm5284_vm6 = vcmp.lt.s32.totalorder %v12659_v4, 1 }
 0x73e   :  { %v5282_v48 = vshrl.u32 %v14076_v3, %v5267_v42  ;;  %v5271_v58 = vor.u32 %v5270_v30, %v5269_v59  ;;  %v12671_v56 = vor.u32 %v5273_v15, %v5272_v53  ;;  %v5277_v10 = vor.u32 %v5276_v25, %v5275_v14 }
 0x73f   :  { %v5280_v13 = vor.u32 %v5279_v8, %v5278_v44  ;;  %v12677_v24 = vshll.u32 %v5260_v47, 8  ;;  %v12682_v7 = vsel %vm12646_vm8, %v12108_v34, %v5221_v32  ;;  %vm5287_vm3 = vcmp.lt.s32.totalorder %v12659_v4, 4 }
 0x740   :  { %v5283_v61 = vor.u32 %v5282_v48, %v5281_v52  ;;  %v5292_v6 = vsel %vm5284_vm6, %v5271_v58, %v12671_v56  ;;  %v5296_v22 = vsel %vm5284_vm6, %v12671_v56, %v5277_v10  ;;  %vm5286_vm4 = vcmp.lt.s32.totalorder %v12659_v4, 3 }
 0x741   :  { %v5293_v62 = vsel %vm5287_vm3, %v5280_v13, 920167782  ;;  %v5222_v5 = vsub.s32 4, %v12528_v31  ;;  %vm5285_vm7 = vcmp.lt.s32.totalorder %v12659_v4, 2  ;;  %v5071_v39 = vsel %vm12640_vm11, 0, %v5069_v27 }
 0x742   :  { %v5297_v38 = vsel %vm5287_vm3, %v5283_v61, 1326507024  ;;  %v5294_v16 = vsel %vm5286_vm4, %v5277_v10, %v5293_v62  ;;  %v5301_v0 = vand.u32 65535, %v12677_v24  ;;  %v5302_v41 = vshrl.u32 %v12677_v24, 16 }
 0x743   :  { %v5298_v18 = vsel %vm5286_vm4, %v5280_v13, %v5297_v38  ;;  %v5295_v55 = vsel %vm5285_vm7, %v5292_v6, %v5294_v16  ;;  %v5072_v28 = vmul.f32 %v12654_v12, %v12654_v12  ;;  %v12714_v46 = vmul.f32 %v12682_v7, %v12682_v7 }
 0x744   :  { %v5299_v49 = vsel %vm5285_vm7, %v5296_v22, %v5298_v18  ;;  %v5325_v29 = vand.u32 65535, %v5295_v55  ;;  %v5326_v36 = vshrl.u32 %v5295_v55, 16  ;;  %v5268_v57 = vshrl.u32 %v14053_v17, %v5267_v42 }
 0x745   :  { %v5303_v51 = vand.u32 65535, %v5299_v49  ;;  %v5304_v33 = vshrl.u32 %v5299_v49, 16  ;;  %v6342_v26 = vadd.s32 3, %v5071_v39  ;;  %v12717_v45 = vand.u32 3, %v5071_v39 }
 0x746   :  { %v5288_v19 = vsel %vm5284_vm6, %v5268_v57, %v5271_v58  ;;  %v5328_v1 = vmul.u32 %v5326_v36, %v5301_v0  ;;  %v5329_v2 = vmul.u32 %v5325_v29, %v5302_v41  ;;  %v5223_v63 = vsel %vm5100_vm2, %v5222_v5, %v12528_v31 }
 0x747   :  { %v5306_v50 = vmul.u32 %v5304_v33, %v5301_v0  ;;  %v5307_v23 = vmul.u32 %v5303_v51, %v5302_v41  ;;  %v5289_v37 = vsel %vm5287_vm3, %v5277_v10, 2102212464  ;;  %v5305_v20 = vmul.u32 %v5303_v51, %v5301_v0 }
 0x748   :  { %v5308_v35 = vmul.u32 %v5304_v33, %v5302_v41  ;;  %v5327_v32 = vmul.u32 %v5325_v29, %v5301_v0  ;;  %v5330_v42 = vmul.u32 %v5326_v36, %v5302_v41  ;;  %v5331_v54 = vshll.u32 %v5328_v1, 16 }
 0x749   :  { %v5309_v17 = vshll.u32 %v5306_v50, 16  ;;  %v5311_v21 = vshll.u32 %v5307_v23, 16  ;;  %v5073_v59 = vmul.f32 -0.001358992, %v5072_v28  ;;  %v5080_v53 = vmul.f32 -0.00019511016, %v5072_v28 }
 0x74a   :  { %v5333_v15 = vshll.u32 %v5329_v2, 16  ;;  %vm5335_vm0 = vc.u32 %v5327_v32, %v5331_v54  ;;  %v5337_v14 = vadd.s32 %v5331_v54, %v5327_v32  ;;  %v5310_v8 = vshrl.u32 %v5306_v50, 16 }
 0x74b   :  { %vm5313_vm12 = vc.u32 %v5305_v20, %v5309_v17  ;;  %v5315_v47 = vadd.s32 %v5309_v17, %v5305_v20  ;;  %v5336_v25 = vsel %vm5335_vm0, 1, %v13909_v9  ;;  %v5074_v44 = vadd.f32 0.041655596, %v5073_v59 }
 0x74c   :  { %v5314_v30 = vsel %vm5313_vm12, 1, %v13909_v9  ;;  %v5338_v3 = vadd.s32 %v5336_v25, %v5330_v42  ;;  %vm5339_vm13 = vc.u32 %v5337_v14, %v5333_v15  ;;  %v5081_v27 = vadd.f32 0.008332121, %v5080_v53 }
 0x74d   :  { %v5316_v31 = vadd.s32 %v5314_v30, %v5308_v35  ;;  %vm5317_vm10 = vc.u32 %v5315_v47, %v5311_v21  ;;  %v5340_v58 = vsel %vm5339_vm13, 1, %v13909_v9  ;;  %v5075_v10 = vmul.f32 %v5074_v44, %v5072_v28 }
 0x74e   :  { %v5318_v52 = vsel %vm5317_vm10, 1, %v13909_v9  ;;  %v5290_v13 = vsel %vm5286_vm4, %v12671_v56, %v5289_v37  ;;  %v5312_v61 = vshrl.u32 %v5307_v23, 16  ;;  %v5332_v6 = vshrl.u32 %v5328_v1, 16 }
 0x74f   :  { %v5320_v48 = vadd.s32 %v5318_v52, %v5316_v31  ;;  %v5342_v22 = vadd.s32 %v5340_v58, %v5338_v3  ;;  %v5076_v38 = vadd.f32 -0.4999988, %v5075_v10  ;;  %v5082_v5 = vmul.f32 %v5081_v27, %v5072_v28 }
 0x750   :  { %v5227_v16 = vmul.f32 -0.001358992, %v12714_v46  ;;  %v5334_v18 = vshrl.u32 %v5329_v2, 16  ;;  %v12734_v39 = vadd.s32 %v5337_v14, %v5333_v15  ;;  %v5234_v49 = vmul.f32 -0.00019511016, %v12714_v46 }
 0x751   :  { %v5321_v62 = vadd.s32 %v5320_v48, %v5310_v8  ;;  %v5343_v55 = vadd.s32 %v5342_v22, %v5332_v6  ;;  %v5077_v41 = vmul.f32 %v5076_v38, %v5072_v28  ;;  %v5083_v51 = vadd.f32 -0.16666654, %v5082_v5 }
 0x752   :  { %v5228_v33 = vadd.f32 0.041655596, %v5227_v16  ;;  %v5291_v56 = vsel %vm5285_vm7, %v5288_v19, %v5290_v13  ;;  %v5225_v36 = vsel %vm12646_vm8, 0, %v5223_v63  ;;  %v5235_v57 = vadd.f32 0.008332121, %v5234_v49 }
 0x753   :  { %v12737_v0 = vadd.s32 %v5321_v62, %v5312_v61  ;;  %v5344_v29 = vadd.s32 %v5343_v55, %v5334_v18  ;;  %v5078_v50 = vadd.f32 1.0, %v5077_v41  ;;  %v5084_v23 = vmul.f32 %v5083_v51, %v5072_v28 }
 0x754   :  { %v6343_v1 = vand.u32 3, %v6342_v26  ;;  %vm5087_vm1 = vweird.f32 %v11940_v43  ;;  %v5229_v37 = vmul.f32 %v5228_v33, %v12714_v46  ;;  %v5236_v20 = vmul.f32 %v5235_v57, %v12714_v46 }
 0x755   :  { %vm5347_vm5 = vc.u32 %v12737_v0, %v12734_v39  ;;  %v5348_v2 = vadd.s32 1, %v5344_v29  ;;  %v5345_v4 = vmul.u32 %v12677_v24, %v5291_v56  ;;  %v5085_v19 = vadd.f32 1.0, %v5084_v23 }
 0x756   :  { %vm5089_vm15 = vcmp.lt.s32.totalorder %v12717_v45, 2  ;;  %v6497_v11 = vadd.s32 3, %v5225_v36  ;;  %v5094_v35 = vxor.u32 2147483648, %v5078_v50  ;;  %v5230_v17 = vadd.f32 -0.4999988, %v5229_v37 }
 0x757   :  { %v5349_v63 = vsel %vm5347_vm5, %v5348_v2, %v5344_v29  ;;  %v5237_v21 = vadd.f32 -0.16666654, %v5236_v20  ;;  %v5086_v28 = vmul.f32 %v5085_v19, %v12654_v12  ;;  %vm6344_vm9 = vcmp.lt.s32.totalorder %v6343_v1, 2 }
 0x758   :  { %v5350_v32 = vadd.s32 %v5349_v63, %v5345_v4  ;;  %vm6345_vm11 = vcmp.eq.s32.totalorder %v6343_v1, 0  ;;  %vm6348_vm8 = vcmp.eq.s32.totalorder %v6343_v1, 2  ;;  %vm5090_vm2 = vcmp.eq.s32.totalorder %v12717_v45, 0 }
 0x759   :  { %v5231_v26 = vmul.f32 %v5230_v17, %v12714_v46  ;;  %v5238_v24 = vmul.f32 %v5237_v21, %v12714_v46  ;;  %v5091_v54 = vxor.u32 2147483648, %v5086_v28  ;;  %vm5093_vm6 = vcmp.eq.s32.totalorder %v12717_v45, 2 }
 0x75a   :  { %v5351_v42 = vadd.s32 536870912, %v5350_v32  ;;  %v5242_v47 = vand.u32 3, %v5225_v36  ;;  %v6350_v59 = vsel %vm6348_vm8, %v5094_v35, %v5086_v28  ;;  %v6498_v15 = vand.u32 3, %v6497_v11 }
 0x75b   :  { %v5232_v53 = vadd.f32 1.0, %v5231_v26  ;;  %v5239_v30 = vadd.f32 1.0, %v5238_v24  ;;  %v6347_v12 = vsel %vm6345_vm11, %v5078_v50, %v5091_v54  ;;  %v5092_v31 = vsel %vm5090_vm2, %v5078_v50, %v5091_v54 }
 0x75c   :  { %v5352_v14 = vshrl.u32 %v5351_v42, 30  ;;  %v5095_v25 = vsel %vm5093_vm6, %v5094_v35, %v5086_v28  ;;  %v6351_v44 = vsel %vm6344_vm9, %v6347_v12, %v6350_v59  ;;  %vm6499_vm3 = vcmp.lt.s32.totalorder %v6498_v15, 2 }
 0x75d   :  { %v5096_v8 = vsel %vm5089_vm15, %v5092_v31, %v5095_v25  ;;  %v5240_v46 = vmul.f32 %v5239_v30, %v12682_v7  ;;  %v5248_v52 = vxor.u32 2147483648, %v5232_v53  ;;  %v6352_v48 = vsel %vm5087_vm1, nan, %v6351_v44 }
 0x75e   :  { %v5353_v3 = vshll.u32 %v5352_v14, 30  ;;  %v5097_v58 = vsel %vm5087_vm1, nan, %v5096_v8  ;;  %6711 = vmatmul.f32.gmra.mxu3 %v6352_v48  ;;  %vm6500_vm4 = vcmp.eq.s32.totalorder %v6498_v15, 0  ;;  %vm5243_vm7 = vcmp.lt.s32.totalorder %v5242_v47, 2 }
 0x75f   :  { %6752 = vmatmul.f32.gmra.mxu1 %v5097_v58  ;;  %v5245_v10 = vxor.u32 2147483648, %v5240_v46  ;;  %vm6503_vm12 = vcmp.eq.s32.totalorder %v6498_v15, 2  ;;  %vm5244_vm0 = vcmp.eq.s32.totalorder %v5242_v47, 0  ;;  %vm5247_vm10 = vcmp.eq.s32.totalorder %v5242_v47, 2 }
 0x760   :  { %v5354_v27 = vsub.s32 %v5350_v32, %v5353_v3  ;;  %v6505_v7 = vsel %vm6503_vm12, %v5248_v52, %v5240_v46  ;;  %v5249_v61 = vsel %vm5247_vm10, %v5248_v52, %v5240_v46  ;;  %vm5241_vm5 = vweird.f32 %v12108_v34 }
 0x761   :  { %v6502_v45 = vsel %vm6500_vm4, %v5232_v53, %v5245_v10  ;;  %v5246_v13 = vsel %vm5244_vm0, %v5232_v53, %v5245_v10  ;;  %v5346_v49 = vadd.s32 %v12734_v39, %v12737_v0  ;;  %vm5254_vm15 = vcmp.lt.s32.totalorder %v12617_v40, 0 }
 0x762   :  { %vm5355_vm13 = vcmp.lt.s32.totalorder %v5354_v27, 0  ;;  %v5356_v6 = vsub.s32 0, %v5354_v27  ;;  %v6506_v22 = vsel %vm6499_vm3, %v6502_v45, %v6505_v7  ;;  %v5250_v62 = vsel %vm5243_vm7, %v5246_v13, %v5249_v61  ;;  %v6781_v45 = vpop.f32.mrf.mxu2 }
 0x763   :  { %v6507_v38 = vsel %vm5241_vm5, nan, %v6506_v22  ;;  %v5251_v5 = vsel %vm5241_vm5, nan, %v5250_v62  ;;  %vm5253_vm9 = vcmp.le.f32.partialorder %v5252_v60, 0.7853982  ;;  %v5376_v0 = vsub.s32 4, %v5352_v14 }
 0x764   :  { %v5357_v43 = vsel %vm5355_vm13, %v5356_v6, %v5354_v27  ;;  %vm5395_vm7 = vweird.f32 %v12617_v40 }
 0x765   :  { %v5358_v16 = vclz %v5357_v43  ;;  %v5377_v11 = vsel %vm5254_vm15, %v5376_v0, %v5352_v14 }
 0x766   :  { %6714 = vmatmul.f32.gmra.mxu3 %v6507_v38  ;;  %v5379_v17 = vsel %vm5253_vm9, 0, %v5377_v11 }
 0x767   :  { %v8650_v18 = vadd.s32 4294967294, %v5358_v16  ;;  %6755 = vmatmul.f32.gmra.mxu1 %v5251_v5  ;;  %v6652_v24 = vadd.s32 3, %v5379_v17  ;;  %v5396_v59 = vand.u32 3, %v5379_v17 }
 0x769   :  { %vm8651_vm1 = vcmp.lt.s32.totalorder %v8650_v18, 0  ;;  %v6653_v53 = vand.u32 3, %v6652_v24  ;;  %vm5397_vm11 = vcmp.lt.s32.totalorder %v5396_v59, 2  ;;  %vm5398_vm8 = vcmp.eq.s32.totalorder %v5396_v59, 0 }
 0x76a   :  { %v5361_v55 = vsel %vm8651_vm1, 0, %v8650_v18  ;;  %vm5401_vm4 = vcmp.eq.s32.totalorder %v5396_v59, 2 }
 0x76b   :  { %v5362_v41 = vsub.s32 32, %v5361_v55  ;;  %v5366_v51 = vsub.s32 4294967266, %v5361_v55  ;;  %v5363_v33 = vshll.u32 %v5354_v27, %v5361_v55  ;;  %vm6654_vm2 = vcmp.lt.s32.totalorder %v6653_v53, 2  ;;  %v8808_v27 = vld [vmem:[%s13700_s6 + $0x1] ss:$0 sm:$0xff] }
 0x76c   :  { %vm6655_vm6 = vcmp.eq.s32.totalorder %v6653_v53, 0  ;;  %vm6658_vm3 = vcmp.eq.s32.totalorder %v6653_v53, 2 }
 0x76d   :  { %v5364_v56 = vshrl.u32 %v5346_v49, %v5362_v41  ;;  %v5367_v29 = vadd.s32 127, %v5366_v51 }
 0x76f   :  { %v5365_v36 = vor.u32 %v5364_v56, %v5363_v33  ;;  %v5368_v57 = vshll.u32 %v5367_v29, 23 }
 0x771   :  { %v5369_v34 = vor.u32 4788187, %v5368_v57  ;;  %v5372_v23 = vcvt.s32.f32 %v5365_v36 }
 0x773   :  { %v5370_v50 = vand.u32 2147483647, %v5369_v34 }
 0x775   :  { %v5373_v1 = vmul.f32 %v5372_v23, %v5370_v50 }
 0x777   :  { %v5374_v2 = vxor.u32 2147483648, %v5373_v1 }
 0x779   :  { %v5375_v37 = vsel %vm5254_vm15, %v5374_v2, %v5373_v1 }
 0x77a   :  { %v5378_v39 = vsel %vm5253_vm9, %v12617_v40, %v5375_v37  ;;  %v6784_v40 = vpop.f32.mrf.mxu2 }
 0x77b   :  { %v5380_v20 = vmul.f32 %v5378_v39, %v5378_v39 }
 0x77d   :  { %v5381_v4 = vmul.f32 -0.001358992, %v5380_v20  ;;  %v5388_v19 = vmul.f32 -0.00019511016, %v5380_v20 }
 0x77f   :  { %v5382_v63 = vadd.f32 0.041655596, %v5381_v4  ;;  %v5389_v35 = vadd.f32 0.008332121, %v5388_v19 }
 0x781   :  { %v5383_v21 = vmul.f32 %v5382_v63, %v5380_v20  ;;  %v5390_v32 = vmul.f32 %v5389_v35, %v5380_v20 }
 0x782   :  { %v6787_v5 = vpop.f32.mrf.mxu2 }
 0x783   :  { %v5384_v28 = vadd.f32 -0.4999988, %v5383_v21  ;;  %v5391_v26 = vadd.f32 -0.16666654, %v5390_v32 }
 0x785   :  { %v5385_v42 = vmul.f32 %v5384_v28, %v5380_v20  ;;  %v5392_v54 = vmul.f32 %v5391_v26, %v5380_v20 }
 0x787   :  { %v5386_v47 = vadd.f32 1.0, %v5385_v42  ;;  %v5393_v60 = vadd.f32 1.0, %v5392_v54 }
 0x789   :  { %v5394_v30 = vmul.f32 %v5393_v60, %v5378_v39  ;;  %v5402_v15 = vxor.u32 2147483648, %v5386_v47 }
 0x78a   :  { %v6790_v33 = vpop.f32.mrf.mxu2 }
 0x78b   :  { %v5399_v12 = vxor.u32 2147483648, %v5394_v30  ;;  %v6660_v31 = vsel %vm6658_vm3, %v5402_v15, %v5394_v30  ;;  %v5403_v44 = vsel %vm5401_vm4, %v5402_v15, %v5394_v30 }
 0x78c   :  { %v6738_v48 = vpop.f32.mrf.mxu1 }
 0x78d   :  { %v6657_v14 = vsel %vm6655_vm6, %v5386_v47, %v5399_v12  ;;  %v5400_v25 = vsel %vm5398_vm8, %v5386_v47, %v5399_v12 }
 0x78e   :  { %v6661_v8 = vsel %vm6654_vm2, %v6657_v14, %v6660_v31  ;;  %v5404_v46 = vsel %vm5397_vm11, %v5400_v25, %v5403_v44 }
 0x78f   :  { %v6662_v52 = vsel %vm5395_vm7, nan, %v6661_v8  ;;  %v5405_v3 = vsel %vm5395_vm7, nan, %v5404_v46 }
 0x790   :  { %6717 = vmatmul.f32.gmra.mxu3 %v6662_v52  ;;  %6758 = vmatmul.f32.gmra.mxu1 %v5405_v3 }
 0x792   :  { %v6697_v58 = vpop.f32.mrf.mxu3  ;;  %v6793_v23 = vpop.f32.mrf.mxu2 }
 0x793   :  { %v6739_v10 = vadd.f32 %v6738_v48, %v6697_v58 }
 0x795   :  { %v6805_v7 = vadd.f32 %v6781_v45, %v6739_v10 }
 0x797   :  { %v6818_v13 = vadd.f32 %v8808_v27, %v6805_v7 }
 0x799   :  { %8718 = vmatmul.msk.f32.vlgmr.msra.gmra.mxu0 %vm2790_vm14, %v6818_v13 }
 0x79a   :  { %v6796_v39 = vpop.f32.mrf.mxu2 }
 0x79d   :  { %v6741_v61 = vpop.f32.mrf.mxu1 }
 0x7a2   :  { %v6700_v6 = vpop.f32.mrf.mxu3  ;;  %v6799_v17 = vpop.f32.mrf.mxu2 }
 0x7a3   :  { %v6742_v22 = vadd.f32 %v6741_v61, %v6700_v6 }
 0x7a5   :  { %v6806_v62 = vadd.f32 %v6784_v40, %v6742_v22  ;;  %v6744_v38 = vpop.f32.mrf.mxu1 }
 0x7a7   :  { %v6819_v43 = vadd.f32 %v8808_v27, %v6806_v62 }
 0x7a9   :  { %8719 = vmatmul.msk.f32.gmra.mxu0 %vm2790_vm14, %v6819_v43 }
 0x7aa   :  { %v6703_v16 = vpop.f32.mrf.mxu3  ;;  %v6802_v42 = vpop.f32.mrf.mxu2 }
 0x7ab   :  { %v6745_v18 = vadd.f32 %v6744_v38, %v6703_v16 }
 0x7ad   :  { %v6807_v55 = vadd.f32 %v6787_v5, %v6745_v18 }
 0x7ae   :  { %v6747_v41 = vpop.f32.mrf.mxu1 }
 0x7af   :  { %v6820_v49 = vadd.f32 %v8808_v27, %v6807_v55 }
 0x7b1   :  { %8720 = vmatmul.msk.f32.gmra.mxu0 %vm2790_vm14, %v6820_v49 }
 0x7b4   :  { %v6706_v51 = vpop.f32.mrf.mxu3 }
 0x7b5   :  { %v6748_v56 = vadd.f32 %v6747_v41, %v6706_v51 }
 0x7b6   :  { %v6750_v57 = vpop.f32.mrf.mxu1 }
 0x7b7   :  { %v6808_v29 = vadd.f32 %v6790_v33, %v6748_v56 }
 0x7b9   :  { %v6821_v36 = vadd.f32 %v8808_v27, %v6808_v29 }
 0x7bb   :  { %8721 = vmatmul.msk.f32.gmra.mxu0 %vm2790_vm14, %v6821_v36 }
 0x7bc   :  { %v6709_v34 = vpop.f32.mrf.mxu3 }
 0x7bd   :  { %v6751_v50 = vadd.f32 %v6750_v57, %v6709_v34 }
 0x7bf   :  { %v6809_v1 = vadd.f32 %v6793_v23, %v6751_v50 }
 0x7c1   :  { %v6822_v2 = vadd.f32 %v8808_v27, %v6809_v1 }
 0x7c3   :  { %8722 = vmatmul.msk.f32.gmra.mxu0 %vm2790_vm14, %v6822_v2 }
 0x7dc   :  { %v6753_v37 = vpop.f32.mrf.mxu1 }
 0x7e1   :  { %v6712_v0 = vpop.f32.mrf.mxu3 }
 0x7e2   :  { %v6754_v20 = vadd.f32 %v6753_v37, %v6712_v0 }
 0x7e4   :  { %v6810_v4 = vadd.f32 %v6796_v39, %v6754_v20  ;;  %v6756_v11 = vpop.f32.mrf.mxu1  ;;  %v12827_v20 = vld [vmem:[%s13703_s8 + $0x1] ss:$0 sm:$0xff] }
 0x7e6   :  { %v6823_v19 = vadd.f32 %v8808_v27, %v6810_v4 }
 0x7e8   :  { %8723 = vmatmul.msk.f32.gmra.mxu0 %vm2790_vm14, %v6823_v19 }
 0x7e9   :  { %v6715_v63 = vpop.f32.mrf.mxu3 }
 0x7ea   :  { %v6757_v35 = vadd.f32 %v6756_v11, %v6715_v63 }
 0x7ec   :  { %v6811_v21 = vadd.f32 %v6799_v17, %v6757_v35 }
 0x7ee   :  { %v6824_v32 = vadd.f32 %v8808_v27, %v6811_v21 }
 0x7f0   :  { %8724 = vmatmul.msk.f32.gmra.mxu0 %vm2790_vm14, %v6824_v32 }
 0x80d   :  { %v6759_v28 = vpop.f32.mrf.mxu1 }
 0x813   :  { %v6718_v26 = vpop.f32.mrf.mxu3 }
 0x814   :  { %v6760_v24 = vadd.f32 %v6759_v28, %v6718_v26 }
 0x816   :  { %v6867_v54 = vpop.f32.mrf.mxu0  ;;  %v6812_v47 = vadd.f32 %v6802_v42, %v6760_v24 }
 0x817   :  { %v6891_v60 = vsub.f32 %v6818_v13, %v6867_v54 }
 0x818   :  { %v6825_v59 = vadd.f32 %v8808_v27, %v6812_v47 }
 0x819   :  { %v6899_v53 = vmul.f32 %v6891_v60, %v6891_v60 }
 0x81a   :  { %8725 = vmatmul.msk.f32.gmra.mxu0 %vm2790_vm14, %v6825_v59 }
 0x81b   :  { %8726 = vmatmul.msk.f32.vlgmr.msrb.gmra.mxu3 %vm2790_vm14, %v6899_v53 }
 0x826   :  { %v6870_v30 = vpop.f32.mrf.mxu0 }
 0x827   :  { %v12783_v15 = vsub.f32 %v6819_v43, %v6870_v30 }
 0x829   :  { %v6900_v12 = vmul.f32 %v12783_v15, %v12783_v15 }
 0x82b   :  { %8727 = vmatmul.msk.f32.gmra.mxu3 %vm2790_vm14, %v6900_v12 }
 0x82e   :  { %v6873_v14 = vpop.f32.mrf.mxu0 }
 0x82f   :  { %v12788_v31 = vsub.f32 %v6820_v49, %v6873_v14 }
 0x831   :  { %v6901_v25 = vmul.f32 %v12788_v31, %v12788_v31 }
 0x833   :  { %8728 = vmatmul.msk.f32.gmra.mxu3 %vm2790_vm14, %v6901_v25 }
 0x838   :  { %v6876_v44 = vpop.f32.mrf.mxu0 }
 0x839   :  { %v12793_v8 = vsub.f32 %v6821_v36, %v6876_v44 }
 0x83b   :  { %v6902_v46 = vmul.f32 %v12793_v8, %v12793_v8 }
 0x83d   :  { %8729 = vmatmul.msk.f32.gmra.mxu3 %vm2790_vm14, %v6902_v46 }
 0x840   :  { %v6879_v52 = vpop.f32.mrf.mxu0 }
 0x841   :  { %v12798_v3 = vsub.f32 %v6822_v2, %v6879_v52  ;;  %v12821_v2 = vld [vmem:[%s13702_s7 + $0x1] ss:$0 sm:$0xff] }
 0x843   :  { %v6903_v48 = vmul.f32 %v12798_v3, %v12798_v3 }
 0x845   :  { %8730 = vmatmul.msk.f32.gmra.mxu3 %vm2790_vm14, %v6903_v48 }
 0x865   :  { %v6882_v58 = vpop.f32.mrf.mxu0 }
 0x866   :  { %v12803_v10 = vsub.f32 %v6823_v19, %v6882_v58 }
 0x868   :  { %v6904_v27 = vmul.f32 %v12803_v10, %v12803_v10 }
 0x86a   :  { %8731 = vmatmul.msk.f32.gmra.mxu3 %vm2790_vm14, %v6904_v27 }
 0x86d   :  { %v6885_v45 = vpop.f32.mrf.mxu0 }
 0x86e   :  { %v12808_v7 = vsub.f32 %v6824_v32, %v6885_v45 }
 0x870   :  { %v6905_v13 = vmul.f32 %v12808_v7, %v12808_v7 }
 0x872   :  { %8732 = vmatmul.msk.f32.gmra.mxu3 %vm2790_vm14, %v6905_v13 }
 0x897   :  { %v6888_v61 = vpop.f32.mrf.mxu0 }
 0x898   :  { %v12813_v40 = vsub.f32 %v6825_v59, %v6888_v61 }
 0x89a   :  { %v6906_v6 = vmul.f32 %v12813_v40, %v12813_v40 }
 0x89c   :  { %8733 = vmatmul.msk.f32.gmra.mxu3 %vm2790_vm14, %v6906_v6 }
 0x89e   :  { %v6948_v22 = vpop.f32.mrf.mxu3 }
 0x89f   :  { %v6949_v62 = vadd.f32 1e-05, %v6948_v22 }
 0x8a1   :  { %8883 = vrsqrt.f32 %v6949_v62  ;;  %vm6978_vm0 = vweird.f32 %v6949_v62 }
 0x8a7   :  { %v8884_v38 = vpop.eup %8883 }
 0x8a8   :  { %v6973_v5 = vmul.f32 %v8884_v38, %v6949_v62  ;;  %vm6979_vm12 = vweird.f32 %v8884_v38 }
 0x8a9   :  { %vm6980_vm10 = vmor %vm6978_vm0, %vm6979_vm12 }
 0x8aa   :  { %v6974_v18 = vmul.f32 %v8884_v38, %v6973_v5 }
 0x8ac   :  { %v6975_v49 = vmul.f32 0.5, %v6974_v18 }
 0x8ae   :  { %v6951_v43 = vpop.f32.mrf.mxu3  ;;  %v6976_v41 = vsub.f32 1.5, %v6975_v49 }
 0x8af   :  { %v6952_v16 = vadd.f32 1e-05, %v6951_v43 }
 0x8b0   :  { %v6977_v56 = vmul.f32 %v8884_v38, %v6976_v41 }
 0x8b1   :  { %8885 = vrsqrt.f32 %v6952_v16  ;;  %vm6988_vm5 = vweird.f32 %v6952_v16 }
 0x8b2   :  { %v6981_v34 = vsel %vm6980_vm10, %v8884_v38, %v6977_v56 }
 0x8b3   :  { %v7052_v1 = vmul.f32 %v6981_v34, %v6891_v60 }
 0x8b5   :  { %v7065_v0 = vmul.f32 %v12821_v2, %v7052_v1 }
 0x8b6   :  { %v6954_v55 = vpop.f32.mrf.mxu3 }
 0x8b7   :  { %v6955_v51 = vadd.f32 1e-05, %v6954_v55  ;;  %v8886_v33 = vpop.eup %8885  ;;  %v12830_v35 = vadd.f32 %v12827_v20, %v7065_v0 }
 0x8b8   :  { %v6983_v29 = vmul.f32 %v8886_v33, %v6952_v16  ;;  %vm6989_vm13 = vweird.f32 %v8886_v33 }
 0x8b9   :  { %8887 = vrsqrt.f32 %v6955_v51  ;;  %v12835_v26 = vmul.f32 0.70710677, %v12830_v35  ;;  %vm6990_vm1 = vmor %vm6988_vm5, %vm6989_vm13  ;;  %vm6998_vm9 = vweird.f32 %v6955_v51 }
 0x8ba   :  { %v6984_v50 = vmul.f32 %v8886_v33, %v6983_v29 }
 0x8bb   :  { %v7102_v47 = vmul.f32 %v12835_v26, %v12835_v26 }
 0x8bc   :  { %v6985_v37 = vmul.f32 0.5, %v6984_v50 }
 0x8bd   :  { %v12843_v12 = vmin.f32 %v7102_v47, 16.0 }
 0x8be   :  { %v6986_v4 = vsub.f32 1.5, %v6985_v37 }
 0x8bf   :  { %v8888_v23 = vpop.eup %8887  ;;  %v7104_v52 = vmul.f32 2.1237322e-06, %v12843_v12 }
 0x8c0   :  { %v6957_v36 = vpop.f32.mrf.mxu3  ;;  %v6993_v39 = vmul.f32 %v8888_v23, %v6955_v51  ;;  %v6987_v21 = vmul.f32 %v8886_v33, %v6986_v4  ;;  %vm6999_vm15 = vweird.f32 %v8888_v23 }
 0x8c1   :  { %v6958_v57 = vadd.f32 1e-05, %v6957_v36  ;;  %vm7000_vm11 = vmor %vm6998_vm9, %vm6999_vm15  ;;  %v7105_v13 = vadd.f32 0.00028619796, %v7104_v52  ;;  %v8746_v52 = vld [vmem:[%s13704_s10 + $0x50] sm:$0xff] }
 0x8c2   :  { %v6994_v63 = vmul.f32 %v8888_v23, %v6993_v39  ;;  %v6991_v24 = vsel %vm6990_vm1, %v8886_v33, %v6987_v21  ;;  %v8749_v39 = vld [vmem:[%s13704_s10 + $0x68] sm:$0xff] }
 0x8c3   :  { %8889 = vrsqrt.f32 %v6958_v57  ;;  %v7053_v60 = vmul.f32 %v6991_v24, %v12783_v15  ;;  %v7115_v15 = vmul.f32 3.8918573e-05, %v12843_v12  ;;  %vm7008_vm2 = vweird.f32 %v6958_v57 }
 0x8c4   :  { %v6995_v28 = vmul.f32 0.5, %v6994_v63  ;;  %v7106_v22 = vmul.f32 %v7105_v13, %v12843_v12 }
 0x8c5   :  { %v7066_v14 = vmul.f32 %v12821_v2, %v7053_v60  ;;  %v7116_v61 = vadd.f32 0.001143296, %v7115_v15 }
 0x8c6   :  { %v6996_v54 = vsub.f32 1.5, %v6995_v28  ;;  %v7107_v16 = vadd.f32 0.0036580483, %v7106_v22 }
 0x8c7   :  { %v12851_v48 = vadd.f32 %v12827_v20, %v7066_v14  ;;  %v7117_v62 = vmul.f32 %v7116_v61, %v12843_v12 }
 0x8c8   :  { %v6960_v19 = vpop.f32.mrf.mxu3  ;;  %v6997_v30 = vmul.f32 %v8888_v23, %v6996_v54  ;;  %v7108_v41 = vmul.f32 %v7107_v16, %v12843_v12 }
 0x8c9   :  { %v8890_v11 = vpop.eup %8889  ;;  %v12832_v17 = vadd.f32 1e-05, %v6960_v19  ;;  %v12856_v6 = vmul.f32 0.70710677, %v12851_v48  ;;  %v7118_v18 = vadd.f32 0.014752088, %v7117_v62 }
 0x8ca   :  { %v7003_v32 = vmul.f32 %v8890_v11, %v6958_v57  ;;  %v7001_v46 = vsel %vm7000_vm11, %v8888_v23, %v6997_v30  ;;  %vm7009_vm8 = vweird.f32 %v8890_v11  ;;  %v8751_v57 = vld [vmem:[%s13704_s10 + $0x78] sm:$0xff]  ;;  %v7109_v34 = vadd.f32 0.05243302, %v7108_v41 }
 0x8cb   :  { %8891 = vrsqrt.f32 %v12832_v17  ;;  %v7054_v58 = vmul.f32 %v7001_v46, %v12788_v31  ;;  %vm7010_vm6 = vmor %vm7008_vm2, %vm7009_vm8  ;;  %v7142_v31 = vmul.f32 %v12856_v6, %v12856_v6  ;;  %v7119_v51 = vmul.f32 %v7118_v18, %v12843_v12  ;;  %7484 = vmatpush.msrb.mxu1 %v8751_v57 }
 0x8cc   :  { %v7004_v42 = vmul.f32 %v8890_v11, %v7003_v32  ;;  %v7110_v0 = vmul.f32 %v7109_v34, %v12843_v12  ;;  %v8748_v32 = vld [vmem:[%s13704_s10 + $0x60] sm:$0xff]  ;;  %vm7018_vm4 = vweird.f32 %v12832_v17 }
 0x8cd   :  { %v7067_v43 = vmul.f32 %v12821_v2, %v7054_v58  ;;  %v12863_v55 = vmin.f32 %v7142_v31, 16.0  ;;  %v7120_v23 = vadd.f32 0.112945676, %v7119_v51 }
 0x8ce   :  { %v7005_v59 = vmul.f32 0.5, %v7004_v42  ;;  %v7111_v28 = vadd.f32 0.18741608, %v7110_v0 }
 0x8cf   :  { %v7144_v56 = vmul.f32 2.1237322e-06, %v12863_v55  ;;  %v7155_v29 = vmul.f32 3.8918573e-05, %v12863_v55  ;;  %v12871_v36 = vadd.f32 %v12827_v20, %v7067_v43 }
 0x8d0   :  { %v7006_v25 = vsub.f32 1.5, %v7005_v59  ;;  %v8747_v59 = vld [vmem:[%s13704_s10 + $0x58] sm:$0xff]  ;;  %v7112_v15 = vmul.f32 %v7111_v28, %v12843_v12 }
 0x8d1   :  { %v12841_v53 = vpop.eup %8891  ;;  %v7145_v4 = vadd.f32 0.00028619796, %v7144_v56  ;;  %v7156_v63 = vadd.f32 0.001143296, %v7155_v29  ;;  %v12890_v21 = vmul.f32 0.70710677, %v12871_v36 }
 0x8d2   :  { %v7013_v44 = vmul.f32 %v12841_v53, %v12832_v17  ;;  %v7007_v27 = vmul.f32 %v8890_v11, %v7006_v25  ;;  %vm7019_vm3 = vweird.f32 %v12841_v53  ;;  %v7113_v18 = vadd.f32 1.1283791, %v7112_v15 }
 0x8d3   :  { %v7146_v24 = vmul.f32 %v7145_v4, %v12863_v55  ;;  %v7157_v54 = vmul.f32 %v7156_v63, %v12863_v55  ;;  %v7182_v47 = vmul.f32 %v12890_v21, %v12890_v21  ;;  %vm12903_vm7 = vmor %vm7018_vm4, %vm7019_vm3 }
 0x8d4   :  { %v7014_v45 = vmul.f32 %v12841_v53, %v7013_v44  ;;  %v7011_v38 = vsel %vm7010_vm6, %v8890_v11, %v7007_v27  ;;  %v7121_v11 = vmul.f32 %v7120_v23, %v12843_v12  ;;  %v7114_v23 = vmul.f32 %v7113_v18, %v12835_v26 }
 0x8d5   :  { %v7055_v49 = vmul.f32 %v7011_v38, %v12793_v8  ;;  %v8750_v8 = vld [vmem:[%s13704_s10 + $0x70] sm:$0xff]  ;;  %v7147_v30 = vadd.f32 0.0036580483, %v7146_v24  ;;  %v7158_v44 = vadd.f32 0.014752088, %v7157_v54  ;;  %v12917_v46 = vmin.f32 %v7182_v47, 16.0 }
 0x8d6   :  { %v7015_v5 = vmul.f32 0.5, %v7014_v45  ;;  %7485 = vmatpush.msrb.mxu1 %v8750_v8  ;;  %v7122_v42 = vadd.f32 0.4994258, %v7121_v11 }
 0x8d7   :  { %v7068_v1 = vmul.f32 %v12821_v2, %v7055_v49  ;;  %v7148_v58 = vmul.f32 %v7147_v30, %v12863_v55  ;;  %v7159_v13 = vmul.f32 %v7158_v44, %v12863_v55  ;;  %v7184_v61 = vmul.f32 2.1237322e-06, %v12917_v46 }
 0x8d8   :  { %v7016_v33 = vsub.f32 1.5, %v7015_v5  ;;  %7486 = vmatpush.msrb.mxu1 %v8749_v39  ;;  %v7123_v25 = vmul.f32 %v7122_v42, %v12843_v12  ;;  %v8745_v12 = vld [vmem:[%s13704_s10 + $0x48] sm:$0xff]  ;;  %v7195_v38 = vmul.f32 3.8918573e-05, %v12917_v46 }
 0x8d9   :  { %v12911_v17 = vadd.f32 %v12827_v20, %v7068_v1  ;;  %v7149_v16 = vadd.f32 0.05243302, %v7148_v58  ;;  %v7160_v41 = vadd.f32 0.112945676, %v7159_v13  ;;  %v7185_v51 = vadd.f32 0.00028619796, %v7184_v61 }
 0x8da   :  { %v7017_v19 = vmul.f32 %v12841_v53, %v7016_v33  ;;  %7487 = vmatpush.msrb.mxu1 %v8748_v32  ;;  %v7196_v56 = vadd.f32 0.001143296, %v7195_v38 }
 0x8db   :  { %v12925_v27 = vmul.f32 0.70710677, %v12911_v17  ;;  %v7150_v8 = vmul.f32 %v7149_v16, %v12863_v55  ;;  %v7161_v34 = vmul.f32 %v7160_v41, %v12863_v55 }
 0x8dc   :  { %v7021_v14 = vsel %vm12903_vm7, %v12841_v53, %v7017_v19  ;;  %7488 = vmatpush.msrb.mxu1 %v8747_v59  ;;  %v12927_v53 = vadd.f32 1.0, %v7123_v25  ;;  %v7197_v1 = vmul.f32 %v7196_v56, %v12917_v46 }
 0x8dd   :  { %v7056_v62 = vmul.f32 %v7021_v14, %v12798_v3  ;;  %v7222_v5 = vmul.f32 %v12925_v27, %v12925_v27  ;;  %v8744_v3 = vld [vmem:[%s13704_s10 + $0x40] sm:$0xff]  ;;  %v7162_v19 = vadd.f32 0.4994258, %v7161_v34  ;;  %v7151_v60 = vadd.f32 0.18741608, %v7150_v8 }
 0x8de   :  { %7489 = vmatpush.msrb.mxu1 %v8746_v52  ;;  %v7134_v28 = vand.u32 2147483647, %v12927_v53  ;;  %v7198_v24 = vadd.f32 0.014752088, %v7197_v1  ;;  %v7136_v47 = vand.u32 2147483648, %v12927_v53  ;;  %vm7130_vm5 = vweird.f32 %v12927_v53 }
 0x8df   :  { %v7069_v33 = vmul.f32 %v12821_v2, %v7056_v62  ;;  %v12947_v29 = vmin.f32 %v7222_v5, 16.0  ;;  %v7163_v14 = vmul.f32 %v7162_v19, %v12863_v55 }
 0x8e0   :  { %7490 = vmatpush.msrb.mxu1 %v8745_v12  ;;  %v7199_v44 = vmul.f32 %v7198_v24, %v12917_v46  ;;  %vm7135_vm1 = vcmp.eq.f32.partialorder %v7134_v28, 8.507059e+37  ;;  %v7137_v16 = vor.u32 1.1754944e-38, %v7136_v47 }
 0x8e1   :  { %v7224_v39 = vmul.f32 2.1237322e-06, %v12947_v29  ;;  %v12977_v13 = vadd.f32 1.0, %v7163_v14  ;;  %v12984_v18 = vadd.f32 %v12827_v20, %v7069_v33 }
 0x8e2   :  { %7491 = vmatpush.msrb.mxu1 %v8744_v3  ;;  %v7200_v12 = vadd.f32 0.112945676, %v7199_v44  ;;  %v7152_v3 = vmul.f32 %v7151_v60, %v12863_v55 }
 0x8e3   :  { %v7225_v42 = vadd.f32 0.00028619796, %v7224_v39  ;;  %vm7170_vm6 = vweird.f32 %v12977_v13 }
 0x8e4   :  { %v7153_v1 = vadd.f32 1.1283791, %v7152_v3 }
 0x8e5   :  { %v7226_v58 = vmul.f32 %v7225_v42, %v12947_v29 }
 0x8e6   :  { %v7154_v44 = vmul.f32 %v7153_v1, %v12856_v6 }
 0x8e7   :  { %v7227_v38 = vadd.f32 0.0036580483, %v7226_v58 }
 0x8ed   :  { %v6963_v50 = vpop.f32.mrf.mxu3 }
 0x8ee   :  { %v12881_v37 = vadd.f32 1e-05, %v6963_v50  ;;  %v7186_v50 = vmul.f32 %v7185_v51, %v12917_v46 }
 0x8f0   :  { %8893 = vrsqrt.f32 %v12881_v37  ;;  %vm7028_vm12 = vweird.f32 %v12881_v37  ;;  %v7187_v11 = vadd.f32 0.0036580483, %v7186_v50  ;;  %v7086_v50 = vmul.f32 0.5, %v12830_v35 }
 0x8f1   :  { %8895 = vrcp.f32 %v12927_v53 }
 0x8f2   :  { %v7188_v25 = vmul.f32 %v7187_v11, %v12917_v46 }
 0x8f4   :  { %v7189_v61 = vadd.f32 0.05243302, %v7188_v25  ;;  %v7087_v25 = vmul.f32 0.5, %v12851_v48 }
 0x8f5   :  { %v6966_v45 = vpop.f32.mrf.mxu3 }
 0x8f6   :  { %v8894_v22 = vpop.eup %8893  ;;  %v12932_v43 = vadd.f32 1e-05, %v6966_v45  ;;  %v7190_v56 = vmul.f32 %v7189_v61, %v12917_v46 }
 0x8f7   :  { %v7023_v31 = vmul.f32 %v8894_v22, %v12881_v37  ;;  %v8896_v0 = vpop.eup %8895  ;;  %vm7029_vm0 = vweird.f32 %v8894_v22  ;;  %v7235_v37 = vmul.f32 3.8918573e-05, %v12947_v29 }
 0x8f8   :  { %8897 = vrsqrt.f32 %v12932_v43  ;;  %v7126_v32 = vmul.f32 %v8896_v0, %v12927_v53  ;;  %vm12965_vm10 = vmor %vm7028_vm12, %vm7029_vm0  ;;  %vm7131_vm13 = vweird.f32 %v8896_v0  ;;  %v7201_v53 = vmul.f32 %v7200_v12, %v12917_v46 }
 0x8f9   :  { %v7024_v49 = vmul.f32 %v8894_v22, %v7023_v31  ;;  %8899 = vrcp.f32 %v12977_v13  ;;  %vm7132_vm15 = vmor %vm7130_vm5, %vm7131_vm13  ;;  %v7236_v41 = vadd.f32 0.001143296, %v7235_v37  ;;  %vm7038_vm11 = vweird.f32 %v12932_v43 }
 0x8fa   :  { %v7127_v30 = vsub.f32 1.0, %v7126_v32  ;;  %v7202_v33 = vadd.f32 0.4994258, %v7201_v53  ;;  %v7191_v28 = vadd.f32 0.18741608, %v7190_v56 }
 0x8fb   :  { %v7025_v57 = vmul.f32 0.5, %v7024_v49  ;;  %v7237_v39 = vmul.f32 %v7236_v41, %v12947_v29 }
 0x8fc   :  { %v7128_v45 = vmul.f32 %v8896_v0, %v7127_v30  ;;  %v7203_v11 = vmul.f32 %v7202_v33, %v12917_v46 }
 0x8fd   :  { %v7026_v4 = vsub.f32 1.5, %v7025_v57  ;;  %v7228_v57 = vmul.f32 %v7227_v38, %v12947_v29  ;;  %v7238_v24 = vadd.f32 0.014752088, %v7237_v39 }
 0x8fe   :  { %v12956_v63 = vpop.eup %8897  ;;  %v7129_v31 = vadd.f32 %v8896_v0, %v7128_v45 }
 0x8ff   :  { %v7027_v54 = vmul.f32 %v8894_v22, %v7026_v4  ;;  %v7033_v26 = vmul.f32 %v12956_v63, %v12932_v43  ;;  %vm7039_vm9 = vweird.f32 %v12956_v63  ;;  %v8900_v4 = vpop.eup %8899  ;;  %v7229_v35 = vadd.f32 0.05243302, %v7228_v57 }
 0x900   :  { %v7133_v49 = vsel %vm7132_vm15, %v8896_v0, %v7129_v31  ;;  %vm12993_vm8 = vmor %vm7038_vm11, %vm7039_vm9  ;;  %v13000_v0 = vmul.f32 0.70710677, %v12984_v18  ;;  %v7166_v32 = vmul.f32 %v8900_v4, %v12977_v13  ;;  %v7239_v59 = vmul.f32 %v7238_v24, %v12947_v29 }
 0x901   :  { %v7031_v52 = vsel %vm12965_vm10, %v8894_v22, %v7027_v54  ;;  %v7034_v15 = vmul.f32 %v12956_v63, %v7033_v26  ;;  %v7138_v51 = vsel %vm7135_vm1, %v7137_v16, %v7133_v49  ;;  %v7176_v54 = vand.u32 2147483648, %v12977_v13 }
 0x902   :  { %v7057_v5 = vmul.f32 %v7031_v52, %v12803_v10  ;;  %v7139_v55 = vmul.f32 %v7138_v51, %v7114_v23  ;;  %v7174_v23 = vand.u32 2147483647, %v12977_v13  ;;  %v13009_v26 = vadd.f32 1.0, %v7203_v11 }
 0x903   :  { %v7035_v62 = vmul.f32 0.5, %v7034_v15  ;;  %v7167_v60 = vsub.f32 1.0, %v7166_v32  ;;  %v7262_v30 = vmul.f32 %v13000_v0, %v13000_v0  ;;  %vm7171_vm2 = vweird.f32 %v8900_v4 }
 0x904   :  { %v7070_v8 = vmul.f32 %v12821_v2, %v7057_v5  ;;  %v8736_v43 = vclamps-f32 %v7139_v55, 1.0  ;;  %8901 = vrcp.f32 %v13009_v26  ;;  %v7192_v15 = vmul.f32 %v7191_v28, %v12917_v46  ;;  %vm7172_vm4 = vmor %vm7170_vm6, %vm7171_vm2 }
 0x905   :  { %v7036_v22 = vsub.f32 1.5, %v7035_v62  ;;  %v7168_v52 = vmul.f32 %v8900_v4, %v7167_v60  ;;  %v7230_v58 = vmul.f32 %v7229_v35, %v12947_v29  ;;  %v13025_v37 = vmin.f32 %v7262_v30, 16.0 }
 0x906   :  { %v7422_v42 = vadd.f32 1.0, %v8736_v43  ;;  %v13012_v47 = vadd.f32 %v12827_v20, %v7070_v8  ;;  %vm7175_vm3 = vcmp.eq.f32.partialorder %v7174_v23, 8.507059e+37  ;;  %v7177_v61 = vor.u32 1.1754944e-38, %v7176_v54 }
 0x907   :  { %v7037_v10 = vmul.f32 %v12956_v63, %v7036_v22  ;;  %v7169_v6 = vadd.f32 %v8900_v4, %v7168_v52  ;;  %v7264_v62 = vmul.f32 2.1237322e-06, %v13025_v37  ;;  %v7275_v12 = vmul.f32 3.8918573e-05, %v13025_v37 }
 0x908   :  { %v7430_v14 = vmul.f32 %v7422_v42, %v7086_v50  ;;  %v13028_v45 = vmul.f32 0.70710677, %v13012_v47  ;;  %v7193_v5 = vadd.f32 1.1283791, %v7192_v15  ;;  %v7214_v31 = vand.u32 2147483647, %v13009_v26 }
 0x909   :  { %v7041_v19 = vsel %vm12993_vm8, %v12956_v63, %v7037_v10  ;;  %v7173_v38 = vsel %vm7172_vm4, %v8900_v4, %v7169_v6  ;;  %v7231_v22 = vadd.f32 0.18741608, %v7230_v58  ;;  %v7265_v53 = vadd.f32 0.00028619796, %v7264_v62 }
 0x90a   :  { %v7058_v63 = vmul.f32 %v7041_v19, %v12808_v7  ;;  %8753 = vmatmul.msk.f32.vlgmr.msrb.gmra.mxu1 %vm2790_vm14, %v7430_v14  ;;  %v7240_v7 = vadd.f32 0.112945676, %v7239_v59  ;;  %v7302_v13 = vmul.f32 %v13028_v45, %v13028_v45  ;;  %v8902_v16 = vpop.eup %8901  ;;  %v7178_v3 = vsel %vm7175_vm3, %v7177_v61, %v7173_v38 }
 0x90b   :  { %v7276_v41 = vadd.f32 0.001143296, %v7275_v12  ;;  %v7179_v10 = vmul.f32 %v7178_v3, %v7154_v44  ;;  %v7206_v51 = vmul.f32 %v8902_v16, %v13009_v26  ;;  %v7216_v56 = vand.u32 2147483648, %v13009_v26 }
 0x90c   :  { %v7071_v48 = vmul.f32 %v12821_v2, %v7058_v63  ;;  %v7241_v46 = vmul.f32 %v7240_v7, %v12947_v29  ;;  %v13039_v57 = vmin.f32 %v7302_v13, 16.0  ;;  %v7266_v55 = vmul.f32 %v7265_v53, %v13025_v37 }
 0x90d   :  { %v7277_v33 = vmul.f32 %v7276_v41, %v13025_v37  ;;  %v8737_v50 = vclamps-f32 %v7179_v10, 1.0  ;;  %v7207_v1 = vsub.f32 1.0, %v7206_v51  ;;  %vm7211_vm7 = vweird.f32 %v8902_v16 }
 0x90e   :  { %v7242_v49 = vadd.f32 0.4994258, %v7241_v46  ;;  %v13045_v34 = vadd.f32 %v12827_v20, %v7071_v48  ;;  %v7304_v39 = vmul.f32 2.1237322e-06, %v13039_v57  ;;  %v7315_v4 = vmul.f32 3.8918573e-05, %v13039_v57 }
 0x90f   :  { %v7267_v43 = vadd.f32 0.0036580483, %v7266_v55  ;;  %v7278_v23 = vadd.f32 0.014752088, %v7277_v33  ;;  %v7423_v11 = vadd.f32 1.0, %v8737_v50  ;;  %v7208_v32 = vmul.f32 %v8902_v16, %v7207_v1 }
 0x910   :  { %v7243_v8 = vmul.f32 %v7242_v49, %v12947_v29  ;;  %v7305_v28 = vadd.f32 0.00028619796, %v7304_v39  ;;  %v7316_v35 = vadd.f32 0.001143296, %v7315_v4  ;;  %v7194_v24 = vmul.f32 %v7193_v5, %v12890_v21 }
 0x911   :  { %vm7210_vm12 = vweird.f32 %v13009_v26  ;;  %v7431_v42 = vmul.f32 %v7423_v11, %v7087_v25  ;;  %v7209_v54 = vadd.f32 %v8902_v16, %v7208_v32  ;;  %v7232_v63 = vmul.f32 %v7231_v22, %v12947_v29 }
 0x912   :  { %v13049_v19 = vadd.f32 1.0, %v7243_v8  ;;  %v7279_v60 = vmul.f32 %v7278_v23, %v13025_v37  ;;  %vm7212_vm0 = vmor %vm7210_vm12, %vm7211_vm7  ;;  %v7217_v59 = vor.u32 1.1754944e-38, %v7216_v56  ;;  %v7268_v30 = vmul.f32 %v7267_v43, %v13025_v37 }
 0x913   :  { %v7306_v14 = vmul.f32 %v7305_v28, %v13039_v57  ;;  %v7317_v44 = vmul.f32 %v7316_v35, %v13039_v57  ;;  %8754 = vmatmul.msk.f32.gmra.mxu1 %vm2790_vm14, %v7431_v42  ;;  %v7213_v21 = vsel %vm7212_vm0, %v8902_v16, %v7209_v54  ;;  %vm7215_vm10 = vcmp.eq.f32.partialorder %v7214_v31, 8.507059e+37 }
 0x914   :  { %8903 = vrcp.f32 %v13049_v19  ;;  %v7280_v26 = vadd.f32 0.112945676, %v7279_v60  ;;  %v13062_v25 = vmul.f32 0.70710677, %v13045_v34  ;;  %v7218_v29 = vsel %vm7215_vm10, %v7217_v59, %v7213_v21 }
 0x915   :  { %v7307_v52 = vadd.f32 0.0036580483, %v7306_v14  ;;  %v7318_v15 = vadd.f32 0.014752088, %v7317_v44  ;;  %v7219_v58 = vmul.f32 %v7218_v29, %v7194_v24  ;;  %v7088_v61 = vmul.f32 0.5, %v12871_v36 }
 0x916   :  { %v7281_v7 = vmul.f32 %v7280_v26, %v13025_v37  ;;  %v7342_v48 = vmul.f32 %v13062_v25, %v13062_v25  ;;  %v7269_v46 = vadd.f32 0.05243302, %v7268_v30  ;;  %v7233_v13 = vadd.f32 1.1283791, %v7232_v63 }
 0x917   :  { %v7319_v62 = vmul.f32 %v7318_v15, %v13039_v57  ;;  %v8738_v12 = vclamps-f32 %v7219_v58, 1.0  ;;  %v7308_v5 = vmul.f32 %v7307_v52, %v13039_v57  ;;  %v7254_v31 = vand.u32 2147483647, %v13049_v19 }
 0x918   :  { %v7282_v22 = vadd.f32 0.4994258, %v7281_v7  ;;  %v7256_v53 = vand.u32 2147483648, %v13049_v19  ;;  %v13073_v41 = vmin.f32 %v7342_v48, 16.0  ;;  %v7270_v36 = vmul.f32 %v7269_v46, %v13025_v37 }
 0x919   :  { %v7320_v16 = vadd.f32 0.112945676, %v7319_v62  ;;  %v7424_v3 = vadd.f32 1.0, %v8738_v12  ;;  %v7309_v55 = vadd.f32 0.05243302, %v7308_v5  ;;  %vm7250_vm5 = vweird.f32 %v13049_v19 }
 0x91a   :  { %v8904_v6 = vpop.eup %8903  ;;  %v7283_v10 = vmul.f32 %v7282_v22, %v13025_v37  ;;  %v7344_v33 = vmul.f32 2.1237322e-06, %v13073_v41  ;;  %v7355_v43 = vmul.f32 3.8918573e-05, %v13073_v41  ;;  %v7234_v23 = vmul.f32 %v7233_v13, %v12925_v27 }
 0x91b   :  { %v7246_v38 = vmul.f32 %v8904_v6, %v13049_v19  ;;  %vm7251_vm13 = vweird.f32 %v8904_v6  ;;  %v7321_v51 = vmul.f32 %v7320_v16, %v13039_v57  ;;  %v7432_v56 = vmul.f32 %v7424_v3, %v7088_v61 }
 0x91c   :  { %v7284_v50 = vadd.f32 1.0, %v7283_v10  ;;  %v7345_v4 = vadd.f32 0.00028619796, %v7344_v33  ;;  %vm7252_vm1 = vmor %vm7250_vm5, %vm7251_vm13  ;;  %v7257_v11 = vor.u32 1.1754944e-38, %v7256_v53  ;;  %v7271_v32 = vadd.f32 0.18741608, %v7270_v36 }
 0x91d   :  { %v7247_v49 = vsub.f32 1.0, %v7246_v38  ;;  %v7322_v1 = vadd.f32 0.4994258, %v7321_v51  ;;  %8755 = vmatmul.msk.f32.gmra.mxu1 %vm2790_vm14, %v7432_v56  ;;  %vm7255_vm15 = vcmp.eq.f32.partialorder %v7254_v31, 8.507059e+37  ;;  %v7310_v35 = vmul.f32 %v7309_v55, %v13039_v57 }
 0x91e   :  { %8905 = vrcp.f32 %v7284_v50  ;;  %v7356_v54 = vadd.f32 0.001143296, %v7355_v43  ;;  %v7346_v60 = vmul.f32 %v7345_v4, %v13073_v41  ;;  %v7272_v59 = vmul.f32 %v7271_v32, %v13025_v37 }
 0x91f   :  { %v7248_v8 = vmul.f32 %v8904_v6, %v7247_v49  ;;  %v7323_v24 = vmul.f32 %v7322_v1, %v13039_v57  ;;  %v7311_v14 = vadd.f32 0.18741608, %v7310_v35  ;;  %v7089_v26 = vmul.f32 0.5, %v12911_v17  ;;  %v6969_v3 = vpop.f32.mrf.mxu3 }
 0x920   :  { %v7357_v27 = vmul.f32 %v7356_v54, %v13073_v41  ;;  %v7347_v15 = vadd.f32 0.0036580483, %v7346_v60  ;;  %v7273_v58 = vadd.f32 1.1283791, %v7272_v59  ;;  %v7294_v61 = vand.u32 2147483647, %v7284_v50 }
 0x921   :  { %v7249_v39 = vadd.f32 %v8904_v6, %v7248_v8  ;;  %v7324_v19 = vadd.f32 1.0, %v7323_v24  ;;  %v7312_v37 = vmul.f32 %v7311_v14, %v13039_v57  ;;  %v7296_v46 = vand.u32 2147483648, %v7284_v50 }
 0x922   :  { %v7358_v21 = vadd.f32 0.014752088, %v7357_v27  ;;  %v7348_v17 = vmul.f32 %v7347_v15, %v13073_v41  ;;  %v7274_v38 = vmul.f32 %v7273_v58, %v13000_v0  ;;  %vm7290_vm11 = vweird.f32 %v7284_v50 }
 0x923   :  { %v7253_v28 = vsel %vm7252_vm1, %v8904_v6, %v7249_v39  ;;  %8907 = vrcp.f32 %v7324_v19  ;;  %vm7295_vm8 = vcmp.eq.f32.partialorder %v7294_v61, 8.507059e+37  ;;  %v7313_v16 = vadd.f32 1.1283791, %v7312_v37 }
 0x924   :  { %v7258_v42 = vsel %vm7255_vm15, %v7257_v11, %v7253_v28  ;;  %v8906_v44 = vpop.eup %8905  ;;  %v7359_v7 = vmul.f32 %v7358_v21, %v13073_v41  ;;  %v7297_v57 = vor.u32 1.1754944e-38, %v7296_v46  ;;  %v13096_v36 = vadd.f32 1e-05, %v6969_v3 }
 0x925   :  { %v7259_v63 = vmul.f32 %v7258_v42, %v7234_v23  ;;  %v7286_v52 = vmul.f32 %v8906_v44, %v7284_v50  ;;  %vm7291_vm9 = vweird.f32 %v8906_v44  ;;  %v7334_v51 = vand.u32 2147483647, %v7324_v19 }
 0x926   :  { %v7360_v62 = vadd.f32 0.112945676, %v7359_v7  ;;  %vm7292_vm2 = vmor %vm7290_vm11, %vm7291_vm9  ;;  %v7336_v56 = vand.u32 2147483648, %v7324_v19  ;;  %v7349_v8 = vadd.f32 0.05243302, %v7348_v17  ;;  %8909 = vrsqrt.f32 %v13096_v36 }
 0x927   :  { %v8739_v30 = vclamps-f32 %v7259_v63, 1.0  ;;  %v7287_v6 = vsub.f32 1.0, %v7286_v52  ;;  %vm7330_vm3 = vweird.f32 %v7324_v19  ;;  %v7314_v11 = vmul.f32 %v7313_v16, %v13028_v45 }
 0x928   :  { %v7361_v31 = vmul.f32 %v7360_v62, %v13073_v41  ;;  %v7337_v43 = vor.u32 1.1754944e-38, %v7336_v56  ;;  %v7350_v23 = vmul.f32 %v7349_v8, %v13073_v41  ;;  %vm7335_vm7 = vcmp.eq.f32.partialorder %v7334_v51, 8.507059e+37 }
 0x929   :  { %v7425_v29 = vadd.f32 1.0, %v8739_v30  ;;  %v8908_v12 = vpop.eup %8907  ;;  %v7288_v13 = vmul.f32 %v8906_v44, %v7287_v6  ;;  %v7090_v28 = vmul.f32 0.5, %v12984_v18  ;;  %v7091_v45 = vmul.f32 0.5, %v13012_v47 }
 0x92a   :  { %v7326_v5 = vmul.f32 %v8908_v12, %v7324_v19  ;;  %v7362_v53 = vadd.f32 0.4994258, %v7361_v31  ;;  %vm7331_vm6 = vweird.f32 %v8908_v12  ;;  %v7351_v60 = vadd.f32 0.18741608, %v7350_v23 }
 0x92b   :  { %v7433_v48 = vmul.f32 %v7425_v29, %v7089_v26  ;;  %v7289_v22 = vadd.f32 %v8906_v44, %v7288_v13  ;;  %vm7332_vm4 = vmor %vm7330_vm3, %vm7331_vm6  ;;  %vm7048_vm1 = vweird.f32 %v13096_v36  ;;  %v7092_v13 = vmul.f32 0.5, %v13045_v34 }
 0x92c   :  { %v7327_v49 = vsub.f32 1.0, %v7326_v5  ;;  %v7363_v33 = vmul.f32 %v7362_v53, %v13073_v41  ;;  %v8910_v54 = vpop.eup %8909  ;;  %vm14083_vm6 = vcmask 64512  }
 0x92d   :  { %8756 = vmatmul.msk.f32.gmra.mxu1 %vm2790_vm14, %v7433_v48  ;;  %v7293_v10 = vsel %vm7292_vm2, %v8906_v44, %v7289_v22  ;;  %v7043_v59 = vmul.f32 %v8910_v54, %v13096_v36  ;;  %v7352_v44 = vmul.f32 %v7351_v60, %v13073_v41  ;;  %vm7049_vm5 = vweird.f32 %v8910_v54  ;;  %vm14084_vm3 = vmmov %vm14083_vm6 }
 0x92e   :  { %v7298_v55 = vsel %vm7295_vm8, %v7297_v57, %v7293_v10  ;;  %v7328_v0 = vmul.f32 %v8908_v12, %v7327_v49  ;;  %v7364_v39 = vadd.f32 1.0, %v7363_v33  ;;  %vm7050_vm15 = vmor %vm7048_vm1, %vm7049_vm5 }
 0x92f   :  { %v7299_v1 = vmul.f32 %v7298_v55, %v7274_v38  ;;  %v7044_v14 = vmul.f32 %v8910_v54, %v7043_v59  ;;  %v7353_v15 = vadd.f32 1.1283791, %v7352_v44 }
 0x930   :  { %v7329_v50 = vadd.f32 %v8908_v12, %v7328_v0  ;;  %8911 = vrcp.f32 %v7364_v39  ;;  %v7376_v29 = vand.u32 2147483648, %v7364_v39  ;;  %v7374_v7 = vand.u32 2147483647, %v7364_v39 }
 0x931   :  { %v8740_v4 = vclamps-f32 %v7299_v1, 1.0  ;;  %v7045_v52 = vmul.f32 0.5, %v7044_v14  ;;  %vm7370_vm0 = vweird.f32 %v7364_v39  ;;  %v7354_v47 = vmul.f32 %v7353_v15, %v13062_v25 }
 0x932   :  { %v7333_v32 = vsel %vm7332_vm4, %v8908_v12, %v7329_v50  ;;  %v7377_v6 = vor.u32 1.1754944e-38, %v7376_v29  ;;  %vm7375_vm13 = vcmp.eq.f32.partialorder %v7374_v7, 8.507059e+37  ;;  %vm14085_vm4 = vmmov %vm14084_vm3 }
 0x933   :  { %v7426_v35 = vadd.f32 1.0, %v8740_v4  ;;  %v7338_v24 = vsel %vm7335_vm7, %v7337_v43, %v7333_v32  ;;  %v7046_v61 = vsub.f32 1.5, %v7045_v52  ;;  %vm14086_vm7 = vmmov %vm14084_vm3 }
 0x934   :  { %v7339_v42 = vmul.f32 %v7338_v24, %v7314_v11 }
 0x935   :  { %v7434_v63 = vmul.f32 %v7426_v35, %v7090_v28  ;;  %v7047_v62 = vmul.f32 %v8910_v54, %v7046_v61 }
 0x936   :  { %v8741_v19 = vclamps-f32 %v7339_v42, 1.0  ;;  %v8912_v27 = vpop.eup %8911 }
 0x937   :  { %8757 = vmatmul.msk.f32.gmra.mxu1 %vm2790_vm14, %v7434_v63  ;;  %v7366_v21 = vmul.f32 %v8912_v27, %v7364_v39  ;;  %vm7371_vm12 = vweird.f32 %v8912_v27  ;;  %v7051_v38 = vsel %vm7050_vm15, %v8910_v54, %v7047_v62 }
 0x938   :  { %v7427_v30 = vadd.f32 1.0, %v8741_v19  ;;  %vm7372_vm10 = vmor %vm7370_vm0, %vm7371_vm12  ;;  %v7059_v31 = vmul.f32 %v7051_v38, %v12813_v40 }
 0x939   :  { %v7367_v26 = vsub.f32 1.0, %v7366_v21  ;;  %vm14087_vm12 = vmmov %vm14084_vm3 }
 0x93a   :  { %v7435_v18 = vmul.f32 %v7427_v30, %v7091_v45  ;;  %v7072_v25 = vmul.f32 %v12821_v2, %v7059_v31  ;;  %vm14089_vm0 = vmmov %vm14084_vm3 }
 0x93b   :  { %v7368_v58 = vmul.f32 %v8912_v27, %v7367_v26  ;;  %vm14093_vm5 = vmmov %vm14089_vm0 }
 0x93c   :  { %v7085_v22 = vadd.f32 %v12827_v20, %v7072_v25  ;;  %vm14094_vm1 = vmmov %vm14089_vm0 }
 0x93d   :  { %v7369_v48 = vadd.f32 %v8912_v27, %v7368_v58  ;;  %vm14095_vm15 = vmmov %vm14089_vm0 }
 0x93e   :  { %v7101_v16 = vmul.f32 0.70710677, %v7085_v22  ;;  %v7093_v21 = vmul.f32 0.5, %v7085_v22  ;;  %v14090_v22 = vld [vmem:[#allocation12_spill] sm:$0xff] }
 0x93f   :  { %8758 = vmatmul.msk.f32.gmra.mxu1 %vm2790_vm14, %v7435_v18  ;;  %v7373_v37 = vsel %vm7372_vm10, %v8912_v27, %v7369_v48  ;;  %v8811_v27 = vld [vmem:[%s13705_s11 + $0x1] ss:$0 sm:$0xff]  ;;  %vm14091_vm10 = vmmov %vm14089_vm0 }
 0x940   :  { %v7378_v41 = vsel %vm7375_vm13, %v7377_v6, %v7373_v37  ;;  %v7382_v3 = vmul.f32 %v7101_v16, %v7101_v16  ;;  %vm14092_vm13 = vmmov %vm14089_vm0 }
 0x941   :  { %v7379_v46 = vmul.f32 %v7378_v41, %v7354_v47 }
 0x942   :  { %v7383_v57 = vmin.f32 %v7382_v3, 16.0 }
 0x943   :  { %v8742_v12 = vclamps-f32 %v7379_v46, 1.0 }
 0x944   :  { %v7384_v49 = vmul.f32 2.1237322e-06, %v7383_v57  ;;  %v7395_v53 = vmul.f32 3.8918573e-05, %v7383_v57 }
 0x945   :  { %v7428_v17 = vadd.f32 1.0, %v8742_v12 }
 0x946   :  { %v7385_v36 = vadd.f32 0.00028619796, %v7384_v49  ;;  %v7396_v10 = vadd.f32 0.001143296, %v7395_v53 }
 0x947   :  { %v7436_v5 = vmul.f32 %v7428_v17, %v7092_v13 }
 0x948   :  { %v7386_v34 = vmul.f32 %v7385_v36, %v7383_v57  ;;  %v7397_v51 = vmul.f32 %v7396_v10, %v7383_v57 }
 0x949   :  { %8759 = vmatmul.msk.f32.gmra.mxu1 %vm2790_vm14, %v7436_v5 }
 0x94a   :  { %v7398_v56 = vadd.f32 0.014752088, %v7397_v51  ;;  %v7387_v8 = vadd.f32 0.0036580483, %v7386_v34 }
 0x94c   :  { %v7399_v55 = vmul.f32 %v7398_v56, %v7383_v57  ;;  %v7388_v33 = vmul.f32 %v7387_v8, %v7383_v57 }
 0x94e   :  { %v7400_v0 = vadd.f32 0.112945676, %v7399_v55  ;;  %v7389_v50 = vadd.f32 0.05243302, %v7388_v33 }
 0x950   :  { %v7401_v1 = vmul.f32 %v7400_v0, %v7383_v57  ;;  %v7390_v20 = vmul.f32 %v7389_v50, %v7383_v57 }
 0x952   :  { %v7402_v40 = vadd.f32 0.4994258, %v7401_v1  ;;  %v7391_v4 = vadd.f32 0.18741608, %v7390_v20 }
 0x954   :  { %v7403_v2 = vmul.f32 %v7402_v40, %v7383_v57  ;;  %v7392_v23 = vmul.f32 %v7391_v4, %v7383_v57 }
 0x956   :  { %v7404_v39 = vadd.f32 1.0, %v7403_v2  ;;  %v7393_v35 = vadd.f32 1.1283791, %v7392_v23 }
 0x958   :  { %8913 = vrcp.f32 %v7404_v39  ;;  %v7416_v28 = vand.u32 2147483648, %v7404_v39  ;;  %v7414_v42 = vand.u32 2147483647, %v7404_v39  ;;  %vm7410_vm11 = vweird.f32 %v7404_v39 }
 0x959   :  { %v7394_v60 = vmul.f32 %v7393_v35, %v7101_v16 }
 0x95a   :  { %v7417_v63 = vor.u32 1.1754944e-38, %v7416_v28  ;;  %vm7415_vm2 = vcmp.eq.f32.partialorder %v7414_v42, 8.507059e+37 }
 0x95e   :  { %v8914_v43 = vpop.eup %8913 }
 0x95f   :  { %v7406_v11 = vmul.f32 %v8914_v43, %v7404_v39  ;;  %vm7411_vm9 = vweird.f32 %v8914_v43 }
 0x960   :  { %vm7412_vm8 = vmor %vm7410_vm11, %vm7411_vm9 }
 0x961   :  { %v7407_v32 = vsub.f32 1.0, %v7406_v11  ;;  %vm14096_vm9 = vmmov %vm14089_vm0 }
 0x962   :  { %vm14097_vm11 = vmmov %vm14089_vm0 }
 0x963   :  { %v7408_v24 = vmul.f32 %v8914_v43, %v7407_v32 }
 0x965   :  { %v7409_v54 = vadd.f32 %v8914_v43, %v7408_v24 }
 0x967   :  { %v7413_v19 = vsel %vm7412_vm8, %v8914_v43, %v7409_v54  ;;  %vm14098_vm8 = vmmov %vm14089_vm0 }
 0x968   :  { %v7418_v59 = vsel %vm7415_vm2, %v7417_v63, %v7413_v19  ;;  %vm14099_vm2 = vmmov %vm14089_vm0 }
 0x969   :  { %v7419_v30 = vmul.f32 %v7418_v59, %v7394_v60 }
 0x96b   :  { %v8743_v14 = vclamps-f32 %v7419_v30, 1.0 }
 0x96d   :  { %v7429_v18 = vadd.f32 1.0, %v8743_v14 }
 0x96f   :  { %v7437_v29 = vmul.f32 %v7429_v18, %v7093_v21 }
 0x971   :  { %8760 = vmatmul.msk.f32.gmra.mxu1 %vm2790_vm14, %v7437_v29  ;;  %vm14088_vm14 = vmmov %vm14084_vm3 }
 0x987   :  { %v7493_v45 = vpop.f32.mrf.mxu1 }
 0x988   :  { %v7494_v44 = vadd.f32 %v8811_v27, %v7493_v45 }
 0x98a   :  { %v7521_v26 = vsel %vm14083_vm6, %v7494_v44, 0.0 }
 0x98b   :  { %7522 = vadd.xlane.f32.xlu1 %v7521_v26 }
 0x990   :  { %v7496_v52 = vpop.f32.mrf.mxu1 }
 0x991   :  { %v7497_v15 = vadd.f32 %v8811_v27, %v7496_v52 }
 0x993   :  { %v7524_v58 = vsel %vm14084_vm3, %v7497_v15, 0.0 }
 0x994   :  { %7525 = vadd.xlane.f32.xlu2 %v7524_v58 }
 0x99a   :  { %v7499_v7 = vpop.f32.mrf.mxu1 }
 0x99b   :  { %v7500_v48 = vadd.f32 %v8811_v27, %v7499_v7 }
 0x99d   :  { %v7527_v6 = vsel %vm14085_vm4, %v7500_v48, 0.0 }
 0x99e   :  { %7528 = vadd.xlane.f32.xlu0 %v7527_v6 }
 0x9aa   :  { %v7502_v61 = vpop.f32.mrf.mxu1 }
 0x9ab   :  { %v7503_v47 = vadd.f32 %v8811_v27, %v7502_v61 }
 0x9ad   :  { %v7530_v37 = vsel %vm14086_vm7, %v7503_v47, 0.0 }
 0x9ae   :  { %7531 = vadd.xlane.f32.xlu1 %v7530_v37 }
 0x9b4   :  { %v7505_v41 = vpop.f32.mrf.mxu1 }
 0x9b5   :  { %v7506_v46 = vadd.f32 %v8811_v27, %v7505_v41 }
 0x9b7   :  { %v7533_v62 = vsel %vm14087_vm12, %v7506_v46, 0.0 }
 0x9b8   :  { %7534 = vadd.xlane.f32.xlu2 %v7533_v62  ;;  %v13180_v62 = vld [vmem:[%s13706_s12 + $0x1] ss:$0 sm:$0xff] }
 0x9bc   :  { %v7508_v12 = vpop.f32.mrf.mxu1 }
 0x9bd   :  { %v7509_v13 = vadd.f32 %v8811_v27, %v7508_v12 }
 0x9bf   :  { %v7536_v17 = vsel %vm14088_vm14, %v7509_v13, 0.0 }
 0x9c0   :  { %7537 = vadd.xlane.f32.xlu0 %v7536_v17 }
 0x9c6   :  { %v7511_v38 = vpop.f32.mrf.mxu1 }
 0x9c7   :  { %v7512_v5 = vadd.f32 %v8811_v27, %v7511_v38 }
 0x9c9   :  { %v7539_v31 = vsel %vm14089_vm0, %v7512_v5, 0.0 }
 0x9ca   :  { %7540 = vadd.xlane.f32.xlu2 %v7539_v31 }
 0x9ee   :  { %v7514_v53 = vpop.f32.mrf.mxu1 }
 0x9ef   :  { %v7515_v36 = vadd.f32 %v8811_v27, %v7514_v53 }
 0x9f1   :  { %v7542_v51 = vsel %vm14092_vm13, %v7515_v36, 0.0 }
 0x9f2   :  { %7543 = vadd.xlane.f32.xlu0 %v7542_v51 }
 0x9fe   :  { %v7523_v25 = vpop.xlane.xlu1 %7522 }
 0x9ff   :  { %v7545_v16 = vmul.f32 %v7523_v25, %v14090_v22 }
 0xa01   :  { %v13127_v3 = vsub.f32 %v7494_v44, %v7545_v16 }
 0xa03   :  { %v7561_v57 = vmul.f32 %v13127_v3, %v13127_v3 }
 0xa05   :  { %v7569_v49 = vsel %vm14091_vm10, %v7561_v57, 0.0 }
 0xa06   :  { %7570 = vadd.xlane.f32.xlu1 %v7569_v49 }
 0xa07   :  { %v7526_v10 = vpop.xlane.xlu2 %7525 }
 0xa08   :  { %v7546_v34 = vmul.f32 %v7526_v10, %v14090_v22 }
 0xa0a   :  { %v13134_v56 = vsub.f32 %v7497_v15, %v7546_v34 }
 0xa0c   :  { %v7562_v8 = vmul.f32 %v13134_v56, %v13134_v56 }
 0xa0e   :  { %v7572_v55 = vsel %vm14093_vm5, %v7562_v8, 0.0 }
 0xa0f   :  { %7573 = vadd.xlane.f32.xlu1 %v7572_v55 }
 0xa11   :  { %v7529_v0 = vpop.xlane.xlu0 %7528 }
 0xa12   :  { %v7547_v33 = vmul.f32 %v7529_v0, %v14090_v22 }
 0xa14   :  { %v13140_v1 = vsub.f32 %v7500_v48, %v7547_v33 }
 0xa16   :  { %v7563_v40 = vmul.f32 %v13140_v1, %v13140_v1 }
 0xa18   :  { %v7575_v50 = vsel %vm14094_vm1, %v7563_v40, 0.0 }
 0xa19   :  { %7576 = vadd.xlane.f32.xlu2 %v7575_v50 }
 0xa21   :  { %v7532_v2 = vpop.xlane.xlu1 %7531 }
 0xa22   :  { %v7548_v39 = vmul.f32 %v7532_v2, %v14090_v22 }
 0xa24   :  { %v13146_v20 = vsub.f32 %v7503_v47, %v7548_v39 }
 0xa26   :  { %v7564_v4 = vmul.f32 %v13146_v20, %v13146_v20 }
 0xa28   :  { %v7578_v43 = vsel %vm14095_vm15, %v7564_v4, 0.0 }
 0xa29   :  { %7579 = vadd.xlane.f32.xlu0 %v7578_v43 }
 0xa2b   :  { %v7535_v23 = vpop.xlane.xlu2 %7534 }
 0xa2c   :  { %v7549_v11 = vmul.f32 %v7535_v23, %v14090_v22 }
 0xa2e   :  { %v13152_v32 = vsub.f32 %v7506_v46, %v7549_v11 }
 0xa30   :  { %v7565_v28 = vmul.f32 %v13152_v32, %v13152_v32 }
 0xa32   :  { %v7581_v35 = vsel %vm14096_vm9, %v7565_v28, 0.0 }
 0xa33   :  { %v7538_v24 = vpop.xlane.xlu0 %7537  ;;  %7582 = vadd.xlane.f32.xlu1 %v7581_v35 }
 0xa34   :  { %v7550_v42 = vmul.f32 %v7538_v24, %v14090_v22 }
 0xa36   :  { %v13158_v54 = vsub.f32 %v7509_v13, %v7550_v42  ;;  %v13185_v13 = vld [vmem:[%s13707_s13 + $0x1] ss:$0 sm:$0xff] }
 0xa38   :  { %v7566_v63 = vmul.f32 %v13158_v54, %v13158_v54 }
 0xa3a   :  { %v7584_v60 = vsel %vm14097_vm11, %v7566_v63, 0.0 }
 0xa3b   :  { %7585 = vadd.xlane.f32.xlu2 %v7584_v60 }
 0xa3d   :  { %v7541_v19 = vpop.xlane.xlu2 %7540 }
 0xa3e   :  { %v7551_v59 = vmul.f32 %v7541_v19, %v14090_v22 }
 0xa40   :  { %v13164_v27 = vsub.f32 %v7512_v5, %v7551_v59 }
 0xa42   :  { %v7567_v30 = vmul.f32 %v13164_v27, %v13164_v27 }
 0xa44   :  { %v7587_v14 = vsel %vm14098_vm8, %v7567_v30, 0.0 }
 0xa45   :  { %7588 = vadd.xlane.f32.xlu0 %v7587_v14 }
 0xa65   :  { %v7544_v18 = vpop.xlane.xlu0 %7543 }
 0xa66   :  { %v7552_v26 = vmul.f32 %v7544_v18, %v14090_v22 }
 0xa68   :  { %v13171_v29 = vsub.f32 %v7515_v36, %v7552_v26 }
 0xa6a   :  { %v7568_v58 = vmul.f32 %v13171_v29, %v13171_v29 }
 0xa6c   :  { %v7590_v61 = vsel %vm14099_vm2, %v7568_v58, 0.0 }
 0xa6d   :  { %7591 = vadd.xlane.f32.xlu1 %v7590_v61 }
 0xa79   :  { %v7571_v45 = vpop.xlane.xlu1 %7570 }
 0xa7a   :  { %v7593_v44 = vmul.f32 %v7571_v45, %v14090_v22 }
 0xa7c   :  { %v7601_v21 = vadd.f32 1e-05, %v7593_v44 }
 0xa7e   :  { %8915 = vrsqrt.f32 %v7601_v21  ;;  %vm7615_vm3 = vweird.f32 %v7601_v21 }
 0xa82   :  { %v7574_v7 = vpop.xlane.xlu1 %7573 }
 0xa83   :  { %v7594_v6 = vmul.f32 %v7574_v7, %v14090_v22 }
 0xa84   :  { %v8916_v52 = vpop.eup %8915 }
 0xa85   :  { %v7610_v15 = vmul.f32 %v8916_v52, %v7601_v21  ;;  %v7602_v37 = vadd.f32 1e-05, %v7594_v6  ;;  %vm7616_vm6 = vweird.f32 %v8916_v52 }
 0xa86   :  { %vm7617_vm4 = vmor %vm7615_vm3, %vm7616_vm6 }
 0xa87   :  { %v7611_v48 = vmul.f32 %v8916_v52, %v7610_v15  ;;  %8917 = vrsqrt.f32 %v7602_v37  ;;  %vm7625_vm12 = vweird.f32 %v7602_v37 }
 0xa89   :  { %v7612_v47 = vmul.f32 0.5, %v7611_v48 }
 0xa8b   :  { %v7613_v41 = vsub.f32 1.5, %v7612_v47 }
 0xa8c   :  { %v7577_v38 = vpop.xlane.xlu2 %7576 }
 0xa8d   :  { %v7614_v46 = vmul.f32 %v8916_v52, %v7613_v41  ;;  %v8918_v5 = vpop.eup %8917  ;;  %v7595_v31 = vmul.f32 %v7577_v38, %v14090_v22 }
 0xa8e   :  { %v7620_v16 = vmul.f32 %v8918_v5, %v7602_v37  ;;  %vm7626_vm7 = vweird.f32 %v8918_v5 }
 0xa8f   :  { %v7618_v12 = vsel %vm7617_vm4, %v8916_v52, %v7614_v46  ;;  %v7603_v57 = vadd.f32 1e-05, %v7595_v31  ;;  %vm7627_vm14 = vmor %vm7625_vm12, %vm7626_vm7 }
 0xa90   :  { %v7689_v17 = vmul.f32 %v7618_v12, %v13127_v3  ;;  %v7621_v53 = vmul.f32 %v8918_v5, %v7620_v16 }
 0xa91   :  { %8919 = vrsqrt.f32 %v7603_v57  ;;  %vm7635_vm10 = vweird.f32 %v7603_v57 }
 0xa92   :  { %v7700_v25 = vmul.f32 %v13180_v62, %v7689_v17  ;;  %v7622_v10 = vmul.f32 0.5, %v7621_v53 }
 0xa94   :  { %v13191_v49 = vadd.f32 %v13185_v13, %v7700_v25  ;;  %v7623_v34 = vsub.f32 1.5, %v7622_v10 }
 0xa96   :  { %v13194_v36 = vmul.f32 0.70710677, %v13191_v49  ;;  %v7624_v8 = vmul.f32 %v8918_v5, %v7623_v34 }
 0xa97   :  { %v8920_v55 = vpop.eup %8919 }
 0xa98   :  { %v7735_v3 = vmul.f32 %v13194_v36, %v13194_v36  ;;  %v7628_v40 = vsel %vm7627_vm14, %v8918_v5, %v7624_v8  ;;  %v7630_v50 = vmul.f32 %v8920_v55, %v7603_v57  ;;  %vm7636_vm0 = vweird.f32 %v8920_v55 }
 0xa99   :  { %v7690_v39 = vmul.f32 %v7628_v40, %v13134_v56  ;;  %vm7637_vm13 = vmor %vm7635_vm10, %vm7636_vm0  ;;  %vm14102_vm10 = vcmask 64512  }
 0xa9a   :  { %v13198_v51 = vmin.f32 %v7735_v3, 16.0  ;;  %v7631_v11 = vmul.f32 %v8920_v55, %v7630_v50 }
 0xa9b   :  { %v7701_v28 = vmul.f32 %v13180_v62, %v7690_v39 }
 0xa9c   :  { %v7737_v0 = vmul.f32 2.1237322e-06, %v13198_v51  ;;  %v7748_v33 = vmul.f32 3.8918573e-05, %v13198_v51  ;;  %v7580_v2 = vpop.xlane.xlu0 %7579  ;;  %v7632_v63 = vmul.f32 0.5, %v7631_v11 }
 0xa9d   :  { %v7596_v4 = vmul.f32 %v7580_v2, %v14090_v22  ;;  %v13208_v60 = vadd.f32 %v13185_v13, %v7701_v28 }
 0xa9e   :  { %v7738_v43 = vadd.f32 0.00028619796, %v7737_v0  ;;  %v7749_v23 = vadd.f32 0.001143296, %v7748_v33  ;;  %v7633_v56 = vsub.f32 1.5, %v7632_v63 }
 0xa9f   :  { %v7604_v35 = vadd.f32 1e-05, %v7596_v4  ;;  %v13211_v30 = vmul.f32 0.70710677, %v13208_v60 }
 0xaa0   :  { %v7739_v24 = vmul.f32 %v7738_v43, %v13198_v51  ;;  %v7750_v42 = vmul.f32 %v7749_v23, %v13198_v51  ;;  %v7634_v44 = vmul.f32 %v8920_v55, %v7633_v56 }
 0xaa1   :  { %8921 = vrsqrt.f32 %v7604_v35  ;;  %v7775_v21 = vmul.f32 %v13211_v30, %v13211_v30  ;;  %vm7645_vm1 = vweird.f32 %v7604_v35 }
 0xaa2   :  { %v7740_v19 = vadd.f32 0.0036580483, %v7739_v24  ;;  %v7751_v59 = vadd.f32 0.014752088, %v7750_v42  ;;  %v7638_v52 = vsel %vm7637_vm13, %v8920_v55, %v7634_v44 }
 0xaa3   :  { %v7691_v58 = vmul.f32 %v7638_v52, %v13140_v1  ;;  %v13218_v7 = vmin.f32 %v7775_v21, 16.0 }
 0xaa4   :  { %v7741_v14 = vmul.f32 %v7740_v19, %v13198_v51  ;;  %v7752_v45 = vmul.f32 %v7751_v59, %v13198_v51 }
 0xaa5   :  { %v7702_v61 = vmul.f32 %v13180_v62, %v7691_v58  ;;  %v7777_v47 = vmul.f32 2.1237322e-06, %v13218_v7  ;;  %v7788_v37 = vmul.f32 3.8918573e-05, %v13218_v7 }
 0xaa6   :  { %v7742_v18 = vadd.f32 0.05243302, %v7741_v14  ;;  %v7753_v26 = vadd.f32 0.112945676, %v7752_v45  ;;  %v7583_v17 = vpop.xlane.xlu1 %7582 }
 0xaa7   :  { %v8922_v15 = vpop.eup %8921  ;;  %v7597_v38 = vmul.f32 %v7583_v17, %v14090_v22  ;;  %v7778_v5 = vadd.f32 0.00028619796, %v7777_v47  ;;  %v7789_v1 = vadd.f32 0.001143296, %v7788_v37  ;;  %v13227_v31 = vadd.f32 %v13185_v13, %v7702_v61 }
 0xaa8   :  { %v7754_v48 = vmul.f32 %v7753_v26, %v13198_v51  ;;  %v7640_v6 = vmul.f32 %v8922_v15, %v7604_v35  ;;  %v7743_v41 = vmul.f32 %v7742_v18, %v13198_v51  ;;  %vm7646_vm5 = vweird.f32 %v8922_v15 }
 0xaa9   :  { %v13230_v57 = vadd.f32 1e-05, %v7597_v38  ;;  %v7779_v53 = vmul.f32 %v7778_v5, %v13218_v7  ;;  %v7790_v10 = vmul.f32 %v7789_v1, %v13218_v7  ;;  %v13237_v55 = vmul.f32 0.70710677, %v13227_v31  ;;  %vm7647_vm15 = vmor %vm7645_vm1, %vm7646_vm5 }
 0xaaa   :  { %v7755_v46 = vadd.f32 0.4994258, %v7754_v48  ;;  %v7641_v12 = vmul.f32 %v8922_v15, %v7640_v6  ;;  %v7744_v3 = vadd.f32 0.18741608, %v7743_v41 }
 0xaab   :  { %8923 = vrsqrt.f32 %v13230_v57  ;;  %v7780_v0 = vadd.f32 0.0036580483, %v7779_v53  ;;  %v7791_v33 = vadd.f32 0.014752088, %v7790_v10  ;;  %v7815_v43 = vmul.f32 %v13237_v55, %v13237_v55 }
 0xaac   :  { %v7756_v25 = vmul.f32 %v7755_v46, %v13198_v51  ;;  %v7642_v16 = vmul.f32 0.5, %v7641_v12  ;;  %v7745_v39 = vmul.f32 %v7744_v3, %v13198_v51  ;;  %vm7655_vm9 = vweird.f32 %v13230_v57 }
 0xaad   :  { %v7781_v50 = vmul.f32 %v7780_v0, %v13218_v7  ;;  %v7792_v2 = vmul.f32 %v7791_v33, %v13218_v7  ;;  %v13248_v63 = vmin.f32 %v7815_v43, 16.0 }
 0xaae   :  { %v13234_v34 = vadd.f32 1.0, %v7756_v25  ;;  %v7643_v8 = vsub.f32 1.5, %v7642_v16  ;;  %v7586_v4 = vpop.xlane.xlu2 %7585  ;;  %v7746_v56 = vadd.f32 1.1283791, %v7745_v39 }
 0xaaf   :  { %v7598_v11 = vmul.f32 %v7586_v4, %v14090_v22  ;;  %v7782_v28 = vadd.f32 0.05243302, %v7781_v50  ;;  %v7793_v42 = vadd.f32 0.112945676, %v7792_v2  ;;  %v7817_v52 = vmul.f32 2.1237322e-06, %v13248_v63 }
 0xab0   :  { %8925 = vrcp.f32 %v13234_v34  ;;  %v7644_v40 = vmul.f32 %v8922_v15, %v7643_v8  ;;  %v7769_v58 = vand.u32 2147483648, %v13234_v34  ;;  %v7828_v48 = vmul.f32 3.8918573e-05, %v13248_v63 }
 0xab1   :  { %v8924_v35 = vpop.eup %8923  ;;  %v13250_v19 = vadd.f32 1e-05, %v7598_v11  ;;  %v7783_v59 = vmul.f32 %v7782_v28, %v13218_v7  ;;  %v7794_v44 = vmul.f32 %v7793_v42, %v13218_v7  ;;  %v7747_v61 = vmul.f32 %v7746_v56, %v13194_v36 }
 0xab2   :  { %v7648_v23 = vsel %vm7647_vm15, %v8922_v15, %v7644_v40  ;;  %v7650_v45 = vmul.f32 %v8924_v35, %v13230_v57  ;;  %v7818_v41 = vadd.f32 0.00028619796, %v7817_v52  ;;  %v7767_v12 = vand.u32 2147483647, %v13234_v34 }
 0xab3   :  { %v7692_v24 = vmul.f32 %v7648_v23, %v13146_v20  ;;  %8927 = vrsqrt.f32 %v13250_v19  ;;  %v7784_v18 = vadd.f32 0.18741608, %v7783_v59  ;;  %v7795_v26 = vadd.f32 0.4994258, %v7794_v44 }
 0xab4   :  { %v7651_v20 = vmul.f32 %v8924_v35, %v7650_v45  ;;  %v7829_v17 = vadd.f32 0.001143296, %v7828_v48  ;;  %vm7656_vm8 = vweird.f32 %v8924_v35  ;;  %vm7763_vm2 = vweird.f32 %v13234_v34 }
 0xab5   :  { %v7703_v14 = vmul.f32 %v13180_v62, %v7692_v24  ;;  %v7796_v37 = vmul.f32 %v7795_v26, %v13218_v7  ;;  %v7785_v5 = vmul.f32 %v7784_v18, %v13218_v7  ;;  %v7770_v36 = vor.u32 1.1754944e-38, %v7769_v58  ;;  %vm7657_vm4 = vmor %vm7655_vm9, %vm7656_vm8 }
 0xab6   :  { %v8926_v51 = vpop.eup %8925  ;;  %v7652_v47 = vmul.f32 0.5, %v7651_v20  ;;  %v7819_v0 = vmul.f32 %v7818_v41, %v13248_v63  ;;  %v7830_v7 = vmul.f32 %v7829_v17, %v13248_v63  ;;  %vm7768_vm3 = vcmp.eq.f32.partialorder %v7767_v12, 8.507059e+37 }
 0xab7   :  { %v7759_v21 = vmul.f32 %v8926_v51, %v13234_v34  ;;  %v13263_v6 = vadd.f32 %v13185_v13, %v7703_v14  ;;  %vm7764_vm11 = vweird.f32 %v8926_v51  ;;  %v13269_v1 = vadd.f32 1.0, %v7796_v37 }
 0xab8   :  { %v7653_v38 = vsub.f32 1.5, %v7652_v47  ;;  %vm7765_vm6 = vmor %vm7763_vm2, %vm7764_vm11  ;;  %v7589_v8 = vpop.xlane.xlu0 %7588  ;;  %v7786_v39 = vadd.f32 1.1283791, %v7785_v5  ;;  %v7820_v57 = vadd.f32 0.0036580483, %v7819_v0  ;;  %v7719_v42 = vmul.f32 0.5, %v13191_v49 }
 0xab9   :  { %v7760_v15 = vsub.f32 1.0, %v7759_v21  ;;  %v13271_v25 = vpop.eup %8927  ;;  %v13275_v53 = vmul.f32 0.70710677, %v13263_v6  ;;  %v7599_v34 = vmul.f32 %v7589_v8, %v14090_v22  ;;  %8929 = vrcp.f32 %v13269_v1  ;;  %vm14105_vm2 = vmmov %vm14102_vm10 }
 0xaba   :  { %v7654_v10 = vmul.f32 %v8924_v35, %v7653_v38  ;;  %v7660_v3 = vmul.f32 %v13271_v25, %v13250_v19  ;;  %v7831_v24 = vadd.f32 0.014752088, %v7830_v7  ;;  %vm7665_vm7 = vweird.f32 %v13250_v19 }
 0xabb   :  { %v7761_v46 = vmul.f32 %v8926_v51, %v7760_v15  ;;  %v13288_v23 = vadd.f32 1e-05, %v7599_v34  ;;  %v7855_v11 = vmul.f32 %v13275_v53, %v13275_v53  ;;  %vm7666_vm12 = vweird.f32 %v13271_v25 }
 0xabc   :  { %v7658_v50 = vsel %vm7657_vm4, %v8924_v35, %v7654_v10  ;;  %v7661_v2 = vmul.f32 %v13271_v25, %v7660_v3  ;;  %v7832_v56 = vmul.f32 %v7831_v24, %v13248_v63  ;;  %v7807_v44 = vand.u32 2147483647, %v13269_v1  ;;  %vm13316_vm0 = vmor %vm7665_vm7, %vm7666_vm12 }
 0xabd   :  { %v7762_v16 = vadd.f32 %v8926_v51, %v7761_v46  ;;  %v7693_v43 = vmul.f32 %v7658_v50, %v13152_v32  ;;  %8931 = vrsqrt.f32 %v13288_v23  ;;  %v7821_v32 = vmul.f32 %v7820_v57, %v13248_v63 }
 0xabe   :  { %v7662_v28 = vmul.f32 0.5, %v7661_v2  ;;  %v13300_v21 = vmin.f32 %v7855_v11, 16.0  ;;  %v7787_v20 = vmul.f32 %v7786_v39, %v13211_v30  ;;  %v7809_v26 = vand.u32 2147483648, %v13269_v1 }
 0xabf   :  { %v7766_v33 = vsel %vm7765_vm6, %v8926_v51, %v7762_v16  ;;  %v7704_v59 = vmul.f32 %v13180_v62, %v7693_v43  ;;  %v8930_v14 = vpop.eup %8929  ;;  %v7833_v15 = vadd.f32 0.112945676, %v7832_v56  ;;  %vm7803_vm14 = vweird.f32 %v13269_v1 }
 0xac0   :  { %v7771_v40 = vsel %vm7768_vm3, %v7770_v36, %v7766_v33  ;;  %v7663_v51 = vsub.f32 1.5, %v7662_v28  ;;  %v7799_v18 = vmul.f32 %v8930_v14, %v13269_v1  ;;  %v7857_v58 = vmul.f32 2.1237322e-06, %v13300_v21 }
 0xac1   :  { %v7772_v4 = vmul.f32 %v7771_v40, %v7747_v61  ;;  %v7868_v48 = vmul.f32 3.8918573e-05, %v13300_v21  ;;  %v7822_v47 = vadd.f32 0.05243302, %v7821_v32  ;;  %v13310_v37 = vadd.f32 %v13185_v13, %v7704_v59 }
 0xac2   :  { %v7664_v49 = vmul.f32 %v13271_v25, %v7663_v51  ;;  %v7800_v61 = vsub.f32 1.0, %v7799_v18  ;;  %vm13321_vm13 = vcmp.eq.f32.partialorder %v7807_v44, 8.507059e+37  ;;  %v7834_v12 = vmul.f32 %v7833_v15, %v13248_v63  ;;  %v8152_v15 = vld [vmem:[%s13710_s1 + $0x8] sm:$0xff] }
 0xac3   :  { %v8763_v35 = vclamps-f32 %v7772_v4, 1.0  ;;  %v8932_v41 = vpop.eup %8931  ;;  %v7858_v17 = vadd.f32 0.00028619796, %v7857_v58  ;;  %v7869_v38 = vadd.f32 0.001143296, %v7868_v48  ;;  %vm7804_vm5 = vweird.f32 %v8930_v14 }
 0xac4   :  { %v7668_v5 = vsel %vm13316_vm0, %v13271_v25, %v7664_v49  ;;  %v7670_v19 = vmul.f32 %v8932_v41, %v13288_v23  ;;  %v7801_v16 = vmul.f32 %v8930_v14, %v7800_v61  ;;  %v7810_v36 = vor.u32 1.1754944e-38, %v7809_v26  ;;  %vm7805_vm1 = vmor %vm7803_vm14, %vm7804_vm5 }
 0xac5   :  { %v8055_v45 = vadd.f32 1.0, %v8763_v35  ;;  %v7835_v10 = vadd.f32 0.4994258, %v7834_v12  ;;  %v7859_v3 = vmul.f32 %v7858_v17, %v13300_v21  ;;  %v7870_v8 = vmul.f32 %v7869_v38, %v13300_v21 }
 0xac6   :  { %v7671_v0 = vmul.f32 %v8932_v41, %v7670_v19  ;;  %v7802_v7 = vadd.f32 %v8930_v14, %v7801_v16  ;;  %v7823_v33 = vmul.f32 %v7822_v47, %v13248_v63  ;;  %v13334_v34 = vmul.f32 0.70710677, %v13310_v37 }
 0xac7   :  { %v8063_v52 = vmul.f32 %v8055_v45, %v7719_v42  ;;  %v7694_v40 = vmul.f32 %v7668_v5, %v13158_v54  ;;  %v7836_v25 = vmul.f32 %v7835_v10, %v13248_v63  ;;  %v7860_v50 = vadd.f32 0.0036580483, %v7859_v3 }
 0xac8   :  { %v7871_v2 = vadd.f32 0.014752088, %v7870_v8  ;;  %v7672_v39 = vmul.f32 0.5, %v7671_v0  ;;  %vm7676_vm15 = vweird.f32 %v8932_v41  ;;  %v7806_v4 = vsel %vm7805_vm1, %v8930_v14, %v7802_v7 }
 0xac9   :  { %8773 = vmatmul.msk.f32.vlgmr.msrb.gmra.mxu2 %vm14102_vm10, %v8063_v52  ;;  %v7895_v43 = vmul.f32 %v13334_v34, %v13334_v34  ;;  %v7811_v11 = vsel %vm13321_vm13, %v7810_v36, %v7806_v4  ;;  %v13344_v28 = vadd.f32 1.0, %v7836_v25  ;;  %v7861_v54 = vmul.f32 %v7860_v50, %v13300_v21  ;;  %vm14106_vm10 = vmmov %vm14105_vm2 }
 0xaca   :  { %v7872_v1 = vmul.f32 %v7871_v2, %v13300_v21  ;;  %v7673_v57 = vsub.f32 1.5, %v7672_v39  ;;  %v7812_v24 = vmul.f32 %v7811_v11, %v7787_v20  ;;  %v7824_v42 = vadd.f32 0.18741608, %v7823_v33 }
 0xacb   :  { %v13348_v35 = vmin.f32 %v7895_v43, 16.0  ;;  %v7705_v59 = vmul.f32 %v13180_v62, %v7694_v40  ;;  %vm7675_vm9 = vweird.f32 %v13288_v23  ;;  %8933 = vrcp.f32 %v13344_v28 }
 0xacc   :  { %v7674_v51 = vmul.f32 %v8932_v41, %v7673_v57  ;;  %v8764_v32 = vclamps-f32 %v7812_v24, 1.0  ;;  %v7862_v56 = vadd.f32 0.05243302, %v7861_v54  ;;  %v7873_v14 = vadd.f32 0.112945676, %v7872_v1  ;;  %vm7677_vm11 = vmor %vm7675_vm9, %vm7676_vm15 }
 0xacd   :  { %v7720_v45 = vmul.f32 0.5, %v13208_v60  ;;  %v7897_v44 = vmul.f32 2.1237322e-06, %v13348_v35  ;;  %v7908_v49 = vmul.f32 3.8918573e-05, %v13348_v35  ;;  %v7825_v26 = vmul.f32 %v7824_v42, %v13248_v63  ;;  %vm14107_vm9 = vmmov %vm14105_vm2 }
 0xace   :  { %v7678_v20 = vsel %vm7677_vm11, %v8932_v41, %v7674_v51  ;;  %v8056_v18 = vadd.f32 1.0, %v8764_v32  ;;  %v7874_v23 = vmul.f32 %v7873_v14, %v13300_v21  ;;  %v13364_v60 = vadd.f32 %v13185_v13, %v7705_v59 }
 0xacf   :  { %v7695_v52 = vmul.f32 %v7678_v20, %v13164_v27  ;;  %v7898_v58 = vadd.f32 0.00028619796, %v7897_v44  ;;  %v7909_v48 = vadd.f32 0.001143296, %v7908_v49  ;;  %v7863_v47 = vmul.f32 %v7862_v56, %v13300_v21  ;;  %v8153_v56 = vld [vmem:[%s13710_s1 + $0x10] sm:$0xff] }
 0xad0   :  { %v8064_v61 = vmul.f32 %v8056_v18, %v7720_v45  ;;  %v7875_v41 = vadd.f32 0.4994258, %v7874_v23  ;;  %vm8160_vm8 = vcmp.gt.f32.partialorder %v8152_v15, 0.5  ;;  %v13375_v16 = vmul.f32 0.70710677, %v13364_v60 }
 0xad1   :  { %v8934_v30 = vpop.eup %8933  ;;  %v7706_v63 = vmul.f32 %v13180_v62, %v7695_v52  ;;  %v8168_v46 = vsel %vm8160_vm8, 1, %v13909_v9  ;;  %v7899_v27 = vmul.f32 %v7898_v58, %v13348_v35  ;;  %v7910_v12 = vmul.f32 %v7909_v48, %v13348_v35 }
 0xad2   :  { %8774 = vmatmul.msk.f32.gmra.mxu2 %vm14105_vm2, %v8064_v61  ;;  %v7839_v17 = vmul.f32 %v8934_v30, %v13344_v28  ;;  %v7876_v38 = vmul.f32 %v7875_v41, %v13300_v21  ;;  %8179 = vperm.xlu0 %8799, %v8168_v46   ;;  %v7826_v36 = vadd.f32 1.1283791, %v7825_v26  ;;  %v7849_v0 = vand.u32 2147483648, %v13344_v28 }
 0xad3   :  { %v7900_v5 = vadd.f32 0.0036580483, %v7899_v27  ;;  %v7911_v19 = vadd.f32 0.014752088, %v7910_v12  ;;  %v13380_v8 = vadd.f32 %v13185_v13, %v7706_v63  ;;  %v7864_v7 = vadd.f32 0.18741608, %v7863_v47 }
 0xad4   :  { %v7840_v10 = vsub.f32 1.0, %v7839_v17  ;;  %v13377_v3 = vadd.f32 1.0, %v7876_v38  ;;  %v7935_v40 = vmul.f32 %v13375_v16, %v13375_v16  ;;  %vm7844_vm6 = vweird.f32 %v8934_v30 }
 0xad5   :  { %v7912_v33 = vmul.f32 %v7911_v19, %v13348_v35  ;;  %v7847_v50 = vand.u32 2147483647, %v13344_v28  ;;  %v7721_v2 = vmul.f32 0.5, %v13227_v31  ;;  %v7901_v39 = vmul.f32 %v7900_v5, %v13348_v35 }
 0xad6   :  { %v7841_v25 = vmul.f32 %v8934_v30, %v7840_v10  ;;  %8935 = vrcp.f32 %v13377_v3  ;;  %v13390_v4 = vmin.f32 %v7935_v40, 16.0  ;;  %vm7843_vm3 = vweird.f32 %v13344_v28 }
 0xad7   :  { %v7913_v11 = vadd.f32 0.112945676, %v7912_v33  ;;  %v13394_v54 = vmul.f32 0.70710677, %v13380_v8  ;;  %v7827_v1 = vmul.f32 %v7826_v36, %v13237_v55  ;;  %vm7845_vm4 = vmor %vm7843_vm3, %vm7844_vm6  ;;  %v7850_v57 = vor.u32 1.1754944e-38, %v7849_v0 }
 0xad8   :  { %v7842_v43 = vadd.f32 %v8934_v30, %v7841_v25  ;;  %v7865_v24 = vmul.f32 %v7864_v7, %v13300_v21  ;;  %v7937_v42 = vmul.f32 2.1237322e-06, %v13390_v4  ;;  %vm7848_vm7 = vcmp.eq.f32.partialorder %v7847_v50, 8.507059e+37  ;;  %vm14108_vm6 = vmmov %vm14107_vm9 }
 0xad9   :  { %v7914_v59 = vmul.f32 %v7913_v11, %v13348_v35  ;;  %v7948_v51 = vmul.f32 3.8918573e-05, %v13390_v4  ;;  %v7902_v28 = vadd.f32 0.05243302, %v7901_v39  ;;  %v7975_v55 = vmul.f32 %v13394_v54, %v13394_v54 }
 0xada   :  { %v7846_v31 = vsel %vm7845_vm4, %v8934_v30, %v7842_v43  ;;  %v7938_v14 = vadd.f32 0.00028619796, %v7937_v42  ;;  %vm8161_vm12 = vcmp.gt.f32.partialorder %v8153_v56, 0.5  ;;  %v7866_v20 = vadd.f32 1.1283791, %v7865_v24 }
 0xadb   :  { %v7851_v32 = vsel %vm7848_vm7, %v7850_v57, %v7846_v31  ;;  %v7915_v44 = vadd.f32 0.4994258, %v7914_v59  ;;  %v7949_v49 = vadd.f32 0.001143296, %v7948_v51  ;;  %v7887_v26 = vand.u32 2147483647, %v13377_v3 }
 0xadc   :  { %v8936_v45 = vpop.eup %8935  ;;  %v7852_v21 = vmul.f32 %v7851_v32, %v7827_v1  ;;  %v8169_v23 = vsel %vm8161_vm12, 1, %v13909_v9  ;;  %v7939_v58 = vmul.f32 %v7938_v14, %v13390_v4  ;;  %v7889_v47 = vand.u32 2147483648, %v13377_v3  ;;  %v8151_v32 = vld [vmem:[%s13710_s1] sm:$0xff] }
 0xadd   :  { %v7879_v18 = vmul.f32 %v8936_v45, %v13377_v3  ;;  %v7916_v15 = vmul.f32 %v7915_v44, %v13348_v35  ;;  %8182 = vperm.xlu1 %8800, %v8169_v23   ;;  %v7950_v48 = vmul.f32 %v7949_v49, %v13390_v4  ;;  %v7903_v41 = vmul.f32 %v7902_v28, %v13348_v35 }
 0xade   :  { %v8765_v52 = vclamps-f32 %v7852_v21, 1.0  ;;  %v13414_v30 = vmin.f32 %v7975_v55, 16.0  ;;  %vm7884_vm14 = vweird.f32 %v8936_v45  ;;  %v7940_v17 = vadd.f32 0.0036580483, %v7939_v58 }
 0xadf   :  { %v7880_v61 = vsub.f32 1.0, %v7879_v18  ;;  %v13416_v46 = vadd.f32 1.0, %v7916_v15  ;;  %v7951_v27 = vadd.f32 0.014752088, %v7950_v48  ;;  %vm7883_vm0 = vweird.f32 %v13377_v3 }
 0xae0   :  { %v8057_v63 = vadd.f32 1.0, %v8765_v52  ;;  %v7977_v38 = vmul.f32 2.1237322e-06, %v13414_v30  ;;  %v7988_v5 = vmul.f32 3.8918573e-05, %v13414_v30  ;;  %v7890_v10 = vor.u32 1.1754944e-38, %v7889_v47  ;;  %vm7885_vm13 = vmor %vm7883_vm0, %vm7884_vm14 }
 0xae1   :  { %v7881_v12 = vmul.f32 %v8936_v45, %v7880_v61  ;;  %8937 = vrcp.f32 %v13416_v46  ;;  %v7952_v0 = vmul.f32 %v7951_v27, %v13390_v4  ;;  %v7867_v7 = vmul.f32 %v7866_v20, %v13275_v53 }
 0xae2   :  { %v8065_v19 = vmul.f32 %v8057_v63, %v7721_v2  ;;  %v7904_v33 = vadd.f32 0.18741608, %v7903_v41  ;;  %v7978_v40 = vadd.f32 0.00028619796, %v7977_v38  ;;  %v7989_v25 = vadd.f32 0.001143296, %v7988_v5 }
 0xae3   :  { %v7882_v36 = vadd.f32 %v8936_v45, %v7881_v12  ;;  %vm7888_vm5 = vcmp.eq.f32.partialorder %v7887_v26, 8.507059e+37  ;;  %v7941_v2 = vmul.f32 %v7940_v17, %v13390_v4  ;;  %v7953_v39 = vadd.f32 0.112945676, %v7952_v0  ;;  %v7592_v0 = vpop.xlane.xlu1 %7591 }
 0xae4   :  { %8775 = vmatmul.msk.f32.gmra.mxu2 %vm14106_vm10, %v8065_v19  ;;  %v7979_v3 = vmul.f32 %v7978_v40, %v13414_v30  ;;  %v7990_v11 = vmul.f32 %v7989_v25, %v13414_v30  ;;  %v7905_v53 = vmul.f32 %v7904_v33, %v13348_v35  ;;  %vm8159_vm1 = vcmp.gt.f32.partialorder %v8151_v32, 0.5 }
 0xae5   :  { %v7886_v50 = vsel %vm7885_vm13, %v8936_v45, %v7882_v36  ;;  %v7954_v57 = vmul.f32 %v7953_v39, %v13390_v4  ;;  %v7942_v51 = vadd.f32 0.05243302, %v7941_v2  ;;  %v7722_v55 = vmul.f32 0.5, %v13263_v6 }
 0xae6   :  { %v7891_v43 = vsel %vm7888_vm5, %v7890_v10, %v7886_v50  ;;  %v7991_v42 = vadd.f32 0.014752088, %v7990_v11  ;;  %v7980_v56 = vadd.f32 0.0036580483, %v7979_v3  ;;  %v8167_v35 = vsel %vm8159_vm1, 1, %v13909_v9 }
 0xae7   :  { %v7892_v1 = vmul.f32 %v7891_v43, %v7867_v7  ;;  %v8938_v24 = vpop.eup %8937  ;;  %v7955_v28 = vadd.f32 0.4994258, %v7954_v57  ;;  %v7906_v44 = vadd.f32 1.1283791, %v7905_v53  ;;  %v7929_v49 = vand.u32 2147483648, %v13416_v46  ;;  %8176 = vperm.xlu2 %8798, %v8167_v35  }
 0xae8   :  { %v7919_v59 = vmul.f32 %v8938_v24, %v13416_v46  ;;  %v7992_v14 = vmul.f32 %v7991_v42, %v13414_v30  ;;  %vm7924_vm15 = vweird.f32 %v8938_v24  ;;  %v7927_v52 = vand.u32 2147483647, %v13416_v46 }
 0xae9   :  { %v8766_v31 = vclamps-f32 %v7892_v1, 1.0  ;;  %v7956_v20 = vmul.f32 %v7955_v28, %v13390_v4  ;;  %v7943_v15 = vmul.f32 %v7942_v51, %v13390_v4  ;;  %v7981_v6 = vmul.f32 %v7980_v56, %v13414_v30 }
 0xaea   :  { %v7920_v21 = vsub.f32 1.0, %v7919_v59  ;;  %v7993_v18 = vadd.f32 0.112945676, %v7992_v14  ;;  %vm7923_vm11 = vweird.f32 %v13416_v46  ;;  %v7930_v47 = vor.u32 1.1754944e-38, %v7929_v49 }
 0xaeb   :  { %v8058_v45 = vadd.f32 1.0, %v8766_v31  ;;  %v7957_v58 = vadd.f32 1.0, %v7956_v20  ;;  %vm7925_vm8 = vmor %vm7923_vm11, %vm7924_vm15  ;;  %v7907_v41 = vmul.f32 %v7906_v44, %v13334_v34  ;;  %vm7928_vm2 = vcmp.eq.f32.partialorder %v7927_v52, 8.507059e+37 }
 0xaec   :  { %v7921_v23 = vmul.f32 %v8938_v24, %v7920_v21  ;;  %v7994_v48 = vmul.f32 %v7993_v18, %v13414_v30  ;;  %v7944_v17 = vadd.f32 0.18741608, %v7943_v15  ;;  %v7982_v38 = vadd.f32 0.05243302, %v7981_v6 }
 0xaed   :  { %v8066_v26 = vmul.f32 %v8058_v45, %v7722_v55  ;;  %8939 = vrcp.f32 %v7957_v58  ;;  %v7600_v40 = vmul.f32 %v7592_v0, %v14090_v22  ;;  %v7723_v34 = vmul.f32 0.5, %v13310_v37 }
 0xaee   :  { %v7922_v61 = vadd.f32 %v8938_v24, %v7921_v23  ;;  %v7995_v27 = vadd.f32 0.4994258, %v7994_v48  ;;  %v7945_v46 = vmul.f32 %v7944_v17, %v13390_v4  ;;  %v7983_v33 = vmul.f32 %v7982_v38, %v13414_v30  ;;  %v8155_v17 = vld [vmem:[%s13710_s1 + $0x20] sm:$0xff] }
 0xaef   :  { %8776 = vmatmul.msk.f32.gmra.mxu2 %vm14107_vm9, %v8066_v26  ;;  %v7608_v43 = vadd.f32 1e-05, %v7600_v40  ;;  %v7969_v11 = vand.u32 2147483648, %v7957_v58  ;;  %v7967_v4 = vand.u32 2147483647, %v7957_v58  ;;  %vm7963_vm7 = vweird.f32 %v7957_v58  ;;  %vm14109_vm9 = vmmov %vm14108_vm6 }
 0xaf0   :  { %v7926_v63 = vsel %vm7925_vm8, %v8938_v24, %v7922_v61  ;;  %v7996_v19 = vmul.f32 %v7995_v27, %v13414_v30  ;;  %v7946_v3 = vadd.f32 1.1283791, %v7945_v46  ;;  %v7984_v1 = vadd.f32 0.18741608, %v7983_v33  ;;  %v8156_v24 = vld [vmem:[%s13710_s1 + $0x28] sm:$0xff] }
 0xaf1   :  { %v7931_v12 = vsel %vm7928_vm2, %v7930_v47, %v7926_v63  ;;  %vm8164_vm4 = vcmp.gt.f32.partialorder %v8156_v24, 0.5  ;;  %v7970_v31 = vor.u32 1.1754944e-38, %v7969_v11  ;;  %vm7968_vm14 = vcmp.eq.f32.partialorder %v7967_v4, 8.507059e+37 }
 0xaf2   :  { %v7932_v5 = vmul.f32 %v7931_v12, %v7907_v41  ;;  %v7997_v10 = vadd.f32 1.0, %v7996_v19  ;;  %v8172_v53 = vsel %vm8164_vm4, 1, %v13909_v9  ;;  %v7985_v59 = vmul.f32 %v7984_v1, %v13414_v30  ;;  %v8154_v30 = vld [vmem:[%s13710_s1 + $0x18] sm:$0xff] }
 0xaf3   :  { %v8940_v7 = vpop.eup %8939  ;;  %8191 = vperm.xlu1 %8800, %v8172_v53   ;;  %v7947_v51 = vmul.f32 %v7946_v3, %v13375_v16  ;;  %v7724_v16 = vmul.f32 0.5, %v13364_v60  ;;  %vm8162_vm10 = vcmp.gt.f32.partialorder %v8154_v30, 0.5  ;;  %vm7685_vm11 = vweird.f32 %v7608_v43 }
 0xaf4   :  { %v8767_v36 = vclamps-f32 %v7932_v5, 1.0  ;;  %v7959_v50 = vmul.f32 %v8940_v7, %v7957_v58  ;;  %8941 = vrcp.f32 %v7997_v10  ;;  %vm7964_vm3 = vweird.f32 %v8940_v7 }
 0xaf5   :  { %8943 = vrsqrt.f32 %v7608_v43  ;;  %vm7965_vm12 = vmor %vm7963_vm7, %vm7964_vm3  ;;  %v7986_v21 = vadd.f32 1.1283791, %v7985_v59  ;;  %v8009_v35 = vand.u32 2147483648, %v7997_v10  ;;  %v8007_v18 = vand.u32 2147483647, %v7997_v10 }
 0xaf6   :  { %v8059_v25 = vadd.f32 1.0, %v8767_v36  ;;  %v7960_v39 = vsub.f32 1.0, %v7959_v50  ;;  %vm8003_vm13 = vweird.f32 %v7997_v10  ;;  %v8170_v15 = vsel %vm8162_vm10, 1, %v13909_v9  ;;  %vm14110_vm10 = vmmov %vm14108_vm6 }
 0xaf7   :  { %v8010_v58 = vor.u32 1.1754944e-38, %v8009_v35  ;;  %8185 = vperm.xlu2 %8798, %v8170_v15   ;;  %v7987_v61 = vmul.f32 %v7986_v21, %v13394_v54  ;;  %vm8008_vm1 = vcmp.eq.f32.partialorder %v8007_v18, 8.507059e+37  ;;  %vm8163_vm2 = vcmp.gt.f32.partialorder %v8155_v17, 0.5 }
 0xaf8   :  { %v8067_v2 = vmul.f32 %v8059_v25, %v7723_v34  ;;  %v7961_v57 = vmul.f32 %v8940_v7, %v7960_v39  ;;  %v7725_v54 = vmul.f32 0.5, %v13380_v8  ;;  %v8171_v36 = vsel %vm8163_vm2, 1, %v13909_v9 }
 0xafa   :  { %8777 = vmatmul.msk.f32.gmra.mxu2 %vm14108_vm6, %v8067_v2  ;;  %v7962_v37 = vadd.f32 %v8940_v7, %v7961_v57  ;;  %v8942_v42 = vpop.eup %8941 }
 0xafb   :  { %v7999_v28 = vmul.f32 %v8942_v42, %v7997_v10  ;;  %v8944_v14 = vpop.eup %8943  ;;  %vm8004_vm0 = vweird.f32 %v8942_v42 }
 0xafc   :  { %v7966_v32 = vsel %vm7965_vm12, %v8940_v7, %v7962_v37  ;;  %v7680_v44 = vmul.f32 %v8944_v14, %v7608_v43  ;;  %vm8005_vm5 = vmor %vm8003_vm13, %vm8004_vm0  ;;  %vm7686_vm15 = vweird.f32 %v8944_v14 }
 0xafd   :  { %v7971_v56 = vsel %vm7968_vm14, %v7970_v31, %v7966_v32  ;;  %v8000_v45 = vsub.f32 1.0, %v7999_v28  ;;  %vm7687_vm8 = vmor %vm7685_vm11, %vm7686_vm15 }
 0xafe   :  { %v7972_v55 = vmul.f32 %v7971_v56, %v7947_v51  ;;  %v7681_v26 = vmul.f32 %v8944_v14, %v7680_v44 }
 0xaff   :  { %v8001_v20 = vmul.f32 %v8942_v42, %v8000_v45  ;;  %8188 = vperm.xlu2 %8798, %v8171_v36  }
 0xb00   :  { %v8768_v49 = vclamps-f32 %v7972_v55, 1.0  ;;  %v7682_v6 = vmul.f32 0.5, %v7681_v26 }
 0xb01   :  { %v8002_v52 = vadd.f32 %v8942_v42, %v8001_v20 }
 0xb02   :  { %v8060_v23 = vadd.f32 1.0, %v8768_v49  ;;  %v7683_v63 = vsub.f32 1.5, %v7682_v6 }
 0xb03   :  { %v8006_v47 = vsel %vm8005_vm5, %v8942_v42, %v8002_v52  ;;  %v13486_v52 = vld [vmem:[%s13708_s15 + $0x1] ss:$0 sm:$0xff]  ;;  %vm14111_vm5 = vmmov %vm14108_vm6 }
 0xb04   :  { %v8068_v48 = vmul.f32 %v8060_v23, %v7724_v16  ;;  %v8011_v41 = vsel %vm8008_vm1, %v8010_v58, %v8006_v47  ;;  %v7684_v27 = vmul.f32 %v8944_v14, %v7683_v63  ;;  %vm14112_vm15 = vmmov %vm14111_vm5 }
 0xb05   :  { %v8012_v60 = vmul.f32 %v8011_v41, %v7987_v61  ;;  %vm14115_vm2 = vmmov %vm14111_vm5 }
 0xb06   :  { %8778 = vmatmul.msk.f32.gmra.mxu2 %vm14109_vm9, %v8068_v48  ;;  %v7688_v38 = vsel %vm7687_vm8, %v8944_v14, %v7684_v27  ;;  %vm14113_vm9 = vmmov %vm14111_vm5 }
 0xb07   :  { %v8769_v12 = vclamps-f32 %v8012_v60, 1.0  ;;  %v7696_v19 = vmul.f32 %v7688_v38, %v13171_v29  ;;  %v8157_v29 = vld [vmem:[%s13710_s1 + $0x30] sm:$0xff]  ;;  %vm14114_vm8 = vmmov %vm14111_vm5 }
 0xb08   :  { %vm8165_vm3 = vcmp.gt.f32.partialorder %v8157_v29, 0.5 }
 0xb09   :  { %v8061_v5 = vadd.f32 1.0, %v8769_v12  ;;  %v7707_v0 = vmul.f32 %v13180_v62, %v7696_v19  ;;  %v8173_v62 = vsel %vm8165_vm3, 1, %v13909_v9  ;;  %vm14116_vm3 = vmmov %vm14115_vm2 }
 0xb0a   :  { %8194 = vperm.xlu2 %8798, %v8173_v62  }
 0xb0b   :  { %v8069_v10 = vmul.f32 %v8061_v5, %v7725_v54  ;;  %v7718_v7 = vadd.f32 %v13185_v13, %v7707_v0  ;;  %v8158_v13 = vld [vmem:[%s13710_s1 + $0x38] sm:$0xff] }
 0xb0c   :  { %vm8166_vm4 = vcmp.gt.f32.partialorder %v8158_v13, 0.5 }
 0xb0d   :  { %v7734_v46 = vmul.f32 0.70710677, %v7718_v7  ;;  %v8174_v11 = vsel %vm8166_vm4, 1, %v13909_v9  ;;  %v7726_v26 = vmul.f32 0.5, %v7718_v7  ;;  %vm14117_vm4 = vmmov %vm14115_vm2 }
 0xb0e   :  { %8779 = vmatmul.msk.f32.gmra.mxu2 %vm14108_vm6, %v8069_v10  ;;  %8197 = vperm.xlu1 %8800, %v8174_v11  }
 0xb0f   :  { %v8015_v33 = vmul.f32 %v7734_v46, %v7734_v46 }
 0xb11   :  { %v8016_v40 = vmin.f32 %v8015_v33, 16.0 }
 0xb13   :  { %v8017_v34 = vmul.f32 2.1237322e-06, %v8016_v40  ;;  %v8028_v25 = vmul.f32 3.8918573e-05, %v8016_v40 }
 0xb15   :  { %v8018_v50 = vadd.f32 0.00028619796, %v8017_v34  ;;  %v8029_v8 = vadd.f32 0.001143296, %v8028_v25 }
 0xb17   :  { %v8019_v2 = vmul.f32 %v8018_v50, %v8016_v40  ;;  %v8030_v39 = vmul.f32 %v8029_v8, %v8016_v40 }
 0xb19   :  { %v8031_v43 = vadd.f32 0.014752088, %v8030_v39  ;;  %v8020_v3 = vadd.f32 0.0036580483, %v8019_v2 }
 0xb1b   :  { %v8032_v1 = vmul.f32 %v8031_v43, %v8016_v40  ;;  %v8021_v4 = vmul.f32 %v8020_v3, %v8016_v40 }
 0xb1d   :  { %v8033_v57 = vadd.f32 0.112945676, %v8032_v1  ;;  %v8022_v53 = vadd.f32 0.05243302, %v8021_v4 }
 0xb1f   :  { %v8034_v24 = vmul.f32 %v8033_v57, %v8016_v40  ;;  %v8023_v59 = vmul.f32 %v8022_v53, %v8016_v40 }
 0xb21   :  { %v8035_v37 = vadd.f32 0.4994258, %v8034_v24  ;;  %v8024_v51 = vadd.f32 0.18741608, %v8023_v59 }
 0xb23   :  { %v8036_v42 = vmul.f32 %v8035_v37, %v8016_v40  ;;  %v8025_v28 = vmul.f32 %v8024_v51, %v8016_v40 }
 0xb25   :  { %v8037_v31 = vadd.f32 1.0, %v8036_v42  ;;  %v8026_v45 = vadd.f32 1.1283791, %v8025_v28 }
 0xb27   :  { %8945 = vrcp.f32 %v8037_v31  ;;  %v8049_v55 = vand.u32 2147483648, %v8037_v31  ;;  %v8047_v9 = vand.u32 2147483647, %v8037_v31  ;;  %vm8043_vm12 = vweird.f32 %v8037_v31 }
 0xb28   :  { %v8027_v49 = vmul.f32 %v8026_v45, %v7734_v46 }
 0xb29   :  { %v8050_v44 = vor.u32 1.1754944e-38, %v8049_v55  ;;  %vm8048_vm0 = vcmp.eq.f32.partialorder %v8047_v9, 8.507059e+37 }
 0xb2d   :  { %v8946_v32 = vpop.eup %8945 }
 0xb2e   :  { %v8039_v56 = vmul.f32 %v8946_v32, %v8037_v31  ;;  %vm8044_vm7 = vweird.f32 %v8946_v32 }
 0xb2f   :  { %vm8045_vm14 = vmor %vm8043_vm12, %vm8044_vm7 }
 0xb30   :  { %v8040_v14 = vsub.f32 1.0, %v8039_v56  ;;  %vm14118_vm12 = vmmov %vm14115_vm2 }
 0xb32   :  { %v8041_v21 = vmul.f32 %v8946_v32, %v8040_v14 }
 0xb34   :  { %v8042_v35 = vadd.f32 %v8946_v32, %v8041_v21 }
 0xb36   :  { %v8046_v20 = vsel %vm8045_vm14, %v8946_v32, %v8042_v35  ;;  %vm14119_vm14 = vmmov %vm14115_vm2 }
 0xb37   :  { %v8051_v18 = vsel %vm8048_vm0, %v8050_v44, %v8046_v20 }
 0xb38   :  { %v8052_v30 = vmul.f32 %v8051_v18, %v8027_v49 }
 0xb3a   :  { %v8770_v16 = vclamps-f32 %v8052_v30, 1.0 }
 0xb3c   :  { %v8062_v23 = vadd.f32 1.0, %v8770_v16 }
 0xb3e   :  { %v8070_v15 = vmul.f32 %v8062_v23, %v7726_v26 }
 0xb40   :  { %8780 = vmatmul.msk.f32.vlgmr.msra.gmra.mxu3 %vm14110_vm10, %v8070_v15  ;;  %vm14120_vm10 = vmmov %vm14115_vm2 }
 0xb41   :  { %v8177_v6 = vpop.permute.xlu2 %8176 }
 0xb42   :  { %vm8199_vm13 = vcmp.eq.s32.totalorder %v8177_v6, 1 }
 0xb44   :  { %v8180_v17 = vpop.permute.xlu0 %8179 }
 0xb45   :  { %vm8200_vm1 = vcmp.eq.s32.totalorder %v8180_v17, 1 }
 0xb4c   :  { %v8119_v58 = vpop.f32.mrf.mxu2 }
 0xb4d   :  { %v8120_v48 = vadd.f32 %v13486_v52, %v8119_v58 }
 0xb4f   :  { %v8143_v61 = vmax.f32 %v8120_v48, 0.0  ;;  %v8183_v29 = vpop.permute.xlu1 %8182 }
 0xb50   :  { %vm8201_vm11 = vcmp.eq.s32.totalorder %v8183_v29, 1 }
 0xb51   :  { %v8207_v47 = vsel %vm8199_vm13, %v8143_v61, -1e+30  ;;  %v8186_v37 = vpop.permute.xlu2 %8185 }
 0xb52   :  { %v8215_v41 = vsel %vm14111_vm5, %v8207_v47, -inf  ;;  %vm8202_vm6 = vcmp.eq.s32.totalorder %v8186_v37, 1 }
 0xb53   :  { %v8216_v63 = vrot.slane %v8215_v41, 4 }
 0xb55   :  { %v8217_v60 = vmax.f32 %v8215_v41, %v8216_v63  ;;  %v8122_v38 = vpop.f32.mrf.mxu2 }
 0xb56   :  { %v8123_v5 = vadd.f32 %v13486_v52, %v8122_v38 }
 0xb57   :  { %v8218_v27 = vrot.slane %v8217_v60, 2 }
 0xb58   :  { %v8144_v36 = vmax.f32 %v8123_v5, 0.0 }
 0xb59   :  { %v8219_v12 = vmax.f32 %v8217_v60, %v8218_v27  ;;  %v8189_v44 = vpop.permute.xlu2 %8188 }
 0xb5a   :  { %v8208_v0 = vsel %vm8200_vm1, %v8144_v36, -1e+30  ;;  %vm8203_vm7 = vcmp.eq.s32.totalorder %v8189_v44, 1 }
 0xb5b   :  { %v8220_v54 = vrot.slane %v8219_v12, 1  ;;  %v8222_v7 = vsel %vm14112_vm15, %v8208_v0, -inf }
 0xb5c   :  { %v8223_v33 = vrot.slane %v8222_v7, 4 }
 0xb5d   :  { %v8221_v19 = vmax.f32 %v8219_v12, %v8220_v54 }
 0xb5e   :  { %v8224_v34 = vmax.f32 %v8222_v7, %v8223_v33 }
 0xb5f   :  { %v8271_v10 = vadd.f32 %v8221_v19, %v8143_v61 }
 0xb60   :  { %v8225_v25 = vrot.slane %v8224_v34, 2 }
 0xb61   :  { %v13496_v46 = vsel %vm8199_vm13, %v8271_v10, 0.0  ;;  %vm14121_vm13 = vmmov %vm14115_vm2 }
 0xb62   :  { %v8289_v40 = vsel %vm14113_vm9, %v13496_v46, 0.0  ;;  %v8226_v50 = vmax.f32 %v8224_v34, %v8225_v25 }
 0xb63   :  { %8290 = vadd.xlane.f32.xlu0 %v8289_v40 }
 0xb64   :  { %v8227_v8 = vrot.slane %v8226_v50, 1  ;;  %v8195_v7 = vpop.permute.xlu2 %8194 }
 0xb65   :  { %v8192_v27 = vpop.permute.xlu1 %8191  ;;  %vm8205_vm5 = vcmp.eq.s32.totalorder %v8195_v7, 1 }
 0xb66   :  { %v8228_v2 = vmax.f32 %v8226_v50, %v8227_v8  ;;  %vm8204_vm0 = vcmp.eq.s32.totalorder %v8192_v27, 1 }
 0xb67   :  { %v8125_v39 = vpop.f32.mrf.mxu2 }
 0xb68   :  { %v8126_v62 = vadd.f32 %v13486_v52, %v8125_v39  ;;  %v8272_v13 = vadd.f32 %v8228_v2, %v8144_v36 }
 0xb6a   :  { %v8145_v43 = vmax.f32 %v8126_v62, 0.0  ;;  %v13502_v3 = vsel %vm8200_vm1, %v8272_v13, 0.0  ;;  %vm14122_vm1 = vmmov %vm14115_vm2 }
 0xb6b   :  { %v8292_v11 = vsel %vm14114_vm8, %v13502_v3, 0.0  ;;  %vm14123_vm15 = vmmov %vm14122_vm1 }
 0xb6c   :  { %v8209_v1 = vsel %vm8201_vm11, %v8145_v43, -1e+30  ;;  %8293 = vadd.xlane.f32.xlu2 %v8292_v11  ;;  %vm14124_vm9 = vmmov %vm14122_vm1 }
 0xb6d   :  { %v8229_v57 = vsel %vm14115_vm2, %v8209_v1, -inf  ;;  %vm14125_vm8 = vmmov %vm14122_vm1 }
 0xb6e   :  { %v8230_v4 = vrot.slane %v8229_v57, 4  ;;  %vm14126_vm2 = vmmov %vm14122_vm1 }
 0xb70   :  { %v8231_v24 = vmax.f32 %v8229_v57, %v8230_v4 }
 0xb72   :  { %v8232_v53 = vrot.slane %v8231_v24, 2  ;;  %v8128_v42 = vpop.f32.mrf.mxu2 }
 0xb73   :  { %v8129_v31 = vadd.f32 %v13486_v52, %v8128_v42 }
 0xb74   :  { %v8233_v59 = vmax.f32 %v8231_v24, %v8232_v53 }
 0xb75   :  { %v8146_v51 = vmax.f32 %v8129_v31, 0.0 }
 0xb76   :  { %v8234_v32 = vrot.slane %v8233_v59, 1 }
 0xb77   :  { %v8210_v28 = vsel %vm8202_vm6, %v8146_v51, -1e+30 }
 0xb78   :  { %v8236_v56 = vsel %vm14116_vm3, %v8210_v28, -inf  ;;  %v8235_v14 = vmax.f32 %v8233_v59, %v8234_v32  ;;  %vm14128_vm3 = vmmov %vm14122_vm1 }
 0xb79   :  { %v8237_v55 = vrot.slane %v8236_v56, 4 }
 0xb7a   :  { %v8273_v45 = vadd.f32 %v8235_v14, %v8145_v43 }
 0xb7b   :  { %v8238_v21 = vmax.f32 %v8236_v56, %v8237_v55 }
 0xb7c   :  { %v13512_v9 = vsel %vm8201_vm11, %v8273_v45, 0.0 }
 0xb7d   :  { %v8239_v35 = vrot.slane %v8238_v21, 2  ;;  %v8295_v49 = vsel %vm14117_vm4, %v13512_v9, 0.0  ;;  %v8131_v20 = vpop.f32.mrf.mxu2  ;;  %vm14129_vm4 = vmmov %vm14122_vm1 }
 0xb7e   :  { %8296 = vadd.xlane.f32.xlu1 %v8295_v49  ;;  %v8132_v30 = vadd.f32 %v13486_v52, %v8131_v20 }
 0xb7f   :  { %v8240_v18 = vmax.f32 %v8238_v21, %v8239_v35 }
 0xb80   :  { %v8147_v16 = vmax.f32 %v8132_v30, 0.0  ;;  %v8198_v56 = vpop.permute.xlu1 %8197 }
 0xb81   :  { %v8241_v26 = vrot.slane %v8240_v18, 1  ;;  %vm8206_vm11 = vcmp.eq.s32.totalorder %v8198_v56, 1 }
 0xb82   :  { %v8211_v23 = vsel %vm8203_vm7, %v8147_v16, -1e+30 }
 0xb83   :  { %v8242_v15 = vmax.f32 %v8240_v18, %v8241_v26  ;;  %v8243_v58 = vsel %vm14118_vm12, %v8211_v23, -inf  ;;  %vm14131_vm12 = vmmov %vm14122_vm1 }
 0xb84   :  { %v8244_v6 = vrot.slane %v8243_v58, 4 }
 0xb85   :  { %v8274_v48 = vadd.f32 %v8242_v15, %v8146_v51 }
 0xb86   :  { %v8245_v61 = vmax.f32 %v8243_v58, %v8244_v6 }
 0xb87   :  { %v13520_v47 = vsel %vm8202_vm6, %v8274_v48, 0.0  ;;  %vm14127_vm6 = vmmov %vm14122_vm1 }
 0xb88   :  { %v8298_v41 = vsel %vm14119_vm14, %v13520_v47, 0.0  ;;  %v8246_v63 = vrot.slane %v8245_v61, 2  ;;  %vm14132_vm14 = vmmov %vm14122_vm1 }
 0xb89   :  { %8299 = vadd.xlane.f32.xlu2 %v8298_v41  ;;  %v8134_v12 = vpop.f32.mrf.mxu2 }
 0xb8a   :  { %v8247_v60 = vmax.f32 %v8245_v61, %v8246_v63  ;;  %v8135_v17 = vadd.f32 %v13486_v52, %v8134_v12 }
 0xb8c   :  { %v8248_v38 = vrot.slane %v8247_v60, 1  ;;  %v8148_v54 = vmax.f32 %v8135_v17, 0.0 }
 0xb8e   :  { %v8249_v5 = vmax.f32 %v8247_v60, %v8248_v38  ;;  %v8212_v19 = vsel %vm8204_vm0, %v8148_v54, -1e+30 }
 0xb8f   :  { %v8250_v10 = vsel %vm14120_vm10, %v8212_v19, -inf }
 0xb90   :  { %v8275_v36 = vadd.f32 %v8249_v5, %v8147_v16  ;;  %v8251_v0 = vrot.slane %v8250_v10, 4 }
 0xb91   :  { %v8137_v40 = vpop.f32.mrf.mxu2 }
 0xb92   :  { %v13528_v33 = vsel %vm8203_vm7, %v8275_v36, 0.0  ;;  %v8252_v25 = vmax.f32 %v8250_v10, %v8251_v0  ;;  %v8138_v50 = vadd.f32 %v13486_v52, %v8137_v40  ;;  %vm14130_vm7 = vmmov %vm14122_vm1 }
 0xb93   :  { %v8301_v34 = vsel %vm14121_vm13, %v13528_v33, 0.0 }
 0xb94   :  { %8302 = vadd.xlane.f32.xlu0 %v8301_v34  ;;  %v8253_v8 = vrot.slane %v8252_v25, 2  ;;  %v8149_v29 = vmax.f32 %v8138_v50, 0.0 }
 0xb96   :  { %v8254_v2 = vmax.f32 %v8252_v25, %v8253_v8  ;;  %v8213_v39 = vsel %vm8205_vm5, %v8149_v29, -1e+30 }
 0xb97   :  { %v8257_v62 = vsel %vm14122_vm1, %v8213_v39, -inf }
 0xb98   :  { %v8258_v13 = vrot.slane %v8257_v62, 4  ;;  %v8255_v43 = vrot.slane %v8254_v2, 1 }
 0xb9a   :  { %v8259_v11 = vmax.f32 %v8257_v62, %v8258_v13  ;;  %v8256_v1 = vmax.f32 %v8254_v2, %v8255_v43 }
 0xb9c   :  { %v8260_v57 = vrot.slane %v8259_v11, 2  ;;  %v8276_v4 = vadd.f32 %v8256_v1, %v8148_v54 }
 0xb9e   :  { %v8261_v24 = vmax.f32 %v8259_v11, %v8260_v57  ;;  %v8284_v37 = vsel %vm8204_vm0, %v8276_v4, 0.0  ;;  %vm14133_vm0 = vmmov %vm14122_vm1 }
 0xb9f   :  { %v8304_v53 = vsel %vm14123_vm15, %v8284_v37, 0.0  ;;  %vm14134_vm10 = vmmov %vm14133_vm0 }
 0xba0   :  { %8305 = vadd.xlane.f32.xlu1 %v8304_v53  ;;  %v8262_v42 = vrot.slane %v8261_v24, 1  ;;  %vm14135_vm15 = vmmov %vm14133_vm0 }
 0xba2   :  { %v8263_v31 = vmax.f32 %v8261_v24, %v8262_v42 }
 0xba4   :  { %v8277_v59 = vadd.f32 %v8263_v31, %v8149_v29 }
 0xba6   :  { %v8285_v51 = vsel %vm8205_vm5, %v8277_v59, 0.0 }
 0xba7   :  { %v8307_v32 = vsel %vm14124_vm9, %v8285_v51, 0.0 }
 0xba8   :  { %8308 = vadd.xlane.f32.xlu2 %v8307_v32 }
 0xbc3   :  { %v8140_v28 = vpop.f32.mrf.mxu3 }
 0xbc4   :  { %v8141_v14 = vadd.f32 %v13486_v52, %v8140_v28 }
 0xbc6   :  { %v8150_v55 = vmax.f32 %v8141_v14, 0.0 }
 0xbc8   :  { %v8214_v45 = vsel %vm8206_vm11, %v8150_v55, -1e+30 }
 0xbc9   :  { %v8264_v21 = vsel %vm14125_vm8, %v8214_v45, -inf  ;;  %v13602_v45 = vld [vmem:[%s13711_s16] ss:$0 sm:$0xff] }
 0xbca   :  { %v8265_v35 = vrot.slane %v8264_v21, 4 }
 0xbcc   :  { %v8266_v20 = vmax.f32 %v8264_v21, %v8265_v35  ;;  %v13607_v35 = vld [vmem:[%s13712_s17] ss:$0 sm:$0xff] }
 0xbce   :  { %v8267_v30 = vrot.slane %v8266_v20, 2 }
 0xbd0   :  { %v8268_v26 = vmax.f32 %v8266_v20, %v8267_v30 }
 0xbd2   :  { %v8269_v23 = vrot.slane %v8268_v26, 1 }
 0xbd4   :  { %v8270_v15 = vmax.f32 %v8268_v26, %v8269_v23  ;;  %v8980_v26 = vld [vmem:[%s13823_s19] sm:$0xff] }
 0xbd6   :  { %v8291_v44 = vpop.xlane.xlu0 %8290  ;;  %v8278_v58 = vadd.f32 %v8270_v15, %v8150_v55 }
 0xbd7   :  { %v8313_v49 = vmul.f32 %v8291_v44, %v14090_v22 }
 0xbd8   :  { %v8286_v6 = vsel %vm8206_vm11, %v8278_v58, 0.0 }
 0xbd9   :  { %v13544_v18 = vsub.f32 %v13496_v46, %v8313_v49  ;;  %v8310_v61 = vsel %vm14127_vm6, %v8286_v6, 0.0 }
 0xbda   :  { %8311 = vadd.xlane.f32.xlu0 %v8310_v61 }
 0xbdb   :  { %v8329_v16 = vmul.f32 %v13544_v18, %v13544_v18 }
 0xbdd   :  { %v8337_v52 = vsel %vm14126_vm2, %v8329_v16, 0.0  ;;  %vm14136_vm2 = vmmov %vm14133_vm0 }
 0xbde   :  { %8338 = vadd.xlane.f32.xlu1 %v8337_v52 }
 0xbdf   :  { %v8294_v48 = vpop.xlane.xlu2 %8293 }
 0xbe0   :  { %v8314_v41 = vmul.f32 %v8294_v48, %v14090_v22 }
 0xbe2   :  { %v13553_v46 = vsub.f32 %v13502_v3, %v8314_v41 }
 0xbe4   :  { %v8330_v63 = vmul.f32 %v13553_v46, %v13553_v46 }
 0xbe6   :  { %v8340_v60 = vsel %vm14128_vm3, %v8330_v63, 0.0 }
 0xbe7   :  { %8341 = vadd.xlane.f32.xlu2 %v8340_v60 }
 0xbf1   :  { %v8297_v27 = vpop.xlane.xlu1 %8296 }
 0xbf2   :  { %v8315_v12 = vmul.f32 %v8297_v27, %v14090_v22 }
 0xbf4   :  { %v13560_v17 = vsub.f32 %v13512_v9, %v8315_v12 }
 0xbf6   :  { %v8331_v38 = vmul.f32 %v13560_v17, %v13560_v17 }
 0xbf8   :  { %v8343_v54 = vsel %vm14129_vm4, %v8331_v38, 0.0  ;;  %v8981_v38 = vld [vmem:[%s13823_s19 + $0x8] sm:$0xff] }
 0xbf9   :  { %8344 = vadd.xlane.f32.xlu0 %v8343_v54 }
 0xbfc   :  { %v8300_v3 = vpop.xlane.xlu2 %8299 }
 0xbfd   :  { %v8316_v5 = vmul.f32 %v8300_v3, %v14090_v22 }
 0xbff   :  { %v13567_v19 = vsub.f32 %v13520_v47, %v8316_v5 }
 0xc01   :  { %v8332_v36 = vmul.f32 %v13567_v19, %v13567_v19 }
 0xc03   :  { %v8346_v10 = vsel %vm14130_vm7, %v8332_v36, 0.0 }
 0xc04   :  { %8347 = vadd.xlane.f32.xlu1 %v8346_v10 }
 0xc07   :  { %v8303_v9 = vpop.xlane.xlu0 %8302 }
 0xc08   :  { %v8317_v0 = vmul.f32 %v8303_v9, %v14090_v22 }
 0xc0a   :  { %v13574_v7 = vsub.f32 %v13528_v33, %v8317_v0 }
 0xc0c   :  { %v8333_v40 = vmul.f32 %v13574_v7, %v13574_v7 }
 0xc0e   :  { %v8349_v34 = vsel %vm14131_vm12, %v8333_v40, 0.0  ;;  %vm14137_vm12 = vmmov %vm14133_vm0 }
 0xc0f   :  { %8350 = vadd.xlane.f32.xlu2 %v8349_v34 }
 0xc13   :  { %v8306_v47 = vpop.xlane.xlu1 %8305 }
 0xc14   :  { %v8318_v25 = vmul.f32 %v8306_v47, %v14090_v22 }
 0xc16   :  { %v13580_v50 = vsub.f32 %v8284_v37, %v8318_v25 }
 0xc18   :  { %v8334_v8 = vmul.f32 %v13580_v50, %v13580_v50 }
 0xc1a   :  { %v8352_v29 = vsel %vm14132_vm14, %v8334_v8, 0.0 }
 0xc1b   :  { %8353 = vadd.xlane.f32.xlu0 %v8352_v29  ;;  %v8309_v2 = vpop.xlane.xlu2 %8308 }
 0xc1c   :  { %v8319_v33 = vmul.f32 %v8309_v2, %v14090_v22 }
 0xc1e   :  { %v13586_v39 = vsub.f32 %v8285_v51, %v8319_v33 }
 0xc20   :  { %v8335_v62 = vmul.f32 %v13586_v39, %v13586_v39 }
 0xc22   :  { %v8355_v13 = vsel %vm14133_vm0, %v8335_v62, 0.0 }
 0xc23   :  { %8356 = vadd.xlane.f32.xlu1 %v8355_v13 }
 0xc4d   :  { %v8312_v57 = vpop.xlane.xlu0 %8311 }
 0xc4e   :  { %v8320_v4 = vmul.f32 %v8312_v57, %v14090_v22 }
 0xc50   :  { %v13593_v37 = vsub.f32 %v8286_v6, %v8320_v4 }
 0xc51   :  { %v8339_v43 = vpop.xlane.xlu1 %8338 }
 0xc52   :  { %v8361_v11 = vmul.f32 %v8339_v43, %v14090_v22  ;;  %v8336_v42 = vmul.f32 %v13593_v37, %v13593_v37 }
 0xc54   :  { %v8369_v1 = vadd.f32 1e-05, %v8361_v11  ;;  %v8358_v51 = vsel %vm14134_vm10, %v8336_v42, 0.0 }
 0xc55   :  { %8359 = vadd.xlane.f32.xlu2 %v8358_v51 }
 0xc56   :  { %8947 = vrsqrt.f32 %v8369_v1  ;;  %vm8383_vm5 = vweird.f32 %v8369_v1 }
 0xc5a   :  { %v8342_v59 = vpop.xlane.xlu2 %8341 }
 0xc5b   :  { %v8362_v28 = vmul.f32 %v8342_v59, %v14090_v22 }
 0xc5c   :  { %v8948_v24 = vpop.eup %8947 }
 0xc5d   :  { %v8378_v53 = vmul.f32 %v8948_v24, %v8369_v1  ;;  %vm8384_vm13 = vweird.f32 %v8948_v24  ;;  %v8370_v14 = vadd.f32 1e-05, %v8362_v28  ;;  %v8982_v1 = vld [vmem:[%s13823_s19 + $0x10] sm:$0xff] }
 0xc5e   :  { %vm8385_vm1 = vmor %vm8383_vm5, %vm8384_vm13 }
 0xc5f   :  { %v8379_v31 = vmul.f32 %v8948_v24, %v8378_v53  ;;  %8949 = vrsqrt.f32 %v8370_v14  ;;  %vm8393_vm11 = vweird.f32 %v8370_v14  ;;  %vm14138_vm13 = vmmov %vm14136_vm2 }
 0xc61   :  { %v8380_v32 = vmul.f32 0.5, %v8379_v31 }
 0xc63   :  { %v8381_v56 = vsub.f32 1.5, %v8380_v32 }
 0xc65   :  { %v8382_v55 = vmul.f32 %v8948_v24, %v8381_v56  ;;  %v8950_v20 = vpop.eup %8949 }
 0xc66   :  { %v8388_v16 = vmul.f32 %v8950_v20, %v8370_v14  ;;  %vm8394_vm9 = vweird.f32 %v8950_v20 }
 0xc67   :  { %v8386_v21 = vsel %vm8385_vm1, %v8948_v24, %v8382_v55  ;;  %vm8395_vm8 = vmor %vm8393_vm11, %vm8394_vm9  ;;  %v8983_v55 = vld [vmem:[%s13823_s19 + $0x18] sm:$0xff] }
 0xc68   :  { %v8457_v44 = vmul.f32 %v8386_v21, %v13544_v18  ;;  %v8389_v23 = vmul.f32 %v8950_v20, %v8388_v16 }
 0xc6a   :  { %v8468_v49 = vmul.f32 %v13602_v45, %v8457_v44  ;;  %v8390_v15 = vmul.f32 0.5, %v8389_v23 }
 0xc6c   :  { %v8479_v30 = vadd.f32 %v13607_v35, %v8468_v49  ;;  %v8391_v58 = vsub.f32 1.5, %v8390_v15  ;;  %v8345_v18 = vpop.xlane.xlu0 %8344 }
 0xc6d   :  { %v8363_v6 = vmul.f32 %v8345_v18, %v14090_v22 }
 0xc6e   :  { %v8487_v52 = vadd.f32 %v8980_v26, %v8479_v30  ;;  %v8392_v48 = vmul.f32 %v8950_v20, %v8391_v58 }
 0xc6f   :  { %v8371_v61 = vadd.f32 1e-05, %v8363_v6 }
 0xc70   :  { %8495 = vst.msk [vmem:[%s13713_s18] sm:$0xff] %vm14135_vm15, %v8487_v52  ;;  %v8396_v41 = vsel %vm8395_vm8, %v8950_v20, %v8392_v48  ;;  %v8984_v48 = vld [vmem:[%s13823_s19 + $0x20] sm:$0xff]  ;;  %vm14139_vm15 = vmmov %vm14136_vm2 }
 0xc71   :  { %v8458_v63 = vmul.f32 %v8396_v41, %v13553_v46  ;;  %8951 = vrsqrt.f32 %v8371_v61  ;;  %vm8403_vm3 = vweird.f32 %v8371_v61 }
 0xc73   :  { %v8469_v60 = vmul.f32 %v13602_v45, %v8458_v63 }
 0xc75   :  { %v8480_v27 = vadd.f32 %v13607_v35, %v8469_v60 }
 0xc77   :  { %v8952_v12 = vpop.eup %8951  ;;  %v8488_v54 = vadd.f32 %v8981_v38, %v8480_v27  ;;  %v8348_v3 = vpop.xlane.xlu1 %8347 }
 0xc78   :  { %v8398_v5 = vmul.f32 %v8952_v12, %v8371_v61  ;;  %v8364_v36 = vmul.f32 %v8348_v3, %v14090_v22  ;;  %vm8404_vm6 = vweird.f32 %v8952_v12 }
 0xc79   :  { %8496 = vst.msk [vmem:[%s13713_s18 + $0x8] sm:$0xff] %vm14136_vm2, %v8488_v54  ;;  %vm8405_vm4 = vmor %vm8403_vm3, %vm8404_vm6 }
 0xc7a   :  { %v8399_v46 = vmul.f32 %v8952_v12, %v8398_v5  ;;  %v8372_v10 = vadd.f32 1e-05, %v8364_v36 }
 0xc7c   :  { %v8400_v9 = vmul.f32 0.5, %v8399_v46  ;;  %8953 = vrsqrt.f32 %v8372_v10  ;;  %vm8413_vm14 = vweird.f32 %v8372_v10 }
 0xc7e   :  { %v8401_v0 = vsub.f32 1.5, %v8400_v9  ;;  %v8985_v9 = vld [vmem:[%s13823_s19 + $0x28] sm:$0xff] }
 0xc80   :  { %v8402_v40 = vmul.f32 %v8952_v12, %v8401_v0 }
 0xc82   :  { %v8954_v34 = vpop.eup %8953  ;;  %v8406_v47 = vsel %vm8405_vm4, %v8952_v12, %v8402_v40  ;;  %v8351_v29 = vpop.xlane.xlu2 %8350  ;;  %vm14140_vm4 = vmmov %vm14137_vm12 }
 0xc83   :  { %v8459_v25 = vmul.f32 %v8406_v47, %v13560_v17  ;;  %v8408_v8 = vmul.f32 %v8954_v34, %v8372_v10  ;;  %v8365_v2 = vmul.f32 %v8351_v29, %v14090_v22  ;;  %vm8414_vm7 = vweird.f32 %v8954_v34 }
 0xc84   :  { %vm8415_vm0 = vmor %vm8413_vm14, %vm8414_vm7 }
 0xc85   :  { %v8470_v33 = vmul.f32 %v13602_v45, %v8459_v25  ;;  %v8409_v62 = vmul.f32 %v8954_v34, %v8408_v8  ;;  %v8373_v13 = vadd.f32 1e-05, %v8365_v2  ;;  %v8986_v25 = vld [vmem:[%s13823_s19 + $0x30] sm:$0xff]  ;;  %vm14141_vm7 = vmmov %vm14140_vm4 }
 0xc87   :  { %v8481_v43 = vadd.f32 %v13607_v35, %v8470_v33  ;;  %v8410_v11 = vmul.f32 0.5, %v8409_v62  ;;  %8955 = vrsqrt.f32 %v8373_v13  ;;  %vm8423_vm5 = vweird.f32 %v8373_v13 }
 0xc89   :  { %v8489_v57 = vadd.f32 %v8982_v1, %v8481_v43  ;;  %v8411_v4 = vsub.f32 1.5, %v8410_v11 }
 0xc8b   :  { %8497 = vst.msk [vmem:[%s13713_s18 + $0x10] sm:$0xff] %vm14137_vm12, %v8489_v57  ;;  %v8412_v17 = vmul.f32 %v8954_v34, %v8411_v4 }
 0xc8d   :  { %v8416_v24 = vsel %vm8415_vm0, %v8954_v34, %v8412_v17  ;;  %v8956_v53 = vpop.eup %8955 }
 0xc8e   :  { %v8460_v42 = vmul.f32 %v8416_v24, %v13567_v19  ;;  %v8418_v31 = vmul.f32 %v8956_v53, %v8373_v13  ;;  %v8354_v32 = vpop.xlane.xlu0 %8353  ;;  %vm8424_vm10 = vweird.f32 %v8956_v53 }
 0xc8f   :  { %v8366_v56 = vmul.f32 %v8354_v32, %v14090_v22  ;;  %vm8425_vm1 = vmor %vm8423_vm5, %vm8424_vm10 }
 0xc90   :  { %v8471_v59 = vmul.f32 %v13602_v45, %v8460_v42  ;;  %v8419_v51 = vmul.f32 %v8956_v53, %v8418_v31  ;;  %vm14142_vm10 = vmmov %vm14140_vm4 }
 0xc91   :  { %v8374_v44 = vadd.f32 1e-05, %v8366_v56 }
 0xc92   :  { %v8482_v28 = vadd.f32 %v13607_v35, %v8471_v59  ;;  %v8420_v14 = vmul.f32 0.5, %v8419_v51 }
 0xc93   :  { %8957 = vrsqrt.f32 %v8374_v44  ;;  %vm8433_vm11 = vweird.f32 %v8374_v44 }
 0xc94   :  { %v8490_v21 = vadd.f32 %v8983_v55, %v8482_v28  ;;  %v8421_v49 = vsub.f32 1.5, %v8420_v14 }
 0xc96   :  { %8498 = vst.msk [vmem:[%s13713_s18 + $0x18] sm:$0xff] %vm14138_vm13, %v8490_v21  ;;  %v8422_v19 = vmul.f32 %v8956_v53, %v8421_v49  ;;  %v8357_v30 = vpop.xlane.xlu1 %8356 }
 0xc97   :  { %v8367_v26 = vmul.f32 %v8357_v30, %v14090_v22 }
 0xc98   :  { %v8426_v20 = vsel %vm8425_vm1, %v8956_v53, %v8422_v19 }
 0xc99   :  { %v8461_v16 = vmul.f32 %v8426_v20, %v13574_v7  ;;  %v8958_v52 = vpop.eup %8957  ;;  %v8375_v15 = vadd.f32 1e-05, %v8367_v26 }
 0xc9a   :  { %v8428_v58 = vmul.f32 %v8958_v52, %v8374_v44  ;;  %vm8434_vm9 = vweird.f32 %v8958_v52 }
 0xc9b   :  { %v8472_v23 = vmul.f32 %v13602_v45, %v8461_v16  ;;  %8959 = vrsqrt.f32 %v8375_v15  ;;  %vm8435_vm8 = vmor %vm8433_vm11, %vm8434_vm9  ;;  %vm8443_vm6 = vweird.f32 %v8375_v15 }
 0xc9c   :  { %v8429_v6 = vmul.f32 %v8958_v52, %v8428_v58 }
 0xc9d   :  { %v8483_v18 = vadd.f32 %v13607_v35, %v8472_v23 }
 0xc9e   :  { %v8430_v41 = vmul.f32 0.5, %v8429_v6 }
 0xc9f   :  { %v8491_v61 = vadd.f32 %v8984_v48, %v8483_v18 }
 0xca0   :  { %v8431_v7 = vsub.f32 1.5, %v8430_v41 }
 0xca1   :  { %8499 = vst.msk [vmem:[%s13713_s18 + $0x20] sm:$0xff] %vm14139_vm15, %v8491_v61  ;;  %v8960_v63 = vpop.eup %8959 }
 0xca2   :  { %v8432_v60 = vmul.f32 %v8958_v52, %v8431_v7  ;;  %v8438_v27 = vmul.f32 %v8960_v63, %v8375_v15  ;;  %vm8444_vm2 = vweird.f32 %v8960_v63 }
 0xca3   :  { %vm8445_vm3 = vmor %vm8443_vm6, %vm8444_vm2 }
 0xca4   :  { %v8436_v12 = vsel %vm8435_vm8, %v8958_v52, %v8432_v60  ;;  %v8439_v38 = vmul.f32 %v8960_v63, %v8438_v27 }
 0xca5   :  { %v8462_v54 = vmul.f32 %v8436_v12, %v13580_v50 }
 0xca6   :  { %v8440_v3 = vmul.f32 0.5, %v8439_v38 }
 0xca7   :  { %v8473_v5 = vmul.f32 %v13602_v45, %v8462_v54 }
 0xca8   :  { %v8441_v36 = vsub.f32 1.5, %v8440_v3 }
 0xca9   :  { %v8484_v46 = vadd.f32 %v13607_v35, %v8473_v5 }
 0xcaa   :  { %v8442_v10 = vmul.f32 %v8960_v63, %v8441_v36 }
 0xcab   :  { %v8492_v0 = vadd.f32 %v8985_v9, %v8484_v46 }
 0xcac   :  { %v8446_v40 = vsel %vm8445_vm3, %v8960_v63, %v8442_v10 }
 0xcad   :  { %8500 = vst.msk [vmem:[%s13713_s18 + $0x28] sm:$0xff] %vm14140_vm4, %v8492_v0  ;;  %v8463_v50 = vmul.f32 %v8446_v40, %v13586_v39 }
 0xcaf   :  { %v8474_v34 = vmul.f32 %v13602_v45, %v8463_v50 }
 0xcb1   :  { %v8485_v47 = vadd.f32 %v13607_v35, %v8474_v34 }
 0xcb3   :  { %v8493_v8 = vadd.f32 %v8986_v25, %v8485_v47 }
 0xcb5   :  { %8501 = vst.msk [vmem:[%s13713_s18 + $0x30] sm:$0xff] %vm14141_vm7, %v8493_v8 }
 0xcc8   :  { %v8360_v29 = vpop.xlane.xlu2 %8359 }
 0xcc9   :  { %v8368_v2 = vmul.f32 %v8360_v29, %v14090_v22  ;;  %v8987_v22 = vld [vmem:[%s13823_s19 + $0x38] sm:$0xff] }
 0xccb   :  { %v8376_v33 = vadd.f32 1e-05, %v8368_v2 }
 0xccd   :  { %8961 = vrsqrt.f32 %v8376_v33  ;;  %vm8453_vm14 = vweird.f32 %v8376_v33 }
 0xcd3   :  { %v8962_v39 = vpop.eup %8961 }
 0xcd4   :  { %v8448_v62 = vmul.f32 %v8962_v39, %v8376_v33  ;;  %vm8454_vm12 = vweird.f32 %v8962_v39 }
 0xcd5   :  { %vm8455_vm0 = vmor %vm8453_vm14, %vm8454_vm12 }
 0xcd6   :  { %v8449_v13 = vmul.f32 %v8962_v39, %v8448_v62 }
 0xcd8   :  { %v8450_v43 = vmul.f32 0.5, %v8449_v13 }
 0xcda   :  { %v8451_v11 = vsub.f32 1.5, %v8450_v43 }
 0xcdc   :  { %v8452_v1 = vmul.f32 %v8962_v39, %v8451_v11 }
 0xcde   :  { %v8456_v57 = vsel %vm8455_vm0, %v8962_v39, %v8452_v1 }
 0xcdf   :  { %v8464_v4 = vmul.f32 %v8456_v57, %v13593_v37 }
 0xce1   :  { %v8475_v17 = vmul.f32 %v13602_v45, %v8464_v4 }
 0xce3   :  { %v8486_v24 = vadd.f32 %v13607_v35, %v8475_v17 }
 0xce5   :  { %v8494_v53 = vadd.f32 %v8987_v22, %v8486_v24 }
 0xce7   :  { %8502 = vst.msk [vmem:[%s13713_s18 + $0x38] sm:$0xff] %vm14142_vm10, %v8494_v53 }

</bundles_post_ra>
